<compile_context>
chip_gen: v6e
topology: v6e:2x2x1
jax: 0.10.0
libtpu: 0.0.40
codegen_flags: <defaults>
</compile_context>

<pallas_src>
import jax
import jax.numpy as jnp
from jax import lax
from jax.experimental import pallas as pl
from jax.experimental.pallas import tpu as pltpu


# Model dimensions (small instantiation consistent with the module).
C_IN = 4
STEM_C = 16
PLANES = 8
EXPANSION = 4
OUT_C = PLANES * EXPANSION          # 32
NUM_CLASSES = 10
H = W = 16
S = H * W                           # 256 spatial positions per image

# Row padding of the flattened (H*W) axis so that every 3x3 tap becomes a
# contiguous length-S window:  buf[PAD_BEFORE + s] = x[s], zeros elsewhere.
PAD_BEFORE = 24
PAD_AFTER = 24
PADDED_S = PAD_BEFORE + S + PAD_AFTER          # 304 rows


def _tap_offset(dh, dw):
    # Window start (in the padded flat buffer) supplying x[h+dh-1, w+dw-1]
    # for output pixel (h, w).  Range: 7 .. 41;  41 + 256 <= PADDED_S.
    return PAD_BEFORE - W - 1 + dh * W + dw


# ----------------------------------------------------------------------------
# Fused kernel: one grid step == one image
# ----------------------------------------------------------------------------
def _fused_forward_kernel(xflat_ref, stem_w_ref, stem_b_ref,
                          w1ds_ref, w1ds_b_ref,
                          w2_ref, w2_b_ref,
                          w3_ref, w3_b_ref,
                          fc_w_ref, fc_b_ref,
                          out_ref,
                          zbuf_ref):
    # Width-boundary masks: a flat shift of dw-1 wraps across image rows, so
    # dw=0 contributions at w==0 and dw=2 contributions at w==W-1 are zeroed.
    # (W is a power of two -> use & instead of %.)
    w_idx = lax.broadcasted_iota(jnp.int32, (S, 1), 0) & (W - 1)
    m_left = (w_idx > 0).astype(jnp.float32)          # kills wrap for dw = 0
    m_right = (w_idx < W - 1).astype(jnp.float32)     # kills wrap for dw = 2

    def conv3x3(load_patch, w_ref, cout):
        # 3x3 conv as 9 shifted (S, Cin) x (Cin, cout) matmuls; each dw partial
        # sum is masked once (not per tap).
        total = jnp.zeros((S, cout), jnp.float32)
        for dw, mask in ((0, m_left), (1, None), (2, m_right)):
            acc = jnp.zeros((S, cout), jnp.float32)
            for dh in range(3):
                patch = load_patch(_tap_offset(dh, dw))        # (S, Cin) bf16
                acc = acc + jnp.dot(patch, w_ref[dh * 3 + dw],
                                    preferred_element_type=jnp.float32)
            total = total + (acc if mask is None else acc * mask)
        return total

    # ---- stem: 3x3 conv (C_IN -> STEM_C) + folded-BN shift + ReLU ------------
    stem = conv3x3(lambda o: xflat_ref[0, o:o + S, :], stem_w_ref, STEM_C)
    h = jnp.maximum(stem + stem_b_ref[...], 0.0)                        # (S, 16)

    # ---- merged 1x1 convs sharing input h: [conv1 -> PLANES | downsample] ----
    y = jnp.dot(h.astype(jnp.bfloat16), w1ds_ref[...],
                preferred_element_type=jnp.float32) + w1ds_b_ref[...]   # (S, 40)
    z1 = jnp.maximum(y[:, :PLANES], 0.0)                                # (S, 8)
    ds = y[:, PLANES:]                                                  # (S, 32)

    # ---- 3x3 conv (PLANES -> PLANES): row-padded VMEM scratch, 9 taps --------
    zbuf_ref[...] = jnp.zeros(zbuf_ref.shape, zbuf_ref.dtype)
    zbuf_ref[PAD_BEFORE:PAD_BEFORE + S, :] = z1.astype(zbuf_ref.dtype)
    c2 = conv3x3(lambda o: zbuf_ref[o:o + S, :], w2_ref, PLANES)
    z2 = jnp.maximum(c2 + w2_b_ref[...], 0.0)                           # (S, 8)

    # ---- 1x1 conv (PLANES -> OUT_C) + shift, residual add, ReLU --------------
    z3 = jnp.dot(z2.astype(jnp.bfloat16), w3_ref[...],
                 preferred_element_type=jnp.float32) + w3_b_ref[...]    # (S, 32)
    feat = jnp.maximum(z3 + ds, 0.0)                                    # (S, 32)

    # ---- global average pool (AdaptiveAvgPool2d((1,1)) + flatten) + fc -------
    pooled = jnp.mean(feat, axis=0, keepdims=True)                      # (1, 32)
    logits = jnp.dot(pooled.astype(jnp.bfloat16), fc_w_ref[...],
                     preferred_element_type=jnp.float32) + fc_b_ref[...]
    out_ref[0] = logits.astype(out_ref.dtype)                           # (1, 10)


# ----------------------------------------------------------------------------
# Wrapper
# ----------------------------------------------------------------------------
def bottleneck_resnet_forward(x_nchw, params):
    N, C, Hx, Wx = x_nchw.shape
    assert (C, Hx, Wx) == (C_IN, H, W)

    # NCHW -> (N, H*W, C) rows, zero-padded along the row axis so every 3x3 tap
    # is a contiguous length-S window (width wrap handled by in-kernel masks).
    x = jnp.transpose(x_nchw, (0, 2, 3, 1)).reshape(N, S, C_IN)
    xflat = jnp.pad(x, ((0, 0), (PAD_BEFORE, PAD_AFTER), (0, 0))).astype(jnp.bfloat16)

    const2 = lambda b: (0, 0)
    const3 = lambda b: (0, 0, 0)

    out = pl.pallas_call(
        _fused_forward_kernel,
        out_shape=jax.ShapeDtypeStruct((N, 1, NUM_CLASSES), jnp.float32),
        grid_spec=pltpu.PrefetchScalarGridSpec(
            num_scalar_prefetch=0,
            grid=(N,),
            in_specs=[
                pl.BlockSpec((1, PADDED_S, C_IN), lambda b: (b, 0, 0)),
                pl.BlockSpec((9, C_IN, STEM_C), const3),
                pl.BlockSpec((1, STEM_C), const2),
                pl.BlockSpec((STEM_C, PLANES + OUT_C), const2),
                pl.BlockSpec((1, PLANES + OUT_C), const2),
                pl.BlockSpec((9, PLANES, PLANES), const3),
                pl.BlockSpec((1, PLANES), const2),
                pl.BlockSpec((PLANES, OUT_C), const2),
                pl.BlockSpec((1, OUT_C), const2),
                pl.BlockSpec((OUT_C, NUM_CLASSES), const2),
                pl.BlockSpec((1, NUM_CLASSES), const2),
            ],
            out_specs=pl.BlockSpec((1, 1, NUM_CLASSES), lambda b: (b, 0, 0)),
            scratch_shapes=[pltpu.VMEM((PADDED_S, PLANES), jnp.bfloat16)],
        ),
        compiler_params=pltpu.CompilerParams(dimension_semantics=("parallel",)),
    )(
        xflat,
        params["stem_w"], params["stem_shift"],
        params["w1ds"], params["w1ds_shift"],
        params["w2"], params["w2_shift"],
        params["w3"], params["w3_shift"],
        params["fc_w"], params["fc_b"],
    )
    return out.reshape(N, NUM_CLASSES)


# ----------------------------------------------------------------------------
# Parameters: random conv/BN weights, with inference-mode BN folded into the
# conv weight columns (kernel only applies the additive shift).
# ----------------------------------------------------------------------------
def make_params(key):
    ks = jax.random.split(key, 12)

    def bn(k, c):
        g = 1.0 + 0.1 * jax.random.normal(k, (c,), jnp.float32)
        b = 0.1 * jax.random.normal(jax.random.fold_in(k, 1), (c,), jnp.float32)
        mean = 0.1 * jax.random.normal(jax.random.fold_in(k, 2), (c,), jnp.float32)
        var = jnp.abs(jax.random.normal(jax.random.fold_in(k, 3), (c,), jnp.float32)) + 1.0
        inv = g / jnp.sqrt(var + 1e-5)
        return inv, b - mean * inv

    stem_w = 0.1 * jax.random.normal(ks[0], (3, 3, C_IN, STEM_C), jnp.float32)
    stem_s, stem_sh = bn(ks[1], STEM_C)
    b_w1 = 0.1 * jax.random.normal(ks[2], (STEM_C, PLANES), jnp.float32)
    b_s1, b_b1 = bn(ks[3], PLANES)
    b_w2 = 0.1 * jax.random.normal(ks[4], (3, 3, PLANES, PLANES), jnp.float32)
    b_s2, b_b2 = bn(ks[5], PLANES)
    b_w3 = 0.1 * jax.random.normal(ks[6], (PLANES, OUT_C), jnp.float32)
    b_s3, b_b3 = bn(ks[7], OUT_C)
    ds_w = 0.1 * jax.random.normal(ks[8], (STEM_C, OUT_C), jnp.float32)
    ds_s, ds_b = bn(ks[9], OUT_C)
    fc_w = 0.1 * jax.random.normal(ks[10], (OUT_C, NUM_CLASSES), jnp.float32)
    fc_b = 0.1 * jax.random.normal(ks[11], (NUM_CLASSES,), jnp.float32)

    p = {}
    # stem 3x3 conv, BN scale folded; laid out (tap, Cin, Cout), tap = dh*3+dw.
    p["stem_w"] = (stem_w * stem_s).reshape(9, C_IN, STEM_C).astype(jnp.bfloat16)
    p["stem_shift"] = stem_sh.reshape(1, STEM_C)
    # bottleneck conv1 (1x1) and downsample (1x1) share input -> merged weight.
    p["w1ds"] = jnp.concatenate([b_w1 * b_s1, ds_w * ds_s], axis=1).astype(jnp.bfloat16)
    p["w1ds_shift"] = jnp.concatenate([b_b1, ds_b]).reshape(1, PLANES + OUT_C)
    # bottleneck 3x3 conv.
    p["w2"] = (b_w2 * b_s2).reshape(9, PLANES, PLANES).astype(jnp.bfloat16)
    p["w2_shift"] = b_b2.reshape(1, PLANES)
    # bottleneck conv3 (1x1).
    p["w3"] = (b_w3 * b_s3).astype(jnp.bfloat16)
    p["w3_shift"] = b_b3.reshape(1, OUT_C)
    # classifier.
    p["fc_w"] = fc_w.astype(jnp.bfloat16)
    p["fc_b"] = fc_b.reshape(1, NUM_CLASSES)
    return p


# TODO(synk): backbone.update() / self.updated are training-time bookkeeping with no
# forward-pass effect and are not represented in the kernel.

if __name__ == "__main__":
    key = jax.random.PRNGKey(0)
    k_x, k_p = jax.random.split(key)
    x = jax.random.normal(k_x, (2, C_IN, H, W), jnp.float32)  # NCHW like PyTorch
    params = make_params(k_p)

    out = jax.jit(bottleneck_resnet_forward)(x, params)
    out = jax.block_until_ready(out)
    assert out.shape == (2, NUM_CLASSES) and out.dtype == jnp.float32
    print("KERNEL_OK")
</pallas_src>

<mosaic_0001>
module attributes {stable_mosaic.version = 11 : i64} {
  func.func @_fused_forward_kernel(%arg0: i32, %arg1: memref<1x304x4xbf16, #tpu.memory_space<vmem>>, %arg2: memref<9x4x16xbf16, #tpu.memory_space<vmem>>, %arg3: memref<1x16xf32, #tpu.memory_space<vmem>>, %arg4: memref<16x40xbf16, #tpu.memory_space<vmem>>, %arg5: memref<1x40xf32, #tpu.memory_space<vmem>>, %arg6: memref<9x8x8xbf16, #tpu.memory_space<vmem>>, %arg7: memref<1x8xf32, #tpu.memory_space<vmem>>, %arg8: memref<8x32xbf16, #tpu.memory_space<vmem>>, %arg9: memref<1x32xf32, #tpu.memory_space<vmem>>, %arg10: memref<32x10xbf16, #tpu.memory_space<vmem>>, %arg11: memref<1x10xf32, #tpu.memory_space<vmem>>, %arg12: memref<1x1x10xf32, #tpu.memory_space<vmem>>, %arg13: memref<304x8xbf16, #tpu.memory_space<vmem>>) attributes {dimension_semantics = [#tpu.dimension_semantics<parallel>], iteration_bounds = array<i64: 2>, scalar_prefetch = 0 : i64, scratch_operands = 1 : i64, tpu.core_type = #tpu.core_type<tc>, window_params = [{transform_indices = @transform_0, window_bounds = array<i64: 1, 304, 4>}, {pipeline_mode = #tpu.pipeline_mode<synchronous>, transform_indices = @transform_1, window_bounds = array<i64: 9, 4, 16>}, {pipeline_mode = #tpu.pipeline_mode<synchronous>, transform_indices = @transform_2, window_bounds = array<i64: 1, 16>}, {pipeline_mode = #tpu.pipeline_mode<synchronous>, transform_indices = @transform_3, window_bounds = array<i64: 16, 40>}, {pipeline_mode = #tpu.pipeline_mode<synchronous>, transform_indices = @transform_4, window_bounds = array<i64: 1, 40>}, {pipeline_mode = #tpu.pipeline_mode<synchronous>, transform_indices = @transform_5, window_bounds = array<i64: 9, 8, 8>}, {pipeline_mode = #tpu.pipeline_mode<synchronous>, transform_indices = @transform_6, window_bounds = array<i64: 1, 8>}, {pipeline_mode = #tpu.pipeline_mode<synchronous>, transform_indices = @transform_7, window_bounds = array<i64: 8, 32>}, {pipeline_mode = #tpu.pipeline_mode<synchronous>, transform_indices = @transform_8, window_bounds = array<i64: 1, 32>}, {pipeline_mode = #tpu.pipeline_mode<synchronous>, transform_indices = @transform_9, window_bounds = array<i64: 32, 10>}, {pipeline_mode = #tpu.pipeline_mode<synchronous>, transform_indices = @transform_10, window_bounds = array<i64: 1, 10>}, {transform_indices = @transform_11, window_bounds = array<i64: 1, 1, 10>}]} {
    %0 = tpu.iota {dimensions = array<i32: 0>} : vector<256x1xi32>
    %c15_i32 = arith.constant 15 : i32
    %1 = vector.broadcast %c15_i32 : i32 to vector<256x1xi32>
    %2 = arith.andi %0, %1 : vector<256x1xi32>
    %c0_i32 = arith.constant 0 : i32
    %3 = vector.broadcast %c0_i32 : i32 to vector<256x1xi32>
    %4 = arith.cmpi sgt, %2, %3 : vector<256x1xi32>
    %5 = arith.extui %4 : vector<256x1xi1> to vector<256x1xi32>
    %6 = arith.sitofp %5 : vector<256x1xi32> to vector<256x1xf32>
    %c15_i32_0 = arith.constant 15 : i32
    %7 = vector.broadcast %c15_i32_0 : i32 to vector<256x1xi32>
    %8 = arith.cmpi slt, %2, %7 : vector<256x1xi32>
    %9 = arith.extui %8 : vector<256x1xi1> to vector<256x1xi32>
    %10 = arith.sitofp %9 : vector<256x1xi32> to vector<256x1xf32>
    %cst = arith.constant 0.000000e+00 : f32
    %11 = vector.broadcast %cst : f32 to vector<256x16xf32>
    %cst_1 = arith.constant 0.000000e+00 : f32
    %12 = vector.broadcast %cst_1 : f32 to vector<256x16xf32>
    %c0 = arith.constant 0 : index
    %c7 = arith.constant 7 : index
    %c0_2 = arith.constant 0 : index
    %13 = vector.load %arg1[%c0, %c7, %c0_2] : memref<1x304x4xbf16, #tpu.memory_space<vmem>>, vector<1x256x4xbf16>
    %14 = vector.shape_cast %13 : vector<1x256x4xbf16> to vector<256x4xbf16>
    %c0_3 = arith.constant 0 : index
    %c0_4 = arith.constant 0 : index
    %c0_5 = arith.constant 0 : index
    %15 = vector.load %arg2[%c0_3, %c0_4, %c0_5] : memref<9x4x16xbf16, #tpu.memory_space<vmem>>, vector<1x4x16xbf16>
    %16 = vector.shape_cast %15 : vector<1x4x16xbf16> to vector<4x16xbf16>
    %cst_6 = arith.constant dense<0.000000e+00> : vector<256x16xf32>
    %17 = tpu.matmul %14, %16, %cst_6 {dimension_numbers = #tpu.dot_dimension_numbers<[1], [0], [0], [1], [0, 0, 1, 1], [], []>} : vector<256x4xbf16>, vector<4x16xbf16>, vector<256x16xf32> -> vector<256x16xf32>
    %18 = arith.addf %12, %17 : vector<256x16xf32>
    %c0_7 = arith.constant 0 : index
    %c23 = arith.constant 23 : index
    %c0_8 = arith.constant 0 : index
    %19 = vector.load %arg1[%c0_7, %c23, %c0_8] : memref<1x304x4xbf16, #tpu.memory_space<vmem>>, vector<1x256x4xbf16>
    %20 = vector.shape_cast %19 : vector<1x256x4xbf16> to vector<256x4xbf16>
    %c3 = arith.constant 3 : index
    %c0_9 = arith.constant 0 : index
    %c0_10 = arith.constant 0 : index
    %21 = vector.load %arg2[%c3, %c0_9, %c0_10] : memref<9x4x16xbf16, #tpu.memory_space<vmem>>, vector<1x4x16xbf16>
    %22 = vector.shape_cast %21 : vector<1x4x16xbf16> to vector<4x16xbf16>
    %cst_11 = arith.constant dense<0.000000e+00> : vector<256x16xf32>
    %23 = tpu.matmul %20, %22, %cst_11 {dimension_numbers = #tpu.dot_dimension_numbers<[1], [0], [0], [1], [0, 0, 1, 1], [], []>} : vector<256x4xbf16>, vector<4x16xbf16>, vector<256x16xf32> -> vector<256x16xf32>
    %24 = arith.addf %18, %23 : vector<256x16xf32>
    %c0_12 = arith.constant 0 : index
    %c39 = arith.constant 39 : index
    %c0_13 = arith.constant 0 : index
    %25 = vector.load %arg1[%c0_12, %c39, %c0_13] : memref<1x304x4xbf16, #tpu.memory_space<vmem>>, vector<1x256x4xbf16>
    %26 = vector.shape_cast %25 : vector<1x256x4xbf16> to vector<256x4xbf16>
    %c6 = arith.constant 6 : index
    %c0_14 = arith.constant 0 : index
    %c0_15 = arith.constant 0 : index
    %27 = vector.load %arg2[%c6, %c0_14, %c0_15] : memref<9x4x16xbf16, #tpu.memory_space<vmem>>, vector<1x4x16xbf16>
    %28 = vector.shape_cast %27 : vector<1x4x16xbf16> to vector<4x16xbf16>
    %cst_16 = arith.constant dense<0.000000e+00> : vector<256x16xf32>
    %29 = tpu.matmul %26, %28, %cst_16 {dimension_numbers = #tpu.dot_dimension_numbers<[1], [0], [0], [1], [0, 0, 1, 1], [], []>} : vector<256x4xbf16>, vector<4x16xbf16>, vector<256x16xf32> -> vector<256x16xf32>
    %30 = arith.addf %24, %29 : vector<256x16xf32>
    %31 = vector.broadcast %6 : vector<256x1xf32> to vector<256x16xf32>
    %32 = arith.mulf %30, %31 : vector<256x16xf32>
    %33 = arith.addf %11, %32 : vector<256x16xf32>
    %cst_17 = arith.constant 0.000000e+00 : f32
    %34 = vector.broadcast %cst_17 : f32 to vector<256x16xf32>
    %c0_18 = arith.constant 0 : index
    %c8 = arith.constant 8 : index
    %c0_19 = arith.constant 0 : index
    %35 = vector.load %arg1[%c0_18, %c8, %c0_19] : memref<1x304x4xbf16, #tpu.memory_space<vmem>>, vector<1x256x4xbf16>
    %36 = vector.shape_cast %35 : vector<1x256x4xbf16> to vector<256x4xbf16>
    %c1 = arith.constant 1 : index
    %c0_20 = arith.constant 0 : index
    %c0_21 = arith.constant 0 : index
    %37 = vector.load %arg2[%c1, %c0_20, %c0_21] : memref<9x4x16xbf16, #tpu.memory_space<vmem>>, vector<1x4x16xbf16>
    %38 = vector.shape_cast %37 : vector<1x4x16xbf16> to vector<4x16xbf16>
    %cst_22 = arith.constant dense<0.000000e+00> : vector<256x16xf32>
    %39 = tpu.matmul %36, %38, %cst_22 {dimension_numbers = #tpu.dot_dimension_numbers<[1], [0], [0], [1], [0, 0, 1, 1], [], []>} : vector<256x4xbf16>, vector<4x16xbf16>, vector<256x16xf32> -> vector<256x16xf32>
    %40 = arith.addf %34, %39 : vector<256x16xf32>
    %c0_23 = arith.constant 0 : index
    %c24 = arith.constant 24 : index
    %c0_24 = arith.constant 0 : index
    %41 = vector.load %arg1[%c0_23, %c24, %c0_24] : memref<1x304x4xbf16, #tpu.memory_space<vmem>>, vector<1x256x4xbf16>
    %42 = vector.shape_cast %41 : vector<1x256x4xbf16> to vector<256x4xbf16>
    %c4 = arith.constant 4 : index
    %c0_25 = arith.constant 0 : index
    %c0_26 = arith.constant 0 : index
    %43 = vector.load %arg2[%c4, %c0_25, %c0_26] : memref<9x4x16xbf16, #tpu.memory_space<vmem>>, vector<1x4x16xbf16>
    %44 = vector.shape_cast %43 : vector<1x4x16xbf16> to vector<4x16xbf16>
    %cst_27 = arith.constant dense<0.000000e+00> : vector<256x16xf32>
    %45 = tpu.matmul %42, %44, %cst_27 {dimension_numbers = #tpu.dot_dimension_numbers<[1], [0], [0], [1], [0, 0, 1, 1], [], []>} : vector<256x4xbf16>, vector<4x16xbf16>, vector<256x16xf32> -> vector<256x16xf32>
    %46 = arith.addf %40, %45 : vector<256x16xf32>
    %c0_28 = arith.constant 0 : index
    %c40 = arith.constant 40 : index
    %c0_29 = arith.constant 0 : index
    %47 = vector.load %arg1[%c0_28, %c40, %c0_29] : memref<1x304x4xbf16, #tpu.memory_space<vmem>>, vector<1x256x4xbf16>
    %48 = vector.shape_cast %47 : vector<1x256x4xbf16> to vector<256x4xbf16>
    %c7_30 = arith.constant 7 : index
    %c0_31 = arith.constant 0 : index
    %c0_32 = arith.constant 0 : index
    %49 = vector.load %arg2[%c7_30, %c0_31, %c0_32] : memref<9x4x16xbf16, #tpu.memory_space<vmem>>, vector<1x4x16xbf16>
    %50 = vector.shape_cast %49 : vector<1x4x16xbf16> to vector<4x16xbf16>
    %cst_33 = arith.constant dense<0.000000e+00> : vector<256x16xf32>
    %51 = tpu.matmul %48, %50, %cst_33 {dimension_numbers = #tpu.dot_dimension_numbers<[1], [0], [0], [1], [0, 0, 1, 1], [], []>} : vector<256x4xbf16>, vector<4x16xbf16>, vector<256x16xf32> -> vector<256x16xf32>
    %52 = arith.addf %46, %51 : vector<256x16xf32>
    %53 = arith.addf %33, %52 : vector<256x16xf32>
    %cst_34 = arith.constant 0.000000e+00 : f32
    %54 = vector.broadcast %cst_34 : f32 to vector<256x16xf32>
    %c0_35 = arith.constant 0 : index
    %c9 = arith.constant 9 : index
    %c0_36 = arith.constant 0 : index
    %55 = vector.load %arg1[%c0_35, %c9, %c0_36] : memref<1x304x4xbf16, #tpu.memory_space<vmem>>, vector<1x256x4xbf16>
    %56 = vector.shape_cast %55 : vector<1x256x4xbf16> to vector<256x4xbf16>
    %c2 = arith.constant 2 : index
    %c0_37 = arith.constant 0 : index
    %c0_38 = arith.constant 0 : index
    %57 = vector.load %arg2[%c2, %c0_37, %c0_38] : memref<9x4x16xbf16, #tpu.memory_space<vmem>>, vector<1x4x16xbf16>
    %58 = vector.shape_cast %57 : vector<1x4x16xbf16> to vector<4x16xbf16>
    %cst_39 = arith.constant dense<0.000000e+00> : vector<256x16xf32>
    %59 = tpu.matmul %56, %58, %cst_39 {dimension_numbers = #tpu.dot_dimension_numbers<[1], [0], [0], [1], [0, 0, 1, 1], [], []>} : vector<256x4xbf16>, vector<4x16xbf16>, vector<256x16xf32> -> vector<256x16xf32>
    %60 = arith.addf %54, %59 : vector<256x16xf32>
    %c0_40 = arith.constant 0 : index
    %c25 = arith.constant 25 : index
    %c0_41 = arith.constant 0 : index
    %61 = vector.load %arg1[%c0_40, %c25, %c0_41] : memref<1x304x4xbf16, #tpu.memory_space<vmem>>, vector<1x256x4xbf16>
    %62 = vector.shape_cast %61 : vector<1x256x4xbf16> to vector<256x4xbf16>
    %c5 = arith.constant 5 : index
    %c0_42 = arith.constant 0 : index
    %c0_43 = arith.constant 0 : index
    %63 = vector.load %arg2[%c5, %c0_42, %c0_43] : memref<9x4x16xbf16, #tpu.memory_space<vmem>>, vector<1x4x16xbf16>
    %64 = vector.shape_cast %63 : vector<1x4x16xbf16> to vector<4x16xbf16>
    %cst_44 = arith.constant dense<0.000000e+00> : vector<256x16xf32>
    %65 = tpu.matmul %62, %64, %cst_44 {dimension_numbers = #tpu.dot_dimension_numbers<[1], [0], [0], [1], [0, 0, 1, 1], [], []>} : vector<256x4xbf16>, vector<4x16xbf16>, vector<256x16xf32> -> vector<256x16xf32>
    %66 = arith.addf %60, %65 : vector<256x16xf32>
    %c0_45 = arith.constant 0 : index
    %c41 = arith.constant 41 : index
    %c0_46 = arith.constant 0 : index
    %67 = vector.load %arg1[%c0_45, %c41, %c0_46] : memref<1x304x4xbf16, #tpu.memory_space<vmem>>, vector<1x256x4xbf16>
    %68 = vector.shape_cast %67 : vector<1x256x4xbf16> to vector<256x4xbf16>
    %c8_47 = arith.constant 8 : index
    %c0_48 = arith.constant 0 : index
    %c0_49 = arith.constant 0 : index
    %69 = vector.load %arg2[%c8_47, %c0_48, %c0_49] : memref<9x4x16xbf16, #tpu.memory_space<vmem>>, vector<1x4x16xbf16>
    %70 = vector.shape_cast %69 : vector<1x4x16xbf16> to vector<4x16xbf16>
    %cst_50 = arith.constant dense<0.000000e+00> : vector<256x16xf32>
    %71 = tpu.matmul %68, %70, %cst_50 {dimension_numbers = #tpu.dot_dimension_numbers<[1], [0], [0], [1], [0, 0, 1, 1], [], []>} : vector<256x4xbf16>, vector<4x16xbf16>, vector<256x16xf32> -> vector<256x16xf32>
    %72 = arith.addf %66, %71 : vector<256x16xf32>
    %73 = vector.broadcast %10 : vector<256x1xf32> to vector<256x16xf32>
    %74 = arith.mulf %72, %73 : vector<256x16xf32>
    %75 = arith.addf %53, %74 : vector<256x16xf32>
    %c0_51 = arith.constant 0 : index
    %c0_52 = arith.constant 0 : index
    %76 = vector.load %arg3[%c0_51, %c0_52] : memref<1x16xf32, #tpu.memory_space<vmem>>, vector<1x16xf32>
    %77 = vector.broadcast %76 : vector<1x16xf32> to vector<256x16xf32>
    %78 = arith.addf %75, %77 : vector<256x16xf32>
    %cst_53 = arith.constant 0.000000e+00 : f32
    %79 = vector.broadcast %cst_53 : f32 to vector<256x16xf32>
    %80 = arith.maximumf %78, %79 : vector<256x16xf32>
    %81 = arith.truncf %80 : vector<256x16xf32> to vector<256x16xbf16>
    %c0_54 = arith.constant 0 : index
    %c0_55 = arith.constant 0 : index
    %82 = vector.load %arg4[%c0_54, %c0_55] : memref<16x40xbf16, #tpu.memory_space<vmem>>, vector<16x40xbf16>
    %cst_56 = arith.constant dense<0.000000e+00> : vector<256x40xf32>
    %83 = tpu.matmul %81, %82, %cst_56 {dimension_numbers = #tpu.dot_dimension_numbers<[1], [0], [0], [1], [0, 0, 1, 1], [], []>} : vector<256x16xbf16>, vector<16x40xbf16>, vector<256x40xf32> -> vector<256x40xf32>
    %c0_57 = arith.constant 0 : index
    %c0_58 = arith.constant 0 : index
    %84 = vector.load %arg5[%c0_57, %c0_58] : memref<1x40xf32, #tpu.memory_space<vmem>>, vector<1x40xf32>
    %85 = vector.broadcast %84 : vector<1x40xf32> to vector<256x40xf32>
    %86 = arith.addf %83, %85 : vector<256x40xf32>
    %87 = vector.extract_strided_slice %86 {offsets = [0, 0], sizes = [256, 8], strides = [1, 1]} : vector<256x40xf32> to vector<256x8xf32>
    %cst_59 = arith.constant 0.000000e+00 : f32
    %88 = vector.broadcast %cst_59 : f32 to vector<256x8xf32>
    %89 = arith.maximumf %87, %88 : vector<256x8xf32>
    %90 = vector.extract_strided_slice %86 {offsets = [0, 8], sizes = [256, 32], strides = [1, 1]} : vector<256x40xf32> to vector<256x32xf32>
    %cst_60 = arith.constant 0.000000e+00 : bf16
    %91 = vector.broadcast %cst_60 : bf16 to vector<304x8xbf16>
    %c0_61 = arith.constant 0 : index
    %c0_62 = arith.constant 0 : index
    %92 = vector.load %arg13[%c0_61, %c0_62] : memref<304x8xbf16, #tpu.memory_space<vmem>>, vector<304x8xbf16>
    tpu.vector_store %arg13[%c0_61, %c0_62], %91 {strides = array<i32>} : memref<304x8xbf16, #tpu.memory_space<vmem>>, vector<304x8xbf16>,
    %93 = arith.truncf %89 : vector<256x8xf32> to vector<256x8xbf16>
    %c24_63 = arith.constant 24 : index
    %c0_64 = arith.constant 0 : index
    %94 = vector.load %arg13[%c24_63, %c0_64] : memref<304x8xbf16, #tpu.memory_space<vmem>>, vector<256x8xbf16>
    tpu.vector_store %arg13[%c24_63, %c0_64], %93 {strides = array<i32>} : memref<304x8xbf16, #tpu.memory_space<vmem>>, vector<256x8xbf16>,
    %cst_65 = arith.constant 0.000000e+00 : f32
    %95 = vector.broadcast %cst_65 : f32 to vector<256x8xf32>
    %cst_66 = arith.constant 0.000000e+00 : f32
    %96 = vector.broadcast %cst_66 : f32 to vector<256x8xf32>
    %c7_67 = arith.constant 7 : index
    %c0_68 = arith.constant 0 : index
    %97 = vector.load %arg13[%c7_67, %c0_68] : memref<304x8xbf16, #tpu.memory_space<vmem>>, vector<256x8xbf16>
    %c0_69 = arith.constant 0 : index
    %c0_70 = arith.constant 0 : index
    %c0_71 = arith.constant 0 : index
    %98 = vector.load %arg6[%c0_69, %c0_70, %c0_71] : memref<9x8x8xbf16, #tpu.memory_space<vmem>>, vector<1x8x8xbf16>
    %99 = vector.shape_cast %98 : vector<1x8x8xbf16> to vector<8x8xbf16>
    %cst_72 = arith.constant dense<0.000000e+00> : vector<256x8xf32>
    %100 = tpu.matmul %97, %99, %cst_72 {dimension_numbers = #tpu.dot_dimension_numbers<[1], [0], [0], [1], [0, 0, 1, 1], [], []>} : vector<256x8xbf16>, vector<8x8xbf16>, vector<256x8xf32> -> vector<256x8xf32>
    %101 = arith.addf %96, %100 : vector<256x8xf32>
    %c23_73 = arith.constant 23 : index
    %c0_74 = arith.constant 0 : index
    %102 = vector.load %arg13[%c23_73, %c0_74] : memref<304x8xbf16, #tpu.memory_space<vmem>>, vector<256x8xbf16>
    %c3_75 = arith.constant 3 : index
    %c0_76 = arith.constant 0 : index
    %c0_77 = arith.constant 0 : index
    %103 = vector.load %arg6[%c3_75, %c0_76, %c0_77] : memref<9x8x8xbf16, #tpu.memory_space<vmem>>, vector<1x8x8xbf16>
    %104 = vector.shape_cast %103 : vector<1x8x8xbf16> to vector<8x8xbf16>
    %cst_78 = arith.constant dense<0.000000e+00> : vector<256x8xf32>
    %105 = tpu.matmul %102, %104, %cst_78 {dimension_numbers = #tpu.dot_dimension_numbers<[1], [0], [0], [1], [0, 0, 1, 1], [], []>} : vector<256x8xbf16>, vector<8x8xbf16>, vector<256x8xf32> -> vector<256x8xf32>
    %106 = arith.addf %101, %105 : vector<256x8xf32>
    %c39_79 = arith.constant 39 : index
    %c0_80 = arith.constant 0 : index
    %107 = vector.load %arg13[%c39_79, %c0_80] : memref<304x8xbf16, #tpu.memory_space<vmem>>, vector<256x8xbf16>
    %c6_81 = arith.constant 6 : index
    %c0_82 = arith.constant 0 : index
    %c0_83 = arith.constant 0 : index
    %108 = vector.load %arg6[%c6_81, %c0_82, %c0_83] : memref<9x8x8xbf16, #tpu.memory_space<vmem>>, vector<1x8x8xbf16>
    %109 = vector.shape_cast %108 : vector<1x8x8xbf16> to vector<8x8xbf16>
    %cst_84 = arith.constant dense<0.000000e+00> : vector<256x8xf32>
    %110 = tpu.matmul %107, %109, %cst_84 {dimension_numbers = #tpu.dot_dimension_numbers<[1], [0], [0], [1], [0, 0, 1, 1], [], []>} : vector<256x8xbf16>, vector<8x8xbf16>, vector<256x8xf32> -> vector<256x8xf32>
    %111 = arith.addf %106, %110 : vector<256x8xf32>
    %112 = vector.broadcast %6 : vector<256x1xf32> to vector<256x8xf32>
    %113 = arith.mulf %111, %112 : vector<256x8xf32>
    %114 = arith.addf %95, %113 : vector<256x8xf32>
    %cst_85 = arith.constant 0.000000e+00 : f32
    %115 = vector.broadcast %cst_85 : f32 to vector<256x8xf32>
    %c8_86 = arith.constant 8 : index
    %c0_87 = arith.constant 0 : index
    %116 = vector.load %arg13[%c8_86, %c0_87] : memref<304x8xbf16, #tpu.memory_space<vmem>>, vector<256x8xbf16>
    %c1_88 = arith.constant 1 : index
    %c0_89 = arith.constant 0 : index
    %c0_90 = arith.constant 0 : index
    %117 = vector.load %arg6[%c1_88, %c0_89, %c0_90] : memref<9x8x8xbf16, #tpu.memory_space<vmem>>, vector<1x8x8xbf16>
    %118 = vector.shape_cast %117 : vector<1x8x8xbf16> to vector<8x8xbf16>
    %cst_91 = arith.constant dense<0.000000e+00> : vector<256x8xf32>
    %119 = tpu.matmul %116, %118, %cst_91 {dimension_numbers = #tpu.dot_dimension_numbers<[1], [0], [0], [1], [0, 0, 1, 1], [], []>} : vector<256x8xbf16>, vector<8x8xbf16>, vector<256x8xf32> -> vector<256x8xf32>
    %120 = arith.addf %115, %119 : vector<256x8xf32>
    %c24_92 = arith.constant 24 : index
    %c0_93 = arith.constant 0 : index
    %121 = vector.load %arg13[%c24_92, %c0_93] : memref<304x8xbf16, #tpu.memory_space<vmem>>, vector<256x8xbf16>
    %c4_94 = arith.constant 4 : index
    %c0_95 = arith.constant 0 : index
    %c0_96 = arith.constant 0 : index
    %122 = vector.load %arg6[%c4_94, %c0_95, %c0_96] : memref<9x8x8xbf16, #tpu.memory_space<vmem>>, vector<1x8x8xbf16>
    %123 = vector.shape_cast %122 : vector<1x8x8xbf16> to vector<8x8xbf16>
    %cst_97 = arith.constant dense<0.000000e+00> : vector<256x8xf32>
    %124 = tpu.matmul %121, %123, %cst_97 {dimension_numbers = #tpu.dot_dimension_numbers<[1], [0], [0], [1], [0, 0, 1, 1], [], []>} : vector<256x8xbf16>, vector<8x8xbf16>, vector<256x8xf32> -> vector<256x8xf32>
    %125 = arith.addf %120, %124 : vector<256x8xf32>
    %c40_98 = arith.constant 40 : index
    %c0_99 = arith.constant 0 : index
    %126 = vector.load %arg13[%c40_98, %c0_99] : memref<304x8xbf16, #tpu.memory_space<vmem>>, vector<256x8xbf16>
    %c7_100 = arith.constant 7 : index
    %c0_101 = arith.constant 0 : index
    %c0_102 = arith.constant 0 : index
    %127 = vector.load %arg6[%c7_100, %c0_101, %c0_102] : memref<9x8x8xbf16, #tpu.memory_space<vmem>>, vector<1x8x8xbf16>
    %128 = vector.shape_cast %127 : vector<1x8x8xbf16> to vector<8x8xbf16>
    %cst_103 = arith.constant dense<0.000000e+00> : vector<256x8xf32>
    %129 = tpu.matmul %126, %128, %cst_103 {dimension_numbers = #tpu.dot_dimension_numbers<[1], [0], [0], [1], [0, 0, 1, 1], [], []>} : vector<256x8xbf16>, vector<8x8xbf16>, vector<256x8xf32> -> vector<256x8xf32>
    %130 = arith.addf %125, %129 : vector<256x8xf32>
    %131 = arith.addf %114, %130 : vector<256x8xf32>
    %cst_104 = arith.constant 0.000000e+00 : f32
    %132 = vector.broadcast %cst_104 : f32 to vector<256x8xf32>
    %c9_105 = arith.constant 9 : index
    %c0_106 = arith.constant 0 : index
    %133 = vector.load %arg13[%c9_105, %c0_106] : memref<304x8xbf16, #tpu.memory_space<vmem>>, vector<256x8xbf16>
    %c2_107 = arith.constant 2 : index
    %c0_108 = arith.constant 0 : index
    %c0_109 = arith.constant 0 : index
    %134 = vector.load %arg6[%c2_107, %c0_108, %c0_109] : memref<9x8x8xbf16, #tpu.memory_space<vmem>>, vector<1x8x8xbf16>
    %135 = vector.shape_cast %134 : vector<1x8x8xbf16> to vector<8x8xbf16>
    %cst_110 = arith.constant dense<0.000000e+00> : vector<256x8xf32>
    %136 = tpu.matmul %133, %135, %cst_110 {dimension_numbers = #tpu.dot_dimension_numbers<[1], [0], [0], [1], [0, 0, 1, 1], [], []>} : vector<256x8xbf16>, vector<8x8xbf16>, vector<256x8xf32> -> vector<256x8xf32>
    %137 = arith.addf %132, %136 : vector<256x8xf32>
    %c25_111 = arith.constant 25 : index
    %c0_112 = arith.constant 0 : index
    %138 = vector.load %arg13[%c25_111, %c0_112] : memref<304x8xbf16, #tpu.memory_space<vmem>>, vector<256x8xbf16>
    %c5_113 = arith.constant 5 : index
    %c0_114 = arith.constant 0 : index
    %c0_115 = arith.constant 0 : index
    %139 = vector.load %arg6[%c5_113, %c0_114, %c0_115] : memref<9x8x8xbf16, #tpu.memory_space<vmem>>, vector<1x8x8xbf16>
    %140 = vector.shape_cast %139 : vector<1x8x8xbf16> to vector<8x8xbf16>
    %cst_116 = arith.constant dense<0.000000e+00> : vector<256x8xf32>
    %141 = tpu.matmul %138, %140, %cst_116 {dimension_numbers = #tpu.dot_dimension_numbers<[1], [0], [0], [1], [0, 0, 1, 1], [], []>} : vector<256x8xbf16>, vector<8x8xbf16>, vector<256x8xf32> -> vector<256x8xf32>
    %142 = arith.addf %137, %141 : vector<256x8xf32>
    %c41_117 = arith.constant 41 : index
    %c0_118 = arith.constant 0 : index
    %143 = vector.load %arg13[%c41_117, %c0_118] : memref<304x8xbf16, #tpu.memory_space<vmem>>, vector<256x8xbf16>
    %c8_119 = arith.constant 8 : index
    %c0_120 = arith.constant 0 : index
    %c0_121 = arith.constant 0 : index
    %144 = vector.load %arg6[%c8_119, %c0_120, %c0_121] : memref<9x8x8xbf16, #tpu.memory_space<vmem>>, vector<1x8x8xbf16>
    %145 = vector.shape_cast %144 : vector<1x8x8xbf16> to vector<8x8xbf16>
    %cst_122 = arith.constant dense<0.000000e+00> : vector<256x8xf32>
    %146 = tpu.matmul %143, %145, %cst_122 {dimension_numbers = #tpu.dot_dimension_numbers<[1], [0], [0], [1], [0, 0, 1, 1], [], []>} : vector<256x8xbf16>, vector<8x8xbf16>, vector<256x8xf32> -> vector<256x8xf32>
    %147 = arith.addf %142, %146 : vector<256x8xf32>
    %148 = vector.broadcast %10 : vector<256x1xf32> to vector<256x8xf32>
    %149 = arith.mulf %147, %148 : vector<256x8xf32>
    %150 = arith.addf %131, %149 : vector<256x8xf32>
    %c0_123 = arith.constant 0 : index
    %c0_124 = arith.constant 0 : index
    %151 = vector.load %arg7[%c0_123, %c0_124] : memref<1x8xf32, #tpu.memory_space<vmem>>, vector<1x8xf32>
    %152 = vector.broadcast %151 : vector<1x8xf32> to vector<256x8xf32>
    %153 = arith.addf %150, %152 : vector<256x8xf32>
    %cst_125 = arith.constant 0.000000e+00 : f32
    %154 = vector.broadcast %cst_125 : f32 to vector<256x8xf32>
    %155 = arith.maximumf %153, %154 : vector<256x8xf32>
    %156 = arith.truncf %155 : vector<256x8xf32> to vector<256x8xbf16>
    %c0_126 = arith.constant 0 : index
    %c0_127 = arith.constant 0 : index
    %157 = vector.load %arg8[%c0_126, %c0_127] : memref<8x32xbf16, #tpu.memory_space<vmem>>, vector<8x32xbf16>
    %cst_128 = arith.constant dense<0.000000e+00> : vector<256x32xf32>
    %158 = tpu.matmul %156, %157, %cst_128 {dimension_numbers = #tpu.dot_dimension_numbers<[1], [0], [0], [1], [0, 0, 1, 1], [], []>} : vector<256x8xbf16>, vector<8x32xbf16>, vector<256x32xf32> -> vector<256x32xf32>
    %c0_129 = arith.constant 0 : index
    %c0_130 = arith.constant 0 : index
    %159 = vector.load %arg9[%c0_129, %c0_130] : memref<1x32xf32, #tpu.memory_space<vmem>>, vector<1x32xf32>
    %160 = vector.broadcast %159 : vector<1x32xf32> to vector<256x32xf32>
    %161 = arith.addf %158, %160 : vector<256x32xf32>
    %162 = arith.addf %161, %90 : vector<256x32xf32>
    %cst_131 = arith.constant 0.000000e+00 : f32
    %163 = vector.broadcast %cst_131 : f32 to vector<256x32xf32>
    %164 = arith.maximumf %162, %163 : vector<256x32xf32>
    %cst_132 = arith.constant dense<0.000000e+00> : vector<32xf32>
    %165 = vector.multi_reduction <add>, %164, %cst_132 [0] : vector<256x32xf32> to vector<32xf32>
    %166 = vector.shape_cast %165 : vector<32xf32> to vector<1x32xf32>
    %cst_133 = arith.constant 2.560000e+02 : f32
    %167 = vector.broadcast %cst_133 : f32 to vector<1x32xf32>
    %168 = arith.divf %166, %167 : vector<1x32xf32>
    %169 = arith.truncf %168 : vector<1x32xf32> to vector<1x32xbf16>
    %c0_134 = arith.constant 0 : index
    %c0_135 = arith.constant 0 : index
    %170 = vector.load %arg10[%c0_134, %c0_135] : memref<32x10xbf16, #tpu.memory_space<vmem>>, vector<32x10xbf16>
    %cst_136 = arith.constant dense<0.000000e+00> : vector<1x10xf32>
    %171 = tpu.matmul %169, %170, %cst_136 {dimension_numbers = #tpu.dot_dimension_numbers<[1], [0], [0], [1], [0, 0, 1, 1], [], []>} : vector<1x32xbf16>, vector<32x10xbf16>, vector<1x10xf32> -> vector<1x10xf32>
    %c0_137 = arith.constant 0 : index
    %c0_138 = arith.constant 0 : index
    %172 = vector.load %arg11[%c0_137, %c0_138] : memref<1x10xf32, #tpu.memory_space<vmem>>, vector<1x10xf32>
    %173 = arith.addf %171, %172 : vector<1x10xf32>
    %c0_139 = arith.constant 0 : index
    %c0_140 = arith.constant 0 : index
    %c0_141 = arith.constant 0 : index
    %174 = vector.load %arg12[%c0_139, %c0_140, %c0_141] : memref<1x1x10xf32, #tpu.memory_space<vmem>>, vector<1x1x10xf32>
    %175 = vector.shape_cast %174 : vector<1x1x10xf32> to vector<1x10xf32>
    %176 = vector.shape_cast %173 : vector<1x10xf32> to vector<1x1x10xf32>
    tpu.vector_store %arg12[%c0_139, %c0_140, %c0_141], %176 {strides = array<i32>} : memref<1x1x10xf32, #tpu.memory_space<vmem>>, vector<1x1x10xf32>,
    return
  }
  func.func @transform_0(%arg0: i32) -> (i32, i32, i32) {
    %c0_i32 = arith.constant 0 : i32
    %c0_i32_0 = arith.constant 0 : i32
    %c0_i32_1 = arith.constant 0 : i32
    return %arg0, %c0_i32, %c0_i32_0 : i32, i32, i32
  }
  func.func @transform_1(%arg0: i32) -> (i32, i32, i32) {
    %c0_i32 = arith.constant 0 : i32
    %c0_i32_0 = arith.constant 0 : i32
    %c0_i32_1 = arith.constant 0 : i32
    %c0_i32_2 = arith.constant 0 : i32
    return %c0_i32, %c0_i32_0, %c0_i32_1 : i32, i32, i32
  }
  func.func @transform_2(%arg0: i32) -> (i32, i32) {
    %c0_i32 = arith.constant 0 : i32
    %c0_i32_0 = arith.constant 0 : i32
    %c0_i32_1 = arith.constant 0 : i32
    return %c0_i32, %c0_i32_0 : i32, i32
  }
  func.func @transform_3(%arg0: i32) -> (i32, i32) {
    %c0_i32 = arith.constant 0 : i32
    %c0_i32_0 = arith.constant 0 : i32
    %c0_i32_1 = arith.constant 0 : i32
    return %c0_i32, %c0_i32_0 : i32, i32
  }
  func.func @transform_4(%arg0: i32) -> (i32, i32) {
    %c0_i32 = arith.constant 0 : i32
    %c0_i32_0 = arith.constant 0 : i32
    %c0_i32_1 = arith.constant 0 : i32
    return %c0_i32, %c0_i32_0 : i32, i32
  }
  func.func @transform_5(%arg0: i32) -> (i32, i32, i32) {
    %c0_i32 = arith.constant 0 : i32
    %c0_i32_0 = arith.constant 0 : i32
    %c0_i32_1 = arith.constant 0 : i32
    %c0_i32_2 = arith.constant 0 : i32
    return %c0_i32, %c0_i32_0, %c0_i32_1 : i32, i32, i32
  }
  func.func @transform_6(%arg0: i32) -> (i32, i32) {
    %c0_i32 = arith.constant 0 : i32
    %c0_i32_0 = arith.constant 0 : i32
    %c0_i32_1 = arith.constant 0 : i32
    return %c0_i32, %c0_i32_0 : i32, i32
  }
  func.func @transform_7(%arg0: i32) -> (i32, i32) {
    %c0_i32 = arith.constant 0 : i32
    %c0_i32_0 = arith.constant 0 : i32
    %c0_i32_1 = arith.constant 0 : i32
    return %c0_i32, %c0_i32_0 : i32, i32
  }
  func.func @transform_8(%arg0: i32) -> (i32, i32) {
    %c0_i32 = arith.constant 0 : i32
    %c0_i32_0 = arith.constant 0 : i32
    %c0_i32_1 = arith.constant 0 : i32
    return %c0_i32, %c0_i32_0 : i32, i32
  }
  func.func @transform_9(%arg0: i32) -> (i32, i32) {
    %c0_i32 = arith.constant 0 : i32
    %c0_i32_0 = arith.constant 0 : i32
    %c0_i32_1 = arith.constant 0 : i32
    return %c0_i32, %c0_i32_0 : i32, i32
  }
  func.func @transform_10(%arg0: i32) -> (i32, i32) {
    %c0_i32 = arith.constant 0 : i32
    %c0_i32_0 = arith.constant 0 : i32
    %c0_i32_1 = arith.constant 0 : i32
    return %c0_i32, %c0_i32_0 : i32, i32
  }
  func.func @transform_11(%arg0: i32) -> (i32, i32, i32) {
    %c0_i32 = arith.constant 0 : i32
    %c0_i32_0 = arith.constant 0 : i32
    %c0_i32_1 = arith.constant 0 : i32
    return %arg0, %c0_i32, %c0_i32_0 : i32, i32, i32
  }
}

</mosaic_0001>

<bundles_post_ra>
// kernel: bottleneck_resnet_forward.1
= control target key start
LH: loop header
LB: loop body
LE: loop exit
PB: predicated region body
PF: predicated region fallthrough
CT: control target
= control target key end

     0   :  { %s13586_s0 = inlined_call_operand.vmem [shape: bf16[2,304,4], index: 0, kind: input, shape index: {}]   ;;  %s13587_s1 = inlined_call_operand.vmem [shape: bf16[9,4,16], index: 1, kind: input, shape index: {}]   ;;  %s13588_s2 = inlined_call_operand.vmem [shape: f32[1,16], index: 2, kind: input, shape index: {}]   ;;  %s13589_s3 = inlined_call_operand.vmem [shape: bf16[16,40], index: 3, kind: input, shape index: {}]   ;;  %s13590_s4 = inlined_call_operand.vmem [shape: f32[1,40], index: 4, kind: input, shape index: {}]   ;;  %s13591_s5 = inlined_call_operand.vmem [shape: bf16[9,8,8], index: 5, kind: input, shape index: {}]   ;;  %s13592_s6 = inlined_call_operand.vmem [shape: f32[1,8], index: 6, kind: input, shape index: {}]   ;;  %s13593_s7 = inlined_call_operand.vmem [shape: bf16[8,32], index: 7, kind: input, shape index: {}]   ;;  %s13594_s8 = inlined_call_operand.vmem [shape: f32[1,32], index: 8, kind: input, shape index: {}]   ;;  %s13595_s9 = inlined_call_operand.vmem [shape: bf16[32,10], index: 9, kind: input, shape index: {}]   ;;  %s13596_s10 = inlined_call_operand.vmem [shape: f32[1,10], index: 10, kind: input, shape index: {}]   ;;  %s13597_s11 = inlined_call_operand.hbm [shape: f32[2,1,10], index: 11, kind: output, shape index: {}]  }
   0x1   :  { %13648 = sst [smem:[#allocation92_spill]] %s13586_s0 }
   0x2   :  { %16 = vsyncpa [#allocation4], 0 }
   0x3   :  { %18 = vsyncpa [#allocation4 + $0x1], 0  ;;  %s10347_s17 = smov 0   ;;  %s10349_s18 = smov 0  }
   0x4   :  { %s10351_s19 = smov 0   ;;  %s10353_s20 = smov 0  }
   0x5 LB: > { %s10368_s21 = sadd.s32 4294967295, %s10280_s20   ;;  %s8259_s22 = sadd.s32 4294967294, %s10280_s20   ;;  %s10280_s20 = sphi %s10353_s20, %s14062_s20   ;;  %s10276_s19 = sphi %s10351_s19, %s14061_s19   ;;  %s10272_s18 = sphi %s10349_s18, %s14060_s18   ;;  %s10268_s17 = sphi %s10347_s17, %s14059_s17  }
   0x6   : > { %s10372_s23 = sadd.s32 1, %s10280_s20   ;;  %s267_s24 = sadd.s32 1, %s10276_s19 }
   0x7   : > { %s264_s25 = ssub.s32 %s10280_s20, %s10372_s23  ;;  %p277_p0 = scmp.ne.s32.totalorder %s10276_s19, %s10272_s18 }
   0x8   : > { %p265_p1 = scmp.eq.s32.totalorder %s264_s25, 0  ;;  %p278_p2 = scmp.eq.s32.totalorder %s10368_s21, 1 }
   0x9   : > { %p283_p3 = scmp.ne.s32.totalorder %s10272_s18, %s10268_s17  ;;  %p284_p4 = scmp.eq.s32.totalorder %s8259_s22, 1 }
   0xa   : > { %s10383_s26 = scalar_select %p265_p1, %s10276_s19, %s267_s24  }
   0xb   : > { %p10385_p5 = por %p278_p2, %p277_p0  ;;  %p10389_p6 = por %p284_p4, %p283_p3 }
   0xc   : > { %p8262_p7 = scmp.ge.s32.totalorder %s10280_s20, 1  ;;  %p340_p8 = scmp.lt.s32.totalorder %s10280_s20, 3 }
   0xe   : > { %p341_p9 = pnand %p8262_p7, %p340_p8 }
  0x10   : > { %344 = sbr.rel (%p341_p9) target bundleno = 1702 (0x6a6), region = 64 }
  0x15   : > { %v8296_v0 = vld [vmem:[%s13587_s1 + $0x6] sm:$0x3]  ;;  %vm966_vm0 = vcmask 1041408   ;;  %v675_v1 = vld [vmem:[%s13587_s1] sm:$0x3]  ;;  %p379_p10 = scmp.lt.s32.totalorder %s10368_s21, 1 }
  0x16   : > { %9950 = vmatprep.subr.msk.bf16.mxu0 %vm966_vm0, %v8296_v0  ;;  %v968_v2 = vsel %vm966_vm0, %v8296_v0, 0  ;;  %9951 = vmatprep.subr.msk.bf16.mxu1 %vm966_vm0, %v675_v1  ;;  %v1177_v3 = vsel %vm966_vm0, %v675_v1, 0  ;;  %v8349_v4 = vld [vmem:[%s13587_s1 + $0xc] sm:$0x3]  ;;  %v10413_v5 = vld [vmem:[%s13587_s1 + $0x8] sm:$0x3] }
  0x17   : > { %9263 = vmatpush3.bf16.msra.mxu0 %v968_v2  ;;  %9297 = vmatpush3.bf16.msra.mxu1 %v1177_v3  ;;  %s380_s14 = scalar_select %p379_p10, %s10368_s21, 1  ;;  %vm764_vm1 = vsmask.f32 4352  ;;  %v10424_v6 = vsel %vm966_vm0, %v8349_v4, 0  ;;  %vm917_vm2 = vcmask 31744  }
  0x18   : > { %9952 = vmatprep.subr.msk.bf16.mxu0 %vm966_vm0, %v8349_v4  ;;  %9953 = vmatprep.subr.msk.bf16.mxu1 %vm966_vm0, %v10413_v5  ;;  %s13651_s0 = sld [smem:[#allocation92_spill]]  ;;  %vm2735_vm3 = vsmask.f32 7424  ;;  %s10284_s22 = smov 120  }
  0x19   : > { %s9969_s25 = smul.u32 152, %s380_s14  ;;  %s377_s24 = sand.u32 1, %s10272_s18  }
  0x1a   : > { %s8884_s30 = sshll.u32 %s10368_s21, 4  ;;  %s378_s13 = scalar_lea.vmem [#allocation3], %s377_s24 }
  0x1b   : > { %s8204_s14 = sshll.u32 %s378_s13, 4  ;;  %s13545_s16 = scalar_lea.hbm %s13597_s11, %s8884_s30  ;;  %s13547_s14 = int_to_ptr.vmem [resolvable:$true] %s8204_s14 }
  0x1c   : > { %s10220_s21 = scalar_lea.vmem %s13547_s14, 16 }
  0x1d   : > { %p10221_p11 = scmp.ne.s32.totalorder %s13547_s14, %s10220_s21 }
  0x1e   : > { %s10421_s12 = scalar_lea.vmem %s13651_s0, %s9969_s25  ;;  %s10286_s25 = smov [#allocation3]  }
  0x1f   : > { %v645_v7 = vld [vmem:[%s10421_s12 + $0xc] sm:$0xf]  ;;  %v646_v8 = vld [vmem:[%s10421_s12 + $0x10] sm:$0xf]  ;;  %v647_v9 = vld [vmem:[%s10421_s12 + $0x14] sm:$0xf]  ;;  %p10222_p12 = pnand %p10221_p11, %p10385_p5 }
  0x20   : > { %v648_v10 = vld [vmem:[%s10421_s12 + $0x18] sm:$0xf]  ;;  %v676_v11 = vld [vmem:[%s10421_s12 + $0x8] sm:$0x8]  ;;  %v8298_v12 = vcombine.low %v646_v8, %v647_v9  ;;  %v642_v13 = vld [vmem:[%s10421_s12] sm:$0x8]  ;;  %v10432_v14 = vcombine.low %v645_v7, %v646_v8 }
  0x21   : > { %v8297_v15 = vcombine.low %v676_v11, %v645_v7  ;;  %v10434_v16 = vcombine.low %v647_v9, %v648_v10  ;;  %v10437_v17 = vld [vmem:[%s10421_s12 + $0x4] sm:$0xf]  ;;  %v10440_v18 = vld [vmem:[%s10421_s12 + $0x8] sm:$0xf]  ;;  %v10443_v19 = vld [vmem:[%s10421_s12 + $0x1c] sm:$0xf]  ;;  %p10223_p13 = pneg %p10222_p12 }
  0x22   : > { %13652 = vst [vmem:[#allocation6_spill] sm:$0xff] %v10432_v14  ;;  %v774_v20 = vshrl.u32 %v8298_v12, 16  ;;  %v777_v21 = vshll.u32 %v8298_v12, 16  ;;  %v8330_v22 = vcombine.low %v642_v13, %v10437_v17  ;;  %v8331_v23 = vcombine.low %v10440_v18, %v645_v7  ;;  %v10448_v24 = vld [vmem:[%s10421_s12 + $0x20] sm:$0xf]  ;;  %s10224_s29 = sshll.u32 %s10286_s25, 4  ;;  %s10225_s29 = int_to_ptr.vmem [resolvable:$false] %s10224_s29 }
  0x23   : > { %v10451_v25 = vld [vmem:[%s10421_s12 + $0x24] sm:$0xf]  ;;  %v766_v26 = vshrl.u32 %v8297_v15, 16  ;;  %v769_v27 = vshll.u32 %v8297_v15, 16  ;;  %v8299_v28 = vcombine.low %v648_v10, %v10443_v19  ;;  %v10457_v34 = vld [vmem:[%s10421_s12 + $0x28] sm:$0xf]  ;;  %p10227_p0 = scmp.lt.s32.totalorder %s13547_s14, %s10225_s29 }
  0x24   : > { %v8300_v29 = vcombine.low %v10448_v24, %v10451_v25  ;;  %v776_v30 = vrot.slane %v774_v20, 3  ;;  %v779_v31 = vrot.slane %v777_v21, 4  ;;  %v1141_v32 = vshrl.u32 %v8330_v22, 16  ;;  %v10460_v35 = vld [vmem:[%s10421_s12 + $0x2c] sm:$0xf]  ;;  %s10226_s15 = scalar_lea.vmem %s10225_s29, 32 }
  0x25   : > { %v1144_v33 = vshll.u32 %v8330_v22, 16  ;;  %v768_v36 = vrot.slane %v766_v26, 3  ;;  %v771_v37 = vrot.slane %v769_v27, 4  ;;  %v1149_v38 = vshrl.u32 %v8331_v23, 16  ;;  %v10463_v40 = vld [vmem:[%s10421_s12 + $0x30] sm:$0xf]  ;;  %p10228_p1 = scmp.lt.s32.totalorder %s10226_s15, %s10220_s21 }
  0x26   : > { %v1152_v39 = vshll.u32 %v8331_v23, 16  ;;  %v10466_v41 = vld [vmem:[%s10421_s12 + $0x34] sm:$0xf]  ;;  %v780_v42 = vor.u32 %v779_v31, %v776_v30  ;;  %v1143_v43 = vrot.slane %v1141_v32, 3  ;;  %v783_v45 = vshrl.u32 %v8299_v28, 16 }
  0x27   : > { %v1146_v44 = vrot.slane %v1144_v33, 4  ;;  %v10469_v46 = vld [vmem:[%s10421_s12 + $0x38] sm:$0xf]  ;;  %v772_v47 = vor.u32 %v771_v37, %v768_v36  ;;  %v1151_v48 = vrot.slane %v1149_v38, 3  ;;  %v786_v50 = vshll.u32 %v8299_v28, 16  ;;  %p10229_p2 = por %p10228_p1, %p10227_p0 }
  0x28   : > { %v1154_v49 = vrot.slane %v1152_v39, 4  ;;  %v10472_v51 = vld [vmem:[%s10421_s12 + $0x3c] sm:$0xf]  ;;  %v785_v53 = vrot.slane %v783_v45, 3  ;;  %v792_v54 = vshrl.u32 %v8300_v29, 16  ;;  %v795_v55 = vshll.u32 %v8300_v29, 16 }
  0x29   : > { %v1147_v52 = vor.u32 %v1146_v44, %v1143_v43  ;;  %v781_v56 = vsel %vm764_vm1, %v772_v47, %v780_v42  ;;  %v788_v58 = vrot.slane %v786_v50, 4  ;;  %v8301_v59 = vcombine.low %v10457_v34, %v10460_v35  ;;  %v10485_v4 = vld [vmem:[%s10421_s12 + $0x40] sm:$0xf]  ;;  %v10489_v11 = vld [vmem:[%s10421_s12 + $0x44] sm:$0xf]  ;;  %p10230_p3 = pnand %p10229_p2, %p10223_p13 }
  0x2a   : > { %v1155_v57 = vor.u32 %v1154_v49, %v1151_v48  ;;  %9264 = vmatprep.mubr.msk.bf16.mxu0 %vm917_vm2, %v781_v56  ;;  %v794_v60 = vrot.slane %v792_v54, 3  ;;  %v797_v61 = vrot.slane %v795_v55, 4  ;;  %v8302_v62 = vcombine.low %v10463_v40, %v10466_v41  ;;  %v10501_v26 = vld [vmem:[%s13587_s1 + $0x2] sm:$0x3]  ;;  %v10508_v31 = vld [vmem:[%s10421_s12 + $0x48] sm:$0xf] }
  0x2b   : > { %v8303_v63 = vcombine.low %v10469_v46, %v10472_v51  ;;  %v789_v1 = vor.u32 %v788_v58, %v785_v53  ;;  %v801_v3 = vshrl.u32 %v8301_v59, 16  ;;  %v804_v8 = vshll.u32 %v8301_v59, 16  ;;  %v10511_v32 = vld [vmem:[%s10421_s12 + $0x4c] sm:$0xf]  ;;  %v10514_v37 = vld [vmem:[%s10421_s12 + $0x50] sm:$0xf] }
  0x2c   : > { %v1156_v0 = vsel %vm764_vm1, %v1147_v52, %v1155_v57  ;;  %v1157_v2 = vsel %vm764_vm1, %v1155_v57, %v780_v42  ;;  %v798_v7 = vor.u32 %v797_v61, %v794_v60  ;;  %v810_v9 = vshrl.u32 %v8302_v62, 16  ;;  %v10517_v38 = vld [vmem:[%s10421_s12 + $0x54] sm:$0xf]  ;;  %v10532_v56 = vld [vmem:[%s10421_s12 + $0x58] sm:$0xf] }
  0x2d   : > { %9298 = vmatprep.mubr.msk.bf16.mxu1 %vm917_vm2, %v1156_v0  ;;  %v813_v10 = vshll.u32 %v8302_v62, 16  ;;  %v790_v12 = vsel %vm764_vm1, %v780_v42, %v789_v1  ;;  %v803_v13 = vrot.slane %v801_v3, 3  ;;  %v1987_v15 = vsel %vm966_vm0, %v10413_v5, 0  ;;  %v10535_v57 = vld [vmem:[%s10421_s12 + $0x5c] sm:$0xf] }
  0x2e   : > { %9299 = vmatmul.mubr.msk.bf16.vlgmr.msra.gmra.mxu1 %vm917_vm2, %v1157_v2  ;;  %9265 = vmatmul.mubr.msk.bf16.vlgmr.msra.gmra.mxu0 %vm917_vm2, %v790_v12  ;;  %v799_v20 = vsel %vm764_vm1, %v789_v1, %v798_v7  ;;  %v806_v21 = vrot.slane %v804_v8, 4  ;;  %v812_v22 = vrot.slane %v810_v9, 3  ;;  %v819_v5 = vshrl.u32 %v8303_v63, 16  ;;  %v10538_v58 = vld [vmem:[%s10421_s12 + $0x60] sm:$0xf] }
  0x2f   : > { %9302 = vmatprep.mubr.msk.bf16.mxu1 %vm917_vm2, %v790_v12  ;;  %v815_v23 = vrot.slane %v813_v10, 4  ;;  %9331 = vmatpush3.bf16.msra.mxu0 %v10424_v6  ;;  %v822_v27 = vshll.u32 %v8303_v63, 16  ;;  %v8304_v28 = vcombine.low %v10485_v4, %v10489_v11  ;;  %v8305_v43 = vcombine.low %v10508_v31, %v10511_v32  ;;  %v10541_v59 = vld [vmem:[%s10421_s12 + $0x64] sm:$0xf]  ;;  %v10554_v10 = vld [vmem:[%s10421_s12 + $0x68] sm:$0xf] }
  0x30   : > { %9268 = vmatprep.mubr.msk.bf16.mxu0 %vm917_vm2, %v799_v20  ;;  %v807_v29 = vor.u32 %v806_v21, %v803_v13  ;;  %9365 = vmatpush3.bf16.msra.mxu1 %v1987_v15  ;;  %v821_v39 = vrot.slane %v819_v5, 3  ;;  %v8306_v48 = vcombine.low %v10514_v37, %v10517_v38  ;;  %v8307_v63 = vcombine.low %v10532_v56, %v10535_v57  ;;  %v10557_v12 = vld [vmem:[%s10421_s12 + $0x6c] sm:$0xf]  ;;  %v10560_v21 = vld [vmem:[%s10421_s12 + $0x70] sm:$0xf] }
  0x31   : > { %v816_v30 = vor.u32 %v815_v23, %v812_v22  ;;  %v828_v33 = vshrl.u32 %v8304_v28, 16  ;;  %v831_v36 = vshll.u32 %v8304_v28, 16  ;;  %9954 = vmatprep.subr.msk.bf16.mxu0 %vm966_vm0, %v10501_v26  ;;  %v824_v42 = vrot.slane %v822_v27, 4  ;;  %v10563_v22 = vld [vmem:[%s10421_s12 + $0x74] sm:$0xf] }
  0x32   : > { %v808_v6 = vsel %vm764_vm1, %v798_v7, %v807_v29  ;;  %v837_v50 = vshrl.u32 %v8305_v43, 16  ;;  %v840_v52 = vshll.u32 %v8305_v43, 16  ;;  %v846_v54 = vshrl.u32 %v8306_v48, 16  ;;  %v10582_v43 = vld [vmem:[%s10421_s12 + $0x7c] sm:$0xf] }
  0x33   : > { %v817_v44 = vsel %vm764_vm1, %v807_v29, %v816_v30  ;;  %v830_v45 = vrot.slane %v828_v33, 3  ;;  %v833_v47 = vrot.slane %v831_v36, 4  ;;  %v825_v49 = vor.u32 %v824_v42, %v821_v39  ;;  %v10575_v39 = vld [vmem:[%s10421_s12 + $0x20] sm:$0xf]  ;;  %v10579_v42 = vld [vmem:[%s10421_s12 + $0x78] sm:$0xf] }
  0x34   : > { %v849_v55 = vshll.u32 %v8306_v48, 16  ;;  %v839_v61 = vrot.slane %v837_v50, 3  ;;  %v842_v62 = vrot.slane %v840_v52, 4  ;;  %v848_v1 = vrot.slane %v846_v54, 3  ;;  %13653 = vst [vmem:[#allocation7_spill] sm:$0xff] %v10575_v39 }
  0x35   : > { %v834_v53 = vor.u32 %v833_v47, %v830_v45  ;;  %v826_v60 = vsel %vm764_vm1, %v816_v30, %v825_v49  ;;  %v8308_v3 = vcombine.low %v10538_v58, %v10541_v59  ;;  %v855_v8 = vshrl.u32 %v8307_v63, 16  ;;  %v10592_v54 = vld [vmem:[%s10421_s12 + $0x80] sm:$0xf] }
  0x36   : > { %9303 = vmatmul.mubr.msk.bf16.gmra.mxu1 %vm917_vm2, %v799_v20  ;;  %9269 = vmatmul.mubr.msk.bf16.gmra.mxu0 %vm917_vm2, %v808_v6  ;;  %v851_v2 = vrot.slane %v849_v55, 4  ;;  %v843_v7 = vor.u32 %v842_v62, %v839_v61  ;;  %v858_v9 = vshll.u32 %v8307_v63, 16  ;;  %v8309_v23 = vcombine.low %v10554_v10, %v10557_v12  ;;  %v10595_v55 = vld [vmem:[%s10421_s12 + $0x84] sm:$0xf]  ;;  %v10604_v61 = vld [vmem:[%s13587_s1 + $0xe] sm:$0x3] }
  0x37   : > { %9306 = vmatprep.mubr.msk.bf16.mxu1 %vm917_vm2, %v808_v6  ;;  %9272 = vmatprep.mubr.msk.bf16.mxu0 %vm917_vm2, %v817_v44  ;;  %v835_v0 = vsel %vm764_vm1, %v825_v49, %v834_v53  ;;  %v864_v15 = vshrl.u32 %v8308_v3, 16  ;;  %v867_v20 = vshll.u32 %v8308_v3, 16  ;;  %v857_v27 = vrot.slane %v855_v8, 3  ;;  %v10572_v6 = vld [vmem:[%s10421_s12 + $0x1c] sm:$0xf] }
  0x38   : > { %v852_v13 = vor.u32 %v851_v2, %v848_v1  ;;  %v844_v5 = vsel %vm764_vm1, %v834_v53, %v843_v7  ;;  %v860_v28 = vrot.slane %v858_v9, 4  ;;  %v8310_v29 = vcombine.low %v10560_v21, %v10563_v22  ;;  %v10607_v62 = vld [vmem:[%s10421_s12 + $0x88] sm:$0xf]  ;;  %9955 = vmatprep.subr.msk.bf16.mxu1 %vm966_vm0, %v10604_v61 }
  0x39   : > { %v866_v33 = vrot.slane %v864_v15, 3  ;;  %v869_v36 = vrot.slane %v867_v20, 4  ;;  %v873_v47 = vshrl.u32 %v8309_v23, 16  ;;  %v876_v48 = vshll.u32 %v8309_v23, 16  ;;  %v10630_v15 = vld [vmem:[%s10421_s12 + $0x14] sm:$0xf] }
  0x3a   : > { %v853_v30 = vsel %vm764_vm1, %v843_v7, %v852_v13  ;;  %v861_v45 = vor.u32 %v860_v28, %v857_v27  ;;  %v882_v49 = vshrl.u32 %v8310_v29, 16  ;;  %v885_v52 = vshll.u32 %v8310_v29, 16 }
  0x3b   : > { %v870_v50 = vor.u32 %v869_v36, %v866_v33  ;;  %v8311_v53 = vcombine.low %v10579_v42, %v10582_v43  ;;  %v10611_v63 = vcombine.low %v10451_v25, %v10457_v34  ;;  %v8312_v1 = vcombine.low %v10592_v54, %v10595_v55 }
  0x3c   : > { %v884_v3 = vrot.slane %v882_v49, 3  ;;  %v887_v7 = vrot.slane %v885_v52, 4  ;;  %v10622_v25 = vcombine.low %v10460_v35, %v10463_v40  ;;  %v8313_v9 = vcombine.low %v10607_v62, %v10607_v62 }
  0x3d   : > { %v871_v2 = vsel %vm764_vm1, %v861_v45, %v870_v50  ;;  %v891_v8 = vshrl.u32 %v8311_v53, 16  ;;  %v894_v34 = vshll.u32 %v8311_v53, 16  ;;  %v10634_v20 = vcombine.low %v10466_v41, %v10469_v46 }
  0x3e   : > { %9307 = vmatmul.mubr.msk.bf16.gmra.mxu1 %vm917_vm2, %v817_v44  ;;  %9273 = vmatmul.mubr.msk.bf16.gmra.mxu0 %vm917_vm2, %v826_v60  ;;  %v900_v40 = vshrl.u32 %v8312_v1, 16  ;;  %v903_v23 = vshll.u32 %v8312_v1, 16  ;;  %v10639_v27 = vcombine.low %v10472_v51, %v10485_v4  ;;  %v8332_v29 = vcombine.low %v10592_v54, %v10592_v54  ;;  %v10787_v44 = vld [vmem:[%s10421_s12 + $0x84] sm:$0xf] }
  0x3f   : > { %9310 = vmatprep.mubr.msk.bf16.mxu1 %vm917_vm2, %v826_v60  ;;  %9276 = vmatprep.mubr.msk.bf16.mxu0 %vm917_vm2, %v835_v0  ;;  %v10599_v60 = vcombine.low %v10443_v19, %v10448_v24  ;;  %v875_v19 = vrot.slane %v873_v47, 3  ;;  %v878_v24 = vrot.slane %v876_v48, 4  ;;  %v893_v28 = vrot.slane %v891_v8, 3  ;;  %v10654_v48 = vld [vmem:[%s10421_s12 + $0x24] sm:$0xf] }
  0x40   : > { %v896_v33 = vrot.slane %v894_v34, 4  ;;  %v909_v41 = vshrl.u32 %v8313_v9, 16  ;;  %v10648_v46 = vcombine.low %v10489_v11, %v10508_v31  ;;  %v905_v47 = vrot.slane %v903_v23, 4  ;;  %13654 = vst [vmem:[#allocation8_spill] sm:$0xff] %v10654_v48 }
  0x41   : > { %v879_v35 = vor.u32 %v878_v24, %v875_v19  ;;  %v10660_v52 = vcombine.low %v10511_v32, %v10514_v37  ;;  %v1159_v11 = vshrl.u32 %v8332_v29, 16  ;;  %v1162_v31 = vshll.u32 %v8332_v29, 16  ;;  %v10669_v19 = vld [vmem:[%s10421_s12 + $0x2c] sm:$0xf] }
  0x42   : > { %v912_v53 = vshll.u32 %v8313_v9, 16  ;;  %v10673_v24 = vcombine.low %v10517_v38, %v10532_v56  ;;  %v897_v32 = vor.u32 %v896_v33, %v893_v28  ;;  %v10678_v8 = vcombine.low %v10535_v57, %v10538_v58 }
  0x43   : > { %v880_v36 = vsel %vm764_vm1, %v870_v50, %v879_v35  ;;  %v911_v50 = vrot.slane %v909_v41, 3  ;;  %v1161_v34 = vrot.slane %v1159_v11, 3  ;;  %v1164_v9 = vrot.slane %v1162_v31, 4 }
  0x44   : > { %v8352_v38 = vcombine.low %v10575_v39, %v10654_v48  ;;  %v10684_v56 = vcombine.low %v10541_v59, %v10554_v10  ;;  %v914_v57 = vrot.slane %v912_v53, 4  ;;  %v10695_v59 = vld [vmem:[%s10421_s12 + $0x30] sm:$0xf]  ;;  %v10698_v10 = vld [vmem:[%s10421_s12 + $0x34] sm:$0xf] }
  0x45   : > { %v1165_v41 = vor.u32 %v1164_v9, %v1161_v34  ;;  %v8354_v53 = vcombine.low %v10695_v59, %v10698_v10  ;;  %v10728_v34 = vld [vmem:[%s10421_s12 + $0x40] sm:$0xf]  ;;  %v10731_v9 = vld [vmem:[%s10421_s12 + $0x44] sm:$0xf] }
  0x46   : > { %9311 = vmatmul.mubr.msk.bf16.gmra.mxu1 %vm917_vm2, %v835_v0  ;;  %9277 = vmatmul.mubr.msk.bf16.gmra.mxu0 %vm917_vm2, %v844_v5  ;;  %v862_v0 = vsel %vm764_vm1, %v852_v13, %v861_v45  ;;  %v1340_v13 = vld [vmem:[%s10421_s12 + $0x10] sm:$0x8]  ;;  %v902_v45 = vrot.slane %v900_v40, 3 }
  0x47   : > { %9314 = vmatprep.mubr.msk.bf16.mxu1 %vm917_vm2, %v844_v5  ;;  %9280 = vmatprep.mubr.msk.bf16.mxu0 %vm917_vm2, %v853_v30  ;;  %v888_v5 = vor.u32 %v887_v7, %v884_v3  ;;  %v8350_v51 = vcombine.low %v1340_v13, %v10630_v15  ;;  %v10688_v13 = vcombine.low %v10557_v12, %v10560_v21  ;;  %v1476_v12 = vshrl.u32 %v8352_v38, 16 }
  0x48   : > { %v906_v37 = vor.u32 %v905_v47, %v902_v45  ;;  %v1479_v21 = vshll.u32 %v8352_v38, 16  ;;  %v10711_v45 = vld [vmem:[%s10421_s12 + $0x3c] sm:$0xf]  ;;  %v915_v47 = vor.u32 %v914_v57, %v911_v50  ;;  %v10737_v38 = vld [vmem:[%s10421_s12 + $0x4c] sm:$0xf]  ;;  %v1494_v57 = vshrl.u32 %v8354_v53, 16 }
  0x49   : > { %v889_v4 = vsel %vm764_vm1, %v879_v35, %v888_v5  ;;  %v1459_v1 = vshrl.u32 %v8350_v51, 16  ;;  %v898_v35 = vsel %vm764_vm1, %v888_v5, %v897_v32  ;;  %v10703_v5 = vcombine.low %v10563_v22, %v10579_v42  ;;  %13657 = vst [vmem:[#allocation11_spill] sm:$0xff] %v10711_v45  ;;  %13659 = vst [vmem:[#allocation13_spill] sm:$0xff] %v10737_v38  ;;  %v10798_v50 = vld [vmem:[%s10421_s12 + $0x8c] sm:$0xf] }
  0x4a   : > { %v907_v40 = vsel %vm764_vm1, %v897_v32, %v906_v37  ;;  %v10716_v22 = vcombine.low %v10582_v43, %v10592_v54  ;;  %v1478_v11 = vrot.slane %v1476_v12, 3  ;;  %v1481_v31 = vrot.slane %v1479_v21, 4  ;;  %v10758_v12 = vld [vmem:[%s10421_s12 + $0x64] sm:$0xf]  ;;  %v10761_v21 = vld [vmem:[%s10421_s12 + $0x68] sm:$0xf] }
  0x4b   : > { %v1461_v23 = vrot.slane %v1459_v1, 3  ;;  %v1166_v1 = vsel %vm764_vm1, %v897_v32, %v1165_v41  ;;  %v916_v43 = vsel %vm764_vm1, %v906_v37, %v915_v47  ;;  %v10734_v32 = vld [vmem:[%s10421_s12 + $0x48] sm:$0xf]  ;;  %v10764_v41 = vld [vmem:[%s10421_s12 + $0x6c] sm:$0xf] }
  0x4c   : > { %13658 = vst [vmem:[#allocation12_spill] sm:$0xff] %v10734_v32  ;;  %v10767_v47 = vld [vmem:[%s10421_s12 + $0x70] sm:$0xf]  ;;  %v10790_v37 = vld [vmem:[%s10421_s12 + $0x88] sm:$0xf]  ;;  %v8357_v39 = vcombine.low %v10734_v32, %v10737_v38 }
  0x4e   : > { %9315 = vmatmul.mubr.msk.bf16.gmra.mxu1 %vm917_vm2, %v853_v30  ;;  %9281 = vmatmul.mubr.msk.bf16.gmra.mxu0 %vm917_vm2, %v862_v0  ;;  %v10644_v30 = vld [vmem:[%s10421_s12 + $0x18] sm:$0xf] }
  0x4f   : > { %9318 = vmatprep.mubr.msk.bf16.mxu1 %vm917_vm2, %v862_v0  ;;  %9284 = vmatprep.mubr.msk.bf16.mxu0 %vm917_vm2, %v871_v2  ;;  %v8351_v49 = vcombine.low %v10644_v30, %v10572_v6  ;;  %v10666_v0 = vld [vmem:[%s10421_s12 + $0x28] sm:$0xf] }
  0x50   : > { %13655 = vst [vmem:[#allocation9_spill] sm:$0xff] %v10666_v0  ;;  %v8353_v58 = vcombine.low %v10666_v0, %v10669_v19  ;;  %v10801_v0 = vld [vmem:[%s10421_s12 + $0x90] sm:$0xf] }
  0x51   : > { %v1467_v3 = vshrl.u32 %v8351_v49, 16  ;;  %v1470_v7 = vshll.u32 %v8351_v49, 16 }
  0x53   : > { %v1469_v29 = vrot.slane %v1467_v3, 3  ;;  %v1472_v33 = vrot.slane %v1470_v7, 4 }
  0x55   : > { %v1473_v49 = vor.u32 %v1472_v33, %v1469_v29  ;;  %v10752_v29 = vld [vmem:[%s10421_s12 + $0x5c] sm:$0xf]  ;;  %v10755_v33 = vld [vmem:[%s10421_s12 + $0x60] sm:$0xf] }
  0x56   : > { %9319 = vmatmul.mubr.msk.bf16.gmra.mxu1 %vm917_vm2, %v871_v2  ;;  %9285 = vmatmul.mubr.msk.bf16.gmra.mxu0 %vm917_vm2, %v880_v36  ;;  %v1462_v2 = vshll.u32 %v8350_v51, 16  ;;  %v1485_v51 = vshrl.u32 %v8353_v58, 16  ;;  %13661 = vst [vmem:[#allocation15_spill] sm:$0xff] %v10752_v29 }
  0x57   : > { %9322 = vmatprep.mubr.msk.bf16.mxu1 %vm917_vm2, %v880_v36  ;;  %9288 = vmatprep.mubr.msk.bf16.mxu0 %vm917_vm2, %v889_v4  ;;  %v10708_v36 = vld [vmem:[%s10421_s12 + $0x38] sm:$0xf] }
  0x58   : > { %v1464_v28 = vrot.slane %v1462_v2, 4  ;;  %13656 = vst [vmem:[#allocation10_spill] sm:$0xff] %v10708_v36  ;;  %v8355_v2 = vcombine.low %v10708_v36, %v10711_v45  ;;  %v1487_v54 = vrot.slane %v1485_v51, 3  ;;  %v1496_v51 = vrot.slane %v1494_v57, 3 }
  0x5a   : > { %v1465_v42 = vor.u32 %v1464_v28, %v1461_v23  ;;  %v10746_v23 = vld [vmem:[%s10421_s12 + $0x54] sm:$0xf]  ;;  %v10749_v28 = vld [vmem:[%s10421_s12 + $0x58] sm:$0xf] }
  0x5b   : > { %13660 = vst [vmem:[#allocation14_spill] sm:$0xff] %v10749_v28 }
  0x5c   : > { %v1474_v7 = vsel %vm764_vm1, %v1465_v42, %v1473_v49  ;;  %v1506_v42 = vshll.u32 %v8355_v2, 16 }
  0x5e   : > { %9323 = vmatmul.mubr.msk.bf16.gmra.mxu1 %vm917_vm2, %v889_v4  ;;  %9289 = vmatmul.mubr.msk.bf16.gmra.mxu0 %vm917_vm2, %v898_v35  ;;  %v1488_v4 = vshll.u32 %v8353_v58, 16  ;;  %v1497_v58 = vshll.u32 %v8354_v53, 16  ;;  %v10781_v53 = vld [vmem:[%s10421_s12 + $0x7c] sm:$0xf] }
  0x5f   : > { %9326 = vmatprep.mubr.msk.bf16.mxu1 %vm917_vm2, %v898_v35  ;;  %9292 = vmatprep.mubr.msk.bf16.mxu0 %vm917_vm2, %v907_v40  ;;  %v10740_v35 = vld [vmem:[%s10421_s12 + $0x50] sm:$0xf]  ;;  %v1482_v40 = vor.u32 %v1481_v31, %v1478_v11  ;;  %v10775_v11 = vld [vmem:[%s10421_s12 + $0x74] sm:$0xf]  ;;  %v10778_v31 = vld [vmem:[%s10421_s12 + $0x78] sm:$0xf] }
  0x60   : > { %v1490_v3 = vrot.slane %v1488_v4, 4  ;;  %v1503_v4 = vshrl.u32 %v8355_v2, 16  ;;  %v1499_v45 = vrot.slane %v1497_v58, 4 }
  0x62   : > { %v1491_v2 = vor.u32 %v1490_v3, %v1487_v54  ;;  %v1483_v54 = vsel %vm764_vm1, %v1473_v49, %v1482_v40  ;;  %v8356_v3 = vcombine.low %v10728_v34, %v10731_v9  ;;  %v1505_v36 = vrot.slane %v1503_v4, 3  ;;  %v10840_v49 = vld [vmem:[%s13587_s1 + $0xa] sm:$0x3] }
  0x63   : > { %v1500_v57 = vor.u32 %v1499_v45, %v1496_v51 }
  0x64   : > { %v1492_v48 = vsel %vm764_vm1, %v1482_v40, %v1491_v2  ;;  %v10848_v40 = vld [vmem:[%s13587_s1 + $0x4] sm:$0x3]  ;;  %v1515_v58 = vshll.u32 %v8356_v3, 16 }
  0x66   : > { %9327 = vmatmul.mubr.msk.bf16.gmra.mxu1 %vm917_vm2, %v1166_v1  ;;  %9293 = vmatmul.mubr.msk.bf16.gmra.mxu0 %vm917_vm2, %v916_v43  ;;  %v10784_v1 = vld [vmem:[%s10421_s12 + $0x80] sm:$0xf]  ;;  %v2155_v43 = vsel %vm966_vm0, %v10501_v26, 0  ;;  %v2385_v26 = vsel %vm966_vm0, %v10604_v61, 0  ;;  %v1512_v61 = vshrl.u32 %v8356_v3, 16  ;;  %v1517_v32 = vrot.slane %v1515_v58, 4 }
  0x67   : > { %9366 = vmatprep.mubr.msk.bf16.mxu1 %vm917_vm2, %v10432_v14  ;;  %9332 = vmatprep.mubr.msk.bf16.mxu0 %vm917_vm2, %v1474_v7  ;;  %v1508_v14 = vrot.slane %v1506_v42, 4  ;;  %v1521_v42 = vshrl.u32 %v8357_v39, 16  ;;  %v1524_v7 = vshll.u32 %v8357_v39, 16  ;;  %v8359_v39 = vcombine.low %v10749_v28, %v10752_v29 }
  0x68   : > { %v1514_v38 = vrot.slane %v1512_v61, 3 }
  0x69   : > { %v1509_v4 = vor.u32 %v1508_v14, %v1505_v36  ;;  %v1523_v51 = vrot.slane %v1521_v42, 3  ;;  %v1526_v14 = vrot.slane %v1524_v7, 4  ;;  %v8360_v42 = vcombine.low %v10755_v33, %v10758_v12 }
  0x6a   : > { %v1518_v36 = vor.u32 %v1517_v32, %v1514_v38 }
  0x6b   : > { %v1510_v45 = vsel %vm764_vm1, %v1500_v57, %v1509_v4  ;;  %v1527_v3 = vor.u32 %v1526_v14, %v1523_v51  ;;  %v1548_v38 = vshrl.u32 %v8360_v42, 16 }
  0x6c   : > { %v1519_v7 = vsel %vm764_vm1, %v1509_v4, %v1518_v36  ;;  %v1551_v4 = vshll.u32 %v8360_v42, 16 }
  0x6e   : > { %9367 = vmatmul.mubr.msk.bf16.vlgmr.msra.gmra.mxu1 %vm917_vm2, %v10434_v16  ;;  %9333 = vmatmul.mubr.msk.bf16.vlgmr.msra.gmra.mxu0 %vm917_vm2, %v1483_v54  ;;  %v1501_v54 = vsel %vm764_vm1, %v1491_v2, %v1500_v57  ;;  %v1542_v57 = vshll.u32 %v8359_v39, 16 }
  0x6f   : > { %9370 = vmatprep.mubr.msk.bf16.mxu1 %vm917_vm2, %v10599_v60  ;;  %9399 = vmatpush3.bf16.msra.mxu0 %v2155_v43 }
  0x70   : > { %9336 = vmatprep.mubr.msk.bf16.mxu0 %vm917_vm2, %v1492_v48  ;;  %9433 = vmatpush3.bf16.msra.mxu1 %v2385_v26  ;;  %v8358_v48 = vcombine.low %v10740_v35, %v10746_v23  ;;  %v1539_v26 = vshrl.u32 %v8359_v39, 16  ;;  %v1544_v28 = vrot.slane %v1542_v57, 4 }
  0x71   : > { %9956 = vmatprep.subr.msk.bf16.mxu0 %vm966_vm0, %v10840_v49  ;;  %9957 = vmatprep.subr.msk.bf16.mxu1 %vm966_vm0, %v10848_v40 }
  0x72   : > { %v1530_v43 = vshrl.u32 %v8358_v48, 16  ;;  %v1533_v2 = vshll.u32 %v8358_v48, 16  ;;  %v1541_v29 = vrot.slane %v1539_v26, 3 }
  0x74   : > { %v1532_v61 = vrot.slane %v1530_v43, 3  ;;  %v1535_v58 = vrot.slane %v1533_v2, 4  ;;  %v1545_v48 = vor.u32 %v1544_v28, %v1541_v29  ;;  %v1553_v43 = vrot.slane %v1551_v4, 4 }
  0x75   : > { %v8362_v2 = vcombine.low %v10767_v47, %v10775_v11  ;;  %v8364_v4 = vcombine.low %v10784_v1, %v10787_v44 }
  0x76   : > { %9371 = vmatmul.mubr.msk.bf16.gmra.mxu1 %vm917_vm2, %v10611_v63  ;;  %9337 = vmatmul.mubr.msk.bf16.gmra.mxu0 %vm917_vm2, %v1501_v54  ;;  %v1528_v54 = vsel %vm764_vm1, %v1518_v36, %v1527_v3  ;;  %v1536_v32 = vor.u32 %v1535_v58, %v1532_v61  ;;  %v1550_v36 = vrot.slane %v1548_v38, 3 }
  0x77   : > { %9374 = vmatprep.mubr.msk.bf16.mxu1 %vm917_vm2, %v10622_v25  ;;  %9340 = vmatprep.mubr.msk.bf16.mxu0 %vm917_vm2, %v1510_v45  ;;  %v8361_v45 = vcombine.low %v10761_v21, %v10764_v41  ;;  %v1566_v29 = vshrl.u32 %v8362_v2, 16 }
  0x78   : > { %v1537_v39 = vsel %vm764_vm1, %v1527_v3, %v1536_v32  ;;  %v1546_v26 = vsel %vm764_vm1, %v1536_v32, %v1545_v48  ;;  %v1554_v28 = vor.u32 %v1553_v43, %v1550_v36  ;;  %v1569_v3 = vshll.u32 %v8362_v2, 16 }
  0x79   : > { %v1557_v51 = vshrl.u32 %v8361_v45, 16  ;;  %v1560_v14 = vshll.u32 %v8361_v45, 16  ;;  %v1568_v32 = vrot.slane %v1566_v29, 3  ;;  %v1584_v36 = vshrl.u32 %v8364_v4, 16 }
  0x7a   : > { %v1555_v45 = vsel %vm764_vm1, %v1545_v48, %v1554_v28  ;;  %v1571_v38 = vrot.slane %v1569_v3, 4  ;;  %v1587_v43 = vshll.u32 %v8364_v4, 16  ;;  %v8366_v3 = vcombine.low %v10801_v0, %v10801_v0 }
  0x7b   : > { %v1559_v57 = vrot.slane %v1557_v51, 3 }
  0x7c   : > { %v1572_v48 = vor.u32 %v1571_v38, %v1568_v32  ;;  %v1589_v29 = vrot.slane %v1587_v43, 4  ;;  %v1602_v32 = vshrl.u32 %v8366_v3, 16  ;;  %v1605_v38 = vshll.u32 %v8366_v3, 16 }
  0x7d   : > { %v8417_v43 = vcombine.low %v10437_v17, %v10440_v18  ;;  %v3108_v18 = vsel %vm966_vm0, %v10848_v40, 0 }
  0x7e   : > { %9375 = vmatmul.mubr.msk.bf16.gmra.mxu1 %vm917_vm2, %v10634_v20  ;;  %9341 = vmatmul.mubr.msk.bf16.gmra.mxu0 %vm917_vm2, %v1519_v7  ;;  %v1562_v7 = vrot.slane %v1560_v14, 4 }
  0x7f   : > { %9378 = vmatprep.mubr.msk.bf16.mxu1 %vm917_vm2, %v10639_v27  ;;  %9344 = vmatprep.mubr.msk.bf16.mxu0 %vm917_vm2, %v1528_v54  ;;  %v8363_v54 = vcombine.low %v10778_v31, %v10781_v53 }
  0x80   : > { %v1563_v61 = vor.u32 %v1562_v7, %v1559_v57 }
  0x81   : > { %v1575_v58 = vshrl.u32 %v8363_v54, 16  ;;  %v1578_v42 = vshll.u32 %v8363_v54, 16 }
  0x82   : > { %v1564_v51 = vsel %vm764_vm1, %v1554_v28, %v1563_v61  ;;  %v1573_v54 = vsel %vm764_vm1, %v1563_v61, %v1572_v48  ;;  %v1586_v28 = vrot.slane %v1584_v36, 3 }
  0x83   : > { %v1577_v14 = vrot.slane %v1575_v58, 3 }
  0x84   : > { %v1590_v61 = vor.u32 %v1589_v29, %v1586_v28 }
  0x86   : > { %9379 = vmatmul.mubr.msk.bf16.gmra.mxu1 %vm917_vm2, %v10648_v46  ;;  %9345 = vmatmul.mubr.msk.bf16.gmra.mxu0 %vm917_vm2, %v1537_v39  ;;  %v1580_v39 = vrot.slane %v1578_v42, 4 }
  0x87   : > { %9382 = vmatprep.mubr.msk.bf16.mxu1 %vm917_vm2, %v10660_v52  ;;  %9348 = vmatprep.mubr.msk.bf16.mxu0 %vm917_vm2, %v1546_v26  ;;  %v8365_v26 = vcombine.low %v10790_v37, %v10798_v50 }
  0x88   : > { %v1581_v2 = vor.u32 %v1580_v39, %v1577_v14  ;;  %v1604_v14 = vrot.slane %v1602_v32, 3  ;;  %v1607_v39 = vrot.slane %v1605_v38, 4  ;;  %v13688_v32 = vcombine.low %v10798_v50, %v10801_v0  ;;  %v10088_v38 = vld [vmem:[%s10421_s12 + $0x2c] sm:$0xff]  }
  0x89   : > { %v1593_v57 = vshrl.u32 %v8365_v26, 16  ;;  %v1596_v7 = vshll.u32 %v8365_v26, 16 }
  0x8a   : > { %v1582_v58 = vsel %vm764_vm1, %v1572_v48, %v1581_v2  ;;  %v1608_v48 = vor.u32 %v1607_v39, %v1604_v14  ;;  %v10089_v39 = vld [vmem:[%s10421_s12 + $0x34] sm:$0xff]  }
  0x8b   : > { %v1595_v42 = vrot.slane %v1593_v57, 3  ;;  %v13663_v57 = vcombine.low %v10630_v15, %v10644_v30  ;;  %v13667_v15 = vld [vmem:[#allocation8_spill] sm:$0xff]  ;;  %v13668_v30 = vld [vmem:[#allocation9_spill] sm:$0xff] }
  0x8c   : > { %v13669_v28 = vcombine.low %v13667_v15, %v13668_v30 }
  0x8e   : > { %9383 = vmatmul.mubr.msk.bf16.gmra.mxu1 %vm917_vm2, %v10673_v24  ;;  %9349 = vmatmul.mubr.msk.bf16.gmra.mxu0 %vm917_vm2, %v1555_v45  ;;  %v1598_v45 = vrot.slane %v1596_v7, 4  ;;  %v2917_v7 = vsel %vm966_vm0, %v10840_v49, 0  ;;  %v13671_v49 = vld [vmem:[#allocation10_spill] sm:$0xff] }
  0x8f   : > { %9386 = vmatprep.mubr.msk.bf16.mxu1 %vm917_vm2, %v10678_v8  ;;  %9352 = vmatprep.mubr.msk.bf16.mxu0 %vm917_vm2, %v1564_v51  ;;  %v1591_v51 = vsel %vm764_vm1, %v1581_v2, %v1590_v61  ;;  %v13662_v2 = vcombine.low %v10595_v55, %v10607_v62  ;;  %v10945_v55 = vld [vmem:[%s13587_s1 + $0x10] sm:$0x3]  ;;  %v13666_v62 = vld [vmem:[#allocation6_spill] sm:$0xff]  ;;  %v13672_v40 = vcombine.low %v10698_v10, %v13671_v49 }
  0x90   : > { %v1599_v4 = vor.u32 %v1598_v45, %v1595_v42  ;;  %v3570_v50 = vsel %vm966_vm0, %v10945_v55, 0 }
  0x92   : > { %v1600_v26 = vsel %vm764_vm1, %v1590_v61, %v1599_v4  ;;  %v1609_v36 = vsel %vm764_vm1, %v1599_v4, %v1608_v48 }
  0x96   : > { %9387 = vmatmul.mubr.msk.bf16.gmra.mxu1 %vm917_vm2, %v10684_v56  ;;  %9353 = vmatmul.mubr.msk.bf16.gmra.mxu0 %vm917_vm2, %v1573_v54  ;;  %v13664_v54 = vld [vmem:[#allocation7_spill] sm:$0xff] }
  0x97   : > { %9390 = vmatprep.mubr.msk.bf16.mxu1 %vm917_vm2, %v10688_v13  ;;  %9356 = vmatprep.mubr.msk.bf16.mxu0 %vm917_vm2, %v1582_v58  ;;  %v13665_v17 = vcombine.low %v10572_v6, %v13664_v54  ;;  %v13670_v6 = vcombine.low %v10669_v19, %v10695_v59  ;;  %v13675_v19 = vld [vmem:[#allocation12_spill] sm:$0xff]  ;;  %v13677_v59 = vld [vmem:[#allocation13_spill] sm:$0xff]  ;;  %v10090_v54 = vld [vmem:[%s10421_s12 + $0x3c] sm:$0xff]  }
  0x98   : > { %v13678_v10 = vcombine.low %v13677_v59, %v10740_v35  ;;  %v10083_v35 = vld [vmem:[%s10421_s12 + $0xc] sm:$0xff]   ;;  %v2780_v59 = vshrl.u32 %v10089_v39, 16 }
  0x9e   : > { %9391 = vmatmul.mubr.msk.bf16.gmra.mxu1 %vm917_vm2, %v10703_v5  ;;  %9357 = vmatmul.mubr.msk.bf16.gmra.mxu0 %vm917_vm2, %v1591_v51 }
  0x9f   : > { %9394 = vmatprep.mubr.msk.bf16.mxu1 %vm917_vm2, %v10716_v22  ;;  %9360 = vmatprep.mubr.msk.bf16.mxu0 %vm917_vm2, %v1600_v26  ;;  %v2768_v26 = vshll.u32 %v10088_v38, 16 }
  0xa6   : > { %9395 = vmatmul.mubr.msk.bf16.gmra.mxu1 %vm917_vm2, %v13662_v2  ;;  %9361 = vmatmul.mubr.msk.bf16.gmra.mxu0 %vm917_vm2, %v1609_v36  ;;  %v2772_v36 = vshrl.u32 %v10088_v38, 16 }
  0xa7   : > { %9434 = vmatprep.mubr.msk.bf16.mxu1 %vm917_vm2, %v13663_v57  ;;  %9400 = vmatprep.mubr.msk.bf16.mxu0 %vm917_vm2, %v8417_v43  ;;  %v2776_v43 = vshll.u32 %v10089_v39, 16 }
  0xa9   : > { %v2778_v30 = vrot.slane %v2776_v43, 1 }
  0xae   : > { %9435 = vmatmul.mubr.msk.bf16.vlgmr.msra.gmra.mxu1 %vm917_vm2, %v13665_v17  ;;  %9401 = vmatmul.mubr.msk.bf16.vlgmr.msra.gmra.mxu0 %vm917_vm2, %v13666_v62 }
  0xaf   : > { %9438 = vmatprep.mubr.msk.bf16.mxu1 %vm917_vm2, %v13669_v28  ;;  %9467 = vmatpush3.bf16.msra.mxu0 %v2917_v7  ;;  %v2770_v7 = vrot.slane %v2768_v26, 1  ;;  %v10091_v28 = vld [vmem:[%s10421_s12 + $0x44] sm:$0xff]  }
  0xb0   : > { %9404 = vmatprep.mubr.msk.bf16.mxu0 %vm917_vm2, %v10434_v16  ;;  %9501 = vmatpush3.bf16.msra.mxu1 %v3108_v18  ;;  %v13673_v16 = vld [vmem:[#allocation11_spill] sm:$0xff] }
  0xb1   : > { %9958 = vmatprep.subr.msk.bf16.mxu0 %vm966_vm0, %v10945_v55  ;;  %v13674_v29 = vcombine.low %v13673_v16, %v10728_v34  ;;  %v13681_v34 = vld [vmem:[#allocation15_spill] sm:$0xff]  ;;  %v2774_v15 = vor.u32 %v2772_v36, %v2770_v7  ;;  %v2784_v16 = vshll.u32 %v10090_v54, 16 }
  0xb6   : > { %9439 = vmatmul.mubr.msk.bf16.gmra.mxu1 %vm917_vm2, %v13670_v6  ;;  %9405 = vmatmul.mubr.msk.bf16.gmra.mxu0 %vm917_vm2, %v10599_v60  ;;  %v13676_v60 = vcombine.low %v10731_v9, %v13675_v19  ;;  %v13683_v9 = vcombine.low %v10758_v12, %v10761_v21 }
  0xb7   : > { %9442 = vmatprep.mubr.msk.bf16.mxu1 %vm917_vm2, %v13672_v40  ;;  %9408 = vmatprep.mubr.msk.bf16.mxu0 %vm917_vm2, %v10611_v63  ;;  %v13679_v63 = vld [vmem:[#allocation14_spill] sm:$0xff] }
  0xbe   : > { %9443 = vmatmul.mubr.msk.bf16.gmra.mxu1 %vm917_vm2, %v13674_v29  ;;  %9409 = vmatmul.mubr.msk.bf16.gmra.mxu0 %vm917_vm2, %v10622_v25  ;;  %v13680_v25 = vcombine.low %v10746_v23, %v13679_v63  ;;  %v10084_v23 = vld [vmem:[%s10421_s12 + $0x14] sm:$0xff]   ;;  %v2779_v63 = vsel %vm2735_vm3, %v2774_v15, %v2778_v30 }
  0xbf   : > { %9446 = vmatprep.mubr.msk.bf16.mxu1 %vm917_vm2, %v13676_v60  ;;  %9412 = vmatprep.mubr.msk.bf16.mxu0 %vm917_vm2, %v10634_v20  ;;  %v13682_v20 = vcombine.low %v13681_v34, %v10755_v33  ;;  %v2739_v33 = vshll.u32 %v10083_v35, 16  ;;  %v2744_v3 = vshll.u32 %v10084_v23, 16  ;;  %v2748_v45 = vshrl.u32 %v10084_v23, 16 }
  0xc0   : > { %v2792_v34 = vshll.u32 %v10091_v28, 16  ;;  %v2782_v23 = vor.u32 %v2780_v59, %v2778_v30 }
  0xc1   : > { %v2746_v42 = vrot.slane %v2744_v3, 1 }
  0xc3   : > { %v2750_v4 = vor.u32 %v2748_v45, %v2746_v42 }
  0xc6   : > { %9447 = vmatmul.mubr.msk.bf16.gmra.mxu1 %vm917_vm2, %v13678_v10  ;;  %9413 = vmatmul.mubr.msk.bf16.gmra.mxu0 %vm917_vm2, %v10639_v27  ;;  %v10085_v27 = vld [vmem:[%s10421_s12 + $0x4] sm:$0xff]  }
  0xc7   : > { %9450 = vmatprep.mubr.msk.bf16.mxu1 %vm917_vm2, %v13680_v25  ;;  %9416 = vmatprep.mubr.msk.bf16.mxu0 %vm917_vm2, %v10648_v46  ;;  %v13684_v46 = vcombine.low %v10764_v41, %v10767_v47  ;;  %v3089_v12 = vshrl.u32 %v10085_v27, 16  ;;  %v2737_v41 = vshrl.u32 %v10083_v35, 16  ;;  %v2741_v47 = vrot.slane %v2739_v33, 1 }
  0xc8   : > { %v2788_v25 = vshrl.u32 %v10090_v54, 16  ;;  %v2786_v35 = vrot.slane %v2784_v16, 1 }
  0xc9   : > { %v2742_v58 = vor.u32 %v2741_v47, %v2737_v41  ;;  %v10093_v41 = vld [vmem:[%s10421_s12 + $0x54] sm:$0xff]  }
  0xcb   : > { %v2747_v61 = vsel %vm2735_vm3, %v2742_v58, %v2746_v42  ;;  %v2787_v58 = vsel %vm2735_vm3, %v2782_v23, %v2786_v35  ;;  %v2796_v42 = vshrl.u32 %v10091_v28, 16 }
  0xce   : > { %9451 = vmatmul.mubr.msk.bf16.gmra.mxu1 %vm917_vm2, %v13682_v20  ;;  %9417 = vmatmul.mubr.msk.bf16.gmra.mxu0 %vm917_vm2, %v10660_v52  ;;  %v13685_v52 = vcombine.low %v10775_v11, %v10778_v31  ;;  %v10086_v11 = vld [vmem:[%s10421_s12 + $0x1c] sm:$0xff]  }
  0xcf   : > { %9454 = vmatprep.mubr.msk.bf16.mxu1 %vm917_vm2, %v13683_v9  ;;  %9420 = vmatprep.mubr.msk.bf16.mxu0 %vm917_vm2, %v10673_v24  ;;  %v3091_v24 = vshll.u32 %v10085_v27, 16 }
  0xd1   : > { %v3093_v21 = vrot.slane %v3091_v24, 1 }
  0xd3   : > { %v3094_v31 = vor.u32 %v3093_v21, %v3089_v12  ;;  %v2790_v12 = vor.u32 %v2788_v25, %v2786_v35  ;;  %v2794_v21 = vrot.slane %v2792_v34, 1  ;;  %v10097_v25 = vld [vmem:[%s10421_s12 + $0x74] sm:$0xff]  }
  0xd6   : > { %9455 = vmatmul.mubr.msk.bf16.gmra.mxu1 %vm917_vm2, %v13684_v46  ;;  %9421 = vmatmul.mubr.msk.bf16.gmra.mxu0 %vm917_vm2, %v10678_v8  ;;  %v13686_v8 = vcombine.low %v10781_v53, %v10784_v1  ;;  %v10087_v53 = vld [vmem:[%s10421_s12 + $0x24] sm:$0xff]   ;;  %v2752_v1 = vshll.u32 %v10086_v11, 16  ;;  %v10092_v46 = vld [vmem:[%s10421_s12 + $0x4c] sm:$0xff]  }
  0xd7   : > { %9458 = vmatprep.mubr.msk.bf16.mxu1 %vm917_vm2, %v13685_v52  ;;  %9424 = vmatprep.mubr.msk.bf16.mxu0 %vm917_vm2, %v10684_v56  ;;  %v13687_v56 = vcombine.low %v10787_v44, %v10790_v37  ;;  %v2756_v44 = vshrl.u32 %v10086_v11, 16  ;;  %v2760_v37 = vshll.u32 %v10087_v53, 16  ;;  %v2764_v0 = vshrl.u32 %v10087_v53, 16 }
  0xd8   : > { %v2804_v45 = vshrl.u32 %v10092_v46, 16 }
  0xd9   : > { %v2762_v14 = vrot.slane %v2760_v37, 1 }
  0xdb   : > { %v2766_v55 = vor.u32 %v2764_v0, %v2762_v14 }
  0xdd   : > { %v2771_v60 = vsel %vm2735_vm3, %v2766_v55, %v2770_v7  ;;  %v2812_v7 = vshrl.u32 %v10093_v41, 16 }
  0xde   : > { %9459 = vmatmul.mubr.msk.bf16.gmra.mxu1 %vm917_vm2, %v13686_v8  ;;  %9425 = vmatmul.mubr.msk.bf16.gmra.mxu0 %vm917_vm2, %v10688_v13  ;;  %v3095_v13 = vsel %vm2735_vm3, %v3094_v31, %v2741_v47 }
  0xdf   : > { %9462 = vmatprep.mubr.msk.bf16.mxu1 %vm917_vm2, %v13687_v56  ;;  %9428 = vmatprep.mubr.msk.bf16.mxu0 %vm917_vm2, %v10703_v5  ;;  %v2754_v5 = vrot.slane %v2752_v1, 1  ;;  %v2800_v56 = vshll.u32 %v10092_v46, 16  ;;  %v2795_v1 = vsel %vm2735_vm3, %v2790_v12, %v2794_v21 }
  0xe1   : > { %v2758_v51 = vor.u32 %v2756_v44, %v2754_v5  ;;  %v2755_v48 = vsel %vm2735_vm3, %v2750_v4, %v2754_v5  ;;  %v10094_v5 = vld [vmem:[%s10421_s12 + $0x5c] sm:$0xff]  }
  0xe2   : > { %v2816_v36 = vshll.u32 %v10094_v5, 16  ;;  %v2820_v55 = vshrl.u32 %v10094_v5, 16 }
  0xe6   : > { %9463 = vmatmul.mubr.msk.bf16.gmra.mxu1 %vm917_vm2, %v13688_v32  ;;  %9429 = vmatmul.mubr.msk.bf16.gmra.mxu0 %vm917_vm2, %v10716_v22  ;;  %v2763_v22 = vsel %vm2735_vm3, %v2758_v51, %v2762_v14  ;;  %v2802_v32 = vrot.slane %v2800_v56, 1  ;;  %v2798_v51 = vor.u32 %v2796_v42, %v2794_v21  ;;  %v10098_v42 = vld [vmem:[%s10421_s12 + $0x7c] sm:$0xff]  }
  0xe7   : > { %9502 = vmatprep.mubr.msk.bf16.mxu1 %vm917_vm2, %v3095_v13  ;;  %9468 = vmatprep.mubr.msk.bf16.mxu0 %vm917_vm2, %v2747_v61  ;;  %v2808_v13 = vshll.u32 %v10093_v41, 16 }
  0xe8   : > { %v2806_v39 = vor.u32 %v2804_v45, %v2802_v32 }
  0xe9   : > { %v2810_v26 = vrot.slane %v2808_v13, 1 }
  0xee   : > { %v9300_v2 = vpop.f32.mrf.mxu1  ;;  %9503 = vmatmul.mubr.msk.bf16.vlgmr.msra.gmra.mxu1 %vm917_vm2, %v2747_v61  ;;  %v9266_v57 = vpop.f32.mrf.mxu0  ;;  %9469 = vmatmul.mubr.msk.bf16.vlgmr.msra.gmra.mxu0 %vm917_vm2, %v2755_v48 }
  0xef   : > { %9506 = vmatprep.mubr.msk.bf16.mxu1 %vm917_vm2, %v2755_v48  ;;  %v11054_v17 = vadd.f32 %v9300_v2, %v9266_v57  ;;  %9535 = vmatpush3.bf16.msra.mxu0 %v3570_v50  ;;  %v10095_v48 = vld [vmem:[%s10421_s12 + $0x64] sm:$0xff]   ;;  %v2803_v57 = vsel %vm2735_vm3, %v2798_v51, %v2802_v32 }
  0xf0   : > { %v1213_v18 = vpop.f32.mrf.mxu1  ;;  %9472 = vmatprep.mubr.msk.bf16.mxu0 %vm917_vm2, %v2763_v22  ;;  %v1004_v62 = vpop.f32.mrf.mxu0  ;;  %v10099_v32 = vld [vmem:[%s10421_s12 + $0x84] sm:$0xff]  }
  0xf1   : > { %v11058_v6 = vadd.f32 %v1213_v18, %v1004_v62  ;;  %v2811_v18 = vsel %vm2735_vm3, %v2806_v39, %v2810_v26  ;;  %v2824_v62 = vshll.u32 %v10095_v48, 16 }
  0xf2   : > { %v9301_v49 = vpop.f32.mrf.mxu1  ;;  %v9267_v40 = vpop.f32.mrf.mxu0 }
  0xf3   : > { %v11060_v29 = vadd.f32 %v9301_v49, %v9267_v40  ;;  %v2818_v49 = vrot.slane %v2816_v36, 1  ;;  %v10096_v40 = vld [vmem:[%s10421_s12 + $0x6c] sm:$0xff]  }
  0xf4   : > { %v1216_v19 = vpop.f32.mrf.mxu1  ;;  %v1007_v10 = vpop.f32.mrf.mxu0  ;;  %v2832_v35 = vshll.u32 %v10096_v40, 16  ;;  %v2836_v41 = vshrl.u32 %v10096_v40, 16  ;;  %v10100_v40 = vld [vmem:[%s10421_s12 + $0x8c] ss:$0 sps:$4 sm:$0x11]  }
  0xf5   : > { %v11064_v20 = vadd.f32 %v1216_v19, %v1007_v10  ;;  %v2822_v10 = vor.u32 %v2820_v55, %v2818_v49 }
  0xf6   : > { %v9304_v9 = vpop.f32.mrf.mxu1  ;;  %9507 = vmatmul.mubr.msk.bf16.gmra.mxu1 %vm917_vm2, %v2763_v22  ;;  %v9270_v27 = vpop.f32.mrf.mxu0  ;;  %9473 = vmatmul.mubr.msk.bf16.gmra.mxu0 %vm917_vm2, %v2771_v60 }
  0xf7   : > { %9510 = vmatprep.mubr.msk.bf16.mxu1 %vm917_vm2, %v2771_v60  ;;  %v11070_v52 = vadd.f32 %v9304_v9, %v9270_v27  ;;  %9476 = vmatprep.mubr.msk.bf16.mxu0 %vm917_vm2, %v2779_v63  ;;  %v2814_v60 = vor.u32 %v2812_v7, %v2810_v26  ;;  %v10102_v7 = vld [vmem:[%s10421_s12 + $0x14] sm:$0xff]  }
  0xf8   : > { %v1229_v24 = vpop.f32.mrf.mxu1  ;;  %v1020_v33 = vpop.f32.mrf.mxu0 }
  0xf9   : > { %v11074_v47 = vadd.f32 %v1229_v24, %v1020_v33  ;;  %v2819_v23 = vsel %vm2735_vm3, %v2814_v60, %v2818_v49  ;;  %v2828_v33 = vshrl.u32 %v10095_v48, 16 }
  0xfa   : > { %v9305_v3 = vpop.f32.mrf.mxu1  ;;  %v9271_v8 = vpop.f32.mrf.mxu0 }
  0xfb   : > { %v11076_v11 = vadd.f32 %v9305_v3, %v9271_v8  ;;  %v2840_v3 = vshll.u32 %v10097_v25, 16 }
  0xfc   : > { %v1232_v31 = vpop.f32.mrf.mxu1  ;;  %v1023_v53 = vpop.f32.mrf.mxu0 }
  0xfd   : > { %v11080_v61 = vadd.f32 %v1232_v31, %v1023_v53 }
  0xfe   : > { %v9308_v44 = vpop.f32.mrf.mxu1  ;;  %9511 = vmatmul.mubr.msk.bf16.gmra.mxu1 %vm917_vm2, %v2779_v63  ;;  %v9274_v37 = vpop.f32.mrf.mxu0  ;;  %9477 = vmatmul.mubr.msk.bf16.gmra.mxu0 %vm917_vm2, %v2787_v58  ;;  %v2826_v63 = vrot.slane %v2824_v62, 1  ;;  %v10101_v62 = vld [vmem:[%s10421_s12 + $0x84] ss:$0 sps:$4 sm:$0x11]  }
  0xff   : > { %9514 = vmatprep.mubr.msk.bf16.mxu1 %vm917_vm2, %v2787_v58  ;;  %v11086_v38 = vadd.f32 %v9308_v44, %v9274_v37  ;;  %9480 = vmatprep.mubr.msk.bf16.mxu0 %vm917_vm2, %v2795_v1  ;;  %v2834_v58 = vrot.slane %v2832_v35, 1  ;;  %v2842_v37 = vrot.slane %v2840_v3, 1  ;;  %v3097_v35 = vshll.u32 %v10101_v62, 16 }
 0x100   : > { %v1245_v4 = vpop.f32.mrf.mxu1  ;;  %v1036_v14 = vpop.f32.mrf.mxu0  ;;  %v2827_v21 = vsel %vm2735_vm3, %v2822_v10, %v2826_v63  ;;  %v2830_v45 = vor.u32 %v2828_v33, %v2826_v63  ;;  %v10103_v10 = vld [vmem:[%s10421_s12 + $0x1c] sm:$0xff]   ;;  %v3392_v63 = vshll.u32 %v10102_v7, 16 }
 0x101   : > { %v11090_v0 = vadd.f32 %v1245_v4, %v1036_v14  ;;  %v2838_v44 = vor.u32 %v2836_v41, %v2834_v58  ;;  %v2848_v14 = vshll.u32 %v10098_v42, 16 }
 0x102   : > { %v9309_v50 = vpop.f32.mrf.mxu1  ;;  %v9275_v22 = vpop.f32.mrf.mxu0  ;;  %v2835_v48 = vsel %vm2735_vm3, %v2830_v45, %v2834_v58  ;;  %v3397_v58 = vshll.u32 %v10103_v10, 16  ;;  %v3099_v45 = vrot.slane %v3097_v35, 1 }
 0x103   : > { %v11092_v43 = vadd.f32 %v9309_v50, %v9275_v22  ;;  %v2844_v50 = vshrl.u32 %v10097_v25, 16  ;;  %v2843_v36 = vsel %vm2735_vm3, %v2838_v44, %v2842_v37  ;;  %v2850_v55 = vrot.slane %v2848_v14, 1 }
 0x104   : > { %v1248_v2 = vpop.f32.mrf.mxu1  ;;  %v1039_v54 = vpop.f32.mrf.mxu0 }
 0x105   : > { %v11096_v15 = vadd.f32 %v1248_v2, %v1039_v54  ;;  %v2852_v2 = vshrl.u32 %v10098_v42, 16  ;;  %v2846_v49 = vor.u32 %v2844_v50, %v2842_v37  ;;  %v10105_v50 = vld [vmem:[%s10421_s12 + $0x2c] sm:$0xff]  }
 0x106   : > { %v9312_v30 = vpop.f32.mrf.mxu1  ;;  %9515 = vmatmul.mubr.msk.bf16.gmra.mxu1 %vm917_vm2, %v2795_v1  ;;  %v9278_v28 = vpop.f32.mrf.mxu0  ;;  %9481 = vmatmul.mubr.msk.bf16.gmra.mxu0 %vm917_vm2, %v2803_v57 }
 0x107   : > { %9518 = vmatprep.mubr.msk.bf16.mxu1 %vm917_vm2, %v2803_v57  ;;  %v11102_v16 = vadd.f32 %v9312_v30, %v9278_v28  ;;  %9484 = vmatprep.mubr.msk.bf16.mxu0 %vm917_vm2, %v2811_v18  ;;  %v2856_v57 = vshll.u32 %v10099_v32, 16  ;;  %v2854_v60 = vor.u32 %v2852_v2, %v2850_v55  ;;  %v2851_v33 = vsel %vm2735_vm3, %v2846_v49, %v2850_v55 }
 0x108   : > { %v1261_v19 = vpop.f32.mrf.mxu1  ;;  %v1052_v59 = vpop.f32.mrf.mxu0 }
 0x109   : > { %v11106_v34 = vadd.f32 %v1261_v19, %v1052_v59  ;;  %v2858_v59 = vrot.slane %v2856_v57, 1 }
 0x10a   : > { %v9313_v9 = vpop.f32.mrf.mxu1  ;;  %v9279_v27 = vpop.f32.mrf.mxu0 }
 0x10b   : > { %v11108_v46 = vadd.f32 %v9313_v9, %v9279_v27  ;;  %v2859_v3 = vsel %vm2735_vm3, %v2854_v60, %v2858_v59 }
 0x10c   : > { %v1264_v24 = vpop.f32.mrf.mxu1  ;;  %v1055_v12 = vpop.f32.mrf.mxu0 }
 0x10d   : > { %v11112_v8 = vadd.f32 %v1264_v24, %v1055_v12  ;;  %v2860_v12 = vshrl.u32 %v10099_v32, 16 }
 0x10e   : > { %v9316_v56 = vpop.f32.mrf.mxu1  ;;  %9519 = vmatmul.mubr.msk.bf16.gmra.mxu1 %vm917_vm2, %v2811_v18  ;;  %v9282_v31 = vpop.f32.mrf.mxu0  ;;  %9485 = vmatmul.mubr.msk.bf16.gmra.mxu0 %vm917_vm2, %v2819_v23 }
 0x10f   : > { %9522 = vmatprep.mubr.msk.bf16.mxu1 %vm917_vm2, %v2819_v23  ;;  %v11118_v53 = vadd.f32 %v9316_v56, %v9282_v31  ;;  %9488 = vmatprep.mubr.msk.bf16.mxu0 %vm917_vm2, %v2827_v21  ;;  %v3390_v56 = vshrl.u32 %v10102_v7, 16  ;;  %v3394_v31 = vrot.slane %v3392_v63, 1  ;;  %v2862_v32 = vor.u32 %v2860_v12, %v2858_v59 }
 0x110   : > { %v1277_v1 = vpop.f32.mrf.mxu1  ;;  %v1068_v13 = vpop.f32.mrf.mxu0  ;;  %v3100_v7 = vsel %vm2735_vm3, %v2854_v60, %v3099_v45  ;;  %v3413_v59 = vshll.u32 %v10105_v50, 16 }
 0x111   : > { %v11122_v5 = vadd.f32 %v1277_v1, %v1068_v13  ;;  %v10104_v13 = vld [vmem:[%s10421_s12 + $0x24] sm:$0xff]   ;;  %v3395_v14 = vor.u32 %v3394_v31, %v3390_v56  ;;  %v10107_v56 = vld [vmem:[%s10421_s12 + $0x3c] sm:$0xff]  }
 0x112   : > { %v9317_v4 = vpop.f32.mrf.mxu1  ;;  %v9283_v51 = vpop.f32.mrf.mxu0 }
 0x113   : > { %v11124_v39 = vadd.f32 %v9317_v4, %v9283_v51 }
 0x114   : > { %v11126_v26 = vpop.f32.mrf.mxu1  ;;  %v11129_v22 = vpop.f32.mrf.mxu0 }
 0x115   : > { %13689 = vst [vmem:[#allocation7_spill] sm:$0xff] %v11126_v26  ;;  %13690 = vst [vmem:[#allocation6_spill] sm:$0xff] %v11129_v22 }
 0x116   : > { %v9320_v54 = vpop.f32.mrf.mxu1  ;;  %9523 = vmatmul.mubr.msk.bf16.gmra.mxu1 %vm917_vm2, %v2827_v21  ;;  %v9286_v18 = vpop.f32.mrf.mxu0  ;;  %9489 = vmatmul.mubr.msk.bf16.gmra.mxu0 %vm917_vm2, %v2835_v48  ;;  %v2864_v21 = vshll.u32 %v10100_v40, 16 }
 0x117   : > { %9526 = vmatprep.mubr.msk.bf16.mxu1 %vm917_vm2, %v2835_v48  ;;  %v11137_v30 = vadd.f32 %v9320_v54, %v9286_v18  ;;  %9492 = vmatprep.mubr.msk.bf16.mxu0 %vm917_vm2, %v2843_v36  ;;  %v3399_v48 = vrot.slane %v3397_v58, 1  ;;  %v3405_v54 = vshll.u32 %v10104_v13, 16 }
 0x118   : > { %v1293_v28 = vpop.f32.mrf.mxu1  ;;  %v1084_v19 = vpop.f32.mrf.mxu0  ;;  %v2866_v4 = vrot.slane %v2864_v21, 1 }
 0x119   : > { %v11142_v25 = vadd.f32 %v1293_v28, %v1084_v19  ;;  %v3401_v28 = vshrl.u32 %v10103_v10, 16  ;;  %v3400_v40 = vsel %vm2735_vm3, %v3395_v14, %v3399_v48  ;;  %v3409_v19 = vshrl.u32 %v10104_v13, 16 }
 0x11a   : > { %v9321_v9 = vpop.f32.mrf.mxu1  ;;  %v9287_v27 = vpop.f32.mrf.mxu0  ;;  %v2867_v62 = vsel %vm2735_vm3, %v2862_v32, %v2866_v4  ;;  %v3407_v60 = vrot.slane %v3405_v54, 1  ;;  %v3417_v32 = vshrl.u32 %v10105_v50, 16  ;;  %v10108_v54 = vld [vmem:[%s10421_s12 + $0x44] sm:$0xff]  }
 0x11b   : > { %v11144_v24 = vadd.f32 %v9321_v9, %v9287_v27  ;;  %v10106_v27 = vld [vmem:[%s10421_s12 + $0x34] sm:$0xff]   ;;  %v3403_v12 = vor.u32 %v3401_v28, %v3399_v48  ;;  %v3429_v48 = vshll.u32 %v10107_v56, 16 }
 0x11c   : > { %v11146_v23 = vpop.f32.mrf.mxu1  ;;  %v11149_v41 = vpop.f32.mrf.mxu0  ;;  %v3411_v21 = vor.u32 %v3409_v19, %v3407_v60  ;;  %v3425_v14 = vshrl.u32 %v10106_v27, 16 }
 0x11d   : > { %13691 = vst [vmem:[#allocation8_spill] sm:$0xff] %v11146_v23  ;;  %13692 = vst [vmem:[#allocation9_spill] sm:$0xff] %v11149_v41  ;;  %v13608_v23 = vmov 0.0  }
 0x11e   : > { %v9324_v42 = vpop.f32.mrf.mxu1  ;;  %9527 = vmatmul.mubr.msk.bf16.gmra.mxu1 %vm917_vm2, %v2843_v36  ;;  %v9290_v1 = vpop.f32.mrf.mxu0  ;;  %9493 = vmatmul.mubr.msk.bf16.gmra.mxu0 %vm917_vm2, %v2851_v33 }
 0x11f   : > { %9530 = vmatprep.mubr.msk.bf16.mxu1 %vm917_vm2, %v2851_v33  ;;  %v11156_v44 = vadd.f32 %v9324_v42, %v9290_v1  ;;  %9496 = vmatprep.mubr.msk.bf16.mxu0 %vm917_vm2, %v2859_v3  ;;  %v3415_v3 = vrot.slane %v3413_v59, 1  ;;  %v3421_v1 = vshll.u32 %v10106_v27, 16  ;;  %v3431_v59 = vrot.slane %v3429_v48, 1 }
 0x120   : > { %v1309_v37 = vpop.f32.mrf.mxu1  ;;  %v1100_v51 = vpop.f32.mrf.mxu0 }
 0x121   : > { %v11160_v2 = vadd.f32 %v1309_v37, %v1100_v51  ;;  %v3408_v37 = vsel %vm2735_vm3, %v3403_v12, %v3407_v60  ;;  %v3416_v51 = vsel %vm2735_vm3, %v3411_v21, %v3415_v3  ;;  %v3419_v50 = vor.u32 %v3417_v32, %v3415_v3 }
 0x122   : > { %v9325_v36 = vpop.f32.mrf.mxu1  ;;  %v9291_v57 = vpop.f32.mrf.mxu0  ;;  %v3433_v21 = vshrl.u32 %v10107_v56, 16 }
 0x123   : > { %v11163_v18 = vadd.f32 %v9325_v36, %v9291_v57 }
 0x124   : > { %v11165_v55 = vpop.f32.mrf.mxu1  ;;  %v11168_v49 = vpop.f32.mrf.mxu0  ;;  %v3435_v48 = vor.u32 %v3433_v21, %v3431_v59 }
 0x125   : > { %13693 = vst [vmem:[#allocation10_spill] sm:$0xff] %v11165_v55  ;;  %13694 = vst [vmem:[#allocation11_spill] sm:$0xff] %v11168_v49 }
 0x126   : > { %v9328_v63 = vpop.f32.mrf.mxu1  ;;  %9531 = vmatmul.mubr.msk.bf16.gmra.mxu1 %vm917_vm2, %v3100_v7  ;;  %v9294_v9 = vpop.f32.mrf.mxu0  ;;  %9497 = vmatmul.mubr.msk.bf16.gmra.mxu0 %vm917_vm2, %v2867_v62  ;;  %v3423_v7 = vrot.slane %v3421_v1, 1 }
 0x127   : > { %v11174_v35 = vadd.f32 %v9328_v63, %v9294_v9  ;;  %9536 = vmatprep.mubr.msk.bf16.mxu0 %vm917_vm2, %v3400_v40  ;;  %v10109_v63 = vld [vmem:[%s10421_s12 + $0x4c] sm:$0xff]  }
 0x128   : > { %v1325_v33 = vpop.f32.mrf.mxu1  ;;  %v1116_v10 = vpop.f32.mrf.mxu0  ;;  %v3427_v19 = vor.u32 %v3425_v14, %v3423_v7 }
 0x129   : > { %v11178_v31 = vadd.f32 %v1325_v33, %v1116_v10  ;;  %v3437_v33 = vshll.u32 %v10108_v54, 16  ;;  %v3424_v10 = vsel %vm2735_vm3, %v3419_v50, %v3423_v7 }
 0x12a   : > { %v9329_v58 = vpop.f32.mrf.mxu1  ;;  %v9295_v42 = vpop.f32.mrf.mxu0 }
 0x12b   : > { %v11180_v45 = vadd.f32 %v9329_v58, %v9295_v42  ;;  %v3432_v58 = vsel %vm2735_vm3, %v3427_v19, %v3431_v59  ;;  %v3441_v42 = vshrl.u32 %v10108_v54, 16 }
 0x12c   : > { %v11182_v13 = vpop.f32.mrf.mxu1  ;;  %v11185_v4 = vpop.f32.mrf.mxu0 }
 0x12d   : > { %13695 = vst [vmem:[#allocation12_spill] sm:$0xff] %v11182_v13  ;;  %13696 = vst [vmem:[#allocation13_spill] sm:$0xff] %v11185_v4 }
 0x12e   : > { %v11188_v36 = vpop.f32.mrf.mxu1  ;;  %v9334_v57 = vpop.f32.mrf.mxu0  ;;  %9537 = vmatmul.mubr.msk.bf16.vlgmr.msra.gmra.mxu0 %vm917_vm2, %v3408_v37 }
 0x12f   : > { %v11193_v62 = vadd.f32 %v9334_v57, %v11054_v17  ;;  %9540 = vmatprep.mubr.msk.bf16.mxu0 %vm917_vm2, %v3416_v51  ;;  %v10110_v51 = vld [vmem:[%s10421_s12 + $0x54] sm:$0xff]  }
 0x130   : > { %v11195_v28 = vpop.f32.mrf.mxu1  ;;  %v1695_v40 = vpop.f32.mrf.mxu0 }
 0x131   : > { %v11200_v9 = vadd.f32 %v1695_v40, %v11058_v6  ;;  %v3445_v6 = vshll.u32 %v10109_v63, 16 }
 0x132   : > { %v11202_v60 = vpop.f32.mrf.mxu1  ;;  %v9335_v27 = vpop.f32.mrf.mxu0 }
 0x133   : > { %v11205_v17 = vadd.f32 %v9335_v27, %v11060_v29  ;;  %v3439_v29 = vrot.slane %v3437_v33, 1  ;;  %v3447_v54 = vrot.slane %v3445_v6, 1  ;;  %v3453_v27 = vshll.u32 %v10110_v51, 16 }
 0x134   : > { %v11207_v12 = vpop.f32.mrf.mxu1  ;;  %v1698_v3 = vpop.f32.mrf.mxu0 }
 0x135   : > { %13697 = vst [vmem:[#allocation14_spill] sm:$0xff] %v11207_v12  ;;  %v11212_v1 = vadd.f32 %v1698_v3, %v11064_v20  ;;  %v3443_v7 = vor.u32 %v3441_v42, %v3439_v29  ;;  %v10111_v20 = vld [vmem:[%s10421_s12 + $0x5c] sm:$0xff]   ;;  %v3440_v59 = vsel %vm2735_vm3, %v3435_v48, %v3439_v29  ;;  %v385_v12 = vlaneseq }
 0x136   : > { %v11214_v37 = vpop.f32.mrf.mxu1  ;;  %v9338_v32 = vpop.f32.mrf.mxu0  ;;  %9541 = vmatmul.mubr.msk.bf16.gmra.mxu0 %vm917_vm2, %v3424_v10  ;;  %v3449_v10 = vshrl.u32 %v10109_v63, 16 }
 0x137   : > { %13698 = vst [vmem:[#allocation15_spill] sm:$0xff] %v11212_v1  ;;  %v11219_v14 = vadd.f32 %v9338_v32, %v11070_v52  ;;  %9544 = vmatprep.mubr.msk.bf16.mxu0 %vm917_vm2, %v3432_v58  ;;  %v3448_v3 = vsel %vm2735_vm3, %v3443_v7, %v3447_v54  ;;  %v3457_v58 = vshrl.u32 %v10110_v51, 16  ;;  %v10114_v1 = vld [vmem:[%s10421_s12 + $0x74] sm:$0xff]  }
 0x138   : > { %v11221_v56 = vpop.f32.mrf.mxu1  ;;  %v1711_v57 = vpop.f32.mrf.mxu0  ;;  %v3451_v29 = vor.u32 %v3449_v10, %v3447_v54 }
 0x139   : > { %v11226_v50 = vadd.f32 %v1711_v57, %v11074_v47  ;;  %v3461_v47 = vshll.u32 %v10111_v20, 16  ;;  %v10112_v57 = vld [vmem:[%s10421_s12 + $0x64] sm:$0xff]  }
 0x13a   : > { %v11228_v40 = vpop.f32.mrf.mxu1  ;;  %v9339_v19 = vpop.f32.mrf.mxu0 }
 0x13b   : > { %v11231_v52 = vadd.f32 %v9339_v19, %v11076_v11  ;;  %v3455_v11 = vrot.slane %v3453_v27, 1  ;;  %v3463_v7 = vrot.slane %v3461_v47, 1  ;;  %v10119_v27 = vld [vmem:[%s13589_s3] sm:$0xff]  }
 0x13c   : > { %v11233_v33 = vpop.f32.mrf.mxu1  ;;  %v1714_v21 = vpop.f32.mrf.mxu0  ;;  %9568 = vmatprep.subr.bf16.mxu1 %v10119_v27 }
 0x13d   : > { %13699 = vst [vmem:[#allocation16_spill] sm:$0xff] %v11233_v33  ;;  %v11238_v42 = vadd.f32 %v1714_v21, %v11080_v61  ;;  %v3459_v48 = vor.u32 %v3457_v58, %v3455_v11  ;;  %v10113_v61 = vld [vmem:[%s10421_s12 + $0x6c] sm:$0xff]   ;;  %v3465_v58 = vshrl.u32 %v10111_v20, 16  ;;  %9569 = vmatpush3.bf16.msra.mxu1 %v10119_v27 }
 0x13e   : > { %v11240_v6 = vpop.f32.mrf.mxu1  ;;  %v9342_v32 = vpop.f32.mrf.mxu0  ;;  %9545 = vmatmul.mubr.msk.bf16.gmra.mxu0 %vm917_vm2, %v3440_v59  ;;  %v3469_v59 = vshll.u32 %v10112_v57, 16 }
 0x13f   : > { %13700 = vst [vmem:[#allocation17_spill] sm:$0xff] %v11238_v42  ;;  %v11245_v19 = vadd.f32 %v9342_v32, %v11086_v38  ;;  %9548 = vmatprep.mubr.msk.bf16.mxu0 %vm917_vm2, %v3448_v3  ;;  %v3456_v3 = vsel %vm2735_vm3, %v3451_v29, %v3455_v11  ;;  %v3464_v47 = vsel %vm2735_vm3, %v3459_v48, %v3463_v7  ;;  %v3473_v32 = vshrl.u32 %v10112_v57, 16 }
 0x140   : > { %v11247_v63 = vpop.f32.mrf.mxu1  ;;  %v1727_v51 = vpop.f32.mrf.mxu0  ;;  %v3467_v29 = vor.u32 %v3465_v58, %v3463_v7  ;;  %v3481_v58 = vshrl.u32 %v10113_v61, 16 }
 0x141   : > { %v11252_v21 = vadd.f32 %v1727_v51, %v11090_v0  ;;  %v3477_v51 = vshll.u32 %v10113_v61, 16 }
 0x142   : > { %v11254_v13 = vpop.f32.mrf.mxu1  ;;  %v9343_v38 = vpop.f32.mrf.mxu0 }
 0x143   : > { %v11260_v54 = vadd.f32 %v9343_v38, %v11092_v43  ;;  %v3471_v38 = vrot.slane %v3469_v59, 1  ;;  %v3479_v27 = vrot.slane %v3477_v51, 1  ;;  %v3489_v51 = vshrl.u32 %v10114_v1, 16 }
 0x144   : > { %v11262_v10 = vpop.f32.mrf.mxu1  ;;  %v1730_v0 = vpop.f32.mrf.mxu0 }
 0x145   : > { %13701 = vst [vmem:[#allocation18_spill] sm:$0xff] %v11262_v10  ;;  %v11267_v4 = vadd.f32 %v1730_v0, %v11096_v15  ;;  %v3475_v48 = vor.u32 %v3473_v32, %v3471_v38  ;;  %v10115_v15 = vld [vmem:[%s10421_s12 + $0x7c] sm:$0xff]   ;;  %v3472_v7 = vsel %vm2735_vm3, %v3467_v29, %v3471_v38  ;;  %v3483_v38 = vor.u32 %v3481_v58, %v3479_v27 }
 0x146   : > { %v11269_v42 = vpop.f32.mrf.mxu1  ;;  %v9346_v43 = vpop.f32.mrf.mxu0  ;;  %9549 = vmatmul.mubr.msk.bf16.gmra.mxu0 %vm917_vm2, %v3456_v3  ;;  %v3485_v3 = vshll.u32 %v10114_v1, 16 }
 0x147   : > { %13702 = vst [vmem:[#allocation19_spill] sm:$0xff] %v11267_v4  ;;  %v11274_v20 = vadd.f32 %v9346_v43, %v11102_v16  ;;  %9552 = vmatprep.mubr.msk.bf16.mxu0 %vm917_vm2, %v3464_v47  ;;  %v3480_v32 = vsel %vm2735_vm3, %v3475_v48, %v3479_v27  ;;  %v3497_v27 = vshrl.u32 %v10115_v15, 16 }
 0x148   : > { %v11276_v11 = vpop.f32.mrf.mxu1  ;;  %v1743_v57 = vpop.f32.mrf.mxu0 }
 0x149   : > { %v11281_v0 = vadd.f32 %v1743_v57, %v11106_v34  ;;  %v3493_v34 = vshll.u32 %v10115_v15, 16  ;;  %v10118_v15 = vld [vmem:[%s10421_s12 + $0x94] ss:$0 sps:$4 sm:$0x11]  }
 0x14a   : > { %v11283_v4 = vpop.f32.mrf.mxu1  ;;  %v9347_v59 = vpop.f32.mrf.mxu0 }
 0x14b   : > { %v11286_v16 = vadd.f32 %v9347_v59, %v11108_v46  ;;  %v3487_v46 = vrot.slane %v3485_v3, 1  ;;  %v10116_v59 = vld [vmem:[%s10421_s12 + $0x84] sm:$0xff]   ;;  %v3495_v48 = vrot.slane %v3493_v34, 1 }
 0x14c   : > { %v11288_v43 = vpop.f32.mrf.mxu1  ;;  %v1746_v47 = vpop.f32.mrf.mxu0  ;;  %v3501_v3 = vshll.u32 %v10116_v59, 16 }
 0x14d   : > { %13703 = vst [vmem:[#allocation20_spill] sm:$0xff] %v11288_v43  ;;  %v11293_v57 = vadd.f32 %v1746_v47, %v11112_v8  ;;  %v3491_v29 = vor.u32 %v3489_v51, %v3487_v46  ;;  %v10117_v8 = vld [vmem:[%s10421_s12 + $0x8c] sm:$0xff]   ;;  %v3505_v51 = vshrl.u32 %v10116_v59, 16 }
 0x14e   : > { %v11295_v10 = vpop.f32.mrf.mxu1  ;;  %v9350_v33 = vpop.f32.mrf.mxu0  ;;  %9553 = vmatmul.mubr.msk.bf16.gmra.mxu0 %vm917_vm2, %v3472_v7  ;;  %v3503_v49 = vrot.slane %v3501_v3, 1 }
 0x14f   : > { %13704 = vst [vmem:[#allocation21_spill] sm:$0xff] %v11293_v57  ;;  %v11300_v43 = vadd.f32 %v9350_v33, %v11118_v53  ;;  %9556 = vmatprep.mubr.msk.bf16.mxu0 %vm917_vm2, %v3480_v32  ;;  %v3488_v33 = vsel %vm2735_vm3, %v3483_v38, %v3487_v46  ;;  %v3496_v32 = vsel %vm2735_vm3, %v3491_v29, %v3495_v48 }
 0x150   : > { %v11302_v61 = vpop.f32.mrf.mxu1  ;;  %v1759_v1 = vpop.f32.mrf.mxu0  ;;  %v3507_v38 = vor.u32 %v3505_v51, %v3503_v49 }
 0x151   : > { %v11307_v47 = vadd.f32 %v1759_v1, %v11122_v5  ;;  %v3509_v5 = vshll.u32 %v10117_v8, 16 }
 0x152   : > { %v11309_v57 = vpop.f32.mrf.mxu1  ;;  %v9351_v7 = vpop.f32.mrf.mxu0 }
 0x153   : > { %v11312_v55 = vadd.f32 %v9351_v7, %v11124_v39  ;;  %v3511_v29 = vrot.slane %v3509_v5, 1 }
 0x154   : > { %v11314_v53 = vpop.f32.mrf.mxu1  ;;  %v11317_v58 = vpop.f32.mrf.mxu0 }
 0x155   : > { %13705 = vst [vmem:[#allocation22_spill] sm:$0xff] %v11314_v53  ;;  %13706 = vst [vmem:[#allocation23_spill] sm:$0xff] %v11317_v58  ;;  %v3499_v53 = vor.u32 %v3497_v27, %v3495_v48  ;;  %v3513_v27 = vshrl.u32 %v10117_v8, 16  ;;  %v3512_v51 = vsel %vm2735_vm3, %v3507_v38, %v3511_v29 }
 0x156   : > { %v11320_v34 = vpop.f32.mrf.mxu1  ;;  %v9354_v1 = vpop.f32.mrf.mxu0  ;;  %9557 = vmatmul.mubr.msk.bf16.gmra.mxu0 %vm917_vm2, %v3488_v33 }
 0x157   : > { %v11324_v39 = vadd.f32 %v9354_v1, %v11137_v30  ;;  %9560 = vmatprep.mubr.msk.bf16.mxu0 %vm917_vm2, %v3496_v32  ;;  %v3504_v48 = vsel %vm2735_vm3, %v3499_v53, %v3503_v49  ;;  %v3517_v32 = vshll.u32 %v10118_v15, 16 }
 0x158   : > { %v11326_v7 = vpop.f32.mrf.mxu1  ;;  %v1775_v46 = vpop.f32.mrf.mxu0 }
 0x159   : > { %v11331_v59 = vadd.f32 %v1775_v46, %v11142_v25  ;;  %v11347_v46 = vshrl.u32 %v385_v12, 7  ;;  %v3519_v49 = vrot.slane %v3517_v32, 1 }
 0x15a   : > { %v11333_v58 = vpop.f32.mrf.mxu1  ;;  %v9355_v33 = vpop.f32.mrf.mxu0 }
 0x15b   : > { %v11336_v3 = vadd.f32 %v9355_v33, %v11144_v24 }
 0x15c   : > { %v11338_v30 = vpop.f32.mrf.mxu1  ;;  %v11341_v1 = vpop.f32.mrf.mxu0 }
 0x15d   : > { %13707 = vst [vmem:[#allocation24_spill] sm:$0xff] %v11338_v30  ;;  %13708 = vst [vmem:[#allocation25_spill] sm:$0xff] %v11341_v1  ;;  %v3515_v30 = vor.u32 %v3513_v27, %v3511_v29 }
 0x15e   : > { %v11344_v5 = vpop.f32.mrf.mxu1  ;;  %v9358_v25 = vpop.f32.mrf.mxu0  ;;  %9561 = vmatmul.mubr.msk.bf16.gmra.mxu0 %vm917_vm2, %v3504_v48  ;;  %v388_v48 = vadd.s32 16, %v11347_v46 }
 0x15f   : > { %v11350_v24 = vadd.f32 %v9358_v25, %v11156_v44  ;;  %9564 = vmatprep.mubr.msk.bf16.mxu0 %vm917_vm2, %v3512_v51  ;;  %v3520_v25 = vsel %vm2735_vm3, %v3515_v30, %v3519_v49  ;;  %v392_v49 = vadd.s32 48, %v11347_v46 }
 0x160   : > { %v11352_v33 = vpop.f32.mrf.mxu1  ;;  %v1791_v8 = vpop.f32.mrf.mxu0 }
 0x161   : > { %v11356_v53 = vadd.f32 %v1791_v8, %v11160_v2  ;;  %v420_v2 = vand.u32 15, %v388_v48 }
 0x162   : > { %v11358_v15 = vpop.f32.mrf.mxu1  ;;  %v9359_v38 = vpop.f32.mrf.mxu0 }
 0x163   : > { %v11362_v12 = vadd.f32 %v9359_v38, %v11163_v18  ;;  %v418_v18 = vand.u32 15, %v11347_v46  ;;  %vm452_vm4 = vcmp.gt.s32.totalorder %v420_v2, 0 }
 0x164   : > { %v11364_v44 = vpop.f32.mrf.mxu1  ;;  %v11367_v29 = vpop.f32.mrf.mxu0 }
 0x165   : > { %13709 = vst [vmem:[#allocation26_spill] sm:$0xff] %v11364_v44  ;;  %13710 = vst [vmem:[#allocation27_spill] sm:$0xff] %v11367_v29  ;;  %vm450_vm5 = vcmp.gt.s32.totalorder %v418_v18, 0 }
 0x166   : > { %v11369_v27 = vpop.f32.mrf.mxu1  ;;  %v9362_v32 = vpop.f32.mrf.mxu0  ;;  %9565 = vmatmul.mubr.msk.bf16.gmra.mxu0 %vm917_vm2, %v3520_v25 }
 0x167   : > { %v11373_v51 = vadd.f32 %v9362_v32, %v11174_v35  ;;  %v390_v32 = vadd.s32 32, %v11347_v46 }
 0x168   : > { %v11375_v8 = vpop.f32.mrf.mxu1  ;;  %v1807_v1 = vpop.f32.mrf.mxu0 }
 0x169   : > { %13711 = vst [vmem:[#allocation28_spill] sm:$0xff] %v11375_v8  ;;  %v11379_v38 = vadd.f32 %v1807_v1, %v11178_v31  ;;  %v11393_v31 = vsel %vm452_vm4, 1.0, %v13608_v23  ;;  %v424_v1 = vand.u32 15, %v392_v49  ;;  %v422_v18 = vand.u32 15, %v390_v32 }
 0x16a   : > { %v11381_v30 = vpop.f32.mrf.mxu1  ;;  %v9363_v44 = vpop.f32.mrf.mxu0  ;;  %13717 = vst [vmem:[#allocation34_spill] sm:$0xff] %v11393_v31 }
 0x16b   : > { %13712 = vst [vmem:[#allocation29_spill] sm:$0xff] %v11379_v38  ;;  %13713 = vst [vmem:[#allocation30_spill] sm:$0xff] %v11381_v30  ;;  %v11385_v25 = vadd.f32 %v9363_v44, %v11180_v45  ;;  %v11397_v45 = vsel %vm450_vm5, 1.0, %v13608_v23  ;;  %vm456_vm6 = vcmp.gt.s32.totalorder %v424_v1, 0  ;;  %v396_v30 = vadd.s32 80, %v11347_v46 }
 0x16c   : > { %v11387_v48 = vpop.f32.mrf.mxu1  ;;  %v11389_v35 = vpop.f32.mrf.mxu0  ;;  %13718 = vst [vmem:[#allocation35_spill] sm:$0xff] %v11397_v45  ;;  %vm454_vm7 = vcmp.gt.s32.totalorder %v422_v18, 0  ;;  %v13719_v1 = vmov 0.0  }
 0x16d   : > { %13714 = vst [vmem:[#allocation31_spill] sm:$0xff] %v11385_v25  ;;  %13715 = vst [vmem:[#allocation32_spill] sm:$0xff] %v11387_v48 }
 0x16e   : > { %13716 = vst [vmem:[#allocation33_spill] sm:$0xff] %v11389_v35  ;;  %v9436_v29 = vpop.f32.mrf.mxu1  ;;  %v9402_v41 = vpop.f32.mrf.mxu0  ;;  %v1856_v35 = vmul.f32 %v11393_v31, %v11193_v62 }
 0x16f   : > { %v2200_v26 = vadd.f32 %v9402_v41, %v11188_v36  ;;  %v1854_v41 = vmul.f32 %v11397_v45, %v11200_v9  ;;  %v428_v9 = vand.u32 15, %v396_v30  ;;  %v400_v30 = vadd.s32 112, %v11347_v46 }
 0x170   : > { %v2421_v2 = vpop.f32.mrf.mxu1  ;;  %v2191_v44 = vpop.f32.mrf.mxu0 }
 0x171   : > { %v2550_v48 = vadd.f32 %v9436_v29, %v2200_v26  ;;  %v2192_v22 = vadd.f32 %v2191_v44, %v11195_v28  ;;  %v394_v26 = vadd.s32 64, %v11347_v46  ;;  %v11416_v44 = vsel %vm456_vm6, 1.0, %v13719_v1 }
 0x172   : > { %v9437_v25 = vpop.f32.mrf.mxu1  ;;  %v9403_v49 = vpop.f32.mrf.mxu0  ;;  %13720 = vst [vmem:[#allocation36_spill] sm:$0xff] %v11416_v44  ;;  %vm460_vm8 = vcmp.gt.s32.totalorder %v428_v9, 0  ;;  %vm4695_vm6 = vcmask 1043456  }
 0x173   : > { %v11405_v36 = vadd.f32 %v2550_v48, %v1856_v35  ;;  %v2548_v23 = vadd.f32 %v2421_v2, %v2192_v22  ;;  %v2203_v38 = vadd.f32 %v9403_v49, %v11202_v60  ;;  %v11423_v2 = vsel %vm454_vm7, 1.0, %v13719_v1 }
 0x174   : > { %v11408_v8 = vpop.f32.mrf.mxu1  ;;  %v11410_v62 = vpop.f32.mrf.mxu0  ;;  %13721 = vst [vmem:[#allocation37_spill] sm:$0xff] %v11423_v2 }
 0x175   : > { %v11413_v28 = vadd.f32 %v2548_v23, %v1854_v41  ;;  %v2551_v29 = vadd.f32 %v9437_v25, %v2203_v38  ;;  %v1860_v23 = vmul.f32 %v11416_v44, %v11219_v14  ;;  %v426_v38 = vand.u32 15, %v394_v26 }
 0x176   : > { %v9440_v32 = vpop.f32.mrf.mxu1  ;;  %v9406_v48 = vpop.f32.mrf.mxu0 }
 0x177   : > { %v11419_v22 = vadd.f32 %v2551_v29, %v11205_v17  ;;  %v2216_v60 = vadd.f32 %v9406_v48, %v11214_v37  ;;  %v1858_v37 = vmul.f32 %v11423_v2, %v11226_v50  ;;  %vm458_vm9 = vcmp.gt.s32.totalorder %v426_v38, 0 }
 0x178   : > { %v2437_v35 = vpop.f32.mrf.mxu1  ;;  %v2207_v18 = vpop.f32.mrf.mxu0  ;;  %v432_v50 = vand.u32 15, %v400_v30  ;;  %v404_v30 = vadd.s32 144, %v11347_v46 }
 0x179   : > { %v2554_v25 = vadd.f32 %v9440_v32, %v2216_v60  ;;  %v2208_v49 = vadd.f32 %v2207_v18, %v11221_v56  ;;  %v398_v56 = vadd.s32 96, %v11347_v46  ;;  %v11442_v60 = vsel %vm460_vm8, 1.0, %v13719_v1 }
 0x17a   : > { %v9441_v41 = vpop.f32.mrf.mxu1  ;;  %v9407_v17 = vpop.f32.mrf.mxu0  ;;  %13722 = vst [vmem:[#allocation38_spill] sm:$0xff] %v11442_v60  ;;  %vm464_vm10 = vcmp.gt.s32.totalorder %v432_v50, 0 }
 0x17b   : > { %v11431_v29 = vadd.f32 %v2554_v25, %v1860_v23  ;;  %v2552_v48 = vadd.f32 %v2437_v35, %v2208_v49  ;;  %v2219_v45 = vadd.f32 %v9407_v17, %v11228_v40  ;;  %v11449_v25 = vsel %vm458_vm9, 1.0, %v13719_v1 }
 0x17c   : > { %v11434_v31 = vpop.f32.mrf.mxu1  ;;  %v11436_v14 = vpop.f32.mrf.mxu0  ;;  %13723 = vst [vmem:[#allocation39_spill] sm:$0xff] %v11449_v25  ;;  %v1864_v49 = vmul.f32 %v11442_v60, %v11245_v19 }
 0x17d   : > { %v11439_v26 = vadd.f32 %v2552_v48, %v1858_v37  ;;  %v2555_v32 = vadd.f32 %v9441_v41, %v2219_v45  ;;  %v430_v45 = vand.u32 15, %v398_v56 }
 0x17e   : > { %v9444_v9 = vpop.f32.mrf.mxu1  ;;  %v9410_v18 = vpop.f32.mrf.mxu0 }
 0x17f   : > { %v11445_v35 = vadd.f32 %v2555_v32, %v11231_v52  ;;  %v2232_v40 = vadd.f32 %v9410_v18, %v11240_v6  ;;  %v1862_v6 = vmul.f32 %v11449_v25, %v11252_v21  ;;  %vm462_vm11 = vcmp.gt.s32.totalorder %v430_v45, 0 }
 0x180   : > { %v2453_v23 = vpop.f32.mrf.mxu1  ;;  %v2223_v38 = vpop.f32.mrf.mxu0  ;;  %v436_v21 = vand.u32 15, %v404_v30  ;;  %v408_v30 = vadd.s32 176, %v11347_v46 }
 0x181   : > { %v2558_v41 = vadd.f32 %v9444_v9, %v2232_v40  ;;  %v2224_v17 = vadd.f32 %v2223_v38, %v11247_v63  ;;  %v402_v63 = vadd.s32 128, %v11347_v46  ;;  %v11468_v40 = vsel %vm464_vm10, 1.0, %v13719_v1 }
 0x182   : > { %v9445_v37 = vpop.f32.mrf.mxu1  ;;  %v9411_v52 = vpop.f32.mrf.mxu0  ;;  %13724 = vst [vmem:[#allocation40_spill] sm:$0xff] %v11468_v40  ;;  %vm468_vm12 = vcmp.gt.s32.totalorder %v436_v21, 0 }
 0x183   : > { %v11457_v48 = vadd.f32 %v2558_v41, %v1864_v49  ;;  %v2556_v32 = vadd.f32 %v2453_v23, %v2224_v17  ;;  %v2235_v18 = vadd.f32 %v9411_v52, %v11254_v13  ;;  %v11475_v41 = vsel %vm462_vm11, 1.0, %v13719_v1 }
 0x184   : > { %v11460_v2 = vpop.f32.mrf.mxu1  ;;  %v11462_v19 = vpop.f32.mrf.mxu0  ;;  %13726 = vst [vmem:[#allocation42_spill] sm:$0xff] %v11475_v41  ;;  %v1868_v17 = vmul.f32 %v11468_v40, %v11274_v20 }
 0x185   : > { %v11465_v56 = vadd.f32 %v2556_v32, %v1862_v6  ;;  %v2559_v9 = vadd.f32 %v9445_v37, %v2235_v18  ;;  %v434_v37 = vand.u32 15, %v402_v63 }
 0x186   : > { %v9448_v50 = vpop.f32.mrf.mxu1  ;;  %v9414_v38 = vpop.f32.mrf.mxu0 }
 0x187   : > { %v11471_v23 = vadd.f32 %v2559_v9, %v11260_v54  ;;  %v2248_v13 = vadd.f32 %v9414_v38, %v11269_v42  ;;  %v1866_v42 = vmul.f32 %v11475_v41, %v11281_v0  ;;  %vm466_vm13 = vcmp.gt.s32.totalorder %v434_v37, 0 }
 0x188   : > { %v2469_v49 = vpop.f32.mrf.mxu1  ;;  %v2239_v45 = vpop.f32.mrf.mxu0  ;;  %v440_v0 = vand.u32 15, %v408_v30  ;;  %v412_v30 = vadd.s32 208, %v11347_v46 }
 0x189   : > { %13725 = vst [vmem:[#allocation41_spill] sm:$0xff] %v11471_v23  ;;  %v2562_v52 = vadd.f32 %v9448_v50, %v2248_v13  ;;  %v2240_v6 = vadd.f32 %v2239_v45, %v11276_v11  ;;  %v406_v11 = vadd.s32 160, %v11347_v46  ;;  %v11494_v13 = vsel %vm468_vm12, 1.0, %v13719_v1 }
 0x18a   : > { %v9449_v32 = vpop.f32.mrf.mxu1  ;;  %v9415_v54 = vpop.f32.mrf.mxu0  ;;  %13729 = vst [vmem:[#allocation45_spill] sm:$0xff] %v11494_v13  ;;  %vm472_vm14 = vcmp.gt.s32.totalorder %v440_v0, 0  ;;  %vm3931_vm12 = vcmask 130048  }
 0x18b   : > { %v11483_v18 = vadd.f32 %v2562_v52, %v1868_v17  ;;  %v2560_v9 = vadd.f32 %v2469_v49, %v2240_v6  ;;  %v2251_v38 = vadd.f32 %v9415_v54, %v11283_v4  ;;  %v11501_v52 = vsel %vm466_vm13, 1.0, %v13719_v1 }
 0x18c   : > { %v11486_v25 = vpop.f32.mrf.mxu1  ;;  %v11488_v20 = vpop.f32.mrf.mxu0  ;;  %13731 = vst [vmem:[#allocation47_spill] sm:$0xff] %v11501_v52  ;;  %v1872_v6 = vmul.f32 %v11494_v13, %v11300_v43 }
 0x18d   : > { %13727 = vst [vmem:[#allocation43_spill] sm:$0xff] %v11483_v18  ;;  %v11491_v63 = vadd.f32 %v2560_v9, %v1866_v42  ;;  %v2563_v50 = vadd.f32 %v9449_v32, %v2251_v38  ;;  %v438_v32 = vand.u32 15, %v406_v11 }
 0x18e   : > { %v9452_v21 = vpop.f32.mrf.mxu1  ;;  %v9418_v45 = vpop.f32.mrf.mxu0 }
 0x18f   : > { %13728 = vst [vmem:[#allocation44_spill] sm:$0xff] %v11491_v63  ;;  %v11497_v49 = vadd.f32 %v2563_v50, %v11286_v16  ;;  %v2264_v4 = vadd.f32 %v9418_v45, %v11295_v10  ;;  %v1870_v10 = vmul.f32 %v11501_v52, %v11307_v47  ;;  %vm470_vm15 = vcmp.gt.s32.totalorder %v438_v32, 0 }
 0x190   : > { %v2485_v17 = vpop.f32.mrf.mxu1  ;;  %v2255_v37 = vpop.f32.mrf.mxu0  ;;  %v444_v47 = vand.u32 15, %v412_v30  ;;  %v416_v30 = vadd.s32 240, %v11347_v46 }
 0x191   : > { %13730 = vst [vmem:[#allocation46_spill] sm:$0xff] %v11497_v49  ;;  %v2566_v54 = vadd.f32 %v9452_v21, %v2264_v4  ;;  %v2256_v42 = vadd.f32 %v2255_v37, %v11302_v61  ;;  %v410_v61 = vadd.s32 192, %v11347_v46  ;;  %v11520_v4 = vsel %vm472_vm14, 1.0, %v13719_v1 }
 0x192   : > { %v9453_v9 = vpop.f32.mrf.mxu1  ;;  %v9419_v16 = vpop.f32.mrf.mxu0  ;;  %13735 = vst [vmem:[#allocation51_spill] sm:$0xff] %v11520_v4  ;;  %vm476_vm0 = vcmp.gt.s32.totalorder %v444_v47, 0 }
 0x193   : > { %v11509_v38 = vadd.f32 %v2566_v54, %v1872_v6  ;;  %v2564_v50 = vadd.f32 %v2485_v17, %v2256_v42  ;;  %v2267_v45 = vadd.f32 %v9419_v16, %v11309_v57  ;;  %v11527_v54 = vsel %vm470_vm15, 1.0, %v13719_v1 }
 0x194   : > { %v11512_v41 = vpop.f32.mrf.mxu1  ;;  %v11514_v43 = vpop.f32.mrf.mxu0  ;;  %13737 = vst [vmem:[#allocation53_spill] sm:$0xff] %v11527_v54  ;;  %v1876_v42 = vmul.f32 %v11520_v4, %v11324_v39 }
 0x195   : > { %13732 = vst [vmem:[#allocation48_spill] sm:$0xff] %v11509_v38  ;;  %13733 = vst [vmem:[#allocation49_spill] sm:$0xff] %v11512_v41  ;;  %v11517_v11 = vadd.f32 %v2564_v50, %v1870_v10  ;;  %v2567_v21 = vadd.f32 %v9453_v9, %v2267_v45  ;;  %v442_v9 = vand.u32 15, %v410_v61 }
 0x196   : > { %v9456_v0 = vpop.f32.mrf.mxu1  ;;  %v9422_v37 = vpop.f32.mrf.mxu0 }
 0x197   : > { %13734 = vst [vmem:[#allocation50_spill] sm:$0xff] %v11517_v11  ;;  %v11523_v17 = vadd.f32 %v2567_v21, %v11312_v55  ;;  %v2280_v57 = vadd.f32 %v9422_v37, %v11320_v34  ;;  %v1874_v34 = vmul.f32 %v11527_v54, %v11331_v59  ;;  %vm474_vm2 = vcmp.gt.s32.totalorder %v442_v9, 0 }
 0x198   : > { %v2501_v6 = vpop.f32.mrf.mxu1  ;;  %v2271_v32 = vpop.f32.mrf.mxu0  ;;  %v448_v59 = vand.u32 15, %v416_v30 }
 0x199   : > { %13736 = vst [vmem:[#allocation52_spill] sm:$0xff] %v11523_v17  ;;  %v2570_v16 = vadd.f32 %v9456_v0, %v2280_v57  ;;  %v2272_v10 = vadd.f32 %v2271_v32, %v11326_v7  ;;  %v414_v7 = vadd.s32 224, %v11347_v46  ;;  %v11546_v57 = vsel %vm476_vm0, 1.0, %v13719_v1 }
 0x19a   : > { %v9457_v50 = vpop.f32.mrf.mxu1  ;;  %v9423_v55 = vpop.f32.mrf.mxu0  ;;  %13742 = vst [vmem:[#allocation58_spill] sm:$0xff] %v11546_v57  ;;  %vm480_vm4 = vcmp.gt.s32.totalorder %v448_v59, 0 }
 0x19b   : > { %v11535_v45 = vadd.f32 %v2570_v16, %v1876_v42  ;;  %v2568_v21 = vadd.f32 %v2501_v6, %v2272_v10  ;;  %v2283_v37 = vadd.f32 %v9423_v55, %v11333_v58  ;;  %v11553_v16 = vsel %vm474_vm2, 1.0, %v13719_v1 }
 0x19c   : > { %v11538_v52 = vpop.f32.mrf.mxu1  ;;  %v11540_v39 = vpop.f32.mrf.mxu0  ;;  %13744 = vst [vmem:[#allocation60_spill] sm:$0xff] %v11553_v16  ;;  %v1880_v10 = vmul.f32 %v11546_v57, %v11350_v24 }
 0x19d   : > { %13738 = vst [vmem:[#allocation54_spill] sm:$0xff] %v11535_v45  ;;  %13739 = vst [vmem:[#allocation55_spill] sm:$0xff] %v11538_v52  ;;  %v11543_v61 = vadd.f32 %v2568_v21, %v1874_v34  ;;  %v2571_v0 = vadd.f32 %v9457_v50, %v2283_v37  ;;  %v446_v50 = vand.u32 15, %v414_v7 }
 0x19e   : > { %13740 = vst [vmem:[#allocation56_spill] sm:$0xff] %v11540_v39  ;;  %v9460_v47 = vpop.f32.mrf.mxu1  ;;  %v9426_v32 = vpop.f32.mrf.mxu0 }
 0x19f   : > { %13741 = vst [vmem:[#allocation57_spill] sm:$0xff] %v11543_v61  ;;  %v11549_v6 = vadd.f32 %v2571_v0, %v11336_v3  ;;  %v2296_v58 = vadd.f32 %v9426_v32, %v11344_v5  ;;  %v1878_v3 = vmul.f32 %v11553_v16, %v11356_v53  ;;  %vm478_vm5 = vcmp.gt.s32.totalorder %v446_v50, 0 }
 0x1a0   : > { %v2517_v42 = vpop.f32.mrf.mxu1  ;;  %v2287_v9 = vpop.f32.mrf.mxu0 }
 0x1a1   : > { %13743 = vst [vmem:[#allocation59_spill] sm:$0xff] %v11549_v6  ;;  %v2574_v55 = vadd.f32 %v9460_v47, %v2296_v58  ;;  %v2288_v34 = vadd.f32 %v2287_v9, %v11352_v33  ;;  %v11570_v47 = vsel %vm480_vm4, 1.0, %v13719_v1 }
 0x1a2   : > { %v9461_v21 = vpop.f32.mrf.mxu1  ;;  %v9427_v30 = vpop.f32.mrf.mxu0  ;;  %13749 = vst [vmem:[#allocation65_spill] sm:$0xff] %v11570_v47 }
 0x1a3   : > { %v11560_v37 = vadd.f32 %v2574_v55, %v1880_v10  ;;  %v2572_v5 = vadd.f32 %v2517_v42, %v2288_v34  ;;  %v2299_v0 = vadd.f32 %v9427_v30, %v11358_v15  ;;  %v11577_v15 = vsel %vm478_vm5, 1.0, %v13719_v1  ;;  %v13752_v55 = vld [vmem:[#allocation28_spill] sm:$0xff] }
 0x1a4   : > { %v11563_v32 = vpop.f32.mrf.mxu1  ;;  %v11565_v54 = vpop.f32.mrf.mxu0  ;;  %13751 = vst [vmem:[#allocation67_spill] sm:$0xff] %v11577_v15  ;;  %v1884_v10 = vmul.f32 %v11570_v47, %v11373_v51 }
 0x1a5   : > { %13745 = vst [vmem:[#allocation61_spill] sm:$0xff] %v11560_v37  ;;  %13746 = vst [vmem:[#allocation62_spill] sm:$0xff] %v11563_v32  ;;  %v11567_v24 = vadd.f32 %v2572_v5, %v1878_v3  ;;  %v2575_v7 = vadd.f32 %v9461_v21, %v2299_v0  ;;  %v13753_v3 = vld [vmem:[#allocation29_spill] sm:$0xff] }
 0x1a6   : > { %13747 = vst [vmem:[#allocation63_spill] sm:$0xff] %v11565_v54  ;;  %v9464_v33 = vpop.f32.mrf.mxu1  ;;  %v9430_v59 = vpop.f32.mrf.mxu0  ;;  %v1882_v5 = vmul.f32 %v11577_v15, %v13753_v3 }
 0x1a7   : > { %13748 = vst [vmem:[#allocation64_spill] sm:$0xff] %v11567_v24  ;;  %v11573_v53 = vadd.f32 %v2575_v7, %v11362_v12  ;;  %v2312_v58 = vadd.f32 %v9430_v59, %v11369_v27  ;;  %v13755_v27 = vld [vmem:[#allocation30_spill] sm:$0xff] }
 0x1a8   : > { %v2533_v42 = vpop.f32.mrf.mxu1  ;;  %v2303_v9 = vpop.f32.mrf.mxu0 }
 0x1a9   : > { %13750 = vst [vmem:[#allocation66_spill] sm:$0xff] %v11573_v53  ;;  %v2578_v50 = vadd.f32 %v9464_v33, %v2312_v58  ;;  %v2304_v34 = vadd.f32 %v2303_v9, %v13752_v55  ;;  %v13759_v9 = vld [vmem:[#allocation31_spill] sm:$0xff] }
 0x1aa   : > { %v9465_v21 = vpop.f32.mrf.mxu1  ;;  %v9431_v30 = vpop.f32.mrf.mxu0 }
 0x1ab   : > { %v11584_v12 = vadd.f32 %v2578_v50, %v1884_v10  ;;  %v2576_v0 = vadd.f32 %v2533_v42, %v2304_v34  ;;  %v2315_v7 = vadd.f32 %v9431_v30, %v13755_v27  ;;  %v8605_v27 = vld [vmem:[%s13591_s5 + $0xc] sm:$0xf] }
 0x1ac   : > { %v11587_v59 = vpop.f32.mrf.mxu1  ;;  %v11589_v16 = vpop.f32.mrf.mxu0  ;;  %9959 = vmatprep.subr.msk.bf16.mxu0 %vm4695_vm6, %v8605_v27 }
 0x1ad   : > { %13754 = vst [vmem:[#allocation28_spill] sm:$0xff] %v11584_v12  ;;  %13756 = vst [vmem:[#allocation29_spill] sm:$0xff] %v11587_v59  ;;  %v11591_v57 = vadd.f32 %v2576_v0, %v1882_v5  ;;  %v2579_v51 = vadd.f32 %v9465_v21, %v2315_v7 }
 0x1ae   : > { %13757 = vst [vmem:[#allocation30_spill] sm:$0xff] %v11589_v16  ;;  %v11593_v33 = vpop.f32.mrf.mxu1  ;;  %v11595_v58 = vpop.f32.mrf.mxu0 }
 0x1af   : > { %13758 = vst [vmem:[#allocation68_spill] sm:$0xff] %v11591_v57  ;;  %v11598_v55 = vadd.f32 %v2579_v51, %v13759_v9  ;;  %v4697_v51 = vsel %vm4695_vm6, %v8605_v27, 0 }
 0x1b0   : > { %v11600_v3 = vpop.f32.mrf.mxu0  ;;  %v11602_v10 = vpop.f32.mrf.mxu1  ;;  %9603 = vmatpush3.bf16.msra.mxu0 %v4697_v51 }
 0x1b1   : > { %13760 = vst [vmem:[#allocation31_spill] sm:$0xff] %v11598_v55 }
 0x1b2   : > { %v11604_v42 = vpop.f32.mrf.mxu0  ;;  %v11608_v34 = vpop.f32.mrf.mxu1 }
 0x1b4   : > { %v11606_v50 = vpop.f32.mrf.mxu0  ;;  %v11614_v5 = vpop.f32.mrf.mxu1 }
 0x1b6   : > { %v11610_v30 = vpop.f32.mrf.mxu0  ;;  %v11625_v9 = vpop.f32.mrf.mxu1 }
 0x1b8   : > { %v11612_v21 = vpop.f32.mrf.mxu0  ;;  %v11631_v4 = vpop.f32.mrf.mxu1 }
 0x1ba   : > { %v11616_v0 = vpop.f32.mrf.mxu0  ;;  %v11637_v60 = vpop.f32.mrf.mxu1 }
 0x1bc   : > { %v11621_v7 = vpop.f32.mrf.mxu0  ;;  %v11643_v27 = vpop.f32.mrf.mxu1 }
 0x1be   : > { %v11627_v15 = vpop.f32.mrf.mxu0  ;;  %v11649_v57 = vpop.f32.mrf.mxu1 }
 0x1c0   : > { %v11629_v47 = vpop.f32.mrf.mxu0  ;;  %v11655_v53 = vpop.f32.mrf.mxu1 }
 0x1c2   : > { %v11633_v13 = vpop.f32.mrf.mxu0  ;;  %v11661_v6 = vpop.f32.mrf.mxu1 }
 0x1c4   : > { %v11635_v40 = vpop.f32.mrf.mxu0  ;;  %v11667_v54 = vpop.f32.mrf.mxu1 }
 0x1c6   : > { %v11639_v44 = vpop.f32.mrf.mxu0  ;;  %v11673_v17 = vpop.f32.mrf.mxu1 }
 0x1c7   : > { %13761 = vst [vmem:[#allocation69_spill] sm:$0xff] %v11639_v44  ;;  %13773 = vst [vmem:[#allocation81_spill] sm:$0xff] %v11673_v17  ;;  %v13791_v17 = vld [vmem:[#allocation16_spill] sm:$0xff] }
 0x1c8   : > { %v11641_v55 = vpop.f32.mrf.mxu0  ;;  %v2211_v44 = vadd.f32 %v11436_v14, %v13791_v17 }
 0x1c9   : > { %13762 = vst [vmem:[#allocation70_spill] sm:$0xff] %v11641_v55 }
 0x1ca   : > { %v11645_v59 = vpop.f32.mrf.mxu0 }
 0x1cb   : > { %13763 = vst [vmem:[#allocation71_spill] sm:$0xff] %v11645_v59  ;;  %v13787_v59 = vld [vmem:[#allocation8_spill] sm:$0xff] }
 0x1cc   : > { %v11647_v51 = vpop.f32.mrf.mxu0 }
 0x1cd   : > { %13764 = vst [vmem:[#allocation72_spill] sm:$0xff] %v11647_v51  ;;  %v13785_v51 = vld [vmem:[#allocation7_spill] sm:$0xff] }
 0x1ce   : > { %v11651_v12 = vpop.f32.mrf.mxu0 }
 0x1cf   : > { %13765 = vst [vmem:[#allocation73_spill] sm:$0xff] %v11651_v12 }
 0x1d0   : > { %v11653_v16 = vpop.f32.mrf.mxu0 }
 0x1d1   : > { %13766 = vst [vmem:[#allocation74_spill] sm:$0xff] %v11653_v16 }
 0x1d2   : > { %v11657_v24 = vpop.f32.mrf.mxu0 }
 0x1d3   : > { %13767 = vst [vmem:[#allocation75_spill] sm:$0xff] %v11657_v24  ;;  %v11679_v24 = vpop.f32.mrf.mxu1 }
 0x1d4   : > { %v11659_v37 = vpop.f32.mrf.mxu0  ;;  %13776 = vst [vmem:[#allocation84_spill] sm:$0xff] %v11679_v24  ;;  %v13790_v24 = vld [vmem:[#allocation10_spill] sm:$0xff] }
 0x1d5   : > { %13768 = vst [vmem:[#allocation76_spill] sm:$0xff] %v11659_v37 }
 0x1d6   : > { %v11663_v32 = vpop.f32.mrf.mxu0 }
 0x1d7   : > { %13769 = vst [vmem:[#allocation77_spill] sm:$0xff] %v11663_v32  ;;  %v11685_v32 = vpop.f32.mrf.mxu1 }
 0x1d8   : > { %v11665_v61 = vpop.f32.mrf.mxu0  ;;  %13779 = vst [vmem:[#allocation87_spill] sm:$0xff] %v11685_v32  ;;  %v13786_v32 = vld [vmem:[#allocation9_spill] sm:$0xff] }
 0x1d9   : > { %13770 = vst [vmem:[#allocation78_spill] sm:$0xff] %v11665_v61  ;;  %v389_v61 = vadd.s32 24, %v11347_v46  ;;  %v11695_v16 = vpop.f32.mrf.mxu1  ;;  %v1297_v41 = vadd.f32 %v13787_v59, %v13786_v32  ;;  %v397_v32 = vadd.s32 88, %v11347_v46  ;;  %v3145_v59 = vadd.f32 %v11602_v10, %v11600_v3  ;;  %v13800_v3 = vld [vmem:[#allocation18_spill] sm:$0xff] }
 0x1da   : > { %v11669_v45 = vpop.f32.mrf.mxu0  ;;  %13782 = vst [vmem:[#allocation90_spill] sm:$0xff] %v11695_v16  ;;  %v2227_v10 = vadd.f32 %v11462_v19, %v13800_v3  ;;  %v11762_v19 = vld [vmem:[%s13588_s2] ss:$0 sm:$0xff] }
 0x1db   : > { %13771 = vst [vmem:[#allocation79_spill] sm:$0xff] %v11669_v45  ;;  %v421_v12 = vand.u32 15, %v389_v61 }
 0x1dc   : > { %v11671_v52 = vpop.f32.mrf.mxu0 }
 0x1dd   : > { %13772 = vst [vmem:[#allocation80_spill] sm:$0xff] %v11671_v52  ;;  %v387_v52 = vadd.s32 8, %v11347_v46  ;;  %vm549_vm7 = vcmp.lt.s32.totalorder %v421_v12, 15 }
 0x1de   : > { %v11675_v11 = vpop.f32.mrf.mxu0 }
 0x1df   : > { %13774 = vst [vmem:[#allocation82_spill] sm:$0xff] %v11675_v11  ;;  %v393_v11 = vadd.s32 56, %v11347_v46  ;;  %v419_v23 = vand.u32 15, %v387_v52  ;;  %v13793_v52 = vld [vmem:[#allocation25_spill] sm:$0xff] }
 0x1e0   : > { %v11677_v38 = vpop.f32.mrf.mxu0 }
 0x1e1   : > { %13775 = vst [vmem:[#allocation83_spill] sm:$0xff] %v11677_v38  ;;  %v391_v38 = vadd.s32 40, %v11347_v46  ;;  %v425_v61 = vand.u32 15, %v393_v11  ;;  %vm547_vm8 = vcmp.lt.s32.totalorder %v419_v23, 15 }
 0x1e2   : > { %v11681_v37 = vpop.f32.mrf.mxu0 }
 0x1e3   : > { %13777 = vst [vmem:[#allocation85_spill] sm:$0xff] %v11681_v37  ;;  %vm11733_vm9 = vcmp.lt.s32.totalorder %v425_v61, 15 }
 0x1e4   : > { %v11683_v39 = vpop.f32.mrf.mxu0 }
 0x1e5   : > { %13778 = vst [vmem:[#allocation86_spill] sm:$0xff] %v11683_v39  ;;  %v13784_v39 = vld [vmem:[#allocation6_spill] sm:$0xff] }
 0x1e6   : > { %v11688_v49 = vpop.f32.mrf.mxu0  ;;  %v1281_v63 = vadd.f32 %v13785_v51, %v13784_v39  ;;  %v3153_v39 = vadd.f32 %v11593_v33, %v11595_v58  ;;  %v11713_v51 = vpop.f32.mrf.mxu1  ;;  %v2553_v33 = vadd.f32 %v11434_v31, %v2211_v44  ;;  %v11731_v58 = vsel %vm549_vm7, 1.0, %v13719_v1 }
 0x1e7   : > { %13780 = vst [vmem:[#allocation88_spill] sm:$0xff] %v11688_v49  ;;  %v13788_v49 = vld [vmem:[#allocation14_spill] sm:$0xff]  ;;  %13795 = vst [vmem:[#allocation6_spill] sm:$0xff] %v11731_v58  ;;  %v429_v44 = vand.u32 15, %v397_v32 }
 0x1e8   : > { %v11691_v45 = vpop.f32.mrf.mxu0  ;;  %v2195_v18 = vadd.f32 %v11410_v62, %v13788_v49  ;;  %v13792_v62 = vld [vmem:[#allocation23_spill] sm:$0xff] }
 0x1e9   : > { %13781 = vst [vmem:[#allocation89_spill] sm:$0xff] %v11691_v45  ;;  %v13789_v45 = vld [vmem:[#allocation11_spill] sm:$0xff]  ;;  %v11717_v49 = vadd.f32 %v13792_v62, %v1281_v63  ;;  %v401_v62 = vadd.s32 120, %v11347_v46  ;;  %vm557_vm11 = vcmp.lt.s32.totalorder %v429_v44, 15  ;;  %v13808_v44 = vld [vmem:[#allocation20_spill] sm:$0xff] }
 0x1ea   : > { %v11697_v37 = vpop.f32.mrf.mxu0  ;;  %v1313_v55 = vadd.f32 %v13790_v24, %v13789_v45  ;;  %v11720_v45 = vadd.f32 %v13793_v52, %v1297_v41  ;;  %v13794_v24 = vld [vmem:[#allocation27_spill] sm:$0xff]  ;;  %v2549_v11 = vadd.f32 %v11408_v8, %v2195_v18  ;;  %v3156_v8 = vadd.f32 %v11608_v34, %v11604_v42  ;;  %v11743_v18 = vpop.f32.mrf.mxu1 }
 0x1eb   : > { %13783 = vst [vmem:[#allocation91_spill] sm:$0xff] %v11697_v37  ;;  %v423_v37 = vand.u32 15, %v391_v38  ;;  %v395_v38 = vadd.s32 72, %v11347_v46  ;;  %v13802_v52 = vld [vmem:[#allocation15_spill] sm:$0xff]  ;;  %v3148_v42 = vadd.f32 %v11614_v5, %v11606_v50  ;;  %v3169_v5 = vadd.f32 %v11625_v9, %v11610_v30 }
 0x1ec   : > { %v11709_v16 = vpop.f32.mrf.mxu0  ;;  %v11723_v14 = vadd.f32 %v13794_v24, %v1313_v55  ;;  %v2581_v24 = vadd.f32 %v2549_v11, %v13802_v52  ;;  %v11777_v11 = vpop.f32.mrf.mxu1  ;;  %v3161_v41 = vadd.f32 %v11631_v4, %v11612_v21  ;;  %v11794_v21 = vsel %vm557_vm11, 1.0, %v13719_v1 }
 0x1ed   : > { %vm11737_vm10 = vcmp.lt.s32.totalorder %v423_v37, 15  ;;  %v427_v37 = vand.u32 15, %v395_v38  ;;  %v11767_v38 = vsel %vm11733_vm9, 1.0, %v13719_v1  ;;  %13809 = vst [vmem:[#allocation14_spill] sm:$0xff] %v11794_v21  ;;  %vm4173_vm11 = vcmask 60416  }
 0x1ee   : > { %v9538_v17 = vpop.f32.mrf.mxu0  ;;  %13804 = vst [vmem:[#allocation9_spill] sm:$0xff] %v11767_v38  ;;  %v11772_v50 = vsel %vm11737_vm10, 1.0, %v13719_v1  ;;  %v11796_v52 = vpop.f32.mrf.mxu1 }
 0x1ef   : > { %v3735_v12 = vadd.f32 %v9538_v17, %v3153_v39  ;;  %v11749_v39 = vsel %vm547_vm8, 1.0, %v13719_v1  ;;  %v13803_v17 = vld [vmem:[#allocation17_spill] sm:$0xff]  ;;  %13805 = vst [vmem:[#allocation8_spill] sm:$0xff] %v11772_v50  ;;  %vm11783_vm13 = vcmp.lt.s32.totalorder %v427_v37, 15 }
 0x1f0   : > { %v3606_v63 = vpop.f32.mrf.mxu0  ;;  %13801 = vst [vmem:[#allocation7_spill] sm:$0xff] %v11749_v39  ;;  %v11757_v32 = vadd.f32 %v2553_v33, %v13803_v17  ;;  %v11825_v55 = vpop.f32.mrf.mxu1 }
 0x1f1   : > { %v3799_v23 = vadd.f32 %v3735_v12, %v11405_v36  ;;  %v3733_v31 = vadd.f32 %v3606_v63, %v3145_v59  ;;  %v2557_v63 = vadd.f32 %v11460_v2, %v2227_v10  ;;  %v2243_v2 = vadd.f32 %v11488_v20, %v13808_v44 }
 0x1f2   : > { %v9539_v61 = vpop.f32.mrf.mxu0  ;;  %v3172_v20 = vadd.f32 %v11637_v60, %v11616_v0  ;;  %v3164_v60 = vadd.f32 %v11643_v27, %v11621_v7  ;;  %v405_v27 = vadd.s32 152, %v11347_v46  ;;  %v403_v44 = vadd.s32 136, %v11347_v46 }
 0x1f3   : > { %v3797_v34 = vadd.f32 %v3733_v31, %v11413_v28  ;;  %v3736_v36 = vadd.f32 %v9539_v61, %v3156_v8  ;;  %v399_v28 = vadd.s32 104, %v11347_v46  ;;  %v433_v31 = vand.u32 15, %v401_v62 }
 0x1f4   : > { %v3609_v59 = vpop.f32.mrf.mxu0  ;;  %v3838_v30 = vadd.f32 %v11762_v19, %v3799_v23 }
 0x1f5   : > { %v3768_v12 = vmul.f32 %v11731_v58, %v3736_v36  ;;  %v3734_v33 = vadd.f32 %v3609_v59, %v3148_v42  ;;  %v3836_v10 = vadd.f32 %v11762_v19, %v3797_v34  ;;  %v431_v37 = vand.u32 15, %v399_v28  ;;  %v13810_v36 = vld [vmem:[#allocation19_spill] sm:$0xff] }
 0x1f6   : > { %v9542_v8 = vpop.f32.mrf.mxu0  ;;  %v11801_v17 = vadd.f32 %v2557_v63, %v13810_v36  ;;  %v11808_v59 = vsel %vm11783_vm13, 1.0, %v13719_v1  ;;  %vm11810_vm14 = vcmp.lt.s32.totalorder %v433_v31, 15 }
 0x1f7   : > { %v3800_v9 = vadd.f32 %v3768_v12, %v11419_v22  ;;  %v3766_v3 = vmul.f32 %v11749_v39, %v3734_v33  ;;  %v3739_v61 = vadd.f32 %v9542_v8, %v3169_v5  ;;  %13811 = vst [vmem:[#allocation11_spill] sm:$0xff] %v11808_v59  ;;  %v2561_v33 = vadd.f32 %v11486_v25, %v2243_v2 }
 0x1f8   : > { %v3622_v4 = vpop.f32.mrf.mxu0  ;;  %vm11819_vm15 = vcmp.lt.s32.totalorder %v431_v37, 15  ;;  %v3185_v8 = vadd.f32 %v11649_v57, %v11627_v15  ;;  %v3868_v31 = vmax.f32 %v3836_v10, 0.0  ;;  %v11831_v7 = vsel %vm11810_vm14, 1.0, %v13719_v1 }
 0x1f9   : > { %v3839_v62 = vadd.f32 %v11762_v19, %v3800_v9  ;;  %v3798_v23 = vadd.f32 %v3766_v3, %v2581_v24  ;;  %v3803_v22 = vadd.f32 %v3739_v61, %v11431_v29  ;;  %v3737_v42 = vadd.f32 %v3622_v4, %v3161_v41  ;;  %13816 = vst [vmem:[#allocation10_spill] sm:$0xff] %v11831_v7  ;;  %v13821_v41 = vld [vmem:[#allocation81_spill] sm:$0xff] }
 0x1fa   : > { %v9543_v34 = vpop.f32.mrf.mxu0  ;;  %v3870_v24 = vmax.f32 %v3838_v30, 0.0  ;;  %v3177_v61 = vadd.f32 %v11655_v53, %v11629_v47  ;;  %v3188_v47 = vadd.f32 %v11661_v6, %v11633_v13  ;;  %v11850_v53 = vpop.f32.mrf.mxu1  ;;  %v3180_v13 = vadd.f32 %v11667_v54, %v11635_v40  ;;  %v13822_v54 = vld [vmem:[#allocation70_spill] sm:$0xff] }
 0x1fb   : > { %v3871_v5 = vmax.f32 %v3839_v62, 0.0  ;;  %v3837_v29 = vadd.f32 %v11762_v19, %v3798_v23  ;;  %v3801_v12 = vadd.f32 %v3737_v42, %v11439_v26  ;;  %v3740_v0 = vadd.f32 %v9543_v34, %v3172_v20  ;;  %v13818_v23 = vld [vmem:[#allocation21_spill] sm:$0xff] }
 0x1fc   : > { %v3625_v63 = vpop.f32.mrf.mxu0  ;;  %v3842_v2 = vadd.f32 %v11762_v19, %v3803_v22  ;;  %v11843_v62 = vsel %vm11819_vm15, 1.0, %v13719_v1  ;;  %v11846_v42 = vadd.f32 %v2561_v33, %v13818_v23 }
 0x1fd   : > { %v3901_v30 = vpack.c.bf16 %v3871_v5, %v3870_v24  ;;  %v3869_v9 = vmax.f32 %v3837_v29, 0.0  ;;  %v3772_v26 = vmul.f32 %v11767_v38, %v3740_v0  ;;  %v3738_v25 = vadd.f32 %v3625_v63, %v3164_v60  ;;  %13817 = vst [vmem:[#allocation16_spill] sm:$0xff] %v11843_v62  ;;  %v13819_v29 = vld [vmem:[#allocation22_spill] sm:$0xff] }
 0x1fe   : > { %v9546_v3 = vpop.f32.mrf.mxu0  ;;  %v437_v24 = vand.u32 15, %v405_v27  ;;  %v2259_v33 = vadd.f32 %v11514_v43, %v13819_v29  ;;  %v3874_v60 = vmax.f32 %v3842_v2, 0.0 }
 0x1ff   : > { %v3743_v57 = vadd.f32 %v9546_v3, %v3185_v8  ;;  %v3900_v15 = vpack.c.bf16 %v3869_v9, %v3868_v31  ;;  %v3804_v10 = vadd.f32 %v3772_v26, %v11445_v35  ;;  %v3770_v4 = vmul.f32 %v11772_v50, %v3738_v25  ;;  %v11866_v31 = vpop.f32.mrf.mxu1  ;;  %v13823_v9 = vld [vmem:[#allocation84_spill] sm:$0xff] }
 0x200   : > { %v3638_v37 = vpop.f32.mrf.mxu0  ;;  %v3840_v35 = vadd.f32 %v11762_v19, %v3801_v12  ;;  %v3193_v26 = vadd.f32 %v13823_v9, %v13822_v54  ;;  %vm11876_vm0 = vcmp.lt.s32.totalorder %v437_v24, 15  ;;  %v13832_v24 = vld [vmem:[#allocation87_spill] sm:$0xff] }
 0x201   : > { %v3807_v22 = vadd.f32 %v3743_v57, %v11457_v48  ;;  %v3741_v36 = vadd.f32 %v3638_v37, %v3177_v61  ;;  %9570 = vmatprep.mubr.msk.bf16.mxu1 %vm3931_vm12, %v3900_v15  ;;  %v3843_v20 = vadd.f32 %v11762_v19, %v3804_v10  ;;  %v3802_v34 = vadd.f32 %v3770_v4, %v11757_v32  ;;  %v13820_v32 = vld [vmem:[#allocation69_spill] sm:$0xff] }
 0x202   : > { %v9547_v28 = vpop.f32.mrf.mxu0  ;;  %9571 = vmatmul.mubr.msk.bf16.vlgmr.msra.gmra.mxu1 %vm3931_vm12, %v3901_v30  ;;  %v435_v48 = vand.u32 15, %v403_v44  ;;  %v3201_v8 = vadd.f32 %v13821_v41, %v13820_v32  ;;  %v3872_v25 = vmax.f32 %v3840_v35, 0.0  ;;  %v13824_v57 = vld [vmem:[#allocation41_spill] sm:$0xff]  ;;  %v13833_v41 = vld [vmem:[#allocation44_spill] sm:$0xff]  ;;  %v11902_v9 = vsel %vm11876_vm0, 1.0, %v13719_v1 }
 0x203   : > { %v3805_v6 = vadd.f32 %v3741_v36, %v11465_v56  ;;  %v3744_v5 = vadd.f32 %v9547_v28, %v3188_v47  ;;  %v3875_v12 = vmax.f32 %v3843_v20, 0.0  ;;  %v3841_v0 = vadd.f32 %v11762_v19, %v3802_v34  ;;  %v11884_v36 = vpop.f32.mrf.mxu1  ;;  %v13829_v20 = vld [vmem:[#allocation43_spill] sm:$0xff]  ;;  %13836 = vst [vmem:[#allocation23_spill] sm:$0xff] %v11902_v9 }
 0x204   : > { %v3641_v63 = vpop.f32.mrf.mxu0  ;;  %v409_v56 = vadd.s32 184, %v11347_v46  ;;  %v3846_v61 = vadd.f32 %v11762_v19, %v3807_v22  ;;  %vm11880_vm2 = vcmp.lt.s32.totalorder %v435_v48, 15 }
 0x205   : > { %v3776_v30 = vmul.f32 %v11794_v21, %v3744_v5  ;;  %v3742_v40 = vadd.f32 %v3641_v63, %v3180_v13  ;;  %v3903_v43 = vpack.c.bf16 %v3875_v12, %v3874_v60  ;;  %v3873_v3 = vmax.f32 %v3841_v0, 0.0  ;;  %v13830_v13 = vld [vmem:[#allocation49_spill] sm:$0xff]  ;;  %v13831_v5 = vld [vmem:[#allocation71_spill] sm:$0xff] }
 0x206   : > { %v9550_v27 = vpop.f32.mrf.mxu0  ;;  %v3844_v10 = vadd.f32 %v11762_v19, %v3805_v6  ;;  %v2565_v6 = vadd.f32 %v13830_v13, %v2259_v33  ;;  %v3204_v29 = vadd.f32 %v13832_v24, %v13831_v5  ;;  %v441_v60 = vand.u32 15, %v409_v56  ;;  %v13844_v5 = vld [vmem:[#allocation56_spill] sm:$0xff] }
 0x207   : > { %v3808_v15 = vadd.f32 %v3776_v30, %v13824_v57  ;;  %v3774_v44 = vmul.f32 %v11808_v59, %v3742_v40  ;;  %v3747_v2 = vadd.f32 %v9550_v27, %v3201_v8  ;;  %v3902_v37 = vpack.c.bf16 %v3873_v3, %v3872_v25  ;;  %v13834_v8 = vld [vmem:[#allocation72_spill] sm:$0xff]  ;;  %v13835_v30 = vld [vmem:[#allocation90_spill] sm:$0xff]  ;;  %v11911_v3 = vpop.f32.mrf.mxu1 }
 0x208   : > { %v3654_v4 = vpop.f32.mrf.mxu0  ;;  %v407_v12 = vadd.s32 168, %v11347_v46  ;;  %v3878_v0 = vmax.f32 %v3846_v61, 0.0  ;;  %v3196_v33 = vadd.f32 %v13835_v30, %v13834_v8  ;;  %v11907_v56 = vsel %vm11880_vm2, 1.0, %v13719_v1 }
 0x209   : > { %v3847_v22 = vadd.f32 %v11762_v19, %v3808_v15  ;;  %v3806_v35 = vadd.f32 %v3774_v44, %v11801_v17  ;;  %v3811_v34 = vadd.f32 %v3747_v2, %v13829_v20  ;;  %v3745_v28 = vadd.f32 %v3654_v4, %v3193_v26  ;;  %9574 = vmatprep.mubr.msk.bf16.mxu1 %vm3931_vm12, %v3902_v37  ;;  %v13838_v26 = vld [vmem:[#allocation73_spill] sm:$0xff]  ;;  %v13841_v37 = vld [vmem:[#allocation74_spill] sm:$0xff] }
 0x20a   : > { %v9551_v48 = vpop.f32.mrf.mxu0  ;;  %9575 = vmatmul.mubr.msk.bf16.gmra.mxu1 %vm3931_vm12, %v3903_v43  ;;  %13837 = vst [vmem:[#allocation25_spill] sm:$0xff] %v11907_v56  ;;  %v3217_v25 = vadd.f32 %v11713_v51, %v13838_v26  ;;  %v3876_v43 = vmax.f32 %v3844_v10, 0.0  ;;  %v2597_v57 = vadd.f32 %v2565_v6, %v11717_v49  ;;  %vm11915_vm4 = vcmp.lt.s32.totalorder %v441_v60, 15  ;;  %v13843_v6 = vld [vmem:[#allocation24_spill] sm:$0xff]  ;;  %v11929_v60 = vpop.f32.mrf.mxu1 }
 0x20b   : > { %v3879_v63 = vmax.f32 %v3847_v22, 0.0  ;;  %v3845_v32 = vadd.f32 %v11762_v19, %v3806_v35  ;;  %v3809_v17 = vadd.f32 %v3745_v28, %v13833_v41  ;;  %v3748_v40 = vadd.f32 %v9551_v48, %v3204_v29  ;;  %v13842_v35 = vld [vmem:[#allocation46_spill] sm:$0xff]  ;;  %v13845_v29 = vld [vmem:[#allocation75_spill] sm:$0xff] }
 0x20c   : > { %v3657_v54 = vpop.f32.mrf.mxu0  ;;  %v3209_v23 = vadd.f32 %v11743_v18, %v13841_v37  ;;  %v439_v22 = vand.u32 15, %v407_v12  ;;  %v3850_v10 = vadd.f32 %v11762_v19, %v3811_v34  ;;  %v413_v13 = vadd.s32 216, %v11347_v46  ;;  %v13846_v18 = vld [vmem:[#allocation48_spill] sm:$0xff] }
 0x20d   : > { %v3905_v27 = vpack.c.bf16 %v3879_v63, %v3878_v0  ;;  %v3877_v61 = vmax.f32 %v3845_v32, 0.0  ;;  %v3780_v15 = vmul.f32 %v11831_v7, %v3748_v40  ;;  %v3746_v44 = vadd.f32 %v3657_v54, %v3196_v33  ;;  %v13849_v33 = vld [vmem:[#allocation50_spill] sm:$0xff] }
 0x20e   : > { %v9554_v2 = vpop.f32.mrf.mxu0  ;;  %v2275_v24 = vadd.f32 %v13844_v5, %v13843_v6  ;;  %v3220_v48 = vadd.f32 %v11777_v11, %v13845_v29  ;;  %v3848_v34 = vadd.f32 %v11762_v19, %v3809_v17  ;;  %v11939_v8 = vsel %vm11915_vm4, 1.0, %v13719_v1  ;;  %v13848_v11 = vld [vmem:[#allocation76_spill] sm:$0xff] }
 0x20f   : > { %v3751_v47 = vadd.f32 %v9554_v2, %v3217_v25  ;;  %v3904_v51 = vpack.c.bf16 %v3877_v61, %v3876_v43  ;;  %v3812_v20 = vadd.f32 %v3780_v15, %v13842_v35  ;;  %v3778_v49 = vmul.f32 %v11843_v62, %v3746_v44  ;;  %13847 = vst [vmem:[#allocation27_spill] sm:$0xff] %v11939_v8  ;;  %v13852_v15 = vld [vmem:[#allocation77_spill] sm:$0xff]  ;;  %v9529_v2 = vpop.f32.mrf.mxu1 }
 0x210   : > { %v3670_v28 = vpop.f32.mrf.mxu0  ;;  %v3212_v30 = vadd.f32 %v11796_v52, %v13848_v11  ;;  %vm11945_vm5 = vcmp.lt.s32.totalorder %v439_v22, 15  ;;  %v3882_v26 = vmax.f32 %v3850_v10, 0.0  ;;  %v445_v61 = vand.u32 15, %v413_v13  ;;  %v13855_v13 = vld [vmem:[#allocation55_spill] sm:$0xff] }
 0x211   : > { %v3815_v0 = vadd.f32 %v3751_v47, %v13846_v18  ;;  %v3749_v12 = vadd.f32 %v3670_v28, %v3209_v23  ;;  %9578 = vmatprep.mubr.msk.bf16.mxu1 %vm3931_vm12, %v3904_v51  ;;  %v3851_v63 = vadd.f32 %v11762_v19, %v3812_v20  ;;  %v3810_v32 = vadd.f32 %v3778_v49, %v11846_v42  ;;  %v13854_v20 = vld [vmem:[#allocation52_spill] sm:$0xff]  ;;  %v3243_v18 = vpop.f32.mrf.mxu1  ;;  %v13859_v11 = vld [vmem:[#allocation63_spill] sm:$0xff] }
 0x212   : > { %v9555_v41 = vpop.f32.mrf.mxu0  ;;  %9579 = vmatmul.mubr.msk.bf16.gmra.mxu1 %vm3931_vm12, %v3905_v27  ;;  %v3233_v44 = vadd.f32 %v11825_v55, %v13852_v15  ;;  %v411_v37 = vadd.s32 200, %v11347_v46  ;;  %v13853_v27 = vld [vmem:[#allocation78_spill] sm:$0xff]  ;;  %v3880_v47 = vmax.f32 %v3848_v34, 0.0  ;;  %v2569_v6 = vadd.f32 %v13855_v13, %v2275_v24  ;;  %v13860_v24 = vld [vmem:[#allocation79_spill] sm:$0xff] }
 0x213   : > { %v3813_v40 = vadd.f32 %v3749_v12, %v13849_v33  ;;  %v3752_v54 = vadd.f32 %v9555_v41, %v3220_v48  ;;  %v3883_v42 = vmax.f32 %v3851_v63, 0.0  ;;  %v3849_v25 = vadd.f32 %v11762_v19, %v3810_v32  ;;  %v13857_v34 = vld [vmem:[#allocation54_spill] sm:$0xff] }
 0x214   : > { %v3673_v43 = vpop.f32.mrf.mxu0  ;;  %v3225_v23 = vadd.f32 %v11850_v53, %v13853_v27  ;;  %v3854_v35 = vadd.f32 %v11762_v19, %v3815_v0  ;;  %v11964_v53 = vsel %vm11945_vm5, 1.0, %v13719_v1  ;;  %v13858_v41 = vld [vmem:[#allocation26_spill] sm:$0xff]  ;;  %v3236_v33 = vadd.f32 %v11866_v31, %v13860_v24  ;;  %v13873_v24 = vld [vmem:[#allocation61_spill] sm:$0xff] }
 0x215   : > { %v3784_v52 = vmul.f32 %v11902_v9, %v3752_v54  ;;  %v3750_v4 = vadd.f32 %v3673_v43, %v3212_v30  ;;  %v3907_v51 = vpack.c.bf16 %v3883_v42, %v3882_v26  ;;  %v3881_v22 = vmax.f32 %v3849_v25, 0.0  ;;  %13856 = vst [vmem:[#allocation18_spill] sm:$0xff] %v11964_v53  ;;  %v13863_v25 = vld [vmem:[#allocation57_spill] sm:$0xff]  ;;  %v13865_v27 = vld [vmem:[#allocation82_spill] sm:$0xff] }
 0x216   : > { %v9558_v10 = vpop.f32.mrf.mxu0  ;;  %v3852_v5 = vadd.f32 %v11762_v19, %v3813_v40  ;;  %v2291_v30 = vadd.f32 %v13859_v11, %v13858_v41  ;;  %vm11973_vm7 = vcmp.lt.s32.totalorder %v445_v61, 15  ;;  %v443_v17 = vand.u32 15, %v411_v37 }
 0x217   : > { %v3816_v49 = vadd.f32 %v3784_v52, %v13854_v20  ;;  %v3782_v28 = vmul.f32 %v11907_v56, %v3750_v4  ;;  %v3755_v55 = vadd.f32 %v9558_v10, %v3233_v44  ;;  %v3906_v48 = vpack.c.bf16 %v3881_v22, %v3880_v47  ;;  %v13864_v44 = vld [vmem:[#allocation80_spill] sm:$0xff] }
 0x218   : > { %v3686_v29 = vpop.f32.mrf.mxu0  ;;  %v3886_v26 = vmax.f32 %v3854_v35, 0.0  ;;  %v2601_v15 = vadd.f32 %v2569_v6, %v11720_v45  ;;  %v3228_v31 = vadd.f32 %v11884_v36, %v13864_v44  ;;  %v417_v61 = vadd.s32 248, %v11347_v46 }
 0x219   : > { %v3855_v12 = vadd.f32 %v11762_v19, %v3816_v49  ;;  %v3814_v0 = vadd.f32 %v3782_v28, %v2597_v57  ;;  %v3819_v63 = vadd.f32 %v3755_v55, %v13857_v34  ;;  %v3753_v32 = vadd.f32 %v3686_v29, %v3225_v23  ;;  %9582 = vmatprep.mubr.msk.bf16.mxu1 %vm3931_vm12, %v3906_v48  ;;  %v9532_v23 = vpop.f32.mrf.mxu1  ;;  %v13869_v49 = vld [vmem:[#allocation62_spill] sm:$0xff]  ;;  %v13871_v29 = vld [vmem:[#allocation59_spill] sm:$0xff] }
 0x21a   : > { %v9559_v40 = vpop.f32.mrf.mxu0  ;;  %9583 = vmatmul.mubr.msk.bf16.gmra.mxu1 %vm3931_vm12, %v3907_v51  ;;  %v3249_v37 = vadd.f32 %v11911_v3, %v13865_v27  ;;  %v3884_v47 = vmax.f32 %v3852_v5, 0.0  ;;  %v11990_v45 = vsel %vm11973_vm7, 1.0, %v13719_v1  ;;  %vm11992_vm8 = vcmp.lt.s32.totalorder %v443_v17, 15  ;;  %v13870_v3 = vld [vmem:[#allocation83_spill] sm:$0xff] }
 0x21b   : > { %v3887_v42 = vmax.f32 %v3855_v12, 0.0  ;;  %v3853_v57 = vadd.f32 %v11762_v19, %v3814_v0  ;;  %v3817_v43 = vadd.f32 %v3753_v32, %v13863_v25  ;;  %v3756_v52 = vadd.f32 %v9559_v40, %v3236_v33  ;;  %13866 = vst [vmem:[#allocation15_spill] sm:$0xff] %v11990_v45  ;;  %v13872_v32 = vld [vmem:[#allocation85_spill] sm:$0xff]  ;;  %v3256_v11 = vpop.f32.mrf.mxu1  ;;  %v13876_v25 = vld [vmem:[#allocation64_spill] sm:$0xff] }
 0x21c   : > { %v3689_v4 = vpop.f32.mrf.mxu0  ;;  %v2573_v28 = vadd.f32 %v13869_v49, %v2291_v30  ;;  %v3241_v55 = vadd.f32 %v11929_v60, %v13870_v3  ;;  %v3858_v5 = vadd.f32 %v11762_v19, %v3819_v63  ;;  %v449_v34 = vand.u32 15, %v417_v61  ;;  %v13879_v61 = vld [vmem:[#allocation88_spill] sm:$0xff] }
 0x21d   : > { %v3909_v22 = vpack.c.bf16 %v3887_v42, %v3886_v26  ;;  %v3885_v10 = vmax.f32 %v3853_v57, 0.0  ;;  %v3788_v35 = vmul.f32 %v11939_v8, %v3756_v52  ;;  %v3754_v20 = vadd.f32 %v3689_v4, %v3228_v31  ;;  %v13875_v42 = vld [vmem:[#allocation86_spill] sm:$0xff] }
 0x21e   : > { %v9562_v51 = vpop.f32.mrf.mxu0  ;;  %v3252_v41 = vadd.f32 %v9529_v2, %v13872_v32  ;;  %v415_v60 = vadd.s32 232, %v11347_v46  ;;  %v3856_v30 = vadd.f32 %v11762_v19, %v3817_v43  ;;  %v12011_v26 = vsel %vm11992_vm8, 1.0, %v13719_v1 }
 0x21f   : > { %v3759_v13 = vadd.f32 %v9562_v51, %v3249_v37  ;;  %v3908_v6 = vpack.c.bf16 %v3885_v10, %v3884_v47  ;;  %v3820_v48 = vadd.f32 %v3788_v35, %v13871_v29  ;;  %v3786_v12 = vmul.f32 %v11964_v53, %v3754_v20  ;;  %13874 = vst [vmem:[#allocation17_spill] sm:$0xff] %v12011_v26  ;;  %v9533_v37 = vpop.f32.mrf.mxu1  ;;  %v13880_v10 = vld [vmem:[#allocation89_spill] sm:$0xff] }
 0x220   : > { %v3702_v0 = vpop.f32.mrf.mxu0  ;;  %v2605_v2 = vadd.f32 %v2573_v28, %v11723_v14  ;;  %v3244_v57 = vadd.f32 %v3243_v18, %v13875_v42  ;;  %v3890_v46 = vmax.f32 %v3858_v5, 0.0  ;;  %vm12018_vm9 = vcmp.lt.s32.totalorder %v449_v34, 15  ;;  %v13881_v28 = vld [vmem:[#allocation66_spill] sm:$0xff]  ;;  %v13887_v42 = vld [vmem:[#allocation68_spill] sm:$0xff] }
 0x221   : > { %v3823_v33 = vadd.f32 %v3759_v13, %v13873_v24  ;;  %v3757_v40 = vadd.f32 %v3702_v0, %v3241_v55  ;;  %9586 = vmatprep.mubr.msk.bf16.mxu1 %vm3931_vm12, %v3908_v6  ;;  %v3859_v63 = vadd.f32 %v11762_v19, %v3820_v48  ;;  %v3818_v54 = vadd.f32 %v3786_v12, %v2601_v15  ;;  %v13882_v6 = vld [vmem:[#allocation32_spill] sm:$0xff]  ;;  %v3259_v0 = vpop.f32.mrf.mxu1 }
 0x222   : > { %v9563_v17 = vpop.f32.mrf.mxu0  ;;  %9587 = vmatmul.mubr.msk.bf16.gmra.mxu1 %vm3931_vm12, %v3909_v22  ;;  %v3265_v27 = vadd.f32 %v9532_v23, %v13879_v61  ;;  %v447_v47 = vand.u32 15, %v415_v60  ;;  %v3257_v35 = vadd.f32 %v3256_v11, %v13880_v10  ;;  %v3888_v20 = vmax.f32 %v3856_v30, 0.0  ;;  %v13883_v23 = vld [vmem:[#allocation30_spill] sm:$0xff] }
 0x223   : > { %v3821_v44 = vadd.f32 %v3757_v40, %v13876_v25  ;;  %v3760_v31 = vadd.f32 %v9563_v17, %v3252_v41  ;;  %v3891_v43 = vmax.f32 %v3859_v63, 0.0  ;;  %v3857_v52 = vadd.f32 %v11762_v19, %v3818_v54  ;;  %v13884_v41 = vld [vmem:[#allocation28_spill] sm:$0xff] }
 0x224   : > { %v3705_v15 = vpop.f32.mrf.mxu0  ;;  %v3862_v49 = vadd.f32 %v11762_v19, %v3823_v33  ;;  %v2307_v5 = vadd.f32 %v13883_v23, %v13882_v6  ;;  %v13885_v33 = vld [vmem:[#allocation91_spill] sm:$0xff]  ;;  %v12038_v60 = vsel %vm12018_vm9, 1.0, %v13719_v1  ;;  %vm575_vm10 = vcmp.lt.s32.totalorder %v447_v47, 15  ;;  %v13889_v25 = vld [vmem:[#allocation12_spill] sm:$0xff] }
 0x225   : > { %v3792_v14 = vmul.f32 %v11990_v45, %v3760_v31  ;;  %v3758_v18 = vadd.f32 %v3705_v15, %v3244_v57  ;;  %v3911_v22 = vpack.c.bf16 %v3891_v43, %v3890_v46  ;;  %v3889_v51 = vmax.f32 %v3857_v52, 0.0  ;;  %13886 = vst [vmem:[#allocation20_spill] sm:$0xff] %v12038_v60  ;;  %v13888_v57 = vld [vmem:[#allocation13_spill] sm:$0xff] }
 0x226   : > { %v9566_v36 = vpop.f32.mrf.mxu0  ;;  %v3860_v29 = vadd.f32 %v11762_v19, %v3821_v44  ;;  %v3268_v40 = vadd.f32 %v9533_v37, %v13885_v33  ;;  %v3894_v63 = vmax.f32 %v3862_v49, 0.0  ;;  %v1329_v44 = vadd.f32 %v13889_v25, %v13888_v57  ;;  %v13890_v31 = vld [vmem:[#allocation29_spill] sm:$0xff] }
 0x227   : > { %v3824_v3 = vadd.f32 %v3792_v14, %v13881_v28  ;;  %v3790_v55 = vmul.f32 %v12011_v26, %v3758_v18  ;;  %v3763_v13 = vadd.f32 %v9566_v36, %v3265_v27  ;;  %v3910_v12 = vpack.c.bf16 %v3889_v51, %v3888_v20  ;;  %v13892_v14 = vld [vmem:[#allocation33_spill] sm:$0xff]  ;;  %v13893_v51 = vld [vmem:[#allocation31_spill] sm:$0xff] }
 0x228   : > { %v3718_v48 = vpop.f32.mrf.mxu0  ;;  %v2577_v46 = vadd.f32 %v13890_v31, %v2307_v5  ;;  %v3260_v43 = vadd.f32 %v3259_v0, %v11709_v16  ;;  %v3892_v4 = vmax.f32 %v3860_v29, 0.0  ;;  %v12048_v37 = vsel %vm575_vm10, 1.0, %v13719_v1 }
 0x229   : > { %v3863_v34 = vadd.f32 %v11762_v19, %v3824_v3  ;;  %v3822_v32 = vadd.f32 %v3790_v55, %v2605_v2  ;;  %v3827_v11 = vadd.f32 %v3763_v13, %v13884_v41  ;;  %v3761_v24 = vadd.f32 %v3718_v48, %v3257_v35  ;;  %9590 = vmatprep.mubr.msk.bf16.mxu1 %vm3931_vm12, %v3910_v12  ;;  %v12122_v41 = vld [vmem:[%s13590_s4] ss:$0 sm:$0xff] }
 0x22a   : > { %v9567_v30 = vpop.f32.mrf.mxu0  ;;  %9591 = vmatmul.mubr.msk.bf16.gmra.mxu1 %vm3931_vm12, %v3911_v22  ;;  %13891 = vst [vmem:[#allocation19_spill] sm:$0xff] %v12048_v37  ;;  %v1851_v18 = vadd.f32 %v13892_v14, %v1329_v44  ;;  %v10283_v12 = vmov 0  }
 0x22b   : > { %v3895_v54 = vmax.f32 %v3863_v34, 0.0  ;;  %v3861_v17 = vadd.f32 %v11762_v19, %v3822_v32  ;;  %v3825_v2 = vadd.f32 %v3761_v24, %v13887_v42  ;;  %v3764_v52 = vadd.f32 %v9567_v30, %v3268_v40  ;;  %4179 = vst.msk [vmem:[#allocation2 + $0x14] sm:$0xf] %vm4173_vm11, %v10283_v12  ;;  %4174 = vst.msk [vmem:[#allocation2] sm:$0xf] %vm4173_vm11, %v10283_v12 }
 0x22c   : > { %v3721_v15 = vpop.f32.mrf.mxu0  ;;  %v2609_v20 = vadd.f32 %v2577_v46, %v1851_v18  ;;  %v3866_v22 = vadd.f32 %v11762_v19, %v3827_v11  ;;  %4175 = vst.msk [vmem:[#allocation2 + $0x4] sm:$0xf] %vm4173_vm11, %v10283_v12  ;;  %4176 = vst.msk [vmem:[#allocation2 + $0x8] sm:$0xf] %vm4173_vm11, %v10283_v12  ;;  %v12108_v34 = vld [vmem:[%s13591_s5 + $0x18] sm:$0xf] }
 0x22d   : > { %v3913_v61 = vpack.c.bf16 %v3895_v54, %v3894_v63  ;;  %v3893_v27 = vmax.f32 %v3861_v17, 0.0  ;;  %v3796_v47 = vmul.f32 %v12038_v60, %v3764_v52  ;;  %v3762_v10 = vadd.f32 %v3721_v15, %v3260_v43  ;;  %4177 = vst.msk [vmem:[#allocation2 + $0xc] sm:$0xf] %vm4173_vm11, %v10283_v12  ;;  %4178 = vst.msk [vmem:[#allocation2 + $0x10] sm:$0xf] %vm4173_vm11, %v10283_v12 }
 0x22e   : > { %v3864_v49 = vadd.f32 %v11762_v19, %v3825_v2  ;;  %v3898_v55 = vmax.f32 %v3866_v22, 0.0  ;;  %4180 = vst.msk [vmem:[#allocation2 + $0x18] sm:$0xf] %vm4173_vm11, %v10283_v12  ;;  %4181 = vst.msk [vmem:[#allocation2 + $0x1c] sm:$0xf] %vm4173_vm11, %v10283_v12  ;;  %9961 = vmatprep.subr.msk.bf16.mxu0 %vm4695_vm6, %v12108_v34 }
 0x22f   : > { %v3912_v35 = vpack.c.bf16 %v3893_v27, %v3892_v4  ;;  %v3828_v36 = vadd.f32 %v3796_v47, %v13893_v51  ;;  %v3794_v16 = vmul.f32 %v12048_v37, %v3762_v10  ;;  %4182 = vst.msk [vmem:[#allocation2 + $0x20] sm:$0xf] %vm4173_vm11, %v10283_v12  ;;  %4183 = vst.msk [vmem:[#allocation2 + $0x24] sm:$0xf] %vm4173_vm11, %v10283_v12  ;;  %v12115_v32 = vld [vmem:[%s13591_s5 + $0x10] sm:$0xf] }
 0x230   : > { %v3896_v23 = vmax.f32 %v3864_v49, 0.0  ;;  %4184 = vst.msk [vmem:[#allocation2 + $0x28] sm:$0xf] %vm4173_vm11, %v10283_v12  ;;  %4185 = vst.msk [vmem:[#allocation2 + $0x2c] sm:$0xf] %vm4173_vm11, %v10283_v12 }
 0x231   : > { %9594 = vmatprep.mubr.msk.bf16.mxu1 %vm3931_vm12, %v3912_v35  ;;  %v3867_v28 = vadd.f32 %v11762_v19, %v3828_v36  ;;  %v3826_v3 = vadd.f32 %v3794_v16, %v2609_v20  ;;  %4186 = vst.msk [vmem:[#allocation2 + $0x30] sm:$0xf] %vm4173_vm11, %v10283_v12  ;;  %4187 = vst.msk [vmem:[#allocation2 + $0x34] sm:$0xf] %vm4173_vm11, %v10283_v12 }
 0x232   : > { %9595 = vmatmul.mubr.msk.bf16.gmra.mxu1 %vm3931_vm12, %v3913_v61  ;;  %4188 = vst.msk [vmem:[#allocation2 + $0x38] sm:$0xf] %vm4173_vm11, %v10283_v12  ;;  %4189 = vst.msk [vmem:[#allocation2 + $0x3c] sm:$0xf] %vm4173_vm11, %v10283_v12  ;;  %v4372_v40 = vld [vmem:[#allocation2] sm:$0x8] }
 0x233   : > { %v3899_v13 = vmax.f32 %v3867_v28, 0.0  ;;  %v3865_v6 = vadd.f32 %v11762_v19, %v3826_v3  ;;  %4190 = vst.msk [vmem:[#allocation2 + $0x40] sm:$0xf] %vm4173_vm11, %v10283_v12  ;;  %4191 = vst.msk [vmem:[#allocation2 + $0x44] sm:$0xf] %vm4173_vm11, %v10283_v12 }
 0x234   : > { %4192 = vst.msk [vmem:[#allocation2 + $0x48] sm:$0xf] %vm4173_vm11, %v10283_v12  ;;  %4193 = vst.msk [vmem:[#allocation2 + $0x4c] sm:$0xf] %vm4173_vm11, %v10283_v12  ;;  %v4405_v19 = vld [vmem:[%s13591_s5] sm:$0xf] }
 0x235   : > { %v3915_v5 = vpack.c.bf16 %v3899_v13, %v3898_v55  ;;  %v3897_v29 = vmax.f32 %v3865_v6, 0.0  ;;  %4194 = vst.msk [vmem:[#allocation2 + $0x50] sm:$0xf] %vm4173_vm11, %v10283_v12  ;;  %4195 = vst.msk [vmem:[#allocation2 + $0x54] sm:$0xf] %vm4173_vm11, %v10283_v12  ;;  %9960 = vmatprep.subr.msk.bf16.mxu1 %vm4695_vm6, %v4405_v19  ;;  %v4906_v0 = vsel %vm4695_vm6, %v4405_v19, 0 }
 0x236   : > { %4196 = vst.msk [vmem:[#allocation2 + $0x58] sm:$0xf] %vm4173_vm11, %v10283_v12  ;;  %4197 = vst.msk [vmem:[#allocation2 + $0x5c] sm:$0xf] %vm4173_vm11, %v10283_v12  ;;  %9637 = vmatpush3.bf16.msra.mxu1 %v4906_v0  ;;  %v4373_v30 = vld [vmem:[#allocation2 + $0x4] sm:$0xf] }
 0x237   : > { %v3914_v48 = vpack.c.bf16 %v3897_v29, %v3896_v23  ;;  %4198 = vst.msk [vmem:[#allocation2 + $0x60] sm:$0xf] %vm4173_vm11, %v10283_v12  ;;  %4199 = vst.msk [vmem:[#allocation2 + $0x64] sm:$0xf] %vm4173_vm11, %v10283_v12  ;;  %9962 = vmatprep.subr.msk.bf16.mxu1 %vm4695_vm6, %v12115_v32  ;;  %v8639_v25 = vcombine.low %v4372_v40, %v4373_v30  ;;  %v4374_v49 = vld [vmem:[#allocation2 + $0x8] sm:$0xf] }
 0x238   : > { %4200 = vst.msk [vmem:[#allocation2 + $0x68] sm:$0xf] %vm4173_vm11, %v10283_v12  ;;  %4201 = vst.msk [vmem:[#allocation2 + $0x6c] sm:$0xf] %vm4173_vm11, %v10283_v12  ;;  %v4406_v3 = vld [vmem:[#allocation2 + $0x8] sm:$0x8] }
 0x239   : > { %9598 = vmatprep.mubr.msk.bf16.mxu1 %vm3931_vm12, %v3914_v48  ;;  %4202 = vst.msk [vmem:[#allocation2 + $0x70] sm:$0xf] %vm4173_vm11, %v10283_v12  ;;  %4203 = vst.msk [vmem:[#allocation2 + $0x74] sm:$0xf] %vm4173_vm11, %v10283_v12  ;;  %v4870_v61 = vshrl.u32 %v8639_v25, 16  ;;  %v4873_v14 = vshll.u32 %v8639_v25, 16 }
 0x23a   : > { %9599 = vmatmul.mubr.msk.bf16.gmra.mxu1 %vm3931_vm12, %v3915_v5  ;;  %4204 = vst.msk [vmem:[#allocation2 + $0x78] sm:$0xf] %vm4173_vm11, %v10283_v12  ;;  %4205 = vst.msk [vmem:[#allocation2 + $0x7c] sm:$0xf] %vm4173_vm11, %v10283_v12  ;;  %vm4646_vm12 = vcmask 64512  }
 0x23b   : > { %4206 = vst.msk [vmem:[#allocation2 + $0x80] sm:$0xf] %vm4173_vm11, %v10283_v12  ;;  %4207 = vst.msk [vmem:[#allocation2 + $0x84] sm:$0xf] %vm4173_vm11, %v10283_v12  ;;  %v4872_v22 = vrot.slane %v4870_v61, 3  ;;  %v4875_v28 = vrot.slane %v4873_v14, 4 }
 0x23c   : > { %4208 = vst.msk [vmem:[#allocation2 + $0x88] sm:$0xf] %vm4173_vm11, %v10283_v12  ;;  %4209 = vst.msk [vmem:[#allocation2 + $0x8c] sm:$0xf] %vm4173_vm11, %v10283_v12 }
 0x23d   : > { %4210 = vst.msk [vmem:[#allocation2 + $0x90] sm:$0xf] %vm4173_vm11, %v10283_v12  ;;  %4211 = vst.msk [vmem:[#allocation2 + $0x94] sm:$0xf] %vm4173_vm11, %v10283_v12 }
 0x2c2   : > { %v9572_v11 = vpop.f32.mrf.mxu1 }
 0x2c3   : > { %v4023_v24 = vadd.f32 %v9572_v11, %v12122_v41 }
 0x2c4   : > { %v4014_v33 = vpop.f32.mrf.mxu1 }
 0x2c5   : > { %v4143_v63 = vmax.f32 %v4023_v24, 0.0  ;;  %v4015_v54 = vadd.f32 %v12122_v41, %v4014_v33  ;;  %7900 = vrot.lane.b32.xlu1 %v4023_v24, %s10284_s22  ;;  %v4876_v24 = vor.u32 %v4875_v28, %v4872_v22 }
 0x2c6   : > { %v9573_v17 = vpop.f32.mrf.mxu1 }
 0x2c7   : > { %v8889_v42 = vpack.c.bf16 %v4143_v63, %v4143_v63  ;;  %v4141_v2 = vmax.f32 %v4015_v54, 0.0  ;;  %v4026_v57 = vadd.f32 %v9573_v17, %v12122_v41  ;;  %7896 = vrot.lane.b32.xlu0 %v4015_v54, %s10284_s22 }
 0x2c8   : > { %v4017_v44 = vpop.f32.mrf.mxu1 }
 0x2c9   : > { %4342 = vst.msk [vmem:[#allocation2 + $0x14] sm:$0xf] %vm4173_vm11, %v8889_v42  ;;  %v8887_v31 = vpack.c.bf16 %v4141_v2, %v4141_v2  ;;  %v4144_v46 = vmax.f32 %v4026_v57, 0.0  ;;  %v4018_v43 = vadd.f32 %v12122_v41, %v4017_v44  ;;  %7902 = vrot.lane.b32.xlu1 %v4026_v57, %s10284_s22 }
 0x2ca   : > { %v9576_v4 = vpop.f32.mrf.mxu1 }
 0x2cb   : > { %4340 = vst.msk [vmem:[#allocation2 + $0xc] sm:$0xf] %vm4173_vm11, %v8887_v31  ;;  %v8890_v52 = vpack.c.bf16 %v4144_v46, %v4144_v46  ;;  %v4142_v15 = vmax.f32 %v4018_v43, 0.0  ;;  %7898 = vrot.lane.b32.xlu0 %v4018_v43, %s10284_s22  ;;  %v4039_v27 = vadd.f32 %v9576_v4, %v12122_v41 }
 0x2cc   : > { %v4030_v47 = vpop.f32.mrf.mxu1 }
 0x2cd   : > { %4343 = vst.msk [vmem:[#allocation2 + $0x18] sm:$0xf] %vm4173_vm11, %v8890_v52  ;;  %v8888_v18 = vpack.c.bf16 %v4142_v15, %v4142_v15  ;;  %v4147_v10 = vmax.f32 %v4039_v27, 0.0  ;;  %v4031_v35 = vadd.f32 %v12122_v41, %v4030_v47 }
 0x2ce   : > { %v9577_v20 = vpop.f32.mrf.mxu1 }
 0x2cf   : > { %4341 = vst.msk [vmem:[#allocation2 + $0x10] sm:$0xf] %vm4173_vm11, %v8888_v18  ;;  %v8893_v51 = vpack.c.bf16 %v4147_v10, %v4147_v10  ;;  %v4145_v36 = vmax.f32 %v4031_v35, 0.0  ;;  %v4042_v16 = vadd.f32 %v9577_v20, %v12122_v41  ;;  %7904 = vrot.lane.b32.xlu0 %v4031_v35, %s10284_s22 }
 0x2d0   : > { %v4033_v55 = vpop.f32.mrf.mxu1  ;;  %v4377_v33 = vld [vmem:[#allocation2 + $0x14] sm:$0xf] }
 0x2d1   : > { %4346 = vst.msk [vmem:[#allocation2 + $0x24] sm:$0xf] %vm4173_vm11, %v8893_v51  ;;  %v8891_v13 = vpack.c.bf16 %v4145_v36, %v4145_v36  ;;  %v4148_v6 = vmax.f32 %v4042_v16, 0.0  ;;  %v4034_v23 = vadd.f32 %v12122_v41, %v4033_v55 }
 0x2d2   : > { %v4375_v5 = vld [vmem:[#allocation2 + $0xc] sm:$0xf]  ;;  %v9580_v29 = vpop.f32.mrf.mxu1 }
 0x2d3   : > { %v8640_v48 = vcombine.low %v4374_v49, %v4375_v5  ;;  %v8606_v12 = vcombine.low %v4406_v3, %v4375_v5  ;;  %4344 = vst.msk [vmem:[#allocation2 + $0x1c] sm:$0xf] %vm4173_vm11, %v8891_v13  ;;  %v8894_v19 = vpack.c.bf16 %v4148_v6, %v4148_v6  ;;  %v4146_v0 = vmax.f32 %v4034_v23, 0.0  ;;  %7906 = vrot.lane.b32.xlu1 %v4034_v23, %s10284_s22 }
 0x2d4   : > { %v4055_v11 = vadd.f32 %v9580_v29, %v12122_v41  ;;  %7908 = vrot.lane.b32.xlu0 %v4039_v27, %s10284_s22  ;;  %v4378_v40 = vld [vmem:[#allocation2 + $0x18] sm:$0xf]  ;;  %v4046_v30 = vpop.f32.mrf.mxu1 }
 0x2d5   : > { %v4878_v63 = vshrl.u32 %v8640_v48, 16  ;;  %v4881_v54 = vshll.u32 %v8640_v48, 16  ;;  %v4495_v17 = vshrl.u32 %v8606_v12, 16  ;;  %v4498_v42 = vshll.u32 %v8606_v12, 16  ;;  %4347 = vst.msk [vmem:[#allocation2 + $0x28] sm:$0xf] %vm4173_vm11, %v8894_v19 }
 0x2d6   : > { %v8892_v2 = vpack.c.bf16 %v4146_v0, %v4146_v0  ;;  %v4151_v57 = vmax.f32 %v4055_v11, 0.0  ;;  %v4047_v25 = vadd.f32 %v12122_v41, %v4046_v30  ;;  %v4376_v44 = vld [vmem:[#allocation2 + $0x10] sm:$0xf]  ;;  %v12148_v31 = vcombine.low %v4377_v33, %v4378_v40  ;;  %v9581_v46 = vpop.f32.mrf.mxu1 }
 0x2d7   : > { %v4880_v43 = vrot.slane %v4878_v63, 3  ;;  %v4883_v52 = vrot.slane %v4881_v54, 4  ;;  %v8607_v15 = vcombine.low %v4376_v44, %v4377_v33  ;;  %v4497_v4 = vrot.slane %v4495_v17, 3  ;;  %7910 = vrot.lane.b32.xlu1 %v4042_v16, %s10284_s22 }
 0x2d8   : > { %4345 = vst.msk [vmem:[#allocation2 + $0x20] sm:$0xf] %vm4173_vm11, %v8892_v2  ;;  %v8897_v61 = vpack.c.bf16 %v4151_v57, %v4151_v57  ;;  %v4149_v27 = vmax.f32 %v4047_v25, 0.0  ;;  %v4058_v14 = vadd.f32 %v9581_v46, %v12122_v41  ;;  %7912 = vrot.lane.b32.xlu0 %v4047_v25, %s10284_s22  ;;  %v4500_v18 = vrot.slane %v4498_v42, 4  ;;  %v4049_v47 = vpop.f32.mrf.mxu1 }
 0x2d9   : > { %v4884_v10 = vor.u32 %v4883_v52, %v4880_v43  ;;  %v4503_v35 = vshrl.u32 %v8607_v15, 16  ;;  %v4506_v20 = vshll.u32 %v8607_v15, 16  ;;  %v12154_v22 = vcombine.low %v4375_v5, %v4376_v44  ;;  %v12184_v43 = vld [vmem:[%s13591_s5 + $0x1c] sm:$0xf] }
 0x2da   : > { %4350 = vst.msk [vmem:[#allocation2 + $0x34] sm:$0xf] %vm4173_vm11, %v8897_v61  ;;  %v8895_v51 = vpack.c.bf16 %v4149_v27, %v4149_v27  ;;  %v4152_v36 = vmax.f32 %v4058_v14, 0.0  ;;  %v4050_v49 = vadd.f32 %v12122_v41, %v4049_v47  ;;  %v9584_v28 = vpop.f32.mrf.mxu1  ;;  %v12159_v16 = vld [vmem:[#allocation2 + $0x1c] sm:$0xf]  ;;  %v4501_v12 = vor.u32 %v4500_v18, %v4497_v4 }
 0x2db   : > { %v4885_v3 = vsel %vm764_vm1, %v4876_v24, %v4884_v10  ;;  %v4505_v55 = vrot.slane %v4503_v35, 3  ;;  %v4508_v13 = vrot.slane %v4506_v20, 4  ;;  %v4071_v5 = vadd.f32 %v9584_v28, %v12122_v41 }
 0x2dc   : > { %4348 = vst.msk [vmem:[#allocation2 + $0x2c] sm:$0xf] %vm4173_vm11, %v8895_v51  ;;  %v8898_v6 = vpack.c.bf16 %v4152_v36, %v4152_v36  ;;  %v4150_v23 = vmax.f32 %v4050_v49, 0.0  ;;  %7914 = vrot.lane.b32.xlu1 %v4050_v49, %s10284_s22  ;;  %7916 = vrot.lane.b32.xlu0 %v4055_v11, %s10284_s22  ;;  %v8608_v29 = vcombine.low %v4378_v40, %v12159_v16  ;;  %v4062_v48 = vpop.f32.mrf.mxu1  ;;  %v12173_v40 = vld [vmem:[#allocation2 + $0x24] sm:$0xf]  ;;  %v5716_v2 = vsel %vm4695_vm6, %v12115_v32, 0 }
 0x2dd   : > { %9638 = vmatprep.mubr.msk.bf16.mxu1 %vm4646_vm12, %v4885_v3  ;;  %v4509_v19 = vor.u32 %v4508_v13, %v4505_v55  ;;  %v4155_v24 = vmax.f32 %v4071_v5, 0.0  ;;  %v4063_v33 = vadd.f32 %v12122_v41, %v4062_v48  ;;  %v12194_v20 = vld [vmem:[#allocation2 + $0x28] sm:$0xf] }
 0x2de   : > { %4351 = vst.msk [vmem:[#allocation2 + $0x38] sm:$0xf] %vm4173_vm11, %v8898_v6  ;;  %v8896_v0 = vpack.c.bf16 %v4150_v23, %v4150_v23  ;;  %v4512_v30 = vshrl.u32 %v8608_v29, 16  ;;  %v9585_v63 = vpop.f32.mrf.mxu1  ;;  %v4515_v17 = vshll.u32 %v8608_v29, 16  ;;  %v12408_v62 = vld [vmem:[#allocation2 + $0x28] sm:$0xf] }
 0x2df   : > { %v4510_v54 = vsel %vm764_vm1, %v4501_v12, %v4509_v19  ;;  %v4886_v11 = vsel %vm764_vm1, %v4884_v10, %v4509_v19  ;;  %v12171_v42 = vld [vmem:[#allocation2 + $0x20] sm:$0xf]  ;;  %v8901_v57 = vpack.c.bf16 %v4155_v24, %v4155_v24  ;;  %v4153_v25 = vmax.f32 %v4063_v33, 0.0 }
 0x2e0   : > { %4349 = vst.msk [vmem:[#allocation2 + $0x30] sm:$0xf] %vm4173_vm11, %v8896_v0  ;;  %v4074_v44 = vadd.f32 %v9585_v63, %v12122_v41  ;;  %7918 = vrot.lane.b32.xlu1 %v4058_v14, %s10284_s22  ;;  %7920 = vrot.lane.b32.xlu0 %v4063_v33, %s10284_s22  ;;  %v4514_v46 = vrot.slane %v4512_v30, 3  ;;  %v4065_v52 = vpop.f32.mrf.mxu1  ;;  %v4517_v32 = vrot.slane %v4515_v17, 4  ;;  %v8609_v15 = vcombine.low %v12171_v42, %v12173_v40 }
 0x2e1   : > { %9604 = vmatprep.mubr.msk.bf16.mxu0 %vm4646_vm12, %v4510_v54  ;;  %9639 = vmatmul.mubr.msk.bf16.vlgmr.msra.gmra.mxu1 %vm4646_vm12, %v4886_v11  ;;  %4354 = vst.msk [vmem:[#allocation2 + $0x44] sm:$0xf] %vm4173_vm11, %v8901_v57  ;;  %v8899_v4 = vpack.c.bf16 %v4153_v25, %v4153_v25  ;;  %v4066_v27 = vadd.f32 %v12122_v41, %v4065_v52  ;;  %v5388_v14 = vsel %vm4695_vm6, %v12108_v34, 0  ;;  %v12222_v11 = vld [vmem:[#allocation2 + $0x34] sm:$0xf] }
 0x2e2   : > { %v4156_v61 = vmax.f32 %v4074_v44, 0.0  ;;  %9705 = vmatpush3.bf16.msra.mxu1 %v5716_v2  ;;  %v9588_v18 = vpop.f32.mrf.mxu1  ;;  %v4518_v47 = vor.u32 %v4517_v32, %v4514_v46  ;;  %v4521_v10 = vshrl.u32 %v8609_v15, 16  ;;  %v4524_v35 = vshll.u32 %v8609_v15, 16 }
 0x2e3   : > { %v12196_v51 = vld [vmem:[#allocation2 + $0x2c] sm:$0xf]  ;;  %9964 = vmatprep.subr.msk.bf16.mxu1 %vm4695_vm6, %v12184_v43  ;;  %4352 = vst.msk [vmem:[#allocation2 + $0x3c] sm:$0xf] %vm4173_vm11, %v8899_v4  ;;  %v4154_v49 = vmax.f32 %v4066_v27, 0.0  ;;  %v4087_v28 = vadd.f32 %v9588_v18, %v12122_v41 }
 0x2e4   : > { %v8902_v36 = vpack.c.bf16 %v4156_v61, %v4156_v61  ;;  %7922 = vrot.lane.b32.xlu1 %v4066_v27, %s10284_s22  ;;  %7924 = vrot.lane.b32.xlu0 %v4071_v5, %s10284_s22  ;;  %v8610_v34 = vcombine.low %v12194_v20, %v12196_v51  ;;  %v4078_v3 = vpop.f32.mrf.mxu1  ;;  %v4519_v55 = vsel %vm764_vm1, %v4509_v19, %v4518_v47  ;;  %v4523_v13 = vrot.slane %v4521_v10, 3  ;;  %v12214_v5 = vld [vmem:[%s13591_s5 + $0x4] sm:$0xf]  ;;  %v12405_v26 = vld [vmem:[#allocation2 + $0x2c] sm:$0xf] }
 0x2e5   : > { %v4526_v6 = vrot.slane %v4524_v35, 4  ;;  %v8900_v23 = vpack.c.bf16 %v4154_v49, %v4154_v49  ;;  %v4159_v29 = vmax.f32 %v4087_v28, 0.0  ;;  %v4079_v48 = vadd.f32 %v12122_v41, %v4078_v3  ;;  %9605 = vmatmul.mubr.msk.bf16.vlgmr.msra.gmra.mxu0 %vm4646_vm12, %v4519_v55  ;;  %9642 = vmatprep.mubr.msk.bf16.mxu1 %vm4646_vm12, %v4519_v55  ;;  %v12243_v49 = vld [vmem:[#allocation2 + $0x20] sm:$0xf] }
 0x2e6   : > { %4355 = vst.msk [vmem:[#allocation2 + $0x48] sm:$0xf] %vm4173_vm11, %v8902_v36  ;;  %v4530_v12 = vshrl.u32 %v8610_v34, 16  ;;  %9671 = vmatpush3.bf16.msra.mxu0 %v5388_v14  ;;  %v9589_v19 = vpop.f32.mrf.mxu1  ;;  %v4533_v24 = vshll.u32 %v8610_v34, 16  ;;  %v12233_v14 = vld [vmem:[#allocation2 + $0x38] sm:$0xf] }
 0x2e7   : > { %v4527_v0 = vor.u32 %v4526_v6, %v4523_v13  ;;  %v12216_v33 = vld [vmem:[#allocation2 + $0x30] sm:$0xf]  ;;  %4353 = vst.msk [vmem:[#allocation2 + $0x40] sm:$0xf] %vm4173_vm11, %v8900_v23  ;;  %v8905_v30 = vpack.c.bf16 %v4159_v29, %v4159_v29  ;;  %v4157_v63 = vmax.f32 %v4079_v48, 0.0  ;;  %v4090_v54 = vadd.f32 %v9589_v19, %v12122_v41  ;;  %9963 = vmatprep.subr.msk.bf16.mxu0 %vm4695_vm6, %v12214_v5 }
 0x2e8   : > { %7926 = vrot.lane.b32.xlu1 %v4074_v44, %s10284_s22  ;;  %7928 = vrot.lane.b32.xlu0 %v4079_v48, %s10284_s22  ;;  %v4532_v17 = vrot.slane %v4530_v12, 3  ;;  %v4081_v2 = vpop.f32.mrf.mxu1  ;;  %v4535_v25 = vrot.slane %v4533_v24, 4  ;;  %v8611_v46 = vcombine.low %v12216_v33, %v12222_v11  ;;  %v12250_v48 = vld [vmem:[#allocation2 + $0x1c] sm:$0xf]  ;;  %v12410_v7 = vld [vmem:[#allocation2 + $0x30] sm:$0xf] }
 0x2e9   : > { %v4528_v57 = vsel %vm764_vm1, %v4518_v47, %v4527_v0  ;;  %4358 = vst.msk [vmem:[#allocation2 + $0x54] sm:$0xf] %vm4173_vm11, %v8905_v30  ;;  %v8903_v52 = vpack.c.bf16 %v4157_v63, %v4157_v63  ;;  %v4160_v32 = vmax.f32 %v4090_v54, 0.0  ;;  %v4082_v44 = vadd.f32 %v12122_v41, %v4081_v2 }
 0x2ea   : > { %9608 = vmatprep.mubr.msk.bf16.mxu0 %vm4646_vm12, %v4528_v57  ;;  %9643 = vmatmul.mubr.msk.bf16.gmra.mxu1 %vm4646_vm12, %v4528_v57  ;;  %v9592_v15 = vpop.f32.mrf.mxu1  ;;  %v4536_v4 = vor.u32 %v4535_v25, %v4532_v17  ;;  %v4539_v61 = vshrl.u32 %v8611_v46, 16  ;;  %v4542_v27 = vshll.u32 %v8611_v46, 16  ;;  %v12235_v18 = vld [vmem:[#allocation2 + $0x3c] sm:$0xf]  ;;  %v12260_v17 = vcombine.low %v12159_v16, %v12171_v42 }
 0x2eb   : > { %4356 = vst.msk [vmem:[#allocation2 + $0x4c] sm:$0xf] %vm4173_vm11, %v8903_v52  ;;  %v8906_v47 = vpack.c.bf16 %v4160_v32, %v4160_v32  ;;  %v4158_v10 = vmax.f32 %v4082_v44, 0.0  ;;  %v4103_v35 = vadd.f32 %v9592_v15, %v12122_v41  ;;  %v8612_v36 = vcombine.low %v12233_v14, %v12235_v18 }
 0x2ec   : > { %7930 = vrot.lane.b32.xlu1 %v4082_v44, %s10284_s22  ;;  %7932 = vrot.lane.b32.xlu0 %v4087_v28, %s10284_s22  ;;  %v4094_v34 = vpop.f32.mrf.mxu1  ;;  %v4537_v3 = vsel %vm764_vm1, %v4527_v0, %v4536_v4  ;;  %v4541_v55 = vrot.slane %v4539_v61, 3  ;;  %v4544_v13 = vrot.slane %v4542_v27, 4  ;;  %v12254_v0 = vld [vmem:[#allocation2 + $0x44] sm:$0xf] }
 0x2ed   : > { %4359 = vst.msk [vmem:[#allocation2 + $0x58] sm:$0xf] %vm4173_vm11, %v8906_v47  ;;  %v8904_v6 = vpack.c.bf16 %v4158_v10, %v4158_v10  ;;  %v4163_v23 = vmax.f32 %v4103_v35, 0.0  ;;  %v4095_v29 = vadd.f32 %v12122_v41, %v4094_v34  ;;  %9609 = vmatmul.mubr.msk.bf16.gmra.mxu0 %vm4646_vm12, %v4537_v3  ;;  %9646 = vmatprep.mubr.msk.bf16.mxu1 %vm4646_vm12, %v4537_v3  ;;  %v4548_v28 = vshrl.u32 %v8612_v36, 16 }
 0x2ee   : > { %v9593_v12 = vpop.f32.mrf.mxu1  ;;  %v4545_v19 = vor.u32 %v4544_v13, %v4541_v55  ;;  %v4551_v24 = vshll.u32 %v8612_v36, 16  ;;  %v12252_v30 = vld [vmem:[#allocation2 + $0x40] sm:$0xf]  ;;  %v12273_v36 = vld [vmem:[#allocation2 + $0x48] sm:$0xf] }
 0x2ef   : > { %4357 = vst.msk [vmem:[#allocation2 + $0x50] sm:$0xf] %vm4173_vm11, %v8904_v6  ;;  %v8909_v2 = vpack.c.bf16 %v4163_v23, %v4163_v23  ;;  %v4161_v57 = vmax.f32 %v4095_v29, 0.0  ;;  %v4106_v25 = vadd.f32 %v9593_v12, %v12122_v41  ;;  %v4550_v46 = vrot.slane %v4548_v28, 3 }
 0x2f0   : > { %7934 = vrot.lane.b32.xlu1 %v4090_v54, %s10284_s22  ;;  %7936 = vrot.lane.b32.xlu0 %v4095_v29, %s10284_s22  ;;  %v4097_v52 = vpop.f32.mrf.mxu1  ;;  %v4546_v32 = vsel %vm764_vm1, %v4536_v4, %v4545_v19  ;;  %v4553_v44 = vrot.slane %v4551_v24, 4  ;;  %v8613_v15 = vcombine.low %v12252_v30, %v12254_v0 }
 0x2f1   : > { %4362 = vst.msk [vmem:[#allocation2 + $0x64] sm:$0xf] %vm4173_vm11, %v8909_v2  ;;  %v8907_v16 = vpack.c.bf16 %v4161_v57, %v4161_v57  ;;  %v4164_v42 = vmax.f32 %v4106_v25, 0.0  ;;  %v4098_v61 = vadd.f32 %v12122_v41, %v4097_v52  ;;  %9612 = vmatprep.mubr.msk.bf16.mxu0 %vm4646_vm12, %v4546_v32 }
 0x2f2   : > { %9647 = vmatmul.mubr.msk.bf16.gmra.mxu1 %vm4646_vm12, %v4546_v32  ;;  %v9596_v54 = vpop.f32.mrf.mxu1  ;;  %v4554_v27 = vor.u32 %v4553_v44, %v4550_v46  ;;  %v4557_v47 = vshrl.u32 %v8613_v15, 16  ;;  %v4560_v10 = vshll.u32 %v8613_v15, 16  ;;  %v12275_v4 = vld [vmem:[#allocation2 + $0x4c] sm:$0xf] }
 0x2f3   : > { %4360 = vst.msk [vmem:[#allocation2 + $0x5c] sm:$0xf] %vm4173_vm11, %v8907_v16  ;;  %v8910_v34 = vpack.c.bf16 %v4164_v42, %v4164_v42  ;;  %v4162_v3 = vmax.f32 %v4098_v61, 0.0  ;;  %v4119_v55 = vadd.f32 %v9596_v54, %v12122_v41  ;;  %v8614_v13 = vcombine.low %v12273_v36, %v12275_v4  ;;  %v12294_v42 = vld [vmem:[#allocation2 + $0x54] sm:$0xf] }
 0x2f4   : > { %7938 = vrot.lane.b32.xlu1 %v4098_v61, %s10284_s22  ;;  %7940 = vrot.lane.b32.xlu0 %v4103_v35, %s10284_s22  ;;  %v4110_v6 = vpop.f32.mrf.mxu1  ;;  %v4555_v23 = vsel %vm764_vm1, %v4545_v19, %v4554_v27  ;;  %v4559_v29 = vrot.slane %v4557_v47, 3  ;;  %v4562_v28 = vrot.slane %v4560_v10, 4 }
 0x2f5   : > { %4363 = vst.msk [vmem:[#allocation2 + $0x68] sm:$0xf] %vm4173_vm11, %v8910_v34  ;;  %v8908_v12 = vpack.c.bf16 %v4162_v3, %v4162_v3  ;;  %v4167_v24 = vmax.f32 %v4119_v55, 0.0  ;;  %v4111_v2 = vadd.f32 %v12122_v41, %v4110_v6  ;;  %9613 = vmatmul.mubr.msk.bf16.gmra.mxu0 %vm4646_vm12, %v4555_v23  ;;  %9650 = vmatprep.mubr.msk.bf16.mxu1 %vm4646_vm12, %v4555_v23  ;;  %v4566_v57 = vshrl.u32 %v8614_v13, 16 }
 0x2f6   : > { %v9597_v35 = vpop.f32.mrf.mxu1  ;;  %v4563_v46 = vor.u32 %v4562_v28, %v4559_v29  ;;  %v4569_v52 = vshll.u32 %v8614_v13, 16  ;;  %v12288_v32 = vld [vmem:[#allocation2 + $0x50] sm:$0xf]  ;;  %v12303_v28 = vld [vmem:[#allocation2 + $0x58] sm:$0xf] }
 0x2f7   : > { %4361 = vst.msk [vmem:[#allocation2 + $0x60] sm:$0xf] %vm4173_vm11, %v8908_v12  ;;  %v8913_v19 = vpack.c.bf16 %v4167_v24, %v4167_v24  ;;  %v4165_v44 = vmax.f32 %v4111_v2, 0.0  ;;  %v4122_v15 = vadd.f32 %v9597_v35, %v12122_v41  ;;  %v4568_v16 = vrot.slane %v4566_v57, 3 }
 0x2f8   : > { %7942 = vrot.lane.b32.xlu1 %v4106_v25, %s10284_s22  ;;  %7944 = vrot.lane.b32.xlu0 %v4111_v2, %s10284_s22  ;;  %v4113_v61 = vpop.f32.mrf.mxu1  ;;  %v4564_v54 = vsel %vm764_vm1, %v4554_v27, %v4563_v46  ;;  %v4571_v47 = vrot.slane %v4569_v52, 4  ;;  %v8615_v10 = vcombine.low %v12288_v32, %v12294_v42  ;;  %v12309_v12 = vcombine.low %v12173_v40, %v12194_v20 }
 0x2f9   : > { %4366 = vst.msk [vmem:[#allocation2 + $0x74] sm:$0xf] %vm4173_vm11, %v8913_v19  ;;  %v8911_v34 = vpack.c.bf16 %v4165_v44, %v4165_v44  ;;  %v4168_v3 = vmax.f32 %v4122_v15, 0.0  ;;  %v4114_v13 = vadd.f32 %v12122_v41, %v4113_v61  ;;  %9616 = vmatprep.mubr.msk.bf16.mxu0 %vm4646_vm12, %v4564_v54 }
 0x2fa   : > { %9651 = vmatmul.mubr.msk.bf16.gmra.mxu1 %vm4646_vm12, %v4564_v54  ;;  %v9600_v25 = vpop.f32.mrf.mxu1  ;;  %v4572_v6 = vor.u32 %v4571_v47, %v4568_v16  ;;  %v4575_v23 = vshrl.u32 %v8615_v10, 16  ;;  %v4578_v29 = vshll.u32 %v8615_v10, 16  ;;  %v12305_v27 = vld [vmem:[#allocation2 + $0x5c] sm:$0xf] }
 0x2fb   : > { %4364 = vst.msk [vmem:[#allocation2 + $0x6c] sm:$0xf] %vm4173_vm11, %v8911_v34  ;;  %v8914_v24 = vpack.c.bf16 %v4168_v3, %v4168_v3  ;;  %v4166_v2 = vmax.f32 %v4114_v13, 0.0  ;;  %v4135_v57 = vadd.f32 %v9600_v25, %v12122_v41  ;;  %v8616_v35 = vcombine.low %v12303_v28, %v12305_v27  ;;  %v12324_v3 = vld [vmem:[#allocation2 + $0x64] sm:$0xf] }
 0x2fc   : > { %7946 = vrot.lane.b32.xlu1 %v4114_v13, %s10284_s22  ;;  %7948 = vrot.lane.b32.xlu0 %v4119_v55, %s10284_s22  ;;  %v4126_v52 = vpop.f32.mrf.mxu1  ;;  %v4573_v19 = vsel %vm764_vm1, %v4563_v46, %v4572_v6  ;;  %v4577_v44 = vrot.slane %v4575_v23, 3  ;;  %v4580_v16 = vrot.slane %v4578_v29, 4  ;;  %v12328_v46 = vcombine.low %v12196_v51, %v12216_v33 }
 0x2fd   : > { %4367 = vst.msk [vmem:[#allocation2 + $0x78] sm:$0xf] %vm4173_vm11, %v8914_v24  ;;  %v8912_v40 = vpack.c.bf16 %v4166_v2, %v4166_v2  ;;  %v4171_v20 = vmax.f32 %v4135_v57, 0.0  ;;  %v4127_v61 = vadd.f32 %v12122_v41, %v4126_v52  ;;  %9617 = vmatmul.mubr.msk.bf16.gmra.mxu0 %vm4646_vm12, %v4573_v19  ;;  %9654 = vmatprep.mubr.msk.bf16.mxu1 %vm4646_vm12, %v4573_v19  ;;  %v4584_v54 = vshrl.u32 %v8616_v35, 16 }
 0x2fe   : > { %v9601_v55 = vpop.f32.mrf.mxu1  ;;  %v4581_v47 = vor.u32 %v4580_v16, %v4577_v44  ;;  %v4587_v10 = vshll.u32 %v8616_v35, 16  ;;  %v12322_v34 = vld [vmem:[#allocation2 + $0x60] sm:$0xf]  ;;  %13894 = vst [vmem:[#allocation21_spill] sm:$0xff] %v12328_v46 }
 0x2ff   : > { %4365 = vst.msk [vmem:[#allocation2 + $0x70] sm:$0xf] %vm4173_vm11, %v8912_v40  ;;  %v8917_v13 = vpack.c.bf16 %v4171_v20, %v4171_v20  ;;  %v4169_v25 = vmax.f32 %v4127_v61, 0.0  ;;  %v4138_v23 = vadd.f32 %v9601_v55, %v12122_v41  ;;  %v4586_v29 = vrot.slane %v4584_v54, 3  ;;  %v12341_v40 = vld [vmem:[#allocation2 + $0x68] sm:$0xf] }
 0x300   : > { %7950 = vrot.lane.b32.xlu1 %v4122_v15, %s10284_s22  ;;  %7952 = vrot.lane.b32.xlu0 %v4127_v61, %s10284_s22  ;;  %v4129_v24 = vpop.f32.mrf.mxu1  ;;  %v4582_v2 = vsel %vm764_vm1, %v4572_v6, %v4581_v47  ;;  %v4589_v35 = vrot.slane %v4587_v10, 4  ;;  %v8617_v52 = vcombine.low %v12322_v34, %v12324_v3  ;;  %v12550_v50 = vld [vmem:[#allocation2 + $0x74] sm:$0xf] }
 0x301   : > { %4370 = vst.msk [vmem:[#allocation2 + $0x84] sm:$0xf] %vm4173_vm11, %v8917_v13  ;;  %v8915_v51 = vpack.c.bf16 %v4169_v25, %v4169_v25  ;;  %v4172_v33 = vmax.f32 %v4138_v23, 0.0  ;;  %v4130_v19 = vadd.f32 %v12122_v41, %v4129_v24  ;;  %9620 = vmatprep.mubr.msk.bf16.mxu0 %vm4646_vm12, %v4582_v2  ;;  %v5069_v24 = vld [vmem:[#allocation2 + $0x10] sm:$0x8] }
 0x302   : > { %9655 = vmatmul.mubr.msk.bf16.gmra.mxu1 %vm4646_vm12, %v4582_v2  ;;  %v4590_v15 = vor.u32 %v4589_v35, %v4586_v29  ;;  %v4593_v44 = vshrl.u32 %v8617_v52, 16  ;;  %v4596_v16 = vshll.u32 %v8617_v52, 16  ;;  %v12343_v6 = vld [vmem:[#allocation2 + $0x6c] sm:$0xf]  ;;  %v12358_v52 = vld [vmem:[#allocation2 + $0x14] sm:$0xf] }
 0x303   : > { %4368 = vst.msk [vmem:[#allocation2 + $0x7c] sm:$0xf] %vm4173_vm11, %v8915_v51  ;;  %v8918_v20 = vpack.c.bf16 %v4172_v33, %v4172_v33  ;;  %v4170_v61 = vmax.f32 %v4130_v19, 0.0  ;;  %v8618_v41 = vcombine.low %v12341_v40, %v12343_v6  ;;  %v12548_v21 = vld [vmem:[#allocation2 + $0x6c] sm:$0xf] }
 0x304   : > { %7954 = vrot.lane.b32.xlu1 %v4130_v19, %s10284_s22  ;;  %7956 = vrot.lane.b32.xlu0 %v4135_v57, %s10284_s22  ;;  %v4591_v54 = vsel %vm764_vm1, %v4581_v47, %v4590_v15  ;;  %v4595_v55 = vrot.slane %v4593_v44, 3  ;;  %v4598_v10 = vrot.slane %v4596_v16, 4  ;;  %v12356_v57 = vld [vmem:[#allocation2 + $0x74] sm:$0xf]  ;;  %v12364_v19 = vld [vmem:[#allocation2 + $0x18] sm:$0xf]  ;;  %v12368_v44 = vcombine.low %v12222_v11, %v12233_v14 }
 0x305   : > { %4371 = vst.msk [vmem:[#allocation2 + $0x88] sm:$0xf] %vm4173_vm11, %v8918_v20  ;;  %v8916_v13 = vpack.c.bf16 %v4170_v61, %v4170_v61  ;;  %9621 = vmatmul.mubr.msk.bf16.gmra.mxu0 %vm4646_vm12, %v4591_v54  ;;  %9658 = vmatprep.mubr.msk.bf16.mxu1 %vm4646_vm12, %v4591_v54  ;;  %v4602_v25 = vshrl.u32 %v8618_v41, 16  ;;  %v4605_v29 = vshll.u32 %v8618_v41, 16  ;;  %v8659_v20 = vcombine.low %v5069_v24, %v12358_v52  ;;  %v12380_v11 = vld [vmem:[#allocation2 + $0x78] sm:$0xf] }
 0x306   : > { %v4599_v2 = vor.u32 %v4598_v10, %v4595_v55  ;;  %v12354_v35 = vld [vmem:[#allocation2 + $0x70] sm:$0xf]  ;;  %v8660_v61 = vcombine.low %v12364_v19, %v12250_v48  ;;  %v12378_v55 = vcombine.low %v12235_v18, %v12252_v30 }
 0x307   : > { %4369 = vst.msk [vmem:[#allocation2 + $0x80] sm:$0xf] %vm4173_vm11, %v8916_v13  ;;  %v4604_v47 = vrot.slane %v4602_v25, 3  ;;  %v4607_v51 = vrot.slane %v4605_v29, 4  ;;  %v8619_v33 = vcombine.low %v12354_v35, %v12356_v57  ;;  %v5188_v24 = vshrl.u32 %v8659_v20, 16 }
 0x308   : > { %7958 = vrot.lane.b32.xlu1 %v4138_v23, %s10284_s22  ;;  %v4600_v16 = vsel %vm764_vm1, %v4590_v15, %v4599_v2  ;;  %s8192_s22 = scalar_lea.sflag [#allocation4], %s377_s24 }
 0x309   : > { %9624 = vmatprep.mubr.msk.bf16.mxu0 %vm4646_vm12, %v4600_v16  ;;  %v4608_v23 = vor.u32 %v4607_v51, %v4604_v47  ;;  %v4611_v41 = vshrl.u32 %v8619_v33, 16  ;;  %v4614_v54 = vshll.u32 %v8619_v33, 16  ;;  %v5191_v47 = vshll.u32 %v8659_v20, 16 }
 0x30a   : > { %9659 = vmatmul.mubr.msk.bf16.gmra.mxu1 %vm4646_vm12, %v4600_v16  ;;  %v12382_v14 = vld [vmem:[#allocation2 + $0x7c] sm:$0xf]  ;;  %v5196_v51 = vshrl.u32 %v8660_v61, 16  ;;  %v5199_v16 = vshll.u32 %v8660_v61, 16  ;;  %v12403_v61 = vld [vmem:[#allocation2 + $0x24] sm:$0xf] }
 0x30b   : > { %v4609_v15 = vsel %vm764_vm1, %v4599_v2, %v4608_v23  ;;  %v4613_v10 = vrot.slane %v4611_v41, 3  ;;  %v4616_v13 = vrot.slane %v4614_v54, 4  ;;  %v8620_v25 = vcombine.low %v12380_v11, %v12382_v14  ;;  %v12393_v2 = vld [vmem:[#allocation2 + $0x84] sm:$0xf]  ;;  %v12556_v39 = vld [vmem:[#allocation2 + $0x7c] sm:$0xf] }
 0x30c   : > { %9662 = vmatprep.mubr.msk.bf16.mxu1 %vm4646_vm12, %v4609_v15  ;;  %v12388_v29 = vld [vmem:[#allocation2 + $0x88] sm:$0xf]  ;;  %v5201_v45 = vrot.slane %v5199_v16, 4  ;;  %v8661_v59 = vcombine.low %v12243_v49, %v12403_v61  ;;  %v12416_v16 = vld [vmem:[#allocation2 + $0x34] sm:$0xf] }
 0x30d   : > { %9625 = vmatmul.mubr.msk.bf16.gmra.mxu0 %vm4646_vm12, %v4609_v15  ;;  %v4617_v18 = vor.u32 %v4616_v13, %v4613_v10  ;;  %v4620_v30 = vshrl.u32 %v8620_v25, 16  ;;  %v4623_v33 = vshll.u32 %v8620_v25, 16  ;;  %v8622_v41 = vcombine.low %v12388_v29, %v12388_v29 }
 0x30e   : > { %v12391_v63 = vld [vmem:[#allocation2 + $0x80] sm:$0xf]  ;;  %v5190_v10 = vrot.slane %v5188_v24, 3  ;;  %v5193_v13 = vrot.slane %v5191_v47, 4  ;;  %v5198_v25 = vrot.slane %v5196_v51, 3 }
 0x30f   : > { %v4618_v54 = vsel %vm764_vm1, %v4608_v23, %v4617_v18  ;;  %v4622_v37 = vrot.slane %v4620_v30, 3  ;;  %v4625_v60 = vrot.slane %v4623_v33, 4  ;;  %v8621_v20 = vcombine.low %v12391_v63, %v12393_v2 }
 0x310   : > { %9628 = vmatprep.mubr.msk.bf16.mxu0 %vm4646_vm12, %v4618_v54  ;;  %v8641_v15 = vcombine.low %v12391_v63, %v12391_v63  ;;  %v4638_v56 = vshrl.u32 %v8622_v41, 16  ;;  %v4641_v9 = vshll.u32 %v8622_v41, 16 }
 0x311   : > { %v4626_v23 = vor.u32 %v4625_v60, %v4622_v37  ;;  %v4629_v30 = vshrl.u32 %v8621_v20, 16  ;;  %v4632_v33 = vshll.u32 %v8621_v20, 16  ;;  %v12427_v20 = vcombine.low %v12275_v4, %v12288_v32 }
 0x312   : > { %9663 = vmatmul.mubr.msk.bf16.gmra.mxu1 %vm4646_vm12, %v4618_v54  ;;  %v4888_v53 = vshrl.u32 %v8641_v15, 16  ;;  %v4891_v8 = vshll.u32 %v8641_v15, 16  ;;  %v8662_v54 = vcombine.low %v12408_v62, %v12405_v26 }
 0x313   : > { %v4627_v24 = vsel %vm764_vm1, %v4617_v18, %v4626_v23  ;;  %v4631_v47 = vrot.slane %v4629_v30, 3  ;;  %v4634_v51 = vrot.slane %v4632_v33, 4  ;;  %v12423_v18 = vcombine.low %v12254_v0, %v12273_v36  ;;  %v12438_v36 = vld [vmem:[#allocation2 + $0x3c] sm:$0xf] }
 0x314   : > { %9666 = vmatprep.mubr.msk.bf16.mxu1 %vm4646_vm12, %v4627_v24  ;;  %v4890_v60 = vrot.slane %v4888_v53, 3  ;;  %v4893_v37 = vrot.slane %v4891_v8, 4  ;;  %v4640_v30 = vrot.slane %v4638_v56, 3  ;;  %v4643_v53 = vrot.slane %v4641_v9, 4 }
 0x315   : > { %9629 = vmatmul.mubr.msk.bf16.gmra.mxu0 %vm4646_vm12, %v4627_v24  ;;  %v4635_v41 = vor.u32 %v4634_v51, %v4631_v47  ;;  %v12431_v8 = vcombine.low %v12294_v42, %v12303_v28  ;;  %v5205_v24 = vshrl.u32 %v8661_v59, 16  ;;  %v5208_v47 = vshll.u32 %v8661_v59, 16 }
 0x316   : > { %v4894_v15 = vor.u32 %v4893_v37, %v4890_v60  ;;  %v8663_v51 = vcombine.low %v12410_v7, %v12416_v16  ;;  %v12442_v9 = vcombine.low %v12305_v27, %v12322_v34  ;;  %v5202_v56 = vor.u32 %v5201_v45, %v5198_v25  ;;  %v12455_v37 = vld [vmem:[#allocation2 + $0x38] sm:$0xf] }
 0x317   : > { %v4636_v33 = vsel %vm764_vm1, %v4626_v23, %v4635_v41  ;;  %v5214_v4 = vshrl.u32 %v8662_v54, 16  ;;  %v5217_v32 = vshll.u32 %v8662_v54, 16  ;;  %v4644_v59 = vor.u32 %v4643_v53, %v4640_v30 }
 0x318   : > { %9632 = vmatprep.mubr.msk.bf16.mxu0 %vm4646_vm12, %v4636_v33  ;;  %v4895_v0 = vsel %vm764_vm1, %v4626_v23, %v4894_v15  ;;  %v12449_v42 = vcombine.low %v12324_v3, %v12341_v40  ;;  %v12453_v28 = vcombine.low %v12343_v6, %v12354_v35  ;;  %v5194_v23 = vor.u32 %v5193_v13, %v5190_v10  ;;  %v12463_v10 = vld [vmem:[#allocation2 + $0x40] sm:$0xf] }
 0x319   : > { %v5207_v27 = vrot.slane %v5205_v24, 3  ;;  %v5210_v34 = vrot.slane %v5208_v47, 4  ;;  %v5223_v60 = vshrl.u32 %v8663_v51, 16  ;;  %v4645_v45 = vsel %vm764_vm1, %v4635_v41, %v4644_v59  ;;  %v12475_v47 = vld [vmem:[#allocation2 + $0x44] sm:$0xf] }
 0x31a   : > { %9667 = vmatmul.mubr.msk.bf16.gmra.mxu1 %vm4646_vm12, %v4895_v0  ;;  %v5226_v25 = vshll.u32 %v8663_v51, 16  ;;  %v8664_v54 = vcombine.low %v12455_v37, %v12438_v36  ;;  %v5203_v3 = vsel %vm764_vm1, %v5194_v23, %v5202_v56  ;;  %v5216_v40 = vrot.slane %v5214_v4, 3  ;;  %v12477_v51 = vld [vmem:[#allocation2 + $0x4c] sm:$0xf]  ;;  %v12488_v0 = vld [vmem:[#allocation2 + $0x48] sm:$0xf] }
 0x31b   : > { %9706 = vmatprep.mubr.msk.bf16.mxu1 %vm4646_vm12, %v12154_v22  ;;  %v5219_v15 = vrot.slane %v5217_v32, 4  ;;  %v5211_v6 = vor.u32 %v5210_v34, %v5207_v27  ;;  %v5225_v35 = vrot.slane %v5223_v60, 3  ;;  %v12467_v13 = vcombine.low %v12356_v57, %v12380_v11  ;;  %13895 = vst [vmem:[#allocation22_spill] sm:$0xff] %v12477_v51  ;;  %13896 = vst [vmem:[#allocation69_spill] sm:$0xff] %v12488_v0  ;;  %v12495_v27 = vld [vmem:[%s13591_s5 + $0x14] sm:$0xf] }
 0x31c   : > { %v5228_v41 = vrot.slane %v5226_v25, 4  ;;  %v5232_v30 = vshrl.u32 %v8664_v54, 16  ;;  %v5235_v53 = vshll.u32 %v8664_v54, 16  ;;  %v12471_v33 = vcombine.low %v12382_v14, %v12391_v63  ;;  %v12504_v34 = vld [vmem:[%s13591_s5 + $0x8] sm:$0xf] }
 0x31d   : > { %9633 = vmatmul.mubr.msk.bf16.gmra.mxu0 %vm4646_vm12, %v4645_v45  ;;  %v5220_v24 = vor.u32 %v5219_v15, %v5216_v40  ;;  %v8665_v57 = vcombine.low %v12463_v10, %v12475_v47  ;;  %v5212_v63 = vsel %vm764_vm1, %v5202_v56, %v5211_v6  ;;  %v5884_v14 = vsel %vm4695_vm6, %v12214_v5, 0  ;;  %v12507_v25 = vld [vmem:[#allocation2 + $0x58] sm:$0xf]  ;;  %v12509_v54 = vld [vmem:[#allocation2 + $0x50] sm:$0xf] }
 0x31e   : > { %9672 = vmatprep.mubr.msk.bf16.mxu0 %vm4646_vm12, %v5203_v3  ;;  %v5229_v4 = vor.u32 %v5228_v41, %v5225_v35  ;;  %v5234_v32 = vrot.slane %v5232_v30, 3  ;;  %v5237_v59 = vrot.slane %v5235_v53, 4  ;;  %v8666_v23 = vcombine.low %v12488_v0, %v12477_v51  ;;  %13897 = vst [vmem:[#allocation81_spill] sm:$0xff] %v12509_v54  ;;  %v12511_v3 = vld [vmem:[#allocation2 + $0x54] sm:$0xf] }
 0x31f   : > { %v5221_v56 = vsel %vm764_vm1, %v5211_v6, %v5220_v24  ;;  %v6114_v5 = vsel %vm4695_vm6, %v12184_v43, 0  ;;  %v5241_v60 = vshrl.u32 %v8665_v57, 16  ;;  %v5244_v45 = vshll.u32 %v8665_v57, 16  ;;  %13898 = vst [vmem:[#allocation70_spill] sm:$0xff] %v12511_v3  ;;  %v12513_v40 = vld [vmem:[#allocation2 + $0x60] sm:$0xf] }
 0x320   : > { %v12515_v15 = vld [vmem:[#allocation2 + $0x68] sm:$0xf]  ;;  %v5230_v43 = vsel %vm764_vm1, %v5220_v24, %v5229_v4  ;;  %v5238_v6 = vor.u32 %v5237_v59, %v5234_v32  ;;  %v5250_v35 = vshrl.u32 %v8666_v23, 16  ;;  %v12520_v41 = vld [vmem:[#allocation2 + $0x5c] sm:$0xf]  ;;  %v5253_v24 = vshll.u32 %v8666_v23, 16 }
 0x321   : > { %v12522_v30 = vld [vmem:[#allocation2 + $0x64] sm:$0xf]  ;;  %v12524_v53 = vld [vmem:[#allocation2 + $0x70] sm:$0xf]  ;;  %v12526_v57 = vld [vmem:[#allocation2 + $0x78] sm:$0xf]  ;;  %v8668_v38 = vcombine.low %v12507_v25, %v12520_v41 }
 0x322   : > { %9707 = vmatmul.mubr.msk.bf16.vlgmr.msra.gmra.mxu1 %vm4646_vm12, %v12148_v31  ;;  %v12536_v32 = vld [vmem:[#allocation2 + $0x88] sm:$0xf]  ;;  %v12538_v59 = vld [vmem:[#allocation2 + $0x8c] sm:$0xf]  ;;  %v5243_v11 = vrot.slane %v5241_v60, 3  ;;  %v5246_v23 = vrot.slane %v5244_v45, 4  ;;  %v5239_v45 = vsel %vm764_vm1, %v5229_v4, %v5238_v6 }
 0x323   : > { %9710 = vmatprep.mubr.msk.bf16.mxu1 %vm4646_vm12, %v12260_v17  ;;  %9773 = vmatpush3.bf16.msra.mxu1 %v6114_v5  ;;  %v12558_v5 = vld [vmem:[#allocation2 + $0x84] sm:$0xf]  ;;  %v5252_v58 = vrot.slane %v5250_v35, 3  ;;  %v5268_v0 = vshrl.u32 %v8668_v38, 16  ;;  %v5271_v60 = vshll.u32 %v8668_v38, 16 }
 0x324   : > { %9966 = vmatprep.subr.msk.bf16.mxu1 %vm4695_vm6, %v12504_v34 }
 0x325   : > { %9673 = vmatmul.mubr.msk.bf16.vlgmr.msra.gmra.mxu0 %vm4646_vm12, %v5212_v63  ;;  %v12560_v63 = vld [vmem:[#allocation2 + $0x90] sm:$0xf] }
 0x326   : > { %9739 = vmatpush3.bf16.msra.mxu0 %v5884_v14  ;;  %9676 = vmatprep.mubr.msk.bf16.mxu0 %vm4646_vm12, %v5221_v56  ;;  %v12534_v14 = vld [vmem:[#allocation2 + $0x80] sm:$0xf]  ;;  %v8667_v56 = vcombine.low %v12509_v54, %v12511_v3  ;;  %v5247_v3 = vor.u32 %v5246_v23, %v5243_v11  ;;  %v5273_v23 = vrot.slane %v5271_v60, 4 }
 0x327   : > { %9965 = vmatprep.subr.msk.bf16.mxu0 %vm4695_vm6, %v12495_v27 }
 0x328   : > { %v5259_v54 = vshrl.u32 %v8667_v56, 16  ;;  %v5262_v1 = vshll.u32 %v8667_v56, 16  ;;  %v5248_v4 = vsel %vm764_vm1, %v5238_v6, %v5247_v3  ;;  %v5270_v56 = vrot.slane %v5268_v0, 3 }
 0x32a   : > { %9711 = vmatmul.mubr.msk.bf16.gmra.mxu1 %vm4646_vm12, %v12309_v12  ;;  %v5264_v35 = vrot.slane %v5262_v1, 4  ;;  %v5274_v1 = vor.u32 %v5273_v23, %v5270_v56 }
 0x32b   : > { %9714 = vmatprep.mubr.msk.bf16.mxu1 %vm4646_vm12, %v12328_v46  ;;  %v5255_v46 = vrot.slane %v5253_v24, 4  ;;  %v8669_v24 = vcombine.low %v12513_v40, %v12522_v30 }
 0x32d   : > { %9677 = vmatmul.mubr.msk.bf16.gmra.mxu0 %vm4646_vm12, %v5230_v43  ;;  %v5256_v51 = vor.u32 %v5255_v46, %v5252_v58  ;;  %v5261_v43 = vrot.slane %v5259_v54, 3  ;;  %v8670_v58 = vcombine.low %v12515_v15, %v12548_v21  ;;  %v5277_v46 = vshrl.u32 %v8669_v24, 16 }
 0x32e   : > { %9680 = vmatprep.mubr.msk.bf16.mxu0 %vm4646_vm12, %v5239_v45  ;;  %v5280_v45 = vshll.u32 %v8669_v24, 16 }
 0x32f   : > { %v5257_v11 = vsel %vm764_vm1, %v5247_v3, %v5256_v51  ;;  %v5265_v38 = vor.u32 %v5264_v35, %v5261_v43  ;;  %v5286_v54 = vshrl.u32 %v8670_v58, 16  ;;  %v5289_v6 = vshll.u32 %v8670_v58, 16 }
 0x330   : > { %v5279_v3 = vrot.slane %v5277_v46, 3  ;;  %v5282_v60 = vrot.slane %v5280_v45, 4 }
 0x331   : > { %v5266_v0 = vsel %vm764_vm1, %v5256_v51, %v5265_v38  ;;  %v5275_v43 = vsel %vm764_vm1, %v5265_v38, %v5274_v1  ;;  %v5288_v35 = vrot.slane %v5286_v54, 3  ;;  %v5291_v24 = vrot.slane %v5289_v6, 4 }
 0x332   : > { %9715 = vmatmul.mubr.msk.bf16.gmra.mxu1 %vm4646_vm12, %v12368_v44  ;;  %v5283_v56 = vor.u32 %v5282_v60, %v5279_v3 }
 0x333   : > { %9718 = vmatprep.mubr.msk.bf16.mxu1 %vm4646_vm12, %v12378_v55  ;;  %v5292_v51 = vor.u32 %v5291_v24, %v5288_v35 }
 0x334   : > { %v5284_v38 = vsel %vm764_vm1, %v5274_v1, %v5283_v56 }
 0x335   : > { %9681 = vmatmul.mubr.msk.bf16.gmra.mxu0 %vm4646_vm12, %v5248_v4  ;;  %v8671_v4 = vcombine.low %v12524_v53, %v12550_v50  ;;  %v5293_v3 = vsel %vm764_vm1, %v5283_v56, %v5292_v51 }
 0x336   : > { %9684 = vmatprep.mubr.msk.bf16.mxu0 %vm4646_vm12, %v5257_v11  ;;  %v8672_v11 = vcombine.low %v12526_v57, %v12556_v39 }
 0x337   : > { %v5295_v23 = vshrl.u32 %v8671_v4, 16  ;;  %v5298_v58 = vshll.u32 %v8671_v4, 16 }
 0x338   : > { %v5304_v46 = vshrl.u32 %v8672_v11, 16  ;;  %v5307_v45 = vshll.u32 %v8672_v11, 16 }
 0x339   : > { %v5297_v54 = vrot.slane %v5295_v23, 3  ;;  %v5300_v6 = vrot.slane %v5298_v58, 4 }
 0x33a   : > { %9719 = vmatmul.mubr.msk.bf16.gmra.mxu1 %vm4646_vm12, %v12423_v18  ;;  %v5306_v60 = vrot.slane %v5304_v46, 3  ;;  %v5309_v4 = vrot.slane %v5307_v45, 4 }
 0x33b   : > { %9722 = vmatprep.mubr.msk.bf16.mxu1 %vm4646_vm12, %v12427_v20  ;;  %v5301_v35 = vor.u32 %v5300_v6, %v5297_v54 }
 0x33c   : > { %v5310_v1 = vor.u32 %v5309_v4, %v5306_v60 }
 0x33d   : > { %9685 = vmatmul.mubr.msk.bf16.gmra.mxu0 %vm4646_vm12, %v5266_v0  ;;  %v8673_v0 = vcombine.low %v12534_v14, %v12558_v5  ;;  %v5302_v56 = vsel %vm764_vm1, %v5292_v51, %v5301_v35 }
 0x33e   : > { %9688 = vmatprep.mubr.msk.bf16.mxu0 %vm4646_vm12, %v5275_v43  ;;  %v8674_v43 = vcombine.low %v12536_v32, %v12538_v59  ;;  %v5311_v54 = vsel %vm764_vm1, %v5301_v35, %v5310_v1 }
 0x33f   : > { %v5313_v24 = vshrl.u32 %v8673_v0, 16  ;;  %v5316_v11 = vshll.u32 %v8673_v0, 16 }
 0x340   : > { %v5322_v23 = vshrl.u32 %v8674_v43, 16  ;;  %v5325_v58 = vshll.u32 %v8674_v43, 16 }
 0x341   : > { %v5315_v46 = vrot.slane %v5313_v24, 3  ;;  %v5318_v45 = vrot.slane %v5316_v11, 4 }
 0x342   : > { %9723 = vmatmul.mubr.msk.bf16.gmra.mxu1 %vm4646_vm12, %v12431_v8  ;;  %v5324_v6 = vrot.slane %v5322_v23, 3  ;;  %v5327_v0 = vrot.slane %v5325_v58, 4  ;;  %v8744_v23 = vcombine.low %v12358_v52, %v12364_v19  ;;  %v6836_v52 = vsel %vm4695_vm6, %v12504_v34, 0  ;;  %v10182_v34 = vld [vmem:[#allocation2 + $0x14] sm:$0xff]  }
 0x343   : > { %9726 = vmatprep.mubr.msk.bf16.mxu1 %vm4646_vm12, %v12442_v9  ;;  %v8746_v19 = vcombine.low %v12403_v61, %v12408_v62  ;;  %v13901_v62 = vcombine.low %v12405_v26, %v12410_v7  ;;  %v13904_v7 = vld [vmem:[#allocation69_spill] sm:$0xff] }
 0x344   : > { %v5328_v51 = vor.u32 %v5327_v0, %v5324_v6  ;;  %v13905_v26 = vcombine.low %v12475_v47, %v13904_v7 }
 0x345   : > { %9689 = vmatmul.mubr.msk.bf16.gmra.mxu0 %vm4646_vm12, %v5284_v38  ;;  %v8675_v38 = vcombine.low %v12560_v63, %v12560_v63 }
 0x346   : > { %9692 = vmatprep.mubr.msk.bf16.mxu0 %vm4646_vm12, %v5293_v3  ;;  %v5319_v3 = vor.u32 %v5318_v45, %v5315_v46  ;;  %v10219_v46 = vld [vmem:[#allocation2 + $0x8] sm:$0xf] }
 0x347   : > { %v5331_v60 = vshrl.u32 %v8675_v38, 16  ;;  %v5334_v4 = vshll.u32 %v8675_v38, 16 }
 0x348   : > { %v5320_v43 = vsel %vm764_vm1, %v5310_v1, %v5319_v3  ;;  %v5329_v35 = vsel %vm764_vm1, %v5319_v3, %v5328_v51  ;;  %v10218_v1 = vld [vmem:[#allocation2 + $0x4] sm:$0xf] }
 0x349   : > { %v5333_v24 = vrot.slane %v5331_v60, 3  ;;  %v5336_v11 = vrot.slane %v5334_v4, 4  ;;  %v8726_v45 = vcombine.low %v10218_v1, %v10219_v46  ;;  %v10187_v1 = vld [vmem:[#allocation2 + $0x3c] sm:$0xff]  }
 0x34a   : > { %9727 = vmatmul.mubr.msk.bf16.gmra.mxu1 %vm4646_vm12, %v12449_v42 }
 0x34b   : > { %9730 = vmatprep.mubr.msk.bf16.mxu1 %vm4646_vm12, %v12453_v28  ;;  %v5337_v58 = vor.u32 %v5336_v11, %v5333_v24  ;;  %v10186_v24 = vld [vmem:[#allocation2 + $0x34] sm:$0xff]  }
 0x34d   : > { %9693 = vmatmul.mubr.msk.bf16.gmra.mxu0 %vm4646_vm12, %v5302_v56  ;;  %v13899_v56 = vcombine.low %v12393_v2, %v12388_v29  ;;  %v5338_v38 = vsel %vm764_vm1, %v5328_v51, %v5337_v58  ;;  %v13900_v29 = vcombine.low %v12250_v48, %v12243_v49  ;;  %v6645_v2 = vsel %vm4695_vm6, %v12495_v27, 0  ;;  %v13907_v48 = vld [vmem:[#allocation22_spill] sm:$0xff] }
 0x34e   : > { %9696 = vmatprep.mubr.msk.bf16.mxu0 %vm4646_vm12, %v5311_v54  ;;  %v12661_v54 = vld [vmem:[%s13591_s5 + $0x20] sm:$0xf]  ;;  %v13902_v49 = vcombine.low %v12416_v16, %v12455_v37  ;;  %v13915_v37 = vcombine.low %v12550_v50, %v12526_v57  ;;  %v13917_v50 = vcombine.low %v12558_v5, %v12536_v32  ;;  %v10184_v57 = vld [vmem:[#allocation2 + $0x24] sm:$0xff]   ;;  %v10185_v5 = vld [vmem:[#allocation2 + $0x2c] sm:$0xff]   ;;  %vm10285_vm1 = vmmov 0  }
 0x34f   : > { %v6488_v6 = vshll.u32 %v10184_v57, 16  ;;  %v6496_v4 = vshll.u32 %v10185_v5, 16  ;;  %v7298_v51 = vsel %vm4695_vm6, %v12661_v54, 0  ;;  %v6492_v58 = vshrl.u32 %v10184_v57, 16 }
 0x352   : > { %9731 = vmatmul.mubr.msk.bf16.gmra.mxu1 %vm4646_vm12, %v12467_v13 }
 0x353   : > { %9734 = vmatprep.mubr.msk.bf16.mxu1 %vm4646_vm12, %v12471_v33 }
 0x355   : > { %9697 = vmatmul.mubr.msk.bf16.gmra.mxu0 %vm4646_vm12, %v5320_v43  ;;  %v6490_v43 = vrot.slane %v6488_v6, 1 }
 0x356   : > { %9700 = vmatprep.mubr.msk.bf16.mxu0 %vm4646_vm12, %v5329_v35 }
 0x35a   : > { %9735 = vmatmul.mubr.msk.bf16.gmra.mxu1 %vm4646_vm12, %v13899_v56  ;;  %v6498_v56 = vrot.slane %v6496_v4, 1 }
 0x35b   : > { %9774 = vmatprep.mubr.msk.bf16.mxu1 %vm4646_vm12, %v8744_v23 }
 0x35d   : > { %9701 = vmatmul.mubr.msk.bf16.gmra.mxu0 %vm4646_vm12, %v5338_v38 }
 0x35e   : > { %9740 = vmatprep.mubr.msk.bf16.mxu0 %vm4646_vm12, %v8726_v45 }
 0x362   : > { %9775 = vmatmul.mubr.msk.bf16.vlgmr.msra.gmra.mxu1 %vm4646_vm12, %v13900_v29  ;;  %v6504_v29 = vshll.u32 %v10186_v24, 16 }
 0x363   : > { %9778 = vmatprep.mubr.msk.bf16.mxu1 %vm4646_vm12, %v8746_v19  ;;  %9841 = vmatpush3.bf16.msra.mxu1 %v6836_v52  ;;  %v6494_v52 = vor.u32 %v6492_v58, %v6490_v43  ;;  %v6500_v19 = vshrl.u32 %v10185_v5, 16 }
 0x365   : > { %9741 = vmatmul.mubr.msk.bf16.vlgmr.msra.gmra.mxu0 %vm4646_vm12, %v12154_v22  ;;  %v13906_v22 = vld [vmem:[#allocation21_spill] sm:$0xff]  ;;  %v6502_v7 = vor.u32 %v6500_v19, %v6498_v56 }
 0x366   : > { %9807 = vmatpush3.bf16.msra.mxu0 %v6645_v2  ;;  %9744 = vmatprep.mubr.msk.bf16.mxu0 %vm4646_vm12, %v12148_v31  ;;  %v13903_v31 = vcombine.low %v12438_v36, %v12463_v10  ;;  %v13912_v36 = vcombine.low %v12520_v41, %v12513_v40  ;;  %v10180_v10 = vld [vmem:[#allocation2 + $0xc] sm:$0xff]   ;;  %v6472_v40 = vshll.u32 %v10182_v34, 16  ;;  %v13919_v2 = vmov 0.0  }
 0x367   : > { %9967 = vmatprep.subr.msk.bf16.mxu0 %vm4695_vm6, %v12661_v54 }
 0x36a   : > { %9779 = vmatmul.mubr.msk.bf16.gmra.mxu1 %vm4646_vm12, %v13901_v62 }
 0x36b   : > { %9782 = vmatprep.mubr.msk.bf16.mxu1 %vm4646_vm12, %v13902_v49 }
 0x36d   : > { %9745 = vmatmul.mubr.msk.bf16.gmra.mxu0 %vm4646_vm12, %v12260_v17  ;;  %v13908_v17 = vld [vmem:[#allocation81_spill] sm:$0xff] }
 0x36e   : > { %9748 = vmatprep.mubr.msk.bf16.mxu0 %vm4646_vm12, %v12309_v12  ;;  %v13909_v61 = vcombine.low %v13907_v48, %v13908_v17  ;;  %v13910_v12 = vld [vmem:[#allocation70_spill] sm:$0xff] }
 0x36f   : > { %v13911_v16 = vcombine.low %v13910_v12, %v12507_v25  ;;  %v10188_v12 = vld [vmem:[#allocation2 + $0x44] sm:$0xff]  }
 0x370   : > { %v6524_v5 = vshrl.u32 %v10188_v12, 16 }
 0x372   : > { %9783 = vmatmul.mubr.msk.bf16.gmra.mxu1 %vm4646_vm12, %v13903_v31  ;;  %v6499_v31 = vsel %vm2735_vm3, %v6494_v52, %v6498_v56 }
 0x373   : > { %9786 = vmatprep.mubr.msk.bf16.mxu1 %vm4646_vm12, %v13905_v26  ;;  %v6512_v26 = vshll.u32 %v10187_v1, 16 }
 0x375   : > { %9749 = vmatmul.mubr.msk.bf16.gmra.mxu0 %vm4646_vm12, %v13906_v22 }
 0x376   : > { %9752 = vmatprep.mubr.msk.bf16.mxu0 %vm4646_vm12, %v12368_v44  ;;  %v13913_v44 = vcombine.low %v12522_v30, %v12515_v15  ;;  %v13918_v15 = vcombine.low %v12538_v59, %v12560_v63 }
 0x37a   : > { %9787 = vmatmul.mubr.msk.bf16.gmra.mxu1 %vm4646_vm12, %v13909_v61  ;;  %v6506_v61 = vrot.slane %v6504_v29, 1 }
 0x37b   : > { %9790 = vmatprep.mubr.msk.bf16.mxu1 %vm4646_vm12, %v13911_v16 }
 0x37d   : > { %9753 = vmatmul.mubr.msk.bf16.gmra.mxu0 %vm4646_vm12, %v12378_v55  ;;  %v13914_v55 = vcombine.low %v12548_v21, %v12524_v53  ;;  %v6467_v21 = vshll.u32 %v10180_v10, 16 }
 0x37e   : > { %9756 = vmatprep.mubr.msk.bf16.mxu0 %vm4646_vm12, %v12423_v18  ;;  %v10181_v18 = vld [vmem:[#allocation2 + $0x4] sm:$0xff]  }
 0x37f   : > { %v6819_v47 = vshll.u32 %v10181_v18, 16 }
 0x381   : > { %v6821_v27 = vrot.slane %v6819_v47, 1 }
 0x382   : > { %9791 = vmatmul.mubr.msk.bf16.gmra.mxu1 %vm4646_vm12, %v13912_v36 }
 0x383   : > { %9794 = vmatprep.mubr.msk.bf16.mxu1 %vm4646_vm12, %v13913_v44 }
 0x385   : > { %9757 = vmatmul.mubr.msk.bf16.gmra.mxu0 %vm4646_vm12, %v12427_v20  ;;  %v13916_v20 = vcombine.low %v12556_v39, %v12534_v14  ;;  %v6465_v39 = vshrl.u32 %v10180_v10, 16  ;;  %v6476_v14 = vshrl.u32 %v10182_v34, 16  ;;  %v10189_v10 = vld [vmem:[#allocation2 + $0x4c] sm:$0xff]  }
 0x386   : > { %9760 = vmatprep.mubr.msk.bf16.mxu0 %vm4646_vm12, %v12431_v8  ;;  %v6817_v8 = vshrl.u32 %v10181_v18, 16  ;;  %v6508_v18 = vshrl.u32 %v10186_v24, 16  ;;  %v6532_v4 = vshrl.u32 %v10189_v10, 16 }
 0x388   : > { %v6822_v25 = vor.u32 %v6821_v27, %v6817_v8  ;;  %v6510_v8 = vor.u32 %v6508_v18, %v6506_v61  ;;  %v6516_v27 = vshrl.u32 %v10187_v1, 16 }
 0x38a   : > { %9795 = vmatmul.mubr.msk.bf16.gmra.mxu1 %vm4646_vm12, %v13914_v55  ;;  %v6507_v55 = vsel %vm2735_vm3, %v6502_v7, %v6506_v61  ;;  %v10193_v7 = vld [vmem:[#allocation2 + $0x6c] sm:$0xff]  }
 0x38b   : > { %9798 = vmatprep.mubr.msk.bf16.mxu1 %vm4646_vm12, %v13915_v37  ;;  %v6514_v37 = vrot.slane %v6512_v26, 1 }
 0x38d   : > { %9761 = vmatmul.mubr.msk.bf16.gmra.mxu0 %vm4646_vm12, %v12442_v9  ;;  %v6469_v9 = vrot.slane %v6467_v21, 1 }
 0x38e   : > { %9764 = vmatprep.mubr.msk.bf16.mxu0 %vm4646_vm12, %v12449_v42  ;;  %v10183_v42 = vld [vmem:[#allocation2 + $0x1c] sm:$0xff]  }
 0x38f   : > { %v6823_v41 = vsel %vm2735_vm3, %v6822_v25, %v6469_v9  ;;  %v6470_v30 = vor.u32 %v6469_v9, %v6465_v39  ;;  %v6480_v53 = vshll.u32 %v10183_v42, 16  ;;  %v6484_v59 = vshrl.u32 %v10183_v42, 16 }
 0x390   : > { %v6515_v42 = vsel %vm2735_vm3, %v6510_v8, %v6514_v37  ;;  %v6518_v39 = vor.u32 %v6516_v27, %v6514_v37 }
 0x391   : > { %v6482_v32 = vrot.slane %v6480_v53, 1 }
 0x392   : > { %9799 = vmatmul.mubr.msk.bf16.gmra.mxu1 %vm4646_vm12, %v13916_v20 }
 0x393   : > { %9802 = vmatprep.mubr.msk.bf16.mxu1 %vm4646_vm12, %v13917_v50  ;;  %v6486_v60 = vor.u32 %v6484_v59, %v6482_v32  ;;  %v6520_v50 = vshll.u32 %v10188_v12, 16  ;;  %v10191_v59 = vld [vmem:[#allocation2 + $0x5c] sm:$0xff]  }
 0x394   : > { %v6548_v12 = vshrl.u32 %v10191_v59, 16 }
 0x395   : > { %9765 = vmatmul.mubr.msk.bf16.gmra.mxu0 %vm4646_vm12, %v12453_v28  ;;  %v6474_v28 = vrot.slane %v6472_v40, 1  ;;  %v6491_v23 = vsel %vm2735_vm3, %v6486_v60, %v6490_v43  ;;  %v6528_v40 = vshll.u32 %v10189_v10, 16  ;;  %v6522_v53 = vrot.slane %v6520_v50, 1 }
 0x396   : > { %9768 = vmatprep.mubr.msk.bf16.mxu0 %vm4646_vm12, %v12467_v13 }
 0x397   : > { %v6475_v13 = vsel %vm2735_vm3, %v6470_v30, %v6474_v28  ;;  %v6478_v63 = vor.u32 %v6476_v14, %v6474_v28  ;;  %v10190_v28 = vld [vmem:[#allocation2 + $0x54] sm:$0xff]   ;;  %v6526_v60 = vor.u32 %v6524_v5, %v6522_v53  ;;  %v6564_v5 = vshrl.u32 %v10193_v7, 16 }
 0x399   : > { %v6483_v3 = vsel %vm2735_vm3, %v6478_v63, %v6482_v32  ;;  %v6523_v32 = vsel %vm2735_vm3, %v6518_v39, %v6522_v53  ;;  %v6530_v63 = vrot.slane %v6528_v40, 1  ;;  %v10195_v53 = vld [vmem:[#allocation2 + $0x7c] sm:$0xff]  }
 0x39a   : > { %9803 = vmatmul.mubr.msk.bf16.gmra.mxu1 %vm4646_vm12, %v13918_v15 }
 0x39b   : > { %9842 = vmatprep.mubr.msk.bf16.mxu1 %vm4646_vm12, %v6823_v41 }
 0x39d   : > { %9769 = vmatmul.mubr.msk.bf16.gmra.mxu0 %vm4646_vm12, %v12471_v33 }
 0x39e   : > { %9808 = vmatprep.mubr.msk.bf16.mxu0 %vm4646_vm12, %v6475_v13 }
 0x3a1   : > { %v9640_v0 = vpop.f32.mrf.mxu1 }
 0x3a2   : > { %9843 = vmatmul.mubr.msk.bf16.vlgmr.msra.gmra.mxu1 %vm4646_vm12, %v6475_v13 }
 0x3a3   : > { %9846 = vmatprep.mubr.msk.bf16.mxu1 %vm4646_vm12, %v6483_v3  ;;  %v4942_v33 = vpop.f32.mrf.mxu1 }
 0x3a5   : > { %v9641_v11 = vpop.f32.mrf.mxu1  ;;  %v9606_v35 = vpop.f32.mrf.mxu0  ;;  %9809 = vmatmul.mubr.msk.bf16.vlgmr.msra.gmra.mxu0 %vm4646_vm12, %v6483_v3 }
 0x3a6   : > { %v12758_v46 = vadd.f32 %v9640_v0, %v9606_v35  ;;  %9875 = vmatpush3.bf16.msra.mxu0 %v7298_v51  ;;  %9812 = vmatprep.mubr.msk.bf16.mxu0 %vm4646_vm12, %v6491_v23  ;;  %v6534_v35 = vor.u32 %v6532_v4, %v6530_v63 }
 0x3a7   : > { %v4945_v45 = vpop.f32.mrf.mxu1  ;;  %v4733_v38 = vpop.f32.mrf.mxu0  ;;  %9942 = vmatprep.subr.bf16.mxu0 %v13919_v2  ;;  %v10208_v2 = vld [vmem:[#allocation2 + $0x5c] sm:$0xff]  }
 0x3a8   : > { %v12762_v54 = vadd.f32 %v4942_v33, %v4733_v38  ;;  %v6536_v33 = vshll.u32 %v10190_v28, 16  ;;  %v10192_v38 = vld [vmem:[#allocation2 + $0x64] sm:$0xff]  }
 0x3a9   : > { %v9607_v62 = vpop.f32.mrf.mxu0 }
 0x3aa   : > { %v9644_v49 = vpop.f32.mrf.mxu1  ;;  %9847 = vmatmul.mubr.msk.bf16.gmra.mxu1 %vm4646_vm12, %v6491_v23  ;;  %v12766_v22 = vadd.f32 %v9641_v11, %v9607_v62  ;;  %v6531_v11 = vsel %vm2735_vm3, %v6526_v60, %v6530_v63  ;;  %v6544_v23 = vshll.u32 %v10191_v59, 16 }
 0x3ab   : > { %9850 = vmatprep.mubr.msk.bf16.mxu1 %vm4646_vm12, %v6499_v31  ;;  %v4736_v48 = vpop.f32.mrf.mxu0 }
 0x3ac   : > { %v4958_v17 = vpop.f32.mrf.mxu1  ;;  %v12769_v16 = vadd.f32 %v4945_v45, %v4736_v48  ;;  %v6538_v45 = vrot.slane %v6536_v33, 1  ;;  %v6576_v33 = vshll.u32 %v10195_v53, 16 }
 0x3ad   : > { %v9610_v36 = vpop.f32.mrf.mxu0  ;;  %9813 = vmatmul.mubr.msk.bf16.gmra.mxu0 %vm4646_vm12, %v6499_v31  ;;  %v6546_v31 = vrot.slane %v6544_v23, 1  ;;  %v10196_v23 = vld [vmem:[#allocation2 + $0x84] sm:$0xff]  }
 0x3ae   : > { %v9645_v44 = vpop.f32.mrf.mxu1  ;;  %v12773_v47 = vadd.f32 %v9644_v49, %v9610_v36  ;;  %9816 = vmatprep.mubr.msk.bf16.mxu0 %vm4646_vm12, %v6507_v55  ;;  %v6539_v62 = vsel %vm2735_vm3, %v6534_v35, %v6538_v45  ;;  %v6540_v49 = vshrl.u32 %v10190_v28, 16  ;;  %v6552_v36 = vshll.u32 %v10192_v38, 16 }
 0x3af   : > { %v4749_v20 = vpop.f32.mrf.mxu0  ;;  %v6550_v10 = vor.u32 %v6548_v12, %v6546_v31 }
 0x3b0   : > { %v4961_v21 = vpop.f32.mrf.mxu1  ;;  %v12776_v34 = vadd.f32 %v4958_v17, %v4749_v20  ;;  %v6542_v61 = vor.u32 %v6540_v49, %v6538_v45  ;;  %v6560_v20 = vshll.u32 %v10193_v7, 16  ;;  %v6554_v50 = vrot.slane %v6552_v36, 1  ;;  %v10198_v36 = vld [vmem:[#allocation2 + $0x8c] ss:$0 sps:$4 sm:$0x11]  }
 0x3b1   : > { %v9611_v9 = vpop.f32.mrf.mxu0 }
 0x3b2   : > { %v9648_v25 = vpop.f32.mrf.mxu1  ;;  %9851 = vmatmul.mubr.msk.bf16.gmra.mxu1 %vm4646_vm12, %v6507_v55  ;;  %v12780_v15 = vadd.f32 %v9645_v44, %v9611_v9  ;;  %v6547_v37 = vsel %vm2735_vm3, %v6542_v61, %v6546_v31  ;;  %v10194_v9 = vld [vmem:[#allocation2 + $0x74] sm:$0xff]   ;;  %v6555_v40 = vsel %vm2735_vm3, %v6550_v10, %v6554_v50 }
 0x3b3   : > { %9854 = vmatprep.mubr.msk.bf16.mxu1 %vm4646_vm12, %v6515_v42  ;;  %v4752_v41 = vpop.f32.mrf.mxu0  ;;  %v6568_v63 = vshll.u32 %v10194_v9, 16  ;;  %v10199_v61 = vld [vmem:[#allocation2 + $0x14] sm:$0xff]  }
 0x3b4   : > { %v4974_v30 = vpop.f32.mrf.mxu1  ;;  %v12783_v57 = vadd.f32 %v4961_v21, %v4752_v41  ;;  %v6556_v41 = vshrl.u32 %v10192_v38, 16  ;;  %v6572_v38 = vshrl.u32 %v10194_v9, 16 }
 0x3b5   : > { %v9614_v13 = vpop.f32.mrf.mxu0  ;;  %9817 = vmatmul.mubr.msk.bf16.gmra.mxu0 %vm4646_vm12, %v6515_v42  ;;  %v6570_v35 = vrot.slane %v6568_v63, 1 }
 0x3b6   : > { %v9649_v14 = vpop.f32.mrf.mxu1  ;;  %v12787_v6 = vadd.f32 %v9648_v25, %v9614_v13  ;;  %9820 = vmatprep.mubr.msk.bf16.mxu0 %vm4646_vm12, %v6523_v32 }
 0x3b7   : > { %v4765_v0 = vpop.f32.mrf.mxu0  ;;  %v6574_v7 = vor.u32 %v6572_v38, %v6570_v35  ;;  %v7118_v38 = vshrl.u32 %v10199_v61, 16 }
 0x3b8   : > { %v4977_v3 = vpop.f32.mrf.mxu1  ;;  %v12790_v51 = vadd.f32 %v4974_v30, %v4765_v0  ;;  %v6562_v30 = vrot.slane %v6560_v20, 1  ;;  %v10200_v20 = vld [vmem:[#allocation2 + $0x1c] sm:$0xff]  }
 0x3b9   : > { %v9615_v43 = vpop.f32.mrf.mxu0 }
 0x3ba   : > { %v9652_v24 = vpop.f32.mrf.mxu1  ;;  %9855 = vmatmul.mubr.msk.bf16.gmra.mxu1 %vm4646_vm12, %v6523_v32  ;;  %v12794_v58 = vadd.f32 %v9649_v14, %v9615_v43  ;;  %v6558_v32 = vor.u32 %v6556_v41, %v6554_v50  ;;  %v6566_v4 = vor.u32 %v6564_v5, %v6562_v30  ;;  %v6588_v5 = vshrl.u32 %v10196_v23, 16 }
 0x3bb   : > { %9858 = vmatprep.mubr.msk.bf16.mxu1 %vm4646_vm12, %v6531_v11  ;;  %v4768_v56 = vpop.f32.mrf.mxu0 }
 0x3bc   : > { %v4990_v1 = vpop.f32.mrf.mxu1  ;;  %v12797_v52 = vadd.f32 %v4977_v3, %v4768_v56  ;;  %v6563_v60 = vsel %vm2735_vm3, %v6558_v32, %v6562_v30  ;;  %v6571_v45 = vsel %vm2735_vm3, %v6566_v4, %v6570_v35  ;;  %v10201_v4 = vld [vmem:[#allocation2 + $0x24] sm:$0xff]  }
 0x3bd   : > { %v9618_v19 = vpop.f32.mrf.mxu0  ;;  %9821 = vmatmul.mubr.msk.bf16.gmra.mxu0 %vm4646_vm12, %v6531_v11 }
 0x3be   : > { %v9653_v29 = vpop.f32.mrf.mxu1  ;;  %v12801_v26 = vadd.f32 %v9652_v24, %v9618_v19  ;;  %9824 = vmatprep.mubr.msk.bf16.mxu0 %vm4646_vm12, %v6539_v62  ;;  %v6578_v19 = vrot.slane %v6576_v33, 1 }
 0x3bf   : > { %v4781_v48 = vpop.f32.mrf.mxu0 }
 0x3c0   : > { %v4993_v17 = vpop.f32.mrf.mxu1  ;;  %v12804_v44 = vadd.f32 %v4990_v1, %v4781_v48  ;;  %v6580_v48 = vshrl.u32 %v10195_v53, 16 }
 0x3c1   : > { %v9619_v55 = vpop.f32.mrf.mxu0 }
 0x3c2   : > { %v9656_v18 = vpop.f32.mrf.mxu1  ;;  %9859 = vmatmul.mubr.msk.bf16.gmra.mxu1 %vm4646_vm12, %v6539_v62  ;;  %v12808_v21 = vadd.f32 %v9653_v29, %v9619_v55  ;;  %v10197_v62 = vld [vmem:[#allocation2 + $0x84] ss:$0 sps:$4 sm:$0x11]   ;;  %v6582_v10 = vor.u32 %v6580_v48, %v6578_v19 }
 0x3c3   : > { %9862 = vmatprep.mubr.msk.bf16.mxu1 %vm4646_vm12, %v6547_v37  ;;  %v4784_v8 = vpop.f32.mrf.mxu0 }
 0x3c4   : > { %v5006_v27 = vpop.f32.mrf.mxu1  ;;  %v12811_v25 = vadd.f32 %v4993_v17, %v4784_v8  ;;  %v6584_v17 = vshll.u32 %v10196_v23, 16 }
 0x3c5   : > { %v9622_v42 = vpop.f32.mrf.mxu0  ;;  %9825 = vmatmul.mubr.msk.bf16.gmra.mxu0 %vm4646_vm12, %v6547_v37  ;;  %v6579_v37 = vsel %vm2735_vm3, %v6574_v7, %v6578_v19  ;;  %v10202_v19 = vld [vmem:[#allocation2 + $0x2c] sm:$0xff]  }
 0x3c6   : > { %v9657_v39 = vpop.f32.mrf.mxu1  ;;  %v12815_v28 = vadd.f32 %v9656_v18, %v9622_v42  ;;  %9828 = vmatprep.mubr.msk.bf16.mxu0 %vm4646_vm12, %v6555_v40  ;;  %v6586_v42 = vrot.slane %v6584_v17, 1  ;;  %v7133_v17 = vshll.u32 %v10201_v4, 16 }
 0x3c7   : > { %v4797_v13 = vpop.f32.mrf.mxu0 }
 0x3c8   : > { %v12818_v14 = vpop.f32.mrf.mxu1  ;;  %v12820_v59 = vadd.f32 %v5006_v27, %v4797_v13  ;;  %v6825_v27 = vshll.u32 %v10197_v62, 16  ;;  %v6587_v53 = vsel %vm2735_vm3, %v6582_v10, %v6586_v42  ;;  %v7125_v13 = vshll.u32 %v10200_v20, 16 }
 0x3c9   : > { %13920 = vst [vmem:[#allocation84_spill] sm:$0xff] %v12818_v14  ;;  %v9623_v0 = vpop.f32.mrf.mxu0  ;;  %v6590_v33 = vor.u32 %v6588_v5, %v6586_v42  ;;  %v7137_v5 = vshrl.u32 %v10201_v4, 16 }
 0x3ca   : > { %v9660_v3 = vpop.f32.mrf.mxu1  ;;  %9863 = vmatmul.mubr.msk.bf16.gmra.mxu1 %vm4646_vm12, %v6555_v40  ;;  %v12824_v43 = vadd.f32 %v9657_v39, %v9623_v0  ;;  %v7120_v39 = vshll.u32 %v10199_v61, 16  ;;  %v6592_v40 = vshll.u32 %v10198_v36, 16  ;;  %v6827_v63 = vrot.slane %v6825_v27, 1 }
 0x3cb   : > { %9866 = vmatprep.mubr.msk.bf16.mxu1 %vm4646_vm12, %v6563_v60  ;;  %v12827_v24 = vpop.f32.mrf.mxu0  ;;  %v7127_v23 = vrot.slane %v7125_v13, 1  ;;  %v7129_v61 = vshrl.u32 %v10200_v20, 16 }
 0x3cc   : > { %13921 = vst [vmem:[#allocation41_spill] sm:$0xff] %v12827_v24  ;;  %v5022_v11 = vpop.f32.mrf.mxu1  ;;  %v6828_v35 = vsel %vm2735_vm3, %v6582_v10, %v6827_v63  ;;  %v7141_v10 = vshll.u32 %v10202_v19, 16 }
 0x3cd   : > { %v9626_v56 = vpop.f32.mrf.mxu0  ;;  %9829 = vmatmul.mubr.msk.bf16.gmra.mxu0 %vm4646_vm12, %v6563_v60  ;;  %v7122_v60 = vrot.slane %v7120_v39, 1  ;;  %v7135_v39 = vrot.slane %v7133_v17, 1 }
 0x3ce   : > { %v9661_v1 = vpop.f32.mrf.mxu1  ;;  %v12831_v29 = vadd.f32 %v9660_v3, %v9626_v56  ;;  %9832 = vmatprep.mubr.msk.bf16.mxu0 %vm4646_vm12, %v6571_v45  ;;  %v6594_v56 = vrot.slane %v6592_v40, 1  ;;  %v10203_v40 = vld [vmem:[#allocation2 + $0x34] sm:$0xff]   ;;  %v7143_v63 = vrot.slane %v7141_v10, 1 }
 0x3cf   : > { %v4813_v49 = vpop.f32.mrf.mxu0  ;;  %v7123_v48 = vor.u32 %v7122_v60, %v7118_v38 }
 0x3d0   : > { %v12834_v31 = vpop.f32.mrf.mxu1  ;;  %v12836_v12 = vadd.f32 %v5022_v11, %v4813_v49  ;;  %v6595_v36 = vsel %vm2735_vm3, %v6590_v33, %v6594_v56  ;;  %v7149_v56 = vshll.u32 %v10203_v40, 16 }
 0x3d1   : > { %v9627_v55 = vpop.f32.mrf.mxu0 }
 0x3d2   : > { %v9664_v18 = vpop.f32.mrf.mxu1  ;;  %9867 = vmatmul.mubr.msk.bf16.gmra.mxu1 %vm4646_vm12, %v6571_v45  ;;  %v12840_v8 = vadd.f32 %v9661_v1, %v9627_v55 }
 0x3d3   : > { %9870 = vmatprep.mubr.msk.bf16.mxu1 %vm4646_vm12, %v6579_v37  ;;  %v12843_v50 = vpop.f32.mrf.mxu0 }
 0x3d4   : > { %v5038_v9 = vpop.f32.mrf.mxu1 }
 0x3d5   : > { %v9630_v41 = vpop.f32.mrf.mxu0  ;;  %9833 = vmatmul.mubr.msk.bf16.gmra.mxu0 %vm4646_vm12, %v6579_v37  ;;  %v7128_v37 = vsel %vm2735_vm3, %v7123_v48, %v7127_v23  ;;  %v7145_v48 = vshrl.u32 %v10202_v19, 16 }
 0x3d6   : > { %v9665_v30 = vpop.f32.mrf.mxu1  ;;  %v12847_v32 = vadd.f32 %v9664_v18, %v9630_v41  ;;  %9836 = vmatprep.mubr.msk.bf16.mxu0 %vm4646_vm12, %v6587_v53  ;;  %v7131_v41 = vor.u32 %v7129_v61, %v7127_v23 }
 0x3d7   : > { %v4829_v0 = vpop.f32.mrf.mxu0 }
 0x3d8   : > { %v12850_v3 = vpop.f32.mrf.mxu1  ;;  %v12852_v11 = vadd.f32 %v5038_v9, %v4829_v0  ;;  %v10204_v0 = vld [vmem:[#allocation2 + $0x3c] sm:$0xff]  }
 0x3d9   : > { %v9631_v1 = vpop.f32.mrf.mxu0  ;;  %v7157_v4 = vshll.u32 %v10204_v0, 16 }
 0x3da   : > { %v9668_v45 = vpop.f32.mrf.mxu1  ;;  %9871 = vmatmul.mubr.msk.bf16.gmra.mxu1 %vm4646_vm12, %v6828_v35  ;;  %v12856_v62 = vadd.f32 %v9665_v30, %v9631_v1  ;;  %v7139_v35 = vor.u32 %v7137_v5, %v7135_v39  ;;  %v7136_v1 = vsel %vm2735_vm3, %v7131_v41, %v7135_v39  ;;  %v7153_v39 = vshrl.u32 %v10203_v40, 16 }
 0x3db   : > { %v12858_v49 = vpop.f32.mrf.mxu0  ;;  %v7159_v41 = vrot.slane %v7157_v4, 1  ;;  %v7161_v4 = vshrl.u32 %v10204_v0, 16 }
 0x3dc   : > { %v5054_v7 = vpop.f32.mrf.mxu1  ;;  %v7144_v23 = vsel %vm2735_vm3, %v7139_v35, %v7143_v63 }
 0x3dd   : > { %v9634_v55 = vpop.f32.mrf.mxu0  ;;  %9837 = vmatmul.mubr.msk.bf16.gmra.mxu0 %vm4646_vm12, %v6595_v36 }
 0x3de   : > { %v9669_v18 = vpop.f32.mrf.mxu1  ;;  %v12863_v27 = vadd.f32 %v9668_v45, %v9634_v55  ;;  %9876 = vmatprep.mubr.msk.bf16.mxu0 %vm4646_vm12, %v7128_v37  ;;  %v7151_v55 = vrot.slane %v7149_v56, 1  ;;  %v7147_v37 = vor.u32 %v7145_v48, %v7143_v63 }
 0x3df   : > { %v4845_v9 = vpop.f32.mrf.mxu0 }
 0x3e0   : > { %v12866_v42 = vpop.f32.mrf.mxu1  ;;  %v12868_v30 = vadd.f32 %v5054_v7, %v4845_v9  ;;  %v7155_v35 = vor.u32 %v7153_v39, %v7151_v55 }
 0x3e1   : > { %v9635_v53 = vpop.f32.mrf.mxu0 }
 0x3e2   : > { %v12870_v13 = vpop.f32.mrf.mxu1  ;;  %v12872_v60 = vadd.f32 %v9669_v18, %v9635_v53  ;;  %v10205_v18 = vld [vmem:[#allocation2 + $0x44] sm:$0xff]   ;;  %v10206_v53 = vld [vmem:[#allocation2 + $0x4c] sm:$0xff]   ;;  %v7160_v40 = vsel %vm2735_vm3, %v7155_v35, %v7159_v41 }
 0x3e3   : > { %v12874_v33 = vpop.f32.mrf.mxu0  ;;  %v7169_v35 = vshrl.u32 %v10205_v18, 16 }
 0x3e4   : > { %v12876_v20 = vpop.f32.mrf.mxu1 }
 0x3e5   : > { %v9674_v45 = vpop.f32.mrf.mxu0  ;;  %9877 = vmatmul.mubr.msk.bf16.vlgmr.msra.gmra.mxu0 %vm4646_vm12, %v7136_v1  ;;  %v7165_v1 = vshll.u32 %v10205_v18, 16 }
 0x3e6   : > { %v12879_v38 = vpop.f32.mrf.mxu1  ;;  %v12884_v7 = vadd.f32 %v9674_v45, %v12758_v46  ;;  %9880 = vmatprep.mubr.msk.bf16.mxu0 %vm4646_vm12, %v7144_v23  ;;  %v7173_v23 = vshll.u32 %v10206_v53, 16 }
 0x3e7   : > { %v5424_v17 = vpop.f32.mrf.mxu0 }
 0x3e8   : > { %v12887_v36 = vpop.f32.mrf.mxu1  ;;  %v12890_v10 = vadd.f32 %v5424_v17, %v12762_v54  ;;  %v7152_v54 = vsel %vm2735_vm3, %v7147_v37, %v7151_v55  ;;  %v7163_v55 = vor.u32 %v7161_v4, %v7159_v41 }
 0x3e9   : > { %v9675_v61 = vpop.f32.mrf.mxu0 }
 0x3ea   : > { %v12892_v9 = vpop.f32.mrf.mxu1  ;;  %v12895_v46 = vadd.f32 %v9675_v61, %v12766_v22  ;;  %v10207_v61 = vld [vmem:[#allocation2 + $0x54] sm:$0xff]  }
 0x3eb   : > { %v5427_v19 = vpop.f32.mrf.mxu0  ;;  %v7181_v14 = vshll.u32 %v10207_v61, 16 }
 0x3ec   : > { %v12897_v5 = vpop.f32.mrf.mxu1  ;;  %v12900_v56 = vadd.f32 %v5427_v19, %v12769_v16  ;;  %v7167_v16 = vrot.slane %v7165_v1, 1 }
 0x3ed   : > { %v9678_v63 = vpop.f32.mrf.mxu0  ;;  %9881 = vmatmul.mubr.msk.bf16.gmra.mxu0 %vm4646_vm12, %v7152_v54  ;;  %v7175_v54 = vrot.slane %v7173_v23, 1  ;;  %v7189_v23 = vshll.u32 %v10208_v2, 16 }
 0x3ee   : > { %v12903_v45 = vpop.f32.mrf.mxu1  ;;  %v12908_v22 = vadd.f32 %v9678_v63, %v12773_v47  ;;  %9884 = vmatprep.mubr.msk.bf16.mxu0 %vm4646_vm12, %v7160_v40  ;;  %v7171_v40 = vor.u32 %v7169_v35, %v7167_v16 }
 0x3ef   : > { %v5440_v48 = vpop.f32.mrf.mxu0 }
 0x3f0   : > { %v12911_v17 = vpop.f32.mrf.mxu1  ;;  %v12914_v37 = vadd.f32 %v5440_v48, %v12776_v34  ;;  %v7168_v34 = vsel %vm2735_vm3, %v7163_v55, %v7167_v16  ;;  %v7176_v18 = vsel %vm2735_vm3, %v7171_v40, %v7175_v54  ;;  %v7177_v48 = vshrl.u32 %v10206_v53, 16  ;;  %v7644_v40 = vld [vmem:[%s13593_s7] sm:$0xf] }
 0x3f1   : > { %v9679_v39 = vpop.f32.mrf.mxu0  ;;  %v7191_v53 = vrot.slane %v7189_v23, 1  ;;  %9968 = vmatprep.subr.msk.bf16.mxu1 %vm4695_vm6, %v7644_v40 }
 0x3f2   : > { %v12916_v19 = vpop.f32.mrf.mxu1  ;;  %v12919_v47 = vadd.f32 %v9679_v39, %v12780_v15  ;;  %v7179_v16 = vor.u32 %v7177_v48, %v7175_v54 }
 0x3f3   : > { %v5443_v0 = vpop.f32.mrf.mxu0 }
 0x3f4   : > { %v12921_v63 = vpop.f32.mrf.mxu1  ;;  %v12924_v1 = vadd.f32 %v5443_v0, %v12783_v57  ;;  %v7183_v57 = vrot.slane %v7181_v14, 1  ;;  %v10209_v0 = vld [vmem:[#allocation2 + $0x64] sm:$0xff]   ;;  %v7701_v14 = vsel %vm4695_vm6, %v7644_v40, 0  ;;  %vm8189_vm6 = vcmask 73728  }
 0x3f5   : > { %v9682_v41 = vpop.f32.mrf.mxu0  ;;  %9885 = vmatmul.mubr.msk.bf16.gmra.mxu0 %vm4646_vm12, %v7168_v34  ;;  %9909 = vmatpush3.bf16.msra.mxu1 %v7701_v14 }
 0x3f6   : > { %v12927_v4 = vpop.f32.mrf.mxu1  ;;  %v12932_v15 = vadd.f32 %v9682_v41, %v12787_v6  ;;  %9888 = vmatprep.mubr.msk.bf16.mxu0 %vm4646_vm12, %v7176_v18  ;;  %v7185_v6 = vshrl.u32 %v10207_v61, 16  ;;  %v10210_v41 = vld [vmem:[#allocation2 + $0x6c] sm:$0xff]   ;;  %v7184_v61 = vsel %vm2735_vm3, %v7179_v16, %v7183_v57 }
 0x3f7   : > { %v5456_v39 = vpop.f32.mrf.mxu0 }
 0x3f8   : > { %v12935_v35 = vpop.f32.mrf.mxu1  ;;  %v12938_v55 = vadd.f32 %v5456_v39, %v12790_v51  ;;  %v7187_v48 = vor.u32 %v7185_v6, %v7183_v57  ;;  %v7197_v39 = vshll.u32 %v10209_v0, 16 }
 0x3f9   : > { %13922 = vst [vmem:[#allocation43_spill] sm:$0xff] %v12935_v35  ;;  %v9683_v34 = vpop.f32.mrf.mxu0 }
 0x3fa   : > { %v12943_v24 = vpop.f32.mrf.mxu1  ;;  %v12947_v18 = vadd.f32 %v9683_v34, %v12794_v58  ;;  %v7192_v58 = vsel %vm2735_vm3, %v7187_v48, %v7191_v53  ;;  %v7205_v34 = vshll.u32 %v10210_v41, 16  ;;  %v7201_v48 = vshrl.u32 %v10209_v0, 16 }
 0x3fb   : > { %13923 = vst [vmem:[#allocation49_spill] sm:$0xff] %v12943_v24  ;;  %v5459_v54 = vpop.f32.mrf.mxu0 }
 0x3fc   : > { %13924 = vst [vmem:[#allocation71_spill] sm:$0xff] %v12947_v18  ;;  %v12950_v51 = vpop.f32.mrf.mxu1  ;;  %v12953_v35 = vadd.f32 %v5459_v54, %v12797_v52  ;;  %v7199_v52 = vrot.slane %v7197_v39, 1  ;;  %v10211_v54 = vld [vmem:[#allocation2 + $0x74] sm:$0xff]   ;;  %v10212_v18 = vld [vmem:[#allocation2 + $0x7c] sm:$0xff]  }
 0x3fd   : > { %13925 = vst [vmem:[#allocation87_spill] sm:$0xff] %v12950_v51  ;;  %v9686_v23 = vpop.f32.mrf.mxu0  ;;  %9889 = vmatmul.mubr.msk.bf16.gmra.mxu0 %vm4646_vm12, %v7184_v61  ;;  %v7193_v51 = vshrl.u32 %v10208_v2, 16 }
 0x3fe   : > { %13926 = vst [vmem:[#allocation44_spill] sm:$0xff] %v12953_v35  ;;  %v12956_v24 = vpop.f32.mrf.mxu1  ;;  %v12961_v40 = vadd.f32 %v9686_v23, %v12801_v26  ;;  %9892 = vmatprep.mubr.msk.bf16.mxu0 %vm4646_vm12, %v7192_v58  ;;  %v7207_v35 = vrot.slane %v7205_v34, 1  ;;  %v7203_v58 = vor.u32 %v7201_v48, %v7199_v52  ;;  %v7221_v34 = vshll.u32 %v10212_v18, 16 }
 0x3ff   : > { %13927 = vst [vmem:[#allocation72_spill] sm:$0xff] %v12956_v24  ;;  %v5472_v6 = vpop.f32.mrf.mxu0  ;;  %v7195_v57 = vor.u32 %v7193_v51, %v7191_v53 }
 0x400   : > { %v12964_v14 = vpop.f32.mrf.mxu1  ;;  %v12967_v16 = vadd.f32 %v5472_v6, %v12804_v44  ;;  %v7208_v0 = vsel %vm2735_vm3, %v7203_v58, %v7207_v35  ;;  %v7209_v6 = vshrl.u32 %v10210_v41, 16  ;;  %v7217_v58 = vshrl.u32 %v10211_v54, 16 }
 0x401   : > { %13928 = vst [vmem:[#allocation90_spill] sm:$0xff] %v12964_v14  ;;  %v9687_v24 = vpop.f32.mrf.mxu0  ;;  %v7213_v14 = vshll.u32 %v10211_v54, 16  ;;  %v7200_v44 = vsel %vm2735_vm3, %v7195_v57, %v7199_v52 }
 0x402   : > { %v12969_v61 = vpop.f32.mrf.mxu1  ;;  %v12972_v26 = vadd.f32 %v9687_v24, %v12808_v21  ;;  %v10213_v21 = vld [vmem:[#allocation2 + $0x84] sm:$0xff]   ;;  %v7211_v52 = vor.u32 %v7209_v6, %v7207_v35 }
 0x403   : > { %13929 = vst [vmem:[#allocation73_spill] sm:$0xff] %v12969_v61  ;;  %v5475_v2 = vpop.f32.mrf.mxu0  ;;  %v10214_v61 = vld [vmem:[#allocation2 + $0x8c] sm:$0xff]  }
 0x404   : > { %v12974_v23 = vpop.f32.mrf.mxu1  ;;  %v12977_v39 = vadd.f32 %v5475_v2, %v12811_v25  ;;  %v7215_v2 = vrot.slane %v7213_v14, 1  ;;  %v7237_v6 = vshll.u32 %v10214_v61, 16 }
 0x405   : > { %13930 = vst [vmem:[#allocation74_spill] sm:$0xff] %v12974_v23  ;;  %v9690_v53 = vpop.f32.mrf.mxu0  ;;  %9893 = vmatmul.mubr.msk.bf16.gmra.mxu0 %vm4646_vm12, %v7200_v44  ;;  %v7223_v23 = vrot.slane %v7221_v34, 1 }
 0x406   : > { %13931 = vst [vmem:[#allocation46_spill] sm:$0xff] %v12977_v39  ;;  %v12980_v51 = vpop.f32.mrf.mxu1  ;;  %v12985_v24 = vadd.f32 %v9690_v53, %v12815_v28  ;;  %9896 = vmatprep.mubr.msk.bf16.mxu0 %vm4646_vm12, %v7208_v0  ;;  %v7229_v39 = vshll.u32 %v10213_v21, 16  ;;  %v7219_v0 = vor.u32 %v7217_v58, %v7215_v2  ;;  %v7216_v35 = vsel %vm2735_vm3, %v7211_v52, %v7215_v2 }
 0x407   : > { %13932 = vst [vmem:[#allocation24_spill] sm:$0xff] %v12980_v51  ;;  %v5488_v48 = vpop.f32.mrf.mxu0  ;;  %v7233_v2 = vshrl.u32 %v10213_v21, 16 }
 0x408   : > { %v12988_v25 = vpop.f32.mrf.mxu1  ;;  %v12991_v57 = vadd.f32 %v5488_v48, %v12820_v59  ;;  %v7224_v54 = vsel %vm2735_vm3, %v7219_v0, %v7223_v23  ;;  %v7231_v34 = vrot.slane %v7229_v39, 1  ;;  %v7239_v0 = vrot.slane %v7237_v6, 1 }
 0x409   : > { %v9691_v51 = vpop.f32.mrf.mxu0 }
 0x40a   : > { %v12993_v44 = vpop.f32.mrf.mxu1  ;;  %v12996_v28 = vadd.f32 %v9691_v51, %v12824_v43  ;;  %v7225_v43 = vshrl.u32 %v10212_v18, 16  ;;  %v10215_v51 = vld [vmem:[#allocation2 + $0x94] ss:$0 sps:$4 sm:$0x11]   ;;  %v7235_v39 = vor.u32 %v7233_v2, %v7231_v34  ;;  %v5042_v2 = vadd.f32 %v12850_v3, %v12858_v49 }
 0x40b   : > { %13933 = vst [vmem:[#allocation56_spill] sm:$0xff] %v12993_v44  ;;  %v12998_v41 = vpop.f32.mrf.mxu0 }
 0x40c   : > { %v13000_v53 = vpop.f32.mrf.mxu1  ;;  %v7227_v52 = vor.u32 %v7225_v43, %v7223_v23  ;;  %v7240_v6 = vsel %vm2735_vm3, %v7235_v39, %v7239_v0 }
 0x40d   : > { %13934 = vst [vmem:[#allocation75_spill] sm:$0xff] %v13000_v53  ;;  %v9694_v14 = vpop.f32.mrf.mxu0  ;;  %9897 = vmatmul.mubr.msk.bf16.gmra.mxu0 %vm4646_vm12, %v7216_v35 }
 0x40e   : > { %v13003_v59 = vpop.f32.mrf.mxu1  ;;  %v13008_v48 = vadd.f32 %v9694_v14, %v12831_v29  ;;  %9900 = vmatprep.mubr.msk.bf16.mxu0 %vm4646_vm12, %v7224_v54  ;;  %v5026_v29 = vadd.f32 %v12834_v31, %v12843_v50  ;;  %v7241_v14 = vshrl.u32 %v10214_v61, 16  ;;  %v7245_v54 = vshll.u32 %v10215_v51, 16 }
 0x40f   : > { %13935 = vst [vmem:[#allocation48_spill] sm:$0xff] %v13003_v59  ;;  %v5504_v53 = vpop.f32.mrf.mxu0 }
 0x410   : > { %13936 = vst [vmem:[#allocation76_spill] sm:$0xff] %v13008_v48  ;;  %v13011_v58 = vpop.f32.mrf.mxu1  ;;  %v13014_v59 = vadd.f32 %v5504_v53, %v12836_v12  ;;  %v7232_v12 = vsel %vm2735_vm3, %v7227_v52, %v7231_v34  ;;  %v7247_v50 = vrot.slane %v7245_v54, 1 }
 0x411   : > { %13937 = vst [vmem:[#allocation50_spill] sm:$0xff] %v13011_v58  ;;  %v9695_v35 = vpop.f32.mrf.mxu0 }
 0x412   : > { %v13016_v44 = vpop.f32.mrf.mxu1  ;;  %v13021_v18 = vadd.f32 %v9695_v35, %v12840_v8  ;;  %v7243_v8 = vor.u32 %v7241_v14, %v7239_v0 }
 0x413   : > { %v5507_v48 = vpop.f32.mrf.mxu0 }
 0x414   : > { %v13023_v58 = vpop.f32.mrf.mxu1  ;;  %v13025_v23 = vadd.f32 %v5507_v48, %v5026_v29 }
 0x415   : > { %v9698_v21 = vpop.f32.mrf.mxu0  ;;  %9901 = vmatmul.mubr.msk.bf16.gmra.mxu0 %vm4646_vm12, %v7232_v12 }
 0x416   : > { %v13028_v53 = vpop.f32.mrf.mxu1  ;;  %v13033_v31 = vadd.f32 %v9698_v21, %v12847_v32  ;;  %9904 = vmatprep.mubr.msk.bf16.mxu0 %vm4646_vm12, %v7240_v6  ;;  %v7248_v32 = vsel %vm2735_vm3, %v7243_v8, %v7247_v50  ;;  %v5058_v21 = vadd.f32 %v12866_v42, %v12874_v33  ;;  %vm8056_vm3 = vcmask 261120  }
 0x417   : > { %v5520_v61 = vpop.f32.mrf.mxu0 }
 0x418   : > { %v13036_v43 = vpop.f32.mrf.mxu1  ;;  %v13039_v48 = vadd.f32 %v5520_v61, %v12852_v11 }
 0x419   : > { %v9699_v34 = vpop.f32.mrf.mxu0 }
 0x41a   : > { %v13041_v51 = vpop.f32.mrf.mxu1  ;;  %v13046_v52 = vadd.f32 %v9699_v34, %v12856_v62 }
 0x41b   : > { %v5523_v35 = vpop.f32.mrf.mxu0 }
 0x41c   : > { %v13049_v39 = vpop.f32.mrf.mxu1  ;;  %v13051_v0 = vadd.f32 %v5523_v35, %v5042_v2 }
 0x41d   : > { %v9702_v29 = vpop.f32.mrf.mxu0  ;;  %9905 = vmatmul.mubr.msk.bf16.gmra.mxu0 %vm4646_vm12, %v7248_v32 }
 0x41e   : > { %v13053_v14 = vpop.f32.mrf.mxu1  ;;  %v13057_v11 = vadd.f32 %v9702_v29, %v12863_v27 }
 0x41f   : > { %13938 = vst [vmem:[#allocation77_spill] sm:$0xff] %v13053_v14  ;;  %v5536_v54 = vpop.f32.mrf.mxu0 }
 0x420   : > { %v13059_v3 = vpop.f32.mrf.mxu1  ;;  %v13062_v62 = vadd.f32 %v5536_v54, %v12868_v30  ;;  %v13943_v30 = vld [vmem:[#allocation34_spill] sm:$0xff] }
 0x421   : > { %13939 = vst [vmem:[#allocation78_spill] sm:$0xff] %v13059_v3  ;;  %v9703_v49 = vpop.f32.mrf.mxu0  ;;  %v5585_v29 = vmul.f32 %v13943_v30, %v12884_v7 }
 0x422   : > { %13940 = vst [vmem:[#allocation52_spill] sm:$0xff] %v13062_v62  ;;  %v9776_v12 = vpop.f32.mrf.mxu1  ;;  %v13067_v6 = vadd.f32 %v9703_v49, %v12872_v60  ;;  %v13944_v60 = vld [vmem:[#allocation35_spill] sm:$0xff] }
 0x423   : > { %v5539_v8 = vpop.f32.mrf.mxu0  ;;  %v5583_v49 = vmul.f32 %v13944_v60, %v12890_v10 }
 0x424   : > { %13941 = vst [vmem:[#allocation55_spill] sm:$0xff] %v13067_v6  ;;  %v6150_v50 = vpop.f32.mrf.mxu1  ;;  %v13069_v61 = vadd.f32 %v5539_v8, %v5058_v21 }
 0x425   : > { %v9742_v27 = vpop.f32.mrf.mxu0 }
 0x426   : > { %13942 = vst [vmem:[#allocation54_spill] sm:$0xff] %v13069_v61  ;;  %v9777_v34 = vpop.f32.mrf.mxu1  ;;  %v5929_v2 = vadd.f32 %v9742_v27, %v12870_v13 }
 0x427   : > { %v5920_v32 = vpop.f32.mrf.mxu0 }
 0x428   : > { %v6153_v35 = vpop.f32.mrf.mxu1  ;;  %v6279_v54 = vadd.f32 %v9776_v12, %v5929_v2  ;;  %v5921_v3 = vadd.f32 %v5920_v32, %v12876_v20 }
 0x429   : > { %v9743_v42 = vpop.f32.mrf.mxu0 }
 0x42a   : > { %v9780_v33 = vpop.f32.mrf.mxu1  ;;  %v6277_v6 = vadd.f32 %v6150_v50, %v5921_v3  ;;  %v5932_v21 = vadd.f32 %v9743_v42, %v12879_v38  ;;  %v13078_v8 = vadd.f32 %v6279_v54, %v5585_v29  ;;  %v13945_v38 = vld [vmem:[#allocation36_spill] sm:$0xff]  ;;  %v13946_v29 = vld [vmem:[#allocation37_spill] sm:$0xff] }
 0x42b   : > { %v5923_v61 = vpop.f32.mrf.mxu0  ;;  %v5589_v32 = vmul.f32 %v13945_v38, %v12908_v22  ;;  %v13948_v38 = vld [vmem:[#allocation39_spill] sm:$0xff] }
 0x42c   : > { %v6166_v13 = vpop.f32.mrf.mxu1  ;;  %v6280_v27 = vadd.f32 %v9777_v34, %v5932_v21  ;;  %v5924_v14 = vadd.f32 %v5923_v61, %v12887_v36  ;;  %v13081_v62 = vadd.f32 %v6277_v6, %v5583_v49 }
 0x42d   : > { %v9746_v7 = vpop.f32.mrf.mxu0 }
 0x42e   : > { %v9781_v12 = vpop.f32.mrf.mxu1  ;;  %v13084_v20 = vadd.f32 %v6280_v27, %v12895_v46  ;;  %v6278_v2 = vadd.f32 %v6153_v35, %v5924_v14  ;;  %v5945_v10 = vadd.f32 %v9746_v7, %v12892_v9  ;;  %v5587_v46 = vmul.f32 %v13946_v29, %v12914_v37 }
 0x42f   : > { %v5936_v3 = vpop.f32.mrf.mxu0 }
 0x430   : > { %v6169_v50 = vpop.f32.mrf.mxu1  ;;  %v13090_v30 = vadd.f32 %v6278_v2, %v12900_v56  ;;  %v6283_v34 = vadd.f32 %v9780_v33, %v5945_v10  ;;  %v5937_v36 = vadd.f32 %v5936_v3, %v12897_v5 }
 0x431   : > { %v9747_v6 = vpop.f32.mrf.mxu0 }
 0x432   : > { %v9784_v61 = vpop.f32.mrf.mxu1  ;;  %v6281_v54 = vadd.f32 %v6166_v13, %v5937_v36  ;;  %v5948_v14 = vadd.f32 %v9747_v6, %v12903_v45  ;;  %v13096_v9 = vadd.f32 %v6283_v34, %v5589_v32  ;;  %v13947_v45 = vld [vmem:[#allocation38_spill] sm:$0xff] }
 0x433   : > { %v5939_v35 = vpop.f32.mrf.mxu0  ;;  %v5593_v7 = vmul.f32 %v13947_v45, %v12932_v15  ;;  %v13949_v15 = vld [vmem:[#allocation43_spill] sm:$0xff] }
 0x434   : > { %v6182_v42 = vpop.f32.mrf.mxu1  ;;  %v6284_v60 = vadd.f32 %v9781_v12, %v5948_v14  ;;  %v5940_v22 = vadd.f32 %v5939_v35, %v12911_v17  ;;  %v13099_v56 = vadd.f32 %v6281_v54, %v5587_v46  ;;  %v13951_v35 = vld [vmem:[#allocation49_spill] sm:$0xff] }
 0x435   : > { %v9750_v33 = vpop.f32.mrf.mxu0 }
 0x436   : > { %v9785_v49 = vpop.f32.mrf.mxu1  ;;  %v13102_v5 = vadd.f32 %v6284_v60, %v12919_v47  ;;  %v6282_v21 = vadd.f32 %v6169_v50, %v5940_v22  ;;  %v5961_v37 = vadd.f32 %v9750_v33, %v12916_v19  ;;  %v5591_v47 = vmul.f32 %v13948_v38, %v12938_v55  ;;  %v13953_v33 = vld [vmem:[#allocation44_spill] sm:$0xff] }
 0x437   : > { %v5952_v13 = vpop.f32.mrf.mxu0 }
 0x438   : > { %v6185_v27 = vpop.f32.mrf.mxu1  ;;  %v13108_v2 = vadd.f32 %v6282_v21, %v12924_v1  ;;  %v6287_v12 = vadd.f32 %v9784_v61, %v5961_v37  ;;  %v5953_v17 = vadd.f32 %v5952_v13, %v12921_v63  ;;  %v13950_v63 = vld [vmem:[#allocation71_spill] sm:$0xff] }
 0x439   : > { %v9751_v10 = vpop.f32.mrf.mxu0  ;;  %v13954_v37 = vld [vmem:[#allocation87_spill] sm:$0xff] }
 0x43a   : > { %v9788_v3 = vpop.f32.mrf.mxu1  ;;  %v6285_v32 = vadd.f32 %v6182_v42, %v5953_v17  ;;  %v5964_v50 = vadd.f32 %v9751_v10, %v12927_v4  ;;  %v13114_v19 = vadd.f32 %v6287_v12, %v5593_v7  ;;  %v13952_v4 = vld [vmem:[#allocation40_spill] sm:$0xff]  ;;  %v13955_v12 = vld [vmem:[#allocation42_spill] sm:$0xff] }
 0x43b   : > { %v5955_v34 = vpop.f32.mrf.mxu0  ;;  %v5597_v22 = vmul.f32 %v13952_v4, %v12961_v40  ;;  %v5595_v17 = vmul.f32 %v13955_v12, %v12967_v16  ;;  %v13957_v40 = vld [vmem:[#allocation90_spill] sm:$0xff] }
 0x43c   : > { %v6198_v36 = vpop.f32.mrf.mxu1  ;;  %v6288_v6 = vadd.f32 %v9785_v49, %v5964_v50  ;;  %v5956_v29 = vadd.f32 %v5955_v34, %v13949_v15  ;;  %v13117_v1 = vadd.f32 %v6285_v32, %v5591_v47  ;;  %v13960_v4 = vld [vmem:[#allocation46_spill] sm:$0xff] }
 0x43d   : > { %v9754_v61 = vpop.f32.mrf.mxu0 }
 0x43e   : > { %v9789_v46 = vpop.f32.mrf.mxu1  ;;  %v13120_v54 = vadd.f32 %v6288_v6, %v13950_v63  ;;  %v6286_v14 = vadd.f32 %v6185_v27, %v5956_v29  ;;  %v5977_v55 = vadd.f32 %v9754_v61, %v13951_v35  ;;  %v13956_v27 = vld [vmem:[#allocation72_spill] sm:$0xff] }
 0x43f   : > { %v5968_v42 = vpop.f32.mrf.mxu0 }
 0x440   : > { %v6201_v60 = vpop.f32.mrf.mxu1  ;;  %v13126_v21 = vadd.f32 %v6286_v14, %v13953_v33  ;;  %v6291_v49 = vadd.f32 %v9788_v3, %v5977_v55  ;;  %v5969_v13 = vadd.f32 %v5968_v42, %v13954_v37  ;;  %v13958_v14 = vld [vmem:[#allocation73_spill] sm:$0xff]  ;;  %v13962_v33 = vld [vmem:[#allocation74_spill] sm:$0xff] }
 0x441   : > { %v9755_v45 = vpop.f32.mrf.mxu0  ;;  %v13959_v55 = vld [vmem:[#allocation45_spill] sm:$0xff] }
 0x442   : > { %v9792_v7 = vpop.f32.mrf.mxu1  ;;  %v6289_v10 = vadd.f32 %v6198_v36, %v5969_v13  ;;  %v5980_v38 = vadd.f32 %v9755_v45, %v13956_v27  ;;  %v13132_v47 = vadd.f32 %v6291_v49, %v5597_v22  ;;  %v5601_v42 = vmul.f32 %v13959_v55, %v12985_v24  ;;  %v13963_v45 = vld [vmem:[#allocation47_spill] sm:$0xff]  ;;  %v13967_v24 = vld [vmem:[#allocation84_spill] sm:$0xff] }
 0x443   : > { %v5971_v32 = vpop.f32.mrf.mxu0 }
 0x444   : > { %v6214_v50 = vpop.f32.mrf.mxu1  ;;  %v6292_v34 = vadd.f32 %v9789_v46, %v5980_v38  ;;  %v5972_v6 = vadd.f32 %v5971_v32, %v13957_v40  ;;  %v13135_v15 = vadd.f32 %v6289_v10, %v5595_v17  ;;  %v13966_v32 = vld [vmem:[#allocation41_spill] sm:$0xff] }
 0x445   : > { %v9758_v3 = vpop.f32.mrf.mxu0 }
 0x446   : > { %v9793_v29 = vpop.f32.mrf.mxu1  ;;  %v13138_v61 = vadd.f32 %v6292_v34, %v12972_v26  ;;  %v6290_v63 = vadd.f32 %v6201_v60, %v5972_v6  ;;  %v5993_v16 = vadd.f32 %v9758_v3, %v13958_v14  ;;  %v5599_v26 = vmul.f32 %v13963_v45, %v12991_v57  ;;  %v13964_v60 = vld [vmem:[#allocation24_spill] sm:$0xff] }
 0x447   : > { %v5984_v36 = vpop.f32.mrf.mxu0  ;;  %v5010_v34 = vadd.f32 %v13967_v24, %v13966_v32 }
 0x448   : > { %v6217_v35 = vpop.f32.mrf.mxu1  ;;  %v13144_v22 = vadd.f32 %v6290_v63, %v13960_v4  ;;  %v6295_v46 = vadd.f32 %v9792_v7, %v5993_v16  ;;  %v5985_v49 = vadd.f32 %v5984_v36, %v13962_v33  ;;  %v13970_v16 = vld [vmem:[#allocation56_spill] sm:$0xff] }
 0x449   : > { %v9759_v37 = vpop.f32.mrf.mxu0  ;;  %v5568_v14 = vadd.f32 %v12998_v41, %v5010_v34  ;;  %v13971_v4 = vld [vmem:[#allocation76_spill] sm:$0xff]  ;;  %v13975_v41 = vld [vmem:[#allocation53_spill] sm:$0xff]  ;;  %v13978_v34 = vld [vmem:[#allocation50_spill] sm:$0xff] }
 0x44a   : > { %13961 = vst [vmem:[#allocation26_spill] sm:$0xff] %v13144_v22  ;;  %v9796_v13 = vpop.f32.mrf.mxu1  ;;  %v6293_v12 = vadd.f32 %v6214_v50, %v5985_v49  ;;  %v5996_v17 = vadd.f32 %v9759_v37, %v13964_v60  ;;  %v13150_v10 = vadd.f32 %v6295_v46, %v5601_v42  ;;  %v13972_v46 = vld [vmem:[#allocation51_spill] sm:$0xff]  ;;  %v13976_v60 = vld [vmem:[#allocation48_spill] sm:$0xff] }
 0x44b   : > { %v5987_v27 = vpop.f32.mrf.mxu0  ;;  %v5605_v33 = vmul.f32 %v13972_v46, %v13971_v4  ;;  %v13974_v49 = vld [vmem:[#allocation75_spill] sm:$0xff] }
 0x44c   : > { %13965 = vst [vmem:[#allocation63_spill] sm:$0xff] %v13150_v10  ;;  %v6230_v38 = vpop.f32.mrf.mxu1  ;;  %v6296_v40 = vadd.f32 %v9793_v29, %v5996_v17  ;;  %v5988_v7 = vadd.f32 %v5987_v27, %v12988_v25  ;;  %v13155_v6 = vadd.f32 %v6293_v12, %v5599_v26  ;;  %v5603_v12 = vmul.f32 %v13975_v41, %v13014_v59 }
 0x44d   : > { %v9762_v3 = vpop.f32.mrf.mxu0 }
 0x44e   : > { %13968 = vst [vmem:[#allocation79_spill] sm:$0xff] %v13155_v6  ;;  %v9797_v63 = vpop.f32.mrf.mxu1  ;;  %v13159_v57 = vadd.f32 %v6296_v40, %v12996_v28  ;;  %v6294_v50 = vadd.f32 %v6217_v35, %v5988_v7  ;;  %v6009_v36 = vadd.f32 %v9762_v3, %v13970_v16 }
 0x44f   : > { %v6000_v55 = vpop.f32.mrf.mxu0 }
 0x450   : > { %13969 = vst [vmem:[#allocation57_spill] sm:$0xff] %v13159_v57  ;;  %v6233_v42 = vpop.f32.mrf.mxu1  ;;  %v13164_v29 = vadd.f32 %v6294_v50, %v5568_v14  ;;  %v6299_v25 = vadd.f32 %v9796_v13, %v6009_v36  ;;  %v6001_v37 = vadd.f32 %v6000_v55, %v13974_v49  ;;  %v13981_v36 = vld [vmem:[#allocation58_spill] sm:$0xff]  ;;  %v13983_v49 = vld [vmem:[#allocation60_spill] sm:$0xff] }
 0x451   : > { %v9763_v45 = vpop.f32.mrf.mxu0  ;;  %v5609_v55 = vmul.f32 %v13981_v36, %v13033_v31 }
 0x452   : > { %13973 = vst [vmem:[#allocation80_spill] sm:$0xff] %v13164_v29  ;;  %v9800_v26 = vpop.f32.mrf.mxu1  ;;  %v6297_v28 = vadd.f32 %v6230_v38, %v6001_v37  ;;  %v6012_v35 = vadd.f32 %v9763_v45, %v13976_v60  ;;  %v13170_v17 = vadd.f32 %v6299_v25, %v5605_v33 }
 0x453   : > { %v6003_v27 = vpop.f32.mrf.mxu0 }
 0x454   : > { %13977 = vst [vmem:[#allocation82_spill] sm:$0xff] %v13170_v17  ;;  %v6246_v32 = vpop.f32.mrf.mxu1  ;;  %v6300_v24 = vadd.f32 %v9797_v63, %v6012_v35  ;;  %v6004_v40 = vadd.f32 %v6003_v27, %v13978_v34  ;;  %v13173_v7 = vadd.f32 %v6297_v28, %v5603_v12 }
 0x455   : > { %v9766_v13 = vpop.f32.mrf.mxu0 }
 0x456   : > { %13979 = vst [vmem:[#allocation62_spill] sm:$0xff] %v13173_v7  ;;  %v9801_v3 = vpop.f32.mrf.mxu1  ;;  %v13176_v14 = vadd.f32 %v6300_v24, %v13021_v18  ;;  %v6298_v50 = vadd.f32 %v6233_v42, %v6004_v40  ;;  %v6025_v59 = vadd.f32 %v9766_v13, %v13016_v44  ;;  %v5607_v18 = vmul.f32 %v13983_v49, %v13039_v48  ;;  %v13989_v40 = vld [vmem:[#allocation52_spill] sm:$0xff]  ;;  %v13990_v13 = vld [vmem:[#allocation67_spill] sm:$0xff] }
 0x457   : > { %v6016_v38 = vpop.f32.mrf.mxu0 }
 0x458   : > { %13980 = vst [vmem:[#allocation83_spill] sm:$0xff] %v13176_v14  ;;  %v6249_v16 = vpop.f32.mrf.mxu1  ;;  %v13182_v4 = vadd.f32 %v6298_v50, %v13025_v23  ;;  %v6303_v63 = vadd.f32 %v9800_v26, %v6025_v59  ;;  %v6017_v46 = vadd.f32 %v6016_v38, %v13023_v58  ;;  %v13991_v59 = vld [vmem:[#allocation77_spill] sm:$0xff] }
 0x459   : > { %v9767_v33 = vpop.f32.mrf.mxu0 }
 0x45a   : > { %13982 = vst [vmem:[#allocation59_spill] sm:$0xff] %v13182_v4  ;;  %v9804_v25 = vpop.f32.mrf.mxu1  ;;  %v6301_v37 = vadd.f32 %v6246_v32, %v6017_v46  ;;  %v6028_v42 = vadd.f32 %v9767_v33, %v13028_v53  ;;  %v13188_v44 = vadd.f32 %v6303_v63, %v5609_v55  ;;  %v13987_v53 = vld [vmem:[#allocation65_spill] sm:$0xff]  ;;  %v13993_v55 = vld [vmem:[#allocation78_spill] sm:$0xff]  ;;  %v13995_v46 = vld [vmem:[#allocation55_spill] sm:$0xff] }
 0x45b   : > { %v6019_v45 = vpop.f32.mrf.mxu0  ;;  %v5613_v27 = vmul.f32 %v13987_v53, %v13057_v11 }
 0x45c   : > { %13984 = vst [vmem:[#allocation85_spill] sm:$0xff] %v13188_v44  ;;  %v6262_v41 = vpop.f32.mrf.mxu1  ;;  %v6304_v12 = vadd.f32 %v9801_v3, %v6028_v42  ;;  %v6020_v31 = vadd.f32 %v6019_v45, %v13036_v43  ;;  %v13191_v23 = vadd.f32 %v6301_v37, %v5607_v18  ;;  %v5611_v3 = vmul.f32 %v13990_v13, %v13989_v40  ;;  %v13997_v18 = vld [vmem:[#allocation54_spill] sm:$0xff] }
 0x45d   : > { %v9770_v26 = vpop.f32.mrf.mxu0 }
 0x45e   : > { %13985 = vst [vmem:[#allocation61_spill] sm:$0xff] %v13191_v23  ;;  %v13194_v58 = vadd.f32 %v6304_v12, %v13046_v52  ;;  %v6302_v28 = vadd.f32 %v6249_v16, %v6020_v31  ;;  %v6041_v60 = vadd.f32 %v9770_v26, %v13041_v51  ;;  %v9805_v48 = vpop.f32.mrf.mxu1 }
 0x45f   : > { %v6032_v35 = vpop.f32.mrf.mxu0 }
 0x460   : > { %13986 = vst [vmem:[#allocation86_spill] sm:$0xff] %v13194_v58  ;;  %v13200_v32 = vadd.f32 %v6302_v28, %v13051_v0  ;;  %v6307_v24 = vadd.f32 %v9804_v25, %v6041_v60  ;;  %v6033_v43 = vadd.f32 %v6032_v35, %v13049_v39  ;;  %v6265_v50 = vpop.f32.mrf.mxu1 }
 0x461   : > { %v9771_v34 = vpop.f32.mrf.mxu0 }
 0x462   : > { %13988 = vst [vmem:[#allocation64_spill] sm:$0xff] %v13200_v32  ;;  %v6305_v52 = vadd.f32 %v6262_v41, %v6033_v43  ;;  %v6044_v38 = vadd.f32 %v9771_v34, %v13991_v59  ;;  %v13206_v51 = vadd.f32 %v6307_v24, %v5613_v27  ;;  %v9844_v39 = vpop.f32.mrf.mxu1 }
 0x463   : > { %v6035_v16 = vpop.f32.mrf.mxu0 }
 0x464   : > { %13992 = vst [vmem:[#allocation88_spill] sm:$0xff] %v13206_v51  ;;  %v6308_v36 = vadd.f32 %v9805_v48, %v6044_v38  ;;  %v6036_v11 = vadd.f32 %v6035_v16, %v13993_v55  ;;  %v13209_v63 = vadd.f32 %v6305_v52, %v5611_v3  ;;  %v6872_v45 = vpop.f32.mrf.mxu1 }
 0x465   : > { %v9810_v0 = vpop.f32.mrf.mxu0 }
 0x466   : > { %13994 = vst [vmem:[#allocation89_spill] sm:$0xff] %v13209_v63  ;;  %v13212_v33 = vadd.f32 %v6308_v36, %v13995_v46  ;;  %v6306_v25 = vadd.f32 %v6265_v50, %v6036_v11  ;;  %v9845_v31 = vpop.f32.mrf.mxu1  ;;  %v6881_v57 = vadd.f32 %v9844_v39, %v9810_v0  ;;  %v13296_v0 = vld [vmem:[%s13592_s6] ss:$0 sm:$0xff] }
 0x467   : > { %v6681_v49 = vpop.f32.mrf.mxu0 }
 0x468   : > { %13996 = vst [vmem:[#allocation66_spill] sm:$0xff] %v13212_v33  ;;  %v13215_v37 = vadd.f32 %v6306_v25, %v13997_v18  ;;  %v6875_v60 = vpop.f32.mrf.mxu1 }
 0x469   : > { %v9811_v42 = vpop.f32.mrf.mxu0 }
 0x46a   : > { %13998 = vst [vmem:[#allocation32_spill] sm:$0xff] %v13215_v37  ;;  %v9848_v53 = vpop.f32.mrf.mxu1 }
 0x46b   : > { %v6684_v41 = vpop.f32.mrf.mxu0 }
 0x46c   : > { %v6888_v43 = vpop.f32.mrf.mxu1  ;;  %v6876_v10 = vadd.f32 %v6875_v60, %v6684_v41 }
 0x46d   : > { %v9814_v12 = vpop.f32.mrf.mxu0 }
 0x46e   : > { %v9849_v13 = vpop.f32.mrf.mxu1 }
 0x46f   : > { %v6697_v26 = vpop.f32.mrf.mxu0 }
 0x470   : > { %v13235_v50 = vpop.f32.mrf.mxu1 }
 0x471   : > { %v13217_v28 = vpop.f32.mrf.mxu0 }
 0x472   : > { %v13241_v16 = vpop.f32.mrf.mxu1 }
 0x473   : > { %v13219_v48 = vpop.f32.mrf.mxu0 }
 0x474   : > { %v13247_v11 = vpop.f32.mrf.mxu1 }
 0x475   : > { %v13221_v35 = vpop.f32.mrf.mxu0 }
 0x476   : > { %v13253_v18 = vpop.f32.mrf.mxu1 }
 0x477   : > { %v13223_v27 = vpop.f32.mrf.mxu0 }
 0x478   : > { %v13259_v63 = vpop.f32.mrf.mxu1 }
 0x479   : > { %v13225_v24 = vpop.f32.mrf.mxu0 }
 0x47a   : > { %v13265_v58 = vpop.f32.mrf.mxu1 }
 0x47b   : > { %v13227_v34 = vpop.f32.mrf.mxu0 }
 0x47c   : > { %v13271_v44 = vpop.f32.mrf.mxu1 }
 0x47d   : > { %v13229_v40 = vpop.f32.mrf.mxu0 }
 0x47e   : > { %v13277_v17 = vpop.f32.mrf.mxu1 }
 0x47f   : > { %v13231_v3 = vpop.f32.mrf.mxu0 }
 0x481   : > { %v13233_v52 = vpop.f32.mrf.mxu0 }
 0x483   : > { %v13237_v59 = vpop.f32.mrf.mxu0 }
 0x485   : > { %v13239_v38 = vpop.f32.mrf.mxu0 }
 0x487   : > { %v13243_v36 = vpop.f32.mrf.mxu0 }
 0x489   : > { %v13245_v55 = vpop.f32.mrf.mxu0 }
 0x48a   : > { %13999 = vst [vmem:[#allocation30_spill] sm:$0xff] %v13245_v55 }
 0x48b   : > { %v13249_v46 = vpop.f32.mrf.mxu0 }
 0x48c   : > { %14000 = vst [vmem:[#allocation28_spill] sm:$0xff] %v13249_v46 }
 0x48d   : > { %v13251_v25 = vpop.f32.mrf.mxu0 }
 0x48e   : > { %14001 = vst [vmem:[#allocation91_spill] sm:$0xff] %v13251_v25 }
 0x48f   : > { %v13255_v37 = vpop.f32.mrf.mxu0 }
 0x490   : > { %14002 = vst [vmem:[#allocation68_spill] sm:$0xff] %v13255_v37  ;;  %v6873_v37 = vadd.f32 %v6872_v45, %v6681_v49  ;;  %v6897_v49 = vadd.f32 %v9848_v53, %v9814_v12  ;;  %v6889_v45 = vadd.f32 %v6888_v43, %v6697_v26  ;;  %v6900_v53 = vadd.f32 %v9849_v13, %v13217_v28  ;;  %v14014_v13 = vld [vmem:[#allocation9_spill] sm:$0xff] }
 0x491   : > { %v13257_v33 = vpop.f32.mrf.mxu0 }
 0x492   : > { %14003 = vst [vmem:[#allocation13_spill] sm:$0xff] %v13257_v33 }
 0x493   : > { %v13261_v51 = vpop.f32.mrf.mxu0 }
 0x494   : > { %14004 = vst [vmem:[#allocation12_spill] sm:$0xff] %v13261_v51  ;;  %v13283_v51 = vpop.f32.mrf.mxu1 }
 0x495   : > { %v13263_v32 = vpop.f32.mrf.mxu0 }
 0x496   : > { %14005 = vst [vmem:[#allocation29_spill] sm:$0xff] %v13263_v32 }
 0x497   : > { %v13267_v23 = vpop.f32.mrf.mxu0 }
 0x498   : > { %14006 = vst [vmem:[#allocation33_spill] sm:$0xff] %v13267_v23 }
 0x499   : > { %v13269_v4 = vpop.f32.mrf.mxu0 }
 0x49a   : > { %14007 = vst [vmem:[#allocation31_spill] sm:$0xff] %v13269_v4  ;;  %v13287_v4 = vpop.f32.mrf.mxu1 }
 0x49b   : > { %v13273_v14 = vpop.f32.mrf.mxu0 }
 0x49c   : > { %14008 = vst [vmem:[#allocation69_spill] sm:$0xff] %v13273_v14  ;;  %v6884_v14 = vadd.f32 %v9845_v31, %v9811_v42 }
 0x49d   : > { %v13275_v7 = vpop.f32.mrf.mxu0 }
 0x49e   : > { %14009 = vst [vmem:[#allocation21_spill] sm:$0xff] %v13275_v7 }
 0x49f   : > { %v13279_v33 = vpop.f32.mrf.mxu0 }
 0x4a0   : > { %14010 = vst [vmem:[#allocation22_spill] sm:$0xff] %v13279_v33  ;;  %v13290_v33 = vpop.f32.mrf.mxu1 }
 0x4a1   : > { %v13281_v29 = vpop.f32.mrf.mxu0 }
 0x4a2   : > { %14011 = vst [vmem:[#allocation81_spill] sm:$0xff] %v13281_v29 }
 0x4a3   : > { %v13285_v32 = vpop.f32.mrf.mxu0 }
 0x4a5   : > { %v9878_v23 = vpop.f32.mrf.mxu0 }
 0x4a6   : > { %v7463_v25 = vadd.f32 %v9878_v23, %v6881_v57  ;;  %v14012_v57 = vld [vmem:[#allocation6_spill] sm:$0xff] }
 0x4a7   : > { %v7334_v6 = vpop.f32.mrf.mxu0 }
 0x4a8   : > { %v7527_v7 = vadd.f32 %v7463_v25, %v13078_v8  ;;  %v7461_v46 = vadd.f32 %v7334_v6, %v6873_v37  ;;  %v13299_v6 = vpop.f32.mrf.mxu1 }
 0x4a9   : > { %v9879_v22 = vpop.f32.mrf.mxu0 }
 0x4aa   : > { %v7525_v29 = vadd.f32 %v7461_v46, %v13081_v62  ;;  %v7464_v55 = vadd.f32 %v9879_v22, %v6884_v14  ;;  %v7566_v37 = vadd.f32 %v13296_v0, %v7527_v7  ;;  %v14013_v62 = vld [vmem:[#allocation7_spill] sm:$0xff] }
 0x4ab   : > { %v7337_v39 = vpop.f32.mrf.mxu0 }
 0x4ac   : > { %v7496_v23 = vmul.f32 %v14012_v57, %v7464_v55  ;;  %v7462_v42 = vadd.f32 %v7337_v39, %v6876_v10  ;;  %v7564_v31 = vadd.f32 %v13296_v0, %v7525_v29  ;;  %v13309_v55 = vpop.f32.mrf.mxu1  ;;  %v7598_v7 = vmax.f32 %v7566_v37, 0.0 }
 0x4ad   : > { %v9882_v8 = vpop.f32.mrf.mxu0  ;;  %v6892_v29 = vadd.f32 %v13235_v50, %v13219_v48  ;;  %v6905_v37 = vadd.f32 %v13247_v11, %v13223_v27 }
 0x4ae   : > { %v7528_v41 = vadd.f32 %v7496_v23, %v13084_v20  ;;  %v7494_v22 = vmul.f32 %v14013_v62, %v7462_v42  ;;  %v7467_v14 = vadd.f32 %v9882_v8, %v6897_v49 }
 0x4af   : > { %v7350_v60 = vpop.f32.mrf.mxu0 }
 0x4b0   : > { %v7567_v46 = vadd.f32 %v13296_v0, %v7528_v41  ;;  %v7526_v12 = vadd.f32 %v7494_v22, %v13090_v30  ;;  %v7531_v10 = vadd.f32 %v7467_v14, %v13096_v9  ;;  %v7465_v26 = vadd.f32 %v7350_v60, %v6889_v45  ;;  %v13320_v41 = vpop.f32.mrf.mxu1  ;;  %v14015_v22 = vld [vmem:[#allocation8_spill] sm:$0xff] }
 0x4b1   : > { %v9883_v43 = vpop.f32.mrf.mxu0  ;;  %v6913_v30 = vadd.f32 %v13241_v16, %v13221_v35  ;;  %v7596_v9 = vmax.f32 %v7564_v31, 0.0  ;;  %v6916_v14 = vadd.f32 %v13253_v18, %v13225_v24 }
 0x4b2   : > { %v7599_v20 = vmax.f32 %v7567_v46, 0.0  ;;  %v7565_v25 = vadd.f32 %v13296_v0, %v7526_v12  ;;  %v7529_v39 = vadd.f32 %v7465_v26, %v13099_v56  ;;  %v7468_v49 = vadd.f32 %v9883_v43, %v6900_v53 }
 0x4b3   : > { %v7353_v57 = vpop.f32.mrf.mxu0  ;;  %v7570_v48 = vadd.f32 %v13296_v0, %v7531_v10  ;;  %v13335_v10 = vpop.f32.mrf.mxu1 }
 0x4b4   : > { %v7629_v23 = vpack.c.bf16 %v7599_v20, %v7598_v7  ;;  %v7597_v28 = vmax.f32 %v7565_v25, 0.0  ;;  %v7500_v42 = vmul.f32 %v14014_v13, %v7468_v49  ;;  %v7466_v45 = vadd.f32 %v7353_v57, %v6892_v29 }
 0x4b5   : > { %v9886_v8 = vpop.f32.mrf.mxu0  ;;  %v7568_v27 = vadd.f32 %v13296_v0, %v7529_v39  ;;  %v7602_v18 = vmax.f32 %v7570_v48, 0.0  ;;  %v6929_v7 = vadd.f32 %v13265_v58, %v13229_v40  ;;  %v6921_v39 = vadd.f32 %v13271_v44, %v13231_v3 }
 0x4b6   : > { %v7471_v56 = vadd.f32 %v9886_v8, %v6913_v30  ;;  %v7628_v62 = vpack.c.bf16 %v7597_v28, %v7596_v9  ;;  %v7532_v50 = vadd.f32 %v7500_v42, %v13102_v5  ;;  %v7498_v35 = vmul.f32 %v14015_v22, %v7466_v45  ;;  %v14017_v9 = vld [vmem:[#allocation11_spill] sm:$0xff] }
 0x4b7   : > { %v7366_v16 = vpop.f32.mrf.mxu0  ;;  %v6908_v5 = vadd.f32 %v13259_v63, %v13227_v34  ;;  %v7600_v63 = vmax.f32 %v7568_v27, 0.0  ;;  %v6932_v8 = vadd.f32 %v13277_v17, %v13233_v52  ;;  %v6945_v17 = vadd.f32 %v13287_v4, %v13239_v38  ;;  %v14020_v38 = vld [vmem:[#allocation30_spill] sm:$0xff] }
 0x4b8   : > { %v7535_v31 = vadd.f32 %v7471_v56, %v13114_v19  ;;  %v7469_v60 = vadd.f32 %v7366_v16, %v6905_v37  ;;  %9910 = vmatprep.mubr.msk.bf16.mxu1 %vm4646_vm12, %v7628_v62  ;;  %v7571_v11 = vadd.f32 %v13296_v0, %v7532_v50  ;;  %v7530_v46 = vadd.f32 %v7498_v35, %v13108_v2  ;;  %v14016_v2 = vld [vmem:[#allocation14_spill] sm:$0xff] }
 0x4b9   : > { %v9887_v12 = vpop.f32.mrf.mxu0  ;;  %9911 = vmatmul.mubr.msk.bf16.vlgmr.msra.gmra.mxu1 %vm4646_vm12, %v7629_v23 }
 0x4ba   : > { %v7533_v24 = vadd.f32 %v7469_v60, %v13117_v1  ;;  %v7472_v19 = vadd.f32 %v9887_v12, %v6916_v14  ;;  %v7603_v26 = vmax.f32 %v7571_v11, 0.0  ;;  %v7569_v53 = vadd.f32 %v13296_v0, %v7530_v46  ;;  %v13344_v1 = vpop.f32.mrf.mxu1  ;;  %v14018_v14 = vld [vmem:[#allocation10_spill] sm:$0xff] }
 0x4bb   : > { %v7369_v43 = vpop.f32.mrf.mxu0  ;;  %v7574_v57 = vadd.f32 %v13296_v0, %v7535_v31 }
 0x4bc   : > { %v7504_v20 = vmul.f32 %v14016_v2, %v7472_v19  ;;  %v7470_v25 = vadd.f32 %v7369_v43, %v6908_v5  ;;  %v7631_v34 = vpack.c.bf16 %v7603_v26, %v7602_v18  ;;  %v7601_v29 = vmax.f32 %v7569_v53, 0.0  ;;  %v13356_v37 = vpop.f32.mrf.mxu1  ;;  %v14019_v5 = vld [vmem:[#allocation16_spill] sm:$0xff]  ;;  %v14021_v18 = vld [vmem:[#allocation63_spill] sm:$0xff]  ;;  %v14022_v43 = vld [vmem:[#allocation26_spill] sm:$0xff] }
 0x4bd   : > { %v9890_v49 = vpop.f32.mrf.mxu0  ;;  %v7572_v58 = vadd.f32 %v13296_v0, %v7533_v24  ;;  %v7606_v56 = vmax.f32 %v7574_v57, 0.0  ;;  %v6948_v19 = vadd.f32 %v13299_v6, %v14020_v38 }
 0x4be   : > { %v7536_v30 = vadd.f32 %v7504_v20, %v13120_v54  ;;  %v7502_v23 = vmul.f32 %v14017_v9, %v7470_v25  ;;  %v7475_v28 = vadd.f32 %v9890_v49, %v6929_v7  ;;  %v7630_v13 = vpack.c.bf16 %v7601_v29, %v7600_v63  ;;  %v9868_v11 = vpop.f32.mrf.mxu1  ;;  %v14023_v20 = vld [vmem:[#allocation28_spill] sm:$0xff] }
 0x4bf   : > { %v7382_v40 = vpop.f32.mrf.mxu0  ;;  %v7604_v52 = vmax.f32 %v7572_v58, 0.0 }
 0x4c0   : > { %v7575_v42 = vadd.f32 %v13296_v0, %v7536_v30  ;;  %v7534_v44 = vadd.f32 %v7502_v23, %v13126_v21  ;;  %v7539_v3 = vadd.f32 %v7475_v28, %v13132_v47  ;;  %v7473_v45 = vadd.f32 %v7382_v40, %v6921_v39  ;;  %9914 = vmatprep.mubr.msk.bf16.mxu1 %vm4646_vm12, %v7630_v13  ;;  %v6968_v25 = vpop.f32.mrf.mxu1  ;;  %v14024_v39 = vld [vmem:[#allocation79_spill] sm:$0xff]  ;;  %v14027_v40 = vld [vmem:[#allocation68_spill] sm:$0xff] }
 0x4c1   : > { %v9891_v54 = vpop.f32.mrf.mxu0  ;;  %9915 = vmatmul.mubr.msk.bf16.gmra.mxu1 %vm4646_vm12, %v7631_v34  ;;  %v6924_v21 = vadd.f32 %v13283_v51, %v13237_v59  ;;  %v14025_v30 = vld [vmem:[#allocation91_spill] sm:$0xff] }
 0x4c2   : > { %v7607_v62 = vmax.f32 %v7575_v42, 0.0  ;;  %v7573_v48 = vadd.f32 %v13296_v0, %v7534_v44  ;;  %v7537_v50 = vadd.f32 %v7473_v45, %v13135_v15  ;;  %v7476_v47 = vadd.f32 %v9891_v54, %v6932_v8  ;;  %v14026_v23 = vld [vmem:[#allocation23_spill] sm:$0xff]  ;;  %v9869_v45 = vpop.f32.mrf.mxu1  ;;  %v14028_v54 = vld [vmem:[#allocation57_spill] sm:$0xff] }
 0x4c3   : > { %v7385_v22 = vpop.f32.mrf.mxu0  ;;  %v6937_v15 = vadd.f32 %v13290_v33, %v13243_v36  ;;  %v7578_v51 = vadd.f32 %v13296_v0, %v7539_v3  ;;  %v6961_v9 = vadd.f32 %v13320_v41, %v14025_v30 }
 0x4c4   : > { %v7633_v35 = vpack.c.bf16 %v7607_v62, %v7606_v56  ;;  %v7605_v16 = vmax.f32 %v7573_v48, 0.0  ;;  %v7508_v31 = vmul.f32 %v14018_v14, %v7476_v47  ;;  %v7474_v60 = vadd.f32 %v7385_v22, %v6924_v21  ;;  %v14029_v62 = vld [vmem:[#allocation25_spill] sm:$0xff] }
 0x4c5   : > { %v9894_v27 = vpop.f32.mrf.mxu0  ;;  %v7576_v33 = vadd.f32 %v13296_v0, %v7537_v50  ;;  %v7610_v6 = vmax.f32 %v7578_v51, 0.0  ;;  %v14032_v14 = vld [vmem:[#allocation13_spill] sm:$0xff]  ;;  %v14033_v51 = vld [vmem:[#allocation62_spill] sm:$0xff] }
 0x4c6   : > { %v7479_v46 = vadd.f32 %v9894_v27, %v6945_v17  ;;  %v7632_v12 = vpack.c.bf16 %v7605_v16, %v7604_v52  ;;  %v7540_v59 = vadd.f32 %v7508_v31, %v13138_v61  ;;  %v7506_v24 = vmul.f32 %v14019_v5, %v7474_v60  ;;  %v14030_v17 = vld [vmem:[#allocation80_spill] sm:$0xff]  ;;  %v14031_v52 = vld [vmem:[#allocation82_spill] sm:$0xff]  ;;  %v6971_v27 = vpop.f32.mrf.mxu1 }
 0x4c7   : > { %v7398_v4 = vpop.f32.mrf.mxu0  ;;  %v6940_v61 = vadd.f32 %v13309_v55, %v14023_v20  ;;  %v6953_v55 = vadd.f32 %v13335_v10, %v14027_v40  ;;  %v7608_v13 = vmax.f32 %v7576_v33, 0.0  ;;  %v6964_v31 = vadd.f32 %v13344_v1, %v14032_v14  ;;  %v14034_v5 = vld [vmem:[#allocation12_spill] sm:$0xff]  ;;  %v14036_v33 = vld [vmem:[#allocation27_spill] sm:$0xff] }
 0x4c8   : > { %v7543_v26 = vadd.f32 %v7479_v46, %v14021_v18  ;;  %v7477_v53 = vadd.f32 %v7398_v4, %v6937_v15  ;;  %9918 = vmatprep.mubr.msk.bf16.mxu1 %vm4646_vm12, %v7632_v12  ;;  %v7579_v36 = vadd.f32 %v13296_v0, %v7540_v59  ;;  %v7538_v7 = vadd.f32 %v7506_v24, %v14022_v43  ;;  %v14042_v40 = vld [vmem:[#allocation59_spill] sm:$0xff] }
 0x4c9   : > { %v9895_v2 = vpop.f32.mrf.mxu0  ;;  %9919 = vmatmul.mubr.msk.bf16.gmra.mxu1 %vm4646_vm12, %v7633_v35  ;;  %v6956_v24 = vadd.f32 %v13356_v37, %v14034_v5 }
 0x4ca   : > { %v7541_v63 = vadd.f32 %v7477_v53, %v14024_v39  ;;  %v7480_v34 = vadd.f32 %v9895_v2, %v6948_v19  ;;  %v7611_v29 = vmax.f32 %v7579_v36, 0.0  ;;  %v7577_v49 = vadd.f32 %v13296_v0, %v7538_v7  ;;  %v14035_v19 = vld [vmem:[#allocation29_spill] sm:$0xff] }
 0x4cb   : > { %v7401_v57 = vpop.f32.mrf.mxu0  ;;  %v7582_v8 = vadd.f32 %v13296_v0, %v7543_v26  ;;  %v6977_v18 = vadd.f32 %v9868_v11, %v14035_v19  ;;  %v14037_v2 = vld [vmem:[#allocation33_spill] sm:$0xff]  ;;  %v14040_v11 = vld [vmem:[#allocation31_spill] sm:$0xff]  ;;  %v14050_v19 = vld [vmem:[#allocation64_spill] sm:$0xff] }
 0x4cc   : > { %v7512_v28 = vmul.f32 %v14026_v23, %v7480_v34  ;;  %v7478_v58 = vadd.f32 %v7401_v57, %v6940_v61  ;;  %v7635_v42 = vpack.c.bf16 %v7611_v29, %v7610_v6  ;;  %v7609_v44 = vmax.f32 %v7577_v49, 0.0  ;;  %v9872_v61 = vpop.f32.mrf.mxu1  ;;  %v14038_v6 = vld [vmem:[#allocation83_spill] sm:$0xff]  ;;  %v14039_v29 = vld [vmem:[#allocation18_spill] sm:$0xff] }
 0x4cd   : > { %v9898_v3 = vpop.f32.mrf.mxu0  ;;  %v7580_v41 = vadd.f32 %v13296_v0, %v7541_v63  ;;  %v7614_v15 = vmax.f32 %v7582_v8, 0.0  ;;  %v6969_v20 = vadd.f32 %v6968_v25, %v14037_v2  ;;  %v6980_v30 = vadd.f32 %v9869_v45, %v14040_v11  ;;  %v14044_v8 = vld [vmem:[#allocation61_spill] sm:$0xff]  ;;  %v14054_v11 = vld [vmem:[#allocation20_spill] sm:$0xff] }
 0x4ce   : > { %v7544_v56 = vadd.f32 %v7512_v28, %v14028_v54  ;;  %v7510_v48 = vmul.f32 %v14029_v62, %v7478_v58  ;;  %v7483_v50 = vadd.f32 %v9898_v3, %v6961_v9  ;;  %v7634_v47 = vpack.c.bf16 %v7609_v44, %v7608_v13  ;;  %v14041_v9 = vld [vmem:[#allocation85_spill] sm:$0xff]  ;;  %v6984_v3 = vpop.f32.mrf.mxu1 }
 0x4cf   : > { %v7414_v21 = vpop.f32.mrf.mxu0  ;;  %v7612_v1 = vmax.f32 %v7580_v41, 0.0  ;;  %v14045_v41 = vld [vmem:[#allocation21_spill] sm:$0xff] }
 0x4d0   : > { %v7583_v22 = vadd.f32 %v13296_v0, %v7544_v56  ;;  %v7542_v10 = vadd.f32 %v7510_v48, %v14030_v17  ;;  %v7547_v35 = vadd.f32 %v7483_v50, %v14031_v52  ;;  %v7481_v16 = vadd.f32 %v7414_v21, %v6953_v55  ;;  %9922 = vmatprep.mubr.msk.bf16.mxu1 %vm4646_vm12, %v7634_v47  ;;  %v14046_v47 = vld [vmem:[#allocation15_spill] sm:$0xff] }
 0x4d1   : > { %v9899_v60 = vpop.f32.mrf.mxu0  ;;  %9923 = vmatmul.mubr.msk.bf16.gmra.mxu1 %vm4646_vm12, %v7635_v42  ;;  %v14043_v42 = vld [vmem:[#allocation69_spill] sm:$0xff]  ;;  %v6993_v21 = vadd.f32 %v9872_v61, %v14045_v41  ;;  %v14058_v41 = vmov 0.0  }
 0x4d2   : > { %v7615_v46 = vmax.f32 %v7583_v22, 0.0  ;;  %v7581_v12 = vadd.f32 %v13296_v0, %v7542_v10  ;;  %v7545_v59 = vadd.f32 %v7481_v16, %v14033_v51  ;;  %v7484_v4 = vadd.f32 %v9899_v60, %v6964_v31  ;;  %v14047_v10 = vld [vmem:[#allocation22_spill] sm:$0xff]  ;;  %v9873_v60 = vpop.f32.mrf.mxu1  ;;  %9946 = vmatprep.mubr.msk.bf16.mxu0 %vm10285_vm1, %v14058_v41 }
 0x4d3   : > { %v7417_v38 = vpop.f32.mrf.mxu0  ;;  %v7586_v34 = vadd.f32 %v13296_v0, %v7547_v35  ;;  %v6972_v44 = vadd.f32 %v6971_v27, %v14043_v42  ;;  %v6985_v52 = vadd.f32 %v6984_v3, %v14047_v10  ;;  %v14057_v42 = vld [vmem:[#allocation32_spill] sm:$0xff] }
 0x4d4   : > { %v7637_v26 = vpack.c.bf16 %v7615_v46, %v7614_v15  ;;  %v7613_v53 = vmax.f32 %v7581_v12, 0.0  ;;  %v7516_v36 = vmul.f32 %v14036_v33, %v7484_v4  ;;  %v7482_v43 = vadd.f32 %v7417_v38, %v6956_v24  ;;  %v14048_v15 = vld [vmem:[#allocation86_spill] sm:$0xff]  ;;  %v14049_v12 = vld [vmem:[#allocation17_spill] sm:$0xff] }
 0x4d5   : > { %v9902_v7 = vpop.f32.mrf.mxu0  ;;  %v7584_v58 = vadd.f32 %v13296_v0, %v7545_v59  ;;  %v7618_v45 = vmax.f32 %v7586_v34, 0.0  ;;  %v14052_v33 = vld [vmem:[#allocation81_spill] sm:$0xff] }
 0x4d6   : > { %v7487_v39 = vadd.f32 %v9902_v7, %v6977_v18  ;;  %v7636_v63 = vpack.c.bf16 %v7613_v53, %v7612_v1  ;;  %v7548_v37 = vadd.f32 %v7516_v36, %v14038_v6  ;;  %v7514_v49 = vmul.f32 %v14039_v29, %v7482_v43  ;;  %v14051_v1 = vld [vmem:[#allocation88_spill] sm:$0xff]  ;;  %v6987_v7 = vpop.f32.mrf.mxu1 }
 0x4d7   : > { %v7430_v57 = vpop.f32.mrf.mxu0  ;;  %v7616_v35 = vmax.f32 %v7584_v58, 0.0  ;;  %v6996_v36 = vadd.f32 %v9873_v60, %v14052_v33  ;;  %v6988_v34 = vadd.f32 %v6987_v7, %v13285_v32  ;;  %v14055_v58 = vld [vmem:[#allocation66_spill] sm:$0xff] }
 0x4d8   : > { %v7551_v23 = vadd.f32 %v7487_v39, %v14041_v9  ;;  %v7485_v28 = vadd.f32 %v7430_v57, %v6969_v20  ;;  %9926 = vmatprep.mubr.msk.bf16.mxu1 %vm4646_vm12, %v7636_v63  ;;  %v7587_v25 = vadd.f32 %v13296_v0, %v7548_v37  ;;  %v7546_v55 = vadd.f32 %v7514_v49, %v14042_v40  ;;  %v14053_v39 = vld [vmem:[#allocation89_spill] sm:$0xff]  ;;  %v14056_v40 = vld [vmem:[#allocation19_spill] sm:$0xff] }
 0x4d9   : > { %v9903_v13 = vpop.f32.mrf.mxu0  ;;  %9927 = vmatmul.mubr.msk.bf16.gmra.mxu1 %vm4646_vm12, %v7637_v26 }
 0x4da   : > { %v7549_v54 = vadd.f32 %v7485_v28, %v14044_v8  ;;  %v7488_v56 = vadd.f32 %v9903_v13, %v6980_v30  ;;  %v7619_v62 = vmax.f32 %v7587_v25, 0.0  ;;  %v7585_v48 = vadd.f32 %v13296_v0, %v7546_v55 }
 0x4db   : > { %v7433_v50 = vpop.f32.mrf.mxu0  ;;  %v7590_v27 = vadd.f32 %v13296_v0, %v7551_v23 }
 0x4dc   : > { %v7520_v22 = vmul.f32 %v14046_v47, %v7488_v56  ;;  %v7486_v17 = vadd.f32 %v7433_v50, %v6972_v44  ;;  %v7639_v16 = vpack.c.bf16 %v7619_v62, %v7618_v45  ;;  %v7617_v14 = vmax.f32 %v7585_v48, 0.0  ;;  %v10216_v50 = vld [vmem:[%s13595_s9 + $0x8] sm:$0xff]   ;;  %v7901_v47 = vpop.permute.xlu1 %7900 }
 0x4dd   : > { %v9906_v31 = vpop.f32.mrf.mxu0  ;;  %v7588_v5 = vadd.f32 %v13296_v0, %v7549_v54  ;;  %v7622_v2 = vmax.f32 %v7590_v27, 0.0  ;;  %9943 = vmatpush3.bf16.msra.mxu0 %v10216_v50  ;;  %v13460_v27 = vld [vmem:[%s13594_s8] ss:$0 sm:$0xff] }
 0x4de   : > { %v7552_v46 = vadd.f32 %v7520_v22, %v14048_v15  ;;  %v7518_v51 = vmul.f32 %v14049_v12, %v7486_v17  ;;  %v7491_v59 = vadd.f32 %v9906_v31, %v6993_v21  ;;  %v7638_v4 = vpack.c.bf16 %v7617_v14, %v7616_v35  ;;  %9944 = vmatprep.subr.bf16.mxu0 %v14058_v41  ;;  %v10217_v21 = vld [vmem:[%s13595_s9] sm:$0xff]  }
 0x4df   : > { %v7446_v24 = vpop.f32.mrf.mxu0  ;;  %v7620_v29 = vmax.f32 %v7588_v5, 0.0 }
 0x4e0   : > { %v7591_v38 = vadd.f32 %v13296_v0, %v7552_v46  ;;  %v7550_v18 = vadd.f32 %v7518_v51, %v14050_v19  ;;  %v7555_v26 = vadd.f32 %v7491_v59, %v14051_v1  ;;  %v7489_v53 = vadd.f32 %v7446_v24, %v6985_v52  ;;  %9930 = vmatprep.mubr.msk.bf16.mxu1 %vm4646_vm12, %v7638_v4  ;;  %v7903_v17 = vpop.permute.xlu1 %7902 }
 0x4e1   : > { %v9907_v43 = vpop.f32.mrf.mxu0  ;;  %9931 = vmatmul.mubr.msk.bf16.gmra.mxu1 %vm4646_vm12, %v7639_v16  ;;  %9945 = vmatpush3.bf16.msra.mxu0 %v10217_v21 }
 0x4e2   : > { %v7623_v20 = vmax.f32 %v7591_v38, 0.0  ;;  %v7589_v61 = vadd.f32 %v13296_v0, %v7550_v18  ;;  %v7553_v63 = vadd.f32 %v7489_v53, %v14053_v39  ;;  %v7492_v6 = vadd.f32 %v9907_v43, %v6996_v36 }
 0x4e3   : > { %v7449_v37 = vpop.f32.mrf.mxu0  ;;  %v7594_v28 = vadd.f32 %v13296_v0, %v7555_v26 }
 0x4e4   : > { %v7641_v49 = vpack.c.bf16 %v7623_v20, %v7622_v2  ;;  %v7621_v57 = vmax.f32 %v7589_v61, 0.0  ;;  %v7524_v30 = vmul.f32 %v14054_v11, %v7492_v6  ;;  %v7490_v9 = vadd.f32 %v7449_v37, %v6988_v34  ;;  %v7907_v52 = vpop.permute.xlu1 %7906 }
 0x4e5   : > { %v7592_v13 = vadd.f32 %v13296_v0, %v7553_v63  ;;  %v7626_v3 = vmax.f32 %v7594_v28, 0.0 }
 0x4e6   : > { %v7640_v23 = vpack.c.bf16 %v7621_v57, %v7620_v29  ;;  %v7556_v25 = vadd.f32 %v7524_v30, %v14055_v58  ;;  %v7522_v55 = vmul.f32 %v14056_v40, %v7490_v9 }
 0x4e7   : > { %v7624_v56 = vmax.f32 %v7592_v13, 0.0 }
 0x4e8   : > { %9934 = vmatprep.mubr.msk.bf16.mxu1 %vm4646_vm12, %v7640_v23  ;;  %v7595_v32 = vadd.f32 %v13296_v0, %v7556_v25  ;;  %v7554_v44 = vadd.f32 %v7522_v55, %v14057_v42  ;;  %v7911_v16 = vpop.permute.xlu1 %7910 }
 0x4e9   : > { %9935 = vmatmul.mubr.msk.bf16.gmra.mxu1 %vm4646_vm12, %v7641_v49 }
 0x4ea   : > { %v7627_v8 = vmax.f32 %v7595_v32, 0.0  ;;  %v7593_v54 = vadd.f32 %v13296_v0, %v7554_v44  ;;  %v7897_v0 = vpop.permute.xlu0 %7896 }
 0x4ec   : > { %v7643_v45 = vpack.c.bf16 %v7627_v8, %v7626_v3  ;;  %v7625_v62 = vmax.f32 %v7593_v54, 0.0  ;;  %v13455_v31 = vpop.permute.xlu1 %7914 }
 0x4ee   : > { %v7642_v48 = vpack.c.bf16 %v7625_v62, %v7624_v56  ;;  %v7899_v22 = vpop.permute.xlu0 %7898 }
 0x4f0   : > { %9938 = vmatprep.mubr.msk.bf16.mxu1 %vm4646_vm12, %v7642_v48  ;;  %v7919_v4 = vpop.permute.xlu1 %7918 }
 0x4f1   : > { %9939 = vmatmul.mubr.msk.bf16.gmra.mxu1 %vm4646_vm12, %v7643_v45 }
 0x4f2   : > { %v7905_v10 = vpop.permute.xlu0 %7904 }
 0x4f4   : > { %v13468_v20 = vpop.permute.xlu1 %7922 }
 0x4f6   : > { %v7909_v35 = vpop.permute.xlu0 %7908 }
 0x4f8   : > { %v7927_v13 = vpop.permute.xlu1 %7926 }
 0x4fa   : > { %v7913_v14 = vpop.permute.xlu0 %7912 }
 0x4fe   : > { %v7917_v51 = vpop.permute.xlu0 %7916 }
 0x502   : > { %v13466_v36 = vpop.permute.xlu0 %7920 }
 0x506   : > { %v7925_v9 = vpop.permute.xlu0 %7924 }
 0x50a   : > { %v7929_v41 = vpop.permute.xlu0 %7928 }
 0x579   : > { %v9912_v60 = vpop.f32.mrf.mxu1 }
 0x57a   : > { %v7746_v46 = vadd.f32 %v9912_v60, %v13460_v27 }
 0x57b   : > { %v7737_v15 = vpop.f32.mrf.mxu1 }
 0x57c   : > { %v7738_v12 = vadd.f32 %v13460_v27, %v7737_v15  ;;  %v7994_v19 = vadd.f32 %v7901_v47, %v7746_v46 }
 0x57d   : > { %v9913_v59 = vpop.f32.mrf.mxu1 }
 0x57e   : > { %v7992_v5 = vadd.f32 %v7897_v0, %v7738_v12  ;;  %v7749_v24 = vadd.f32 %v9913_v59, %v13460_v27  ;;  %v8026_v43 = vmax.f32 %v7994_v19, 0.0 }
 0x57f   : > { %v7740_v38 = vpop.f32.mrf.mxu1 }
 0x580   : > { %v7741_v18 = vadd.f32 %v13460_v27, %v7740_v38  ;;  %v8024_v1 = vmax.f32 %v7992_v5, 0.0  ;;  %v7995_v26 = vadd.f32 %v7903_v17, %v7749_v24  ;;  %v8060_v57 = vsel %vm8056_vm3, %v8026_v43, 0.0  ;;  %v7933_v38 = vpop.permute.xlu0 %7932 }
 0x581   : > { %v9916_v33 = vpop.f32.mrf.mxu1 }
 0x582   : > { %v7993_v53 = vadd.f32 %v7899_v22, %v7741_v18  ;;  %v8057_v39 = vsel %vm8056_vm3, %v8024_v1, 0.0  ;;  %v8027_v63 = vmax.f32 %v7995_v26, 0.0  ;;  %v7762_v6 = vadd.f32 %v9916_v33, %v13460_v27 }
 0x583   : > { %v7753_v2 = vpop.f32.mrf.mxu1 }
 0x584   : > { %v8025_v7 = vmax.f32 %v7993_v53, 0.0  ;;  %v7754_v61 = vadd.f32 %v13460_v27, %v7753_v2  ;;  %v8062_v58 = vsel %vm8056_vm3, %v8027_v63, 0.0  ;;  %v7998_v25 = vadd.f32 %v7909_v35, %v7762_v6 }
 0x585   : > { %v9917_v37 = vpop.f32.mrf.mxu1 }
 0x586   : > { %v8058_v34 = vsel %vm8056_vm3, %v8025_v7, 0.0  ;;  %v7996_v49 = vadd.f32 %v7905_v10, %v7754_v61  ;;  %v7765_v11 = vadd.f32 %v9917_v37, %v13460_v27  ;;  %v8030_v45 = vmax.f32 %v7998_v25, 0.0  ;;  %v13483_v10 = vpop.permute.xlu1 %7930 }
 0x587   : > { %v8059_v29 = vadd.f32 %v8058_v34, %v8057_v39  ;;  %v7756_v30 = vpop.f32.mrf.mxu1 }
 0x588   : > { %v8028_v28 = vmax.f32 %v7996_v49, 0.0  ;;  %v7757_v40 = vadd.f32 %v13460_v27, %v7756_v30  ;;  %v7999_v44 = vadd.f32 %v7911_v16, %v7765_v11  ;;  %v8068_v35 = vsel %vm8056_vm3, %v8030_v45, 0.0 }
 0x589   : > { %v8061_v23 = vadd.f32 %v8060_v57, %v8059_v29  ;;  %v9920_v55 = vpop.f32.mrf.mxu1  ;;  %v7937_v57 = vpop.permute.xlu0 %7936 }
 0x58a   : > { %v8064_v42 = vsel %vm8056_vm3, %v8028_v28, 0.0  ;;  %v7997_v3 = vadd.f32 %v7907_v52, %v7757_v40  ;;  %v7778_v48 = vadd.f32 %v9920_v55, %v13460_v27  ;;  %v8031_v0 = vmax.f32 %v7999_v44, 0.0  ;;  %v7935_v43 = vpop.permute.xlu1 %7934 }
 0x58b   : > { %v8063_v32 = vadd.f32 %v8062_v58, %v8061_v23  ;;  %v7769_v8 = vpop.f32.mrf.mxu1 }
 0x58c   : > { %v7770_v56 = vadd.f32 %v13460_v27, %v7769_v8  ;;  %v8029_v62 = vmax.f32 %v7997_v3, 0.0  ;;  %v8002_v16 = vadd.f32 %v7917_v51, %v7778_v48  ;;  %v8070_v59 = vsel %vm8056_vm3, %v8031_v0, 0.0 }
 0x58d   : > { %v8065_v54 = vadd.f32 %v8064_v42, %v8063_v32  ;;  %v9921_v50 = vpop.f32.mrf.mxu1  ;;  %v7941_v45 = vpop.permute.xlu0 %7940 }
 0x58e   : > { %v8000_v21 = vadd.f32 %v7913_v14, %v7770_v56  ;;  %v8066_v47 = vsel %vm8056_vm3, %v8029_v62, 0.0  ;;  %v7781_v22 = vadd.f32 %v9921_v50, %v13460_v27  ;;  %v8034_v1 = vmax.f32 %v8002_v16, 0.0  ;;  %v7939_v58 = vpop.permute.xlu1 %7938 }
 0x58f   : > { %v7772_v17 = vpop.f32.mrf.mxu1  ;;  %v8067_v52 = vadd.f32 %v8066_v47, %v8065_v54 }
 0x590   : > { %v8032_v60 = vmax.f32 %v8000_v21, 0.0  ;;  %v7773_v15 = vadd.f32 %v13460_v27, %v7772_v17  ;;  %v8003_v14 = vadd.f32 %v7919_v4, %v7781_v22  ;;  %v8076_v34 = vsel %vm8056_vm3, %v8034_v1, 0.0 }
 0x591   : > { %v9924_v46 = vpop.f32.mrf.mxu1  ;;  %v8069_v12 = vadd.f32 %v8068_v35, %v8067_v52 }
 0x592   : > { %v8001_v5 = vadd.f32 %v13455_v31, %v7773_v15  ;;  %v8072_v26 = vsel %vm8056_vm3, %v8032_v60, 0.0  ;;  %v7794_v51 = vadd.f32 %v9924_v46, %v13460_v27  ;;  %v8035_v61 = vmax.f32 %v8003_v14, 0.0  ;;  %v7943_v22 = vpop.permute.xlu1 %7942 }
 0x593   : > { %v7785_v24 = vpop.f32.mrf.mxu1  ;;  %v8071_v19 = vadd.f32 %v8070_v59, %v8069_v12 }
 0x594   : > { %v7786_v18 = vadd.f32 %v13460_v27, %v7785_v24  ;;  %v8033_v53 = vmax.f32 %v8001_v5, 0.0  ;;  %v8006_v6 = vadd.f32 %v7925_v9, %v7794_v51  ;;  %v8078_v30 = vsel %vm8056_vm3, %v8035_v61, 0.0  ;;  %v7945_v24 = vpop.permute.xlu0 %7944 }
 0x595   : > { %v9925_v33 = vpop.f32.mrf.mxu1  ;;  %v8073_v7 = vadd.f32 %v8072_v26, %v8071_v19 }
 0x596   : > { %v8004_v2 = vadd.f32 %v13466_v36, %v7786_v18  ;;  %v8074_v4 = vsel %vm8056_vm3, %v8033_v53, 0.0  ;;  %v7797_v31 = vadd.f32 %v9925_v33, %v13460_v27  ;;  %v8038_v55 = vmax.f32 %v8006_v6, 0.0  ;;  %v7947_v53 = vpop.permute.xlu1 %7946 }
 0x597   : > { %v7788_v39 = vpop.f32.mrf.mxu1  ;;  %v8075_v63 = vadd.f32 %v8074_v4, %v8073_v7 }
 0x598   : > { %v8036_v37 = vmax.f32 %v8004_v2, 0.0  ;;  %v7789_v29 = vadd.f32 %v13460_v27, %v7788_v39  ;;  %v8007_v23 = vadd.f32 %v7927_v13, %v7797_v31  ;;  %v8084_v48 = vsel %vm8056_vm3, %v8038_v55, 0.0  ;;  %v7949_v6 = vpop.permute.xlu0 %7948 }
 0x599   : > { %v9928_v49 = vpop.f32.mrf.mxu1  ;;  %v8077_v11 = vadd.f32 %v8076_v34, %v8075_v63 }
 0x59a   : > { %v8005_v36 = vadd.f32 %v13468_v20, %v7789_v29  ;;  %v8080_v32 = vsel %vm8056_vm3, %v8036_v37, 0.0  ;;  %v7810_v42 = vadd.f32 %v9928_v49, %v13460_v27  ;;  %v8039_v54 = vmax.f32 %v8007_v23, 0.0 }
 0x59b   : > { %v7801_v28 = vpop.f32.mrf.mxu1  ;;  %v8079_v25 = vadd.f32 %v8078_v30, %v8077_v11 }
 0x59c   : > { %v7802_v40 = vadd.f32 %v13460_v27, %v7801_v28  ;;  %v8037_v9 = vmax.f32 %v8005_v36, 0.0  ;;  %v8010_v50 = vadd.f32 %v7933_v38, %v7810_v42  ;;  %v8086_v52 = vsel %vm8056_vm3, %v8039_v54, 0.0  ;;  %v7951_v36 = vpop.permute.xlu1 %7950 }
 0x59d   : > { %v9929_v44 = vpop.f32.mrf.mxu1  ;;  %v8081_v3 = vadd.f32 %v8080_v32, %v8079_v25 }
 0x59e   : > { %v8008_v8 = vadd.f32 %v7929_v41, %v7802_v40  ;;  %v8082_v56 = vsel %vm8056_vm3, %v8037_v9, 0.0  ;;  %v7813_v13 = vadd.f32 %v9929_v44, %v13460_v27  ;;  %v8042_v46 = vmax.f32 %v8010_v50, 0.0 }
 0x59f   : > { %v7804_v20 = vpop.f32.mrf.mxu1  ;;  %v8083_v62 = vadd.f32 %v8082_v56, %v8081_v3  ;;  %v7953_v56 = vpop.permute.xlu0 %7952 }
 0x5a0   : > { %v8040_v21 = vmax.f32 %v8008_v8, 0.0  ;;  %v7805_v0 = vadd.f32 %v13460_v27, %v7804_v20  ;;  %v8011_v41 = vadd.f32 %v7935_v43, %v7813_v13  ;;  %v8092_v33 = vsel %vm8056_vm3, %v8042_v46, 0.0  ;;  %v7955_v50 = vpop.permute.xlu1 %7954 }
 0x5a1   : > { %v9932_v47 = vpop.f32.mrf.mxu1  ;;  %v8085_v17 = vadd.f32 %v8084_v48, %v8083_v62 }
 0x5a2   : > { %v8009_v35 = vadd.f32 %v13483_v10, %v7805_v0  ;;  %v8088_v12 = vsel %vm8056_vm3, %v8040_v21, 0.0  ;;  %v7826_v14 = vadd.f32 %v9932_v47, %v13460_v27  ;;  %v8043_v18 = vmax.f32 %v8011_v41, 0.0 }
 0x5a3   : > { %v7817_v16 = vpop.f32.mrf.mxu1  ;;  %v8087_v60 = vadd.f32 %v8086_v52, %v8085_v17 }
 0x5a4   : > { %v7818_v15 = vadd.f32 %v13460_v27, %v7817_v16  ;;  %v8041_v59 = vmax.f32 %v8009_v35, 0.0  ;;  %v8014_v43 = vadd.f32 %v7941_v45, %v7826_v14  ;;  %v8094_v31 = vsel %vm8056_vm3, %v8043_v18, 0.0  ;;  %v7959_v18 = vpop.permute.xlu1 %7958 }
 0x5a5   : > { %v9933_v5 = vpop.f32.mrf.mxu1  ;;  %v8089_v38 = vadd.f32 %v8088_v12, %v8087_v60 }
 0x5a6   : > { %v8012_v19 = vadd.f32 %v7937_v57, %v7818_v15  ;;  %v8090_v1 = vsel %vm8056_vm3, %v8041_v59, 0.0  ;;  %v7829_v26 = vadd.f32 %v9933_v5, %v13460_v27  ;;  %v8046_v49 = vmax.f32 %v8014_v43, 0.0  ;;  %v7957_v59 = vpop.permute.xlu0 %7956 }
 0x5a7   : > { %v7820_v10 = vpop.f32.mrf.mxu1  ;;  %v8091_v51 = vadd.f32 %v8090_v1, %v8089_v38 }
 0x5a8   : > { %v8044_v7 = vmax.f32 %v8012_v19, 0.0  ;;  %v7821_v2 = vadd.f32 %v13460_v27, %v7820_v10  ;;  %v8015_v39 = vadd.f32 %v7943_v22, %v7829_v26  ;;  %v8100_v42 = vsel %vm8056_vm3, %v8046_v49, 0.0 }
 0x5a9   : > { %v9936_v61 = vpop.f32.mrf.mxu1  ;;  %v8093_v4 = vadd.f32 %v8092_v33, %v8091_v51 }
 0x5aa   : > { %v8013_v63 = vadd.f32 %v7939_v58, %v7821_v2  ;;  %v8096_v57 = vsel %vm8056_vm3, %v8044_v7, 0.0  ;;  %v7842_v30 = vadd.f32 %v9936_v61, %v13460_v27  ;;  %v8047_v40 = vmax.f32 %v8015_v39, 0.0 }
 0x5ab   : > { %v7833_v34 = vpop.f32.mrf.mxu1  ;;  %v8095_v37 = vadd.f32 %v8094_v31, %v8093_v4 }
 0x5ac   : > { %v7834_v29 = vadd.f32 %v13460_v27, %v7833_v34  ;;  %v8045_v11 = vmax.f32 %v8013_v63, 0.0  ;;  %v8018_v44 = vadd.f32 %v7949_v6, %v7842_v30  ;;  %v8102_v20 = vsel %vm8056_vm3, %v8047_v40, 0.0 }
 0x5ad   : > { %v9937_v23 = vpop.f32.mrf.mxu1  ;;  %v8097_v28 = vadd.f32 %v8096_v57, %v8095_v37 }
 0x5ae   : > { %v8016_v25 = vadd.f32 %v7945_v24, %v7834_v29  ;;  %v8098_v55 = vsel %vm8056_vm3, %v8045_v11, 0.0  ;;  %v7845_v58 = vadd.f32 %v9937_v23, %v13460_v27  ;;  %v8050_v47 = vmax.f32 %v8018_v44, 0.0 }
 0x5af   : > { %v7836_v32 = vpop.f32.mrf.mxu1  ;;  %v8099_v9 = vadd.f32 %v8098_v55, %v8097_v28 }
 0x5b0   : > { %v8048_v3 = vmax.f32 %v8016_v25, 0.0  ;;  %v7837_v8 = vadd.f32 %v13460_v27, %v7836_v32  ;;  %v8019_v45 = vadd.f32 %v7951_v36, %v7845_v58  ;;  %v8108_v5 = vsel %vm8056_vm3, %v8050_v47, 0.0  ;;  %v8133_v36 = vld [vmem:[%s13596_s10] sm:$0x1] }
 0x5b1   : > { %v9940_v54 = vpop.f32.mrf.mxu1  ;;  %v8101_v13 = vadd.f32 %v8100_v42, %v8099_v9 }
 0x5b2   : > { %v8017_v62 = vadd.f32 %v7947_v53, %v7837_v8  ;;  %v8104_v22 = vsel %vm8056_vm3, %v8048_v3, 0.0  ;;  %v7858_v52 = vadd.f32 %v9940_v54, %v13460_v27  ;;  %v8051_v60 = vmax.f32 %v8019_v45, 0.0 }
 0x5b3   : > { %v7849_v48 = vpop.f32.mrf.mxu1  ;;  %v8103_v21 = vadd.f32 %v8102_v20, %v8101_v13 }
 0x5b4   : > { %v7850_v0 = vadd.f32 %v13460_v27, %v7849_v48  ;;  %v8049_v17 = vmax.f32 %v8017_v62, 0.0  ;;  %v8022_v24 = vadd.f32 %v7957_v59, %v7858_v52  ;;  %v8110_v26 = vsel %vm8056_vm3, %v8051_v60, 0.0 }
 0x5b5   : > { %v9941_v41 = vpop.f32.mrf.mxu1  ;;  %v8105_v35 = vadd.f32 %v8104_v22, %v8103_v21 }
 0x5b6   : > { %v8020_v16 = vadd.f32 %v7953_v56, %v7850_v0  ;;  %v8106_v15 = vsel %vm8056_vm3, %v8049_v17, 0.0  ;;  %v7861_v46 = vadd.f32 %v9941_v41, %v13460_v27  ;;  %v8054_v33 = vmax.f32 %v8022_v24, 0.0 }
 0x5b7   : > { %v7852_v12 = vpop.f32.mrf.mxu1  ;;  %v8107_v14 = vadd.f32 %v8106_v15, %v8105_v35 }
 0x5b8   : > { %v8052_v38 = vmax.f32 %v8020_v16, 0.0  ;;  %v7853_v19 = vadd.f32 %v13460_v27, %v7852_v12  ;;  %v8023_v10 = vadd.f32 %v7959_v18, %v7861_v46  ;;  %v8116_v27 = vsel %vm8056_vm3, %v8054_v33, 0.0 }
 0x5b9   : > { %v8109_v1 = vadd.f32 %v8108_v5, %v8107_v14 }
 0x5ba   : > { %v8021_v53 = vadd.f32 %v7955_v50, %v7853_v19  ;;  %v8112_v43 = vsel %vm8056_vm3, %v8052_v38, 0.0  ;;  %v8055_v61 = vmax.f32 %v8023_v10, 0.0 }
 0x5bb   : > { %v8111_v51 = vadd.f32 %v8110_v26, %v8109_v1 }
 0x5bc   : > { %v8053_v7 = vmax.f32 %v8021_v53, 0.0  ;;  %v8118_v63 = vsel %vm8056_vm3, %v8055_v61, 0.0 }
 0x5bd   : > { %v8113_v2 = vadd.f32 %v8112_v43, %v8111_v51 }
 0x5be   : > { %v8114_v4 = vsel %vm8056_vm3, %v8053_v7, 0.0 }
 0x5bf   : > { %v8115_v31 = vadd.f32 %v8114_v4, %v8113_v2 }
 0x5c1   : > { %v8117_v39 = vadd.f32 %v8116_v27, %v8115_v31 }
 0x5c3   : > { %v8119_v34 = vadd.f32 %v8118_v63, %v8117_v39 }
 0x5c5   : > { %v8120_v6 = vrot.slane %v8119_v34, 4 }
 0x5c7   : > { %v8121_v37 = vadd.f32 %v8120_v6, %v8119_v34 }
 0x5c9   : > { %v8122_v29 = vrot.slane %v8121_v37, 2 }
 0x5cb   : > { %v8123_v49 = vadd.f32 %v8122_v29, %v8121_v37 }
 0x5cd   : > { %v8124_v57 = vrot.slane %v8123_v49, 1 }
 0x5cf   : > { %v8125_v11 = vadd.f32 %v8124_v57, %v8123_v49 }
 0x5d1   : > { %v8127_v30 = vmul.f32 0.00390625, %v8125_v11 }
 0x5d3   : > { %v8128_v23 = vpack.c.bf16 %v8127_v30, %v8127_v30 }
 0x5d5   : > { %9947 = vmatmul.mubr.msk.bf16.vlgmr.msra.gmra.mxu0 %vm8056_vm3, %v8128_v23 }
 0x695   : > { %v8183_v28 = vpop.f32.mrf.mxu0 }
 0x696   : > { %v8184_v25 = vadd.f32 %v8183_v28, %v8133_v36 }
 0x697   : > { %v9948_v40 = vpop.f32.mrf.mxu0 }
 0x698   : > { %8190 = vst.msk [vmem:[%s378_s13] sm:$0x1] %vm8189_vm6, %v8184_v25 }
 0x699   : > { %v8186_v55 = vpop.f32.mrf.mxu0 }
 0x69a   : > { %10233 = shalt.err (!%p10230_p3)
}
 0x69b   : > { %s10234_s30 = scalar_lea.hbm %s13545_s16, 16  ;;  %s10238_s12 = scalar_lea.hbm %s13597_s11, 32 }
 0x69c   : > { %p10235_p4 = scmp.ne.s32.totalorder %s13545_s16, %s10234_s30  ;;  %p10239_p9 = scmp.lt.s32.totalorder %s13545_s16, %s13597_s11 }
 0x69d   : > { %p10240_p10 = scmp.lt.s32.totalorder %s10238_s12, %s10234_s30 }
 0x69e   : > { %p10236_p7 = pnand %p10235_p4, %p10385_p5 }
 0x69f   : > { %p10241_p11 = por %p10240_p10, %p10239_p9 }
 0x6a0   : > { %p10237_p8 = pneg %p10236_p7 }
 0x6a2   : > { %p10242_p12 = pnand %p10241_p11, %p10237_p8 }
 0x6a4   : > { %10245 = shalt.err (!%p10242_p12)
}
 0x6a5   : > { %9970 = dma.vmem_to_hbm [thread:$0]  (%p10385_p5), %s13547_s14, 16, %s13545_s16, %s8192_s22   ;;  %v9949_v58 = vpop.f32.mrf.mxu0 }
 0x6a6 PF: > { %p9976_p13 = scmp.ge.s32.totalorder %s10280_s20, 2  ;;  %s8216_s21 = sand.u32 1, %s10268_s17  }
 0x6a7   : > { %s8217_s0 = scalar_lea.sflag [#allocation4], %s8216_s21 }
 0x6a8   : > { %p9973_p0 = pnand %p9976_p13, %p10389_p6 }
 0x6aa   : > { %p9974_p1 = pneg %p9973_p0 }
 0x6ac   : > { %10263 = dma.done.wait (%p9974_p1), %s8217_s0, 16  }
 0x6ad   : > { %10265 = vsyncadd (%p9974_p1), %s8217_s0, 4294967280  ;;  %p21_p2 = scmp.ge.s32.totalorder %s10372_s23, 4   ;;  %s14059_s17 = smov %s10272_s18 }
 0x6ae   : > { %s14060_s18 = smov %s10276_s19  ;;  %s14061_s19 = smov %s10383_s26 }
 0x6af   : > { %s14062_s20 = smov %s10372_s23  ;;  %23 = sbr.rel (!%p21_p2) target bundleno = 5 (0x5), region = 115 }
 0x6b4   :  { %8221 = vsyncpa [#allocation4], 1 }
 0x6b5   :  { %8223 = vsyncpa [#allocation4 + $0x1], 1 }

</bundles_post_ra>
